<compile_context>
chip_gen: v7x
topology: tpu7x:2x2x1
jax: 0.10.0
libtpu: 0.0.40
codegen_flags: <defaults>
</compile_context>

<pallas_src>
import math

import numpy as np
import jax
import jax.numpy as jnp
from jax import lax
from jax.experimental import pallas as pl
from jax.experimental.pallas import tpu as pltpu

# ----------------------------- config (small) --------------------------------
B = 2
SEQ_LEN = 16
LABEL_LEN = 8
PRED_LEN = 8
ENC_IN = DEC_IN = C_OUT = CHANNELS = 4
D_MODEL = 32
N_HEADS = 4
DK = D_MODEL // N_HEADS
D_FF = 32                      # == D_MODEL (lets FFN biases live in the vec table)
E_LAYERS = 2
D_LAYERS = 1
D_L = 16                       # configs.hidden_dim
NUM_COARSE = 4
NUM_FINE = 8
MARK_DIM = 4                   # embed='timeF', freq='h' -> 4 time features
DEC_LEN = LABEL_LEN + PRED_LEN
ENC_L1 = (SEQ_LEN - 1) // 2 + 1   # encoder length after distil conv (=8)
EPS_LN = 1e-5
EPS_BN = 1e-5
SQRT_2_OVER_PI = 0.7978845608028654

assert E_LAYERS == 2 and D_LAYERS == 1 and D_FF == D_MODEL

# whole-array, VMEM-resident blocks; grid=() (single invocation per call)
VMEM_SPEC = pl.BlockSpec(memory_space=pltpu.MemorySpace.VMEM)

# -------- row layout of the packed [N_VECS, D_MODEL] vector table ------------
(V_E0_BO, V_E0_G1, V_E0_BE1, V_E0_B1, V_E0_B2, V_E0_G2, V_E0_BE2) = range(7)
(V_E1_BO, V_E1_G1, V_E1_BE1, V_E1_B1, V_E1_B2, V_E1_G2, V_E1_BE2) = range(7, 14)
V_CONV_BC = 14
V_EN_G, V_EN_B = 15, 16
V_DS_BO, V_D_G1, V_D_BE1 = 17, 18, 19
V_DC_BO, V_D_G2, V_D_BE2 = 20, 21, 22
V_D_B1, V_D_B2, V_D_G3, V_D_BE3 = 23, 24, 25, 26
V_DN_G, V_DN_B = 27, 28
N_VECS = 29

# attention slot indices in the packed attention-weight stacks
A_E0, A_E1, A_DS, A_DC = 0, 1, 2, 3
# FFN slot indices
F_E0, F_E1, F_D = 0, 1, 2


def _pallas(kernel, inputs, out_shape, cost=None):
    multi = isinstance(out_shape, (tuple, list))
    return pl.pallas_call(
        kernel,
        out_shape=tuple(out_shape) if multi else out_shape,
        in_specs=[VMEM_SPEC] * len(inputs),
        out_specs=tuple([VMEM_SPEC] * len(out_shape)) if multi else VMEM_SPEC,
        cost_estimate=cost,
    )(*inputs)


# ----------------------------- in-kernel helpers -----------------------------
def _gelu(x):
    # TODO(synk): F.gelu defaults to exact erf; tanh approximation used here.
    return 0.5 * x * (1.0 + jnp.tanh(SQRT_2_OVER_PI * (x + 0.044715 * x * x * x)))


def _layernorm(x2, g, b):
    mu = jnp.mean(x2, axis=-1, keepdims=True)
    xc = x2 - mu
    var = jnp.mean(xc * xc, axis=-1, keepdims=True)
    return xc * lax.rsqrt(var + EPS_LN) * g + b


def _softmax_last(s):
    m = jnp.max(s, axis=-1, keepdims=True)
    p = jnp.exp(s - m)
    return p / jnp.sum(p, axis=-1, keepdims=True)


# ----------------------------- kernel 1: full network ------------------------
def _informer_kernel(x_enc_ref, xme_ref, x_dec_ref, xmd_ref, pe_ref,
                     Wemb_ref, Wqkv_ref, bqkv_ref, Wo_ref,
                     W1_ref, W2_ref, Wc_ref, vecs_ref,
                     WprojT_ref, bprojC_ref,
                     Wcfg1_ref, bcfg1_ref, Wcpc_ref, bcpc_ref,
                     Wfpf_ref, bfpf_ref,
                     cfg_ref, cc_ref, ff_ref, xflat_ref):
    dtf = jnp.float32
    pe = pe_ref[...]                       # [SEQ_LEN, D]
    vecs = vecs_ref[...]                   # [N_VECS, D]
    Wemb = Wemb_ref[...]                   # [2, 3C+M, D]

    def vrow(i):                           # [1, D] row of the packed vector table
        return vecs[i:i + 1, :]

    # --- DataEmbedding: circular k=3 token conv + timeF linear + positional ---
    def embed(x3, xm3, We, L):
        x_prev = jnp.concatenate([x3[:, L - 1:, :], x3[:, :L - 1, :]], axis=1)
        x_next = jnp.concatenate([x3[:, 1:, :], x3[:, :1, :]], axis=1)
        feat = jnp.concatenate([x_prev, x3, x_next, xm3], axis=-1)   # [B, L, 3C+M]
        y = jnp.dot(feat.reshape(B * L, feat.shape[-1]), We,
                    preferred_element_type=dtf)
        y = y.reshape(B, L, D_MODEL) + pe[:L]
        return y.reshape(B * L, D_MODEL)

    # --- multi-head attention with packed QKV / packed output projection ------
    # TODO(synk): ProbSparse (top-u query sampling) attention has no clean static
    # Pallas equivalent; dense softmax attention is used instead.
    def mha(xq2, xkv2, Lq, Lk, aidx, bo_row, causal, same):
        Wqkv = Wqkv_ref[aidx]              # [D, 3D]
        bqkv = bqkv_ref[aidx]              # [1, 3D]
        Wo = Wo_ref[aidx]                  # [D, D]
        bo = vrow(bo_row)                  # [1, D]
        D = D_MODEL
        if same:
            qkv = jnp.dot(xq2, Wqkv, preferred_element_type=dtf) + bqkv
            q2, k2, v2 = qkv[:, :D], qkv[:, D:2 * D], qkv[:, 2 * D:]
        else:
            q2 = jnp.dot(xq2, Wqkv[:, :D], preferred_element_type=dtf) + bqkv[:, :D]
            kv = jnp.dot(xkv2, Wqkv[:, D:], preferred_element_type=dtf) + bqkv[:, D:]
            k2, v2 = kv[:, :D], kv[:, D:]
        scale = 1.0 / math.sqrt(DK)
        keep = None
        if causal:
            row = lax.broadcasted_iota(jnp.int32, (Lq, Lk), 0)
            col = lax.broadcasted_iota(jnp.int32, (Lq, Lk), 1)
            keep = (col <= row + (Lk - Lq))[None]          # [1, Lq, Lk]
        heads = []
        for h in range(N_HEADS):
            sl = slice(h * DK, (h + 1) * DK)
            q3 = q2[:, sl].reshape(B, Lq, DK)
            k3 = k2[:, sl].reshape(B, Lk, DK)
            v3 = v2[:, sl].reshape(B, Lk, DK)
            s = jnp.einsum('bld,bmd->blm', q3, k3,
                           preferred_element_type=dtf) * scale
            if causal:
                s = jnp.where(keep, s, -1e30)
            prob = _softmax_last(s)
            o3 = jnp.einsum('blm,bmd->bld', prob, v3, preferred_element_type=dtf)
            heads.append(o3.reshape(B * Lq, DK))
        o2 = jnp.concatenate(heads, axis=-1)               # [B*Lq, D]
        return jnp.dot(o2, Wo, preferred_element_type=dtf) + bo

    def ffn(x2, fidx, b1_row, b2_row):
        y = jnp.dot(x2, W1_ref[fidx], preferred_element_type=dtf) + vrow(b1_row)
        y = _gelu(y)
        return jnp.dot(y, W2_ref[fidx], preferred_element_type=dtf) + vrow(b2_row)

    def enc_layer(x2, L, aidx, fidx, v0):
        x2 = _layernorm(x2 + mha(x2, x2, L, L, aidx, v0 + 0, False, True),
                        vrow(v0 + 1), vrow(v0 + 2))
        y = ffn(x2, fidx, v0 + 3, v0 + 4)
        return _layernorm(x2 + y, vrow(v0 + 5), vrow(v0 + 6))

    # --- distil ConvLayer: circular k=3 conv (+folded BN) + ELU + MaxPool(3,2,1)
    def distil(x2, L):
        x3 = x2.reshape(B, L, D_MODEL)
        x_prev = jnp.concatenate([x3[:, L - 1:, :], x3[:, :L - 1, :]], axis=1)
        x_next = jnp.concatenate([x3[:, 1:, :], x3[:, :1, :]], axis=1)
        Wc = Wc_ref[...]                                   # [3, D, D]
        y = (jnp.dot(x_prev.reshape(B * L, D_MODEL), Wc[0], preferred_element_type=dtf)
             + jnp.dot(x3.reshape(B * L, D_MODEL), Wc[1], preferred_element_type=dtf)
             + jnp.dot(x_next.reshape(B * L, D_MODEL), Wc[2], preferred_element_type=dtf)
             + vrow(V_CONV_BC))
        y = jnp.where(y > 0, y, jnp.exp(jnp.minimum(y, 0.0)) - 1.0)   # ELU
        y3 = y.reshape(B, L, D_MODEL)
        Lo = (L - 1) // 2 + 1
        wins = []
        for i in range(Lo):                                # MaxPool1d(k=3, s=2, p=1)
            lo = max(2 * i - 1, 0)
            hi = min(2 * i + 2, L)
            w = y3[:, lo:lo + 1, :]
            for j in range(lo + 1, hi):
                w = jnp.maximum(w, y3[:, j:j + 1, :])
            wins.append(w)
        return jnp.concatenate(wins, axis=1).reshape(B * Lo, D_MODEL)

    # ------------------------------ encoder -----------------------------------
    e2 = embed(x_enc_ref[...], xme_ref[...], Wemb[0], SEQ_LEN)
    e2 = enc_layer(e2, SEQ_LEN, A_E0, F_E0, V_E0_BO)
    e2 = distil(e2, SEQ_LEN)
    e2 = enc_layer(e2, ENC_L1, A_E1, F_E1, V_E1_BO)
    e2 = _layernorm(e2, vrow(V_EN_G), vrow(V_EN_B))        # encoder final norm

    # ------------------------------ decoder -----------------------------------
    d2 = embed(x_dec_ref[...], xmd_ref[...], Wemb[1], DEC_LEN)
    d2 = _layernorm(d2 + mha(d2, d2, DEC_LEN, DEC_LEN, A_DS, V_DS_BO, True, True),
                    vrow(V_D_G1), vrow(V_D_BE1))
    d2 = _layernorm(d2 + mha(d2, e2, DEC_LEN, ENC_L1, A_DC, V_DC_BO, False, False),
                    vrow(V_D_G2), vrow(V_D_BE2))
    y = ffn(d2, F_D, V_D_B1, V_D_B2)
    d2 = _layernorm(d2 + y, vrow(V_D_G3), vrow(V_D_BE3))
    d2 = _layernorm(d2, vrow(V_DN_G), vrow(V_DN_B))        # decoder final norm

    # --- projection, transposed: x = dec_out[:, -P:, :].permute(0,2,1) as [B*C, P]
    WprojT = WprojT_ref[...]                               # [C_OUT, D]
    bprojC = bprojC_ref[...]                               # [C_OUT, 1]
    blocks = []
    for b in range(B):
        hb = d2[b * DEC_LEN + LABEL_LEN:(b + 1) * DEC_LEN, :]       # [P, D]
        xb = jnp.einsum('cd,pd->cp', WprojT, hb,
                        preferred_element_type=dtf) + bprojC        # [C, P]
        blocks.append(xb)
    x_flat = jnp.concatenate(blocks, axis=0)               # [B*C, P]
    xflat_ref[...] = x_flat

    # --------------------- head projections (packed weights) ------------------
    cfg = jnp.dot(x_flat, Wcfg1_ref[...], preferred_element_type=dtf) + bcfg1_ref[...]
    cfg_ref[...] = cfg                                     # [B*C, 3*d_l] = c|f|g
    c_p = cfg[:, :D_L]
    f_p = cfg[:, D_L:2 * D_L]
    cc_ref[...] = jnp.dot(c_p, Wcpc_ref[...], preferred_element_type=dtf) + bcpc_ref[...]
    ff_ref[...] = jnp.dot(f_p, Wfpf_ref[...], preferred_element_type=dtf) + bfpf_ref[...]


# ----------------------------- kernel 2: non-local head mix ------------------
def _head_mix_kernel(theta_ref, phi_ref, g_ref, x_ref,
                     wg2_ref, bg2_ref, wpr_ref, bpr_ref, o_ref):
    dtf = jnp.float32
    theta = theta_ref[...]                  # [B, C, d_l]
    phi = phi_ref[...]                      # [B, d_l, C]
    g = g_ref[...]                          # [B, C, d_l]
    f = jnp.einsum('bkd,bdm->bkm', theta, phi, preferred_element_type=dtf)  # [B,C,C]
    prob = _softmax_last(f)
    y = jnp.einsum('bkm,bmd->bkd', prob, g, preferred_element_type=dtf)     # [B,C,d_l]
    y2 = y.reshape(B * CHANNELS, D_L)
    wy = jnp.dot(y2, wg2_ref[...], preferred_element_type=dtf) + bg2_ref[...]
    z = wy + x_ref[...]                     # [B*C, P]
    o_ref[...] = jnp.dot(z, wpr_ref[...], preferred_element_type=dtf) + bpr_ref[...]


# ----------------------------- parameter init --------------------------------
class KeyGen:
    def __init__(self, key):
        self.key = key

    def __call__(self):
        self.key, sub = jax.random.split(self.key)
        return sub


def init_linear(kg, fan_in, fan_out, bias=True):
    lim = 1.0 / math.sqrt(fan_in)
    W = jax.random.uniform(kg(), (fan_in, fan_out), jnp.float32, -lim, lim)
    if bias:
        b = jax.random.uniform(kg(), (fan_out,), jnp.float32, -lim, lim)
    else:
        b = jnp.zeros((fan_out,), jnp.float32)
    return W, b


def sinusoidal_pe(max_len, d_model):
    pos = np.arange(max_len, dtype=np.float32)[:, None]
    div = np.exp(np.arange(0, d_model, 2, dtype=np.float32) * -(math.log(10000.0) / d_model))
    pe = np.zeros((max_len, d_model), dtype=np.float32)
    pe[:, 0::2] = np.sin(pos * div)
    pe[:, 1::2] = np.cos(pos * div)
    return jnp.asarray(pe)


def init_attn_packed(kg):
    Wq, bq = init_linear(kg, D_MODEL, D_MODEL)
    Wk, bk = init_linear(kg, D_MODEL, D_MODEL)
    Wv, bv = init_linear(kg, D_MODEL, D_MODEL)
    Wo, bo = init_linear(kg, D_MODEL, D_MODEL)
    Wqkv = jnp.concatenate([Wq, Wk, Wv], axis=1)                   # [D, 3D]
    bqkv = jnp.concatenate([bq, bk, bv], axis=0).reshape(1, 3 * D_MODEL)
    return Wqkv, bqkv, Wo, bo


def init_params(seed=0):
    kg = KeyGen(jax.random.PRNGKey(seed))
    p = {}
    p["pe"] = sinusoidal_pe(64, D_MODEL)[:SEQ_LEN]                 # [16, 32]

    def emb(c_in):
        # token conv (k=3, circular, no bias) + timeF linear (no bias), fused.
        Wt, _ = init_linear(kg, 3 * c_in, D_MODEL, bias=False)
        Wm, _ = init_linear(kg, MARK_DIM, D_MODEL, bias=False)
        return jnp.concatenate([Wt, Wm], axis=0)                   # [3c+M, D]

    p["Wemb"] = jnp.stack([emb(ENC_IN), emb(DEC_IN)], axis=0)      # [2, 16, 32]

    ones = jnp.ones((D_MODEL,), jnp.float32)
    zeros = jnp.zeros((D_MODEL,), jnp.float32)
    vec_rows = [None] * N_VECS
    Wqkv_l, bqkv_l, Wo_l, W1_l, W2_l = [], [], [], [], []

    # encoder layers
    for li, base in enumerate((V_E0_BO, V_E1_BO)):
        Wqkv, bqkv, Wo, bo = init_attn_packed(kg)
        Wqkv_l.append(Wqkv); bqkv_l.append(bqkv); Wo_l.append(Wo)
        W1, b1 = init_linear(kg, D_MODEL, D_FF)
        W2, b2 = init_linear(kg, D_FF, D_MODEL)
        W1_l.append(W1); W2_l.append(W2)
        vec_rows[base + 0] = bo
        vec_rows[base + 1] = ones
        vec_rows[base + 2] = zeros
        vec_rows[base + 3] = b1
        vec_rows[base + 4] = b2
        vec_rows[base + 5] = ones
        vec_rows[base + 6] = zeros

    # distil conv; BatchNorm1d (eval, default running stats) folded into weights.
    # TODO(synk): BN fold assumes default (untrained) running stats mean=0 var=1.
    s = 1.0 / math.sqrt(1.0 + EPS_BN)
    Wc, bc = init_linear(kg, 3 * D_MODEL, D_MODEL)
    p["Wc"] = (Wc * s).reshape(3, D_MODEL, D_MODEL)                # [prev, center, next]
    vec_rows[V_CONV_BC] = bc * s
    vec_rows[V_EN_G] = ones
    vec_rows[V_EN_B] = zeros

    # decoder layer (self + cross attention)
    sWqkv, sbqkv, sWo, sbo = init_attn_packed(kg)
    cWqkv, cbqkv, cWo, cbo = init_attn_packed(kg)
    Wqkv_l += [sWqkv, cWqkv]; bqkv_l += [sbqkv, cbqkv]; Wo_l += [sWo, cWo]
    W1, b1 = init_linear(kg, D_MODEL, D_FF)
    W2, b2 = init_linear(kg, D_FF, D_MODEL)
    W1_l.append(W1); W2_l.append(W2)
    vec_rows[V_DS_BO] = sbo; vec_rows[V_D_G1] = ones; vec_rows[V_D_BE1] = zeros
    vec_rows[V_DC_BO] = cbo; vec_rows[V_D_G2] = ones; vec_rows[V_D_BE2] = zeros
    vec_rows[V_D_B1] = b1; vec_rows[V_D_B2] = b2
    vec_rows[V_D_G3] = ones; vec_rows[V_D_BE3] = zeros
    vec_rows[V_DN_G] = ones; vec_rows[V_DN_B] = zeros

    Wproj, bproj = init_linear(kg, D_MODEL, C_OUT)
    p["WprojT"] = Wproj.T                                          # [C_OUT, D]
    p["bprojC"] = bproj.reshape(C_OUT, 1)

    p["Wqkv"] = jnp.stack(Wqkv_l, axis=0)                          # [4, 32, 96]
    p["bqkv"] = jnp.stack(bqkv_l, axis=0)                          # [4, 1, 96]
    p["Wo"] = jnp.stack(Wo_l, axis=0)                              # [4, 32, 32]
    p["W1"] = jnp.stack(W1_l, axis=0)                              # [3, 32, 32]
    p["W2"] = jnp.stack(W2_l, axis=0)                              # [3, 32, 32]
    p["vecs"] = jnp.stack(vec_rows, axis=0)                        # [29, 32]

    # head weights, packed lane-dense
    def lin2(fi, fo):
        W, bb = init_linear(kg, fi, fo)
        return W, bb.reshape(1, fo)

    Wg1, bg1 = lin2(PRED_LEN, D_L)
    Wg2, bg2 = lin2(D_L, PRED_LEN)
    Wpr, bpr = lin2(PRED_LEN, PRED_LEN)
    Wc1, bc1 = lin2(PRED_LEN, D_L)
    Wcp, bcp = lin2(D_L, PRED_LEN * NUM_COARSE)
    Wcc, bcc = lin2(D_L, PRED_LEN * NUM_COARSE)
    Wf1, bf1 = lin2(PRED_LEN, D_L)
    Wfp, bfp = lin2(D_L, PRED_LEN * NUM_FINE)
    Wfc, bfc = lin2(D_L, PRED_LEN * NUM_FINE)
    p["Wcfg1"] = jnp.concatenate([Wc1, Wf1, Wg1], axis=1)          # [8, 48]
    p["bcfg1"] = jnp.concatenate([bc1, bf1, bg1], axis=1)
    p["Wcpc"] = jnp.concatenate([Wcp, Wcc], axis=1)                # [16, 64]
    p["bcpc"] = jnp.concatenate([bcp, bcc], axis=1)
    p["Wfpf"] = jnp.concatenate([Wfp, Wfc], axis=1)                # [16, 128]
    p["bfpf"] = jnp.concatenate([bfp, bfc], axis=1)
    p["Wg2"], p["bg2"], p["Wpr"], p["bpr"] = Wg2, bg2, Wpr, bpr
    return p


# ----------------------------- forward (host glue) ---------------------------
def model_forward(params, x_enc, x_mark_enc, x_dec, x_mark_dec):
    prm = params
    cfg, cc, ff, x_flat = _pallas(
        _informer_kernel,
        [x_enc, x_mark_enc, x_dec, x_mark_dec, prm["pe"],
         prm["Wemb"], prm["Wqkv"], prm["bqkv"], prm["Wo"],
         prm["W1"], prm["W2"], prm["Wc"], prm["vecs"],
         prm["WprojT"], prm["bprojC"],
         prm["Wcfg1"], prm["bcfg1"], prm["Wcpc"], prm["bcpc"],
         prm["Wfpf"], prm["bfpf"]],
        (jax.ShapeDtypeStruct((B * CHANNELS, 3 * D_L), jnp.float32),
         jax.ShapeDtypeStruct((B * CHANNELS, 2 * PRED_LEN * NUM_COARSE), jnp.float32),
         jax.ShapeDtypeStruct((B * CHANNELS, 2 * PRED_LEN * NUM_FINE), jnp.float32),
         jax.ShapeDtypeStruct((B * CHANNELS, PRED_LEN), jnp.float32)),
        cost=pl.CostEstimate(flops=2_500_000, transcendentals=16_000,
                             bytes_accessed=220_000))

    Bx, C, P, nc, nf, dl = B, CHANNELS, PRED_LEN, NUM_COARSE, NUM_FINE, D_L
    c_proj = cfg[:, :dl]
    f_proj = cfg[:, dl:2 * dl]
    g_proj = cfg[:, 2 * dl:]

    coarse_prediction = cc[:, :P * nc].reshape(Bx, P, C, nc)
    coarse_logit = cc[:, P * nc:].reshape(Bx, P, C, nc)
    fine_prediction = ff[:, :P * nf].reshape(Bx, P, C, nf)
    fine_logit = ff[:, P * nf:].reshape(Bx, P, C, nf)
    # pairwise_sum: stop index is size[1]=pred_len, exactly as in the PyTorch code
    even = fine_logit[:, :, :, 0:P:2]
    odd = fine_logit[:, :, :, 1:P:2]
    fine_logit_switch = (even + odd) / 2.0

    # mirrors torch .view(B, d_l, -1): a row-major reinterpretation (NOT a transpose)
    def as_dl_c(p2):
        return p2.reshape(Bx, C, dl).reshape(Bx, dl, C)

    theta_x = as_dl_c(c_proj).transpose(0, 2, 1)    # [B, C, d_l]
    phi_x = as_dl_c(f_proj)                         # [B, d_l, C]
    g_x = as_dl_c(g_proj).transpose(0, 2, 1)        # [B, C, d_l]

    direct2 = _pallas(
        _head_mix_kernel,
        [theta_x, phi_x, g_x, x_flat,
         prm["Wg2"], prm["bg2"], prm["Wpr"], prm["bpr"]],
        jax.ShapeDtypeStruct((Bx * C, P), jnp.float32),
        cost=pl.CostEstimate(flops=8_000, transcendentals=64, bytes_accessed=5_000))
    direct = direct2.reshape(Bx, C, P).transpose(0, 2, 1)          # [B, P, C]

    return (direct, coarse_prediction, coarse_logit,
            fine_prediction, fine_logit, fine_logit_switch)


# ----------------------------- main -------------------------------------------
if __name__ == "__main__":
    key = jax.random.PRNGKey(0)
    k1, k2, k3, k4 = jax.random.split(key, 4)
    x_enc = jax.random.normal(k1, (B, SEQ_LEN, ENC_IN), jnp.float32)
    x_mark_enc = jax.random.normal(k2, (B, SEQ_LEN, MARK_DIM), jnp.float32)
    x_dec = jax.random.normal(k3, (B, DEC_LEN, DEC_IN), jnp.float32)
    x_mark_dec = jax.random.normal(k4, (B, DEC_LEN, MARK_DIM), jnp.float32)

    params = init_params(0)
    outs = jax.jit(model_forward)(params, x_enc, x_mark_enc, x_dec, x_mark_dec)
    outs = jax.block_until_ready(outs)

    expected = [(B, PRED_LEN, CHANNELS),
                (B, PRED_LEN, CHANNELS, NUM_COARSE),
                (B, PRED_LEN, CHANNELS, NUM_COARSE),
                (B, PRED_LEN, CHANNELS, NUM_FINE),
                (B, PRED_LEN, CHANNELS, NUM_FINE),
                (B, PRED_LEN, CHANNELS, NUM_FINE // 2)]
    assert [tuple(o.shape) for o in outs] == expected, [o.shape for o in outs]
    assert all(bool(jnp.all(jnp.isfinite(o))) for o in outs)
    print("KERNEL_OK")
</pallas_src>

<mosaic_0001>
module attributes {stable_mosaic.version = 11 : i64} {
  func.func @_informer_kernel(%arg0: memref<2x16x4xf32, #tpu.memory_space<vmem>>, %arg1: memref<2x16x4xf32, #tpu.memory_space<vmem>>, %arg2: memref<2x16x4xf32, #tpu.memory_space<vmem>>, %arg3: memref<2x16x4xf32, #tpu.memory_space<vmem>>, %arg4: memref<16x32xf32, #tpu.memory_space<vmem>>, %arg5: memref<2x16x32xf32, #tpu.memory_space<vmem>>, %arg6: memref<4x32x96xf32, #tpu.memory_space<vmem>>, %arg7: memref<4x1x96xf32, #tpu.memory_space<vmem>>, %arg8: memref<4x32x32xf32, #tpu.memory_space<vmem>>, %arg9: memref<3x32x32xf32, #tpu.memory_space<vmem>>, %arg10: memref<3x32x32xf32, #tpu.memory_space<vmem>>, %arg11: memref<3x32x32xf32, #tpu.memory_space<vmem>>, %arg12: memref<29x32xf32, #tpu.memory_space<vmem>>, %arg13: memref<4x32xf32, #tpu.memory_space<vmem>>, %arg14: memref<4x1xf32, #tpu.memory_space<vmem>>, %arg15: memref<8x48xf32, #tpu.memory_space<vmem>>, %arg16: memref<1x48xf32, #tpu.memory_space<vmem>>, %arg17: memref<16x64xf32, #tpu.memory_space<vmem>>, %arg18: memref<1x64xf32, #tpu.memory_space<vmem>>, %arg19: memref<16x128xf32, #tpu.memory_space<vmem>>, %arg20: memref<1x128xf32, #tpu.memory_space<vmem>>, %arg21: memref<8x48xf32, #tpu.memory_space<vmem>>, %arg22: memref<8x64xf32, #tpu.memory_space<vmem>>, %arg23: memref<8x128xf32, #tpu.memory_space<vmem>>, %arg24: memref<8x8xf32, #tpu.memory_space<vmem>>) attributes {dimension_semantics = [], scalar_prefetch = 0 : i64, scratch_operands = 0 : i64, tpu.core_type = #tpu.core_type<tc>} {
    %c0 = arith.constant 0 : index
    %c0_0 = arith.constant 0 : index
    %0 = vector.load %arg4[%c0, %c0_0] : memref<16x32xf32, #tpu.memory_space<vmem>>, vector<16x32xf32>
    %c0_1 = arith.constant 0 : index
    %c0_2 = arith.constant 0 : index
    %1 = vector.load %arg12[%c0_1, %c0_2] : memref<29x32xf32, #tpu.memory_space<vmem>>, vector<29x32xf32>
    %c0_3 = arith.constant 0 : index
    %c0_4 = arith.constant 0 : index
    %c0_5 = arith.constant 0 : index
    %2 = vector.load %arg5[%c0_3, %c0_4, %c0_5] : memref<2x16x32xf32, #tpu.memory_space<vmem>>, vector<2x16x32xf32>
    %c0_6 = arith.constant 0 : index
    %c0_7 = arith.constant 0 : index
    %c0_8 = arith.constant 0 : index
    %3 = vector.load %arg0[%c0_6, %c0_7, %c0_8] : memref<2x16x4xf32, #tpu.memory_space<vmem>>, vector<2x16x4xf32>
    %c0_9 = arith.constant 0 : index
    %c0_10 = arith.constant 0 : index
    %c0_11 = arith.constant 0 : index
    %4 = vector.load %arg1[%c0_9, %c0_10, %c0_11] : memref<2x16x4xf32, #tpu.memory_space<vmem>>, vector<2x16x4xf32>
    %5 = vector.extract_strided_slice %2 {offsets = [0, 0, 0], sizes = [1, 16, 32], strides = [1, 1, 1]} : vector<2x16x32xf32> to vector<1x16x32xf32>
    %6 = vector.shape_cast %5 : vector<1x16x32xf32> to vector<16x32xf32>
    %7 = vector.extract_strided_slice %3 {offsets = [0, 15, 0], sizes = [2, 1, 4], strides = [1, 1, 1]} : vector<2x16x4xf32> to vector<2x1x4xf32>
    %8 = vector.extract_strided_slice %3 {offsets = [0, 0, 0], sizes = [2, 15, 4], strides = [1, 1, 1]} : vector<2x16x4xf32> to vector<2x15x4xf32>
    %9 = tpu.concatenate %7, %8 in 1 : vector<2x1x4xf32>, vector<2x15x4xf32> -> vector<2x16x4xf32>
    %10 = vector.extract_strided_slice %3 {offsets = [0, 1, 0], sizes = [2, 15, 4], strides = [1, 1, 1]} : vector<2x16x4xf32> to vector<2x15x4xf32>
    %11 = vector.extract_strided_slice %3 {offsets = [0, 0, 0], sizes = [2, 1, 4], strides = [1, 1, 1]} : vector<2x16x4xf32> to vector<2x1x4xf32>
    %12 = tpu.concatenate %10, %11 in 1 : vector<2x15x4xf32>, vector<2x1x4xf32> -> vector<2x16x4xf32>
    %13 = tpu.concatenate %9, %3, %12, %4 in 2 : vector<2x16x4xf32>, vector<2x16x4xf32>, vector<2x16x4xf32>, vector<2x16x4xf32> -> vector<2x16x16xf32>
    %14 = vector.shape_cast %13 : vector<2x16x16xf32> to vector<32x16xf32>
    %cst = arith.constant dense<0.000000e+00> : vector<32x32xf32>
    %15 = tpu.matmul %14, %6, %cst {dimension_numbers = #tpu.dot_dimension_numbers<[1], [0], [0], [1], [0, 0, 1, 1], [], []>} : vector<32x16xf32>, vector<16x32xf32>, vector<32x32xf32> -> vector<32x32xf32>
    %16 = vector.shape_cast %15 : vector<32x32xf32> to vector<2x16x32xf32>
    %17 = vector.shape_cast %0 : vector<16x32xf32> to vector<1x16x32xf32>
    %18 = vector.broadcast %17 : vector<1x16x32xf32> to vector<2x16x32xf32>
    %19 = arith.addf %16, %18 : vector<2x16x32xf32>
    %20 = vector.shape_cast %19 : vector<2x16x32xf32> to vector<32x32xf32>
    %c0_12 = arith.constant 0 : index
    %c0_13 = arith.constant 0 : index
    %c0_14 = arith.constant 0 : index
    %21 = vector.load %arg6[%c0_12, %c0_13, %c0_14] : memref<4x32x96xf32, #tpu.memory_space<vmem>>, vector<1x32x96xf32>
    %22 = vector.shape_cast %21 : vector<1x32x96xf32> to vector<32x96xf32>
    %c0_15 = arith.constant 0 : index
    %c0_16 = arith.constant 0 : index
    %c0_17 = arith.constant 0 : index
    %23 = vector.load %arg7[%c0_15, %c0_16, %c0_17] : memref<4x1x96xf32, #tpu.memory_space<vmem>>, vector<1x1x96xf32>
    %24 = vector.shape_cast %23 : vector<1x1x96xf32> to vector<1x96xf32>
    %c0_18 = arith.constant 0 : index
    %c0_19 = arith.constant 0 : index
    %c0_20 = arith.constant 0 : index
    %25 = vector.load %arg8[%c0_18, %c0_19, %c0_20] : memref<4x32x32xf32, #tpu.memory_space<vmem>>, vector<1x32x32xf32>
    %26 = vector.shape_cast %25 : vector<1x32x32xf32> to vector<32x32xf32>
    %27 = vector.extract_strided_slice %1 {offsets = [0, 0], sizes = [1, 32], strides = [1, 1]} : vector<29x32xf32> to vector<1x32xf32>
    %cst_21 = arith.constant dense<0.000000e+00> : vector<32x96xf32>
    %28 = tpu.matmul %20, %22, %cst_21 {dimension_numbers = #tpu.dot_dimension_numbers<[1], [0], [0], [1], [0, 0, 1, 1], [], []>} : vector<32x32xf32>, vector<32x96xf32>, vector<32x96xf32> -> vector<32x96xf32>
    %29 = vector.broadcast %24 : vector<1x96xf32> to vector<32x96xf32>
    %30 = arith.addf %28, %29 : vector<32x96xf32>
    %31 = vector.extract_strided_slice %30 {offsets = [0, 0], sizes = [32, 32], strides = [1, 1]} : vector<32x96xf32> to vector<32x32xf32>
    %32 = vector.extract_strided_slice %30 {offsets = [0, 32], sizes = [32, 32], strides = [1, 1]} : vector<32x96xf32> to vector<32x32xf32>
    %33 = vector.extract_strided_slice %30 {offsets = [0, 64], sizes = [32, 32], strides = [1, 1]} : vector<32x96xf32> to vector<32x32xf32>
    %34 = vector.extract_strided_slice %31 {offsets = [0, 0], sizes = [32, 8], strides = [1, 1]} : vector<32x32xf32> to vector<32x8xf32>
    %35 = vector.shape_cast %34 : vector<32x8xf32> to vector<2x16x8xf32>
    %36 = vector.extract_strided_slice %32 {offsets = [0, 0], sizes = [32, 8], strides = [1, 1]} : vector<32x32xf32> to vector<32x8xf32>
    %37 = vector.shape_cast %36 : vector<32x8xf32> to vector<2x16x8xf32>
    %38 = vector.extract_strided_slice %33 {offsets = [0, 0], sizes = [32, 8], strides = [1, 1]} : vector<32x32xf32> to vector<32x8xf32>
    %39 = vector.shape_cast %38 : vector<32x8xf32> to vector<2x16x8xf32>
    "tpu.trace_start"() <{level = 10 : i32, message = "bld,bmd->blm"}> : () -> ()
    %cst_22 = arith.constant dense<0.000000e+00> : vector<2x16x16xf32>
    %40 = tpu.matmul %35, %37, %cst_22 {dimension_numbers = #tpu.dot_dimension_numbers<[2], [2], [1], [1], [0, 0, 0, 1, 1, 1], [0], [0]>} : vector<2x16x8xf32>, vector<2x16x8xf32>, vector<2x16x16xf32> -> vector<2x16x16xf32>
    "tpu.trace_stop"() : () -> ()
    %cst_23 = arith.constant 0.353553385 : f32
    %41 = vector.broadcast %cst_23 : f32 to vector<2x16x16xf32>
    %42 = arith.mulf %40, %41 : vector<2x16x16xf32>
    %cst_24 = arith.constant dense<0xFF800000> : vector<2x16xf32>
    %43 = vector.multi_reduction <maximumf>, %42, %cst_24 [2] : vector<2x16x16xf32> to vector<2x16xf32>
    %44 = vector.shape_cast %43 : vector<2x16xf32> to vector<2x16x1xf32>
    %45 = vector.broadcast %44 : vector<2x16x1xf32> to vector<2x16x16xf32>
    %46 = arith.subf %42, %45 : vector<2x16x16xf32>
    %47 = math.exp %46 : vector<2x16x16xf32>
    %cst_25 = arith.constant dense<0.000000e+00> : vector<2x16xf32>
    %48 = vector.multi_reduction <add>, %47, %cst_25 [2] : vector<2x16x16xf32> to vector<2x16xf32>
    %49 = vector.shape_cast %48 : vector<2x16xf32> to vector<2x16x1xf32>
    %50 = vector.broadcast %49 : vector<2x16x1xf32> to vector<2x16x16xf32>
    %51 = arith.divf %47, %50 : vector<2x16x16xf32>
    "tpu.trace_start"() <{level = 10 : i32, message = "blm,bmd->bld"}> : () -> ()
    %cst_26 = arith.constant dense<0.000000e+00> : vector<2x16x8xf32>
    %52 = tpu.matmul %51, %39, %cst_26 {dimension_numbers = #tpu.dot_dimension_numbers<[2], [1], [1], [2], [0, 0, 0, 1, 1, 2], [0], [0]>} : vector<2x16x16xf32>, vector<2x16x8xf32>, vector<2x16x8xf32> -> vector<2x16x8xf32>
    "tpu.trace_stop"() : () -> ()
    %53 = vector.shape_cast %52 : vector<2x16x8xf32> to vector<32x8xf32>
    %54 = vector.extract_strided_slice %31 {offsets = [0, 8], sizes = [32, 8], strides = [1, 1]} : vector<32x32xf32> to vector<32x8xf32>
    %55 = vector.shape_cast %54 : vector<32x8xf32> to vector<2x16x8xf32>
    %56 = vector.extract_strided_slice %32 {offsets = [0, 8], sizes = [32, 8], strides = [1, 1]} : vector<32x32xf32> to vector<32x8xf32>
    %57 = vector.shape_cast %56 : vector<32x8xf32> to vector<2x16x8xf32>
    %58 = vector.extract_strided_slice %33 {offsets = [0, 8], sizes = [32, 8], strides = [1, 1]} : vector<32x32xf32> to vector<32x8xf32>
    %59 = vector.shape_cast %58 : vector<32x8xf32> to vector<2x16x8xf32>
    "tpu.trace_start"() <{level = 10 : i32, message = "bld,bmd->blm"}> : () -> ()
    %cst_27 = arith.constant dense<0.000000e+00> : vector<2x16x16xf32>
    %60 = tpu.matmul %55, %57, %cst_27 {dimension_numbers = #tpu.dot_dimension_numbers<[2], [2], [1], [1], [0, 0, 0, 1, 1, 1], [0], [0]>} : vector<2x16x8xf32>, vector<2x16x8xf32>, vector<2x16x16xf32> -> vector<2x16x16xf32>
    "tpu.trace_stop"() : () -> ()
    %cst_28 = arith.constant 0.353553385 : f32
    %61 = vector.broadcast %cst_28 : f32 to vector<2x16x16xf32>
    %62 = arith.mulf %60, %61 : vector<2x16x16xf32>
    %cst_29 = arith.constant dense<0xFF800000> : vector<2x16xf32>
    %63 = vector.multi_reduction <maximumf>, %62, %cst_29 [2] : vector<2x16x16xf32> to vector<2x16xf32>
    %64 = vector.shape_cast %63 : vector<2x16xf32> to vector<2x16x1xf32>
    %65 = vector.broadcast %64 : vector<2x16x1xf32> to vector<2x16x16xf32>
    %66 = arith.subf %62, %65 : vector<2x16x16xf32>
    %67 = math.exp %66 : vector<2x16x16xf32>
    %cst_30 = arith.constant dense<0.000000e+00> : vector<2x16xf32>
    %68 = vector.multi_reduction <add>, %67, %cst_30 [2] : vector<2x16x16xf32> to vector<2x16xf32>
    %69 = vector.shape_cast %68 : vector<2x16xf32> to vector<2x16x1xf32>
    %70 = vector.broadcast %69 : vector<2x16x1xf32> to vector<2x16x16xf32>
    %71 = arith.divf %67, %70 : vector<2x16x16xf32>
    "tpu.trace_start"() <{level = 10 : i32, message = "blm,bmd->bld"}> : () -> ()
    %cst_31 = arith.constant dense<0.000000e+00> : vector<2x16x8xf32>
    %72 = tpu.matmul %71, %59, %cst_31 {dimension_numbers = #tpu.dot_dimension_numbers<[2], [1], [1], [2], [0, 0, 0, 1, 1, 2], [0], [0]>} : vector<2x16x16xf32>, vector<2x16x8xf32>, vector<2x16x8xf32> -> vector<2x16x8xf32>
    "tpu.trace_stop"() : () -> ()
    %73 = vector.shape_cast %72 : vector<2x16x8xf32> to vector<32x8xf32>
    %74 = vector.extract_strided_slice %31 {offsets = [0, 16], sizes = [32, 8], strides = [1, 1]} : vector<32x32xf32> to vector<32x8xf32>
    %75 = vector.shape_cast %74 : vector<32x8xf32> to vector<2x16x8xf32>
    %76 = vector.extract_strided_slice %32 {offsets = [0, 16], sizes = [32, 8], strides = [1, 1]} : vector<32x32xf32> to vector<32x8xf32>
    %77 = vector.shape_cast %76 : vector<32x8xf32> to vector<2x16x8xf32>
    %78 = vector.extract_strided_slice %33 {offsets = [0, 16], sizes = [32, 8], strides = [1, 1]} : vector<32x32xf32> to vector<32x8xf32>
    %79 = vector.shape_cast %78 : vector<32x8xf32> to vector<2x16x8xf32>
    "tpu.trace_start"() <{level = 10 : i32, message = "bld,bmd->blm"}> : () -> ()
    %cst_32 = arith.constant dense<0.000000e+00> : vector<2x16x16xf32>
    %80 = tpu.matmul %75, %77, %cst_32 {dimension_numbers = #tpu.dot_dimension_numbers<[2], [2], [1], [1], [0, 0, 0, 1, 1, 1], [0], [0]>} : vector<2x16x8xf32>, vector<2x16x8xf32>, vector<2x16x16xf32> -> vector<2x16x16xf32>
    "tpu.trace_stop"() : () -> ()
    %cst_33 = arith.constant 0.353553385 : f32
    %81 = vector.broadcast %cst_33 : f32 to vector<2x16x16xf32>
    %82 = arith.mulf %80, %81 : vector<2x16x16xf32>
    %cst_34 = arith.constant dense<0xFF800000> : vector<2x16xf32>
    %83 = vector.multi_reduction <maximumf>, %82, %cst_34 [2] : vector<2x16x16xf32> to vector<2x16xf32>
    %84 = vector.shape_cast %83 : vector<2x16xf32> to vector<2x16x1xf32>
    %85 = vector.broadcast %84 : vector<2x16x1xf32> to vector<2x16x16xf32>
    %86 = arith.subf %82, %85 : vector<2x16x16xf32>
    %87 = math.exp %86 : vector<2x16x16xf32>
    %cst_35 = arith.constant dense<0.000000e+00> : vector<2x16xf32>
    %88 = vector.multi_reduction <add>, %87, %cst_35 [2] : vector<2x16x16xf32> to vector<2x16xf32>
    %89 = vector.shape_cast %88 : vector<2x16xf32> to vector<2x16x1xf32>
    %90 = vector.broadcast %89 : vector<2x16x1xf32> to vector<2x16x16xf32>
    %91 = arith.divf %87, %90 : vector<2x16x16xf32>
    "tpu.trace_start"() <{level = 10 : i32, message = "blm,bmd->bld"}> : () -> ()
    %cst_36 = arith.constant dense<0.000000e+00> : vector<2x16x8xf32>
    %92 = tpu.matmul %91, %79, %cst_36 {dimension_numbers = #tpu.dot_dimension_numbers<[2], [1], [1], [2], [0, 0, 0, 1, 1, 2], [0], [0]>} : vector<2x16x16xf32>, vector<2x16x8xf32>, vector<2x16x8xf32> -> vector<2x16x8xf32>
    "tpu.trace_stop"() : () -> ()
    %93 = vector.shape_cast %92 : vector<2x16x8xf32> to vector<32x8xf32>
    %94 = vector.extract_strided_slice %31 {offsets = [0, 24], sizes = [32, 8], strides = [1, 1]} : vector<32x32xf32> to vector<32x8xf32>
    %95 = vector.shape_cast %94 : vector<32x8xf32> to vector<2x16x8xf32>
    %96 = vector.extract_strided_slice %32 {offsets = [0, 24], sizes = [32, 8], strides = [1, 1]} : vector<32x32xf32> to vector<32x8xf32>
    %97 = vector.shape_cast %96 : vector<32x8xf32> to vector<2x16x8xf32>
    %98 = vector.extract_strided_slice %33 {offsets = [0, 24], sizes = [32, 8], strides = [1, 1]} : vector<32x32xf32> to vector<32x8xf32>
    %99 = vector.shape_cast %98 : vector<32x8xf32> to vector<2x16x8xf32>
    "tpu.trace_start"() <{level = 10 : i32, message = "bld,bmd->blm"}> : () -> ()
    %cst_37 = arith.constant dense<0.000000e+00> : vector<2x16x16xf32>
    %100 = tpu.matmul %95, %97, %cst_37 {dimension_numbers = #tpu.dot_dimension_numbers<[2], [2], [1], [1], [0, 0, 0, 1, 1, 1], [0], [0]>} : vector<2x16x8xf32>, vector<2x16x8xf32>, vector<2x16x16xf32> -> vector<2x16x16xf32>
    "tpu.trace_stop"() : () -> ()
    %cst_38 = arith.constant 0.353553385 : f32
    %101 = vector.broadcast %cst_38 : f32 to vector<2x16x16xf32>
    %102 = arith.mulf %100, %101 : vector<2x16x16xf32>
    %cst_39 = arith.constant dense<0xFF800000> : vector<2x16xf32>
    %103 = vector.multi_reduction <maximumf>, %102, %cst_39 [2] : vector<2x16x16xf32> to vector<2x16xf32>
    %104 = vector.shape_cast %103 : vector<2x16xf32> to vector<2x16x1xf32>
    %105 = vector.broadcast %104 : vector<2x16x1xf32> to vector<2x16x16xf32>
    %106 = arith.subf %102, %105 : vector<2x16x16xf32>
    %107 = math.exp %106 : vector<2x16x16xf32>
    %cst_40 = arith.constant dense<0.000000e+00> : vector<2x16xf32>
    %108 = vector.multi_reduction <add>, %107, %cst_40 [2] : vector<2x16x16xf32> to vector<2x16xf32>
    %109 = vector.shape_cast %108 : vector<2x16xf32> to vector<2x16x1xf32>
    %110 = vector.broadcast %109 : vector<2x16x1xf32> to vector<2x16x16xf32>
    %111 = arith.divf %107, %110 : vector<2x16x16xf32>
    "tpu.trace_start"() <{level = 10 : i32, message = "blm,bmd->bld"}> : () -> ()
    %cst_41 = arith.constant dense<0.000000e+00> : vector<2x16x8xf32>
    %112 = tpu.matmul %111, %99, %cst_41 {dimension_numbers = #tpu.dot_dimension_numbers<[2], [1], [1], [2], [0, 0, 0, 1, 1, 2], [0], [0]>} : vector<2x16x16xf32>, vector<2x16x8xf32>, vector<2x16x8xf32> -> vector<2x16x8xf32>
    "tpu.trace_stop"() : () -> ()
    %113 = vector.shape_cast %112 : vector<2x16x8xf32> to vector<32x8xf32>
    %114 = tpu.concatenate %53, %73, %93, %113 in 1 : vector<32x8xf32>, vector<32x8xf32>, vector<32x8xf32>, vector<32x8xf32> -> vector<32x32xf32>
    %cst_42 = arith.constant dense<0.000000e+00> : vector<32x32xf32>
    %115 = tpu.matmul %114, %26, %cst_42 {dimension_numbers = #tpu.dot_dimension_numbers<[1], [0], [0], [1], [0, 0, 1, 1], [], []>} : vector<32x32xf32>, vector<32x32xf32>, vector<32x32xf32> -> vector<32x32xf32>
    %116 = vector.broadcast %27 : vector<1x32xf32> to vector<32x32xf32>
    %117 = arith.addf %115, %116 : vector<32x32xf32>
    %118 = arith.addf %20, %117 : vector<32x32xf32>
    %119 = vector.extract_strided_slice %1 {offsets = [1, 0], sizes = [1, 32], strides = [1, 1]} : vector<29x32xf32> to vector<1x32xf32>
    %120 = vector.extract_strided_slice %1 {offsets = [2, 0], sizes = [1, 32], strides = [1, 1]} : vector<29x32xf32> to vector<1x32xf32>
    %cst_43 = arith.constant dense<0.000000e+00> : vector<32xf32>
    %121 = vector.multi_reduction <add>, %118, %cst_43 [1] : vector<32x32xf32> to vector<32xf32>
    %122 = vector.shape_cast %121 : vector<32xf32> to vector<32x1xf32>
    %cst_44 = arith.constant 3.200000e+01 : f32
    %123 = vector.broadcast %cst_44 : f32 to vector<32x1xf32>
    %124 = arith.divf %122, %123 : vector<32x1xf32>
    %125 = vector.broadcast %124 : vector<32x1xf32> to vector<32x32xf32>
    %126 = arith.subf %118, %125 : vector<32x32xf32>
    %127 = arith.mulf %126, %126 : vector<32x32xf32>
    %cst_45 = arith.constant dense<0.000000e+00> : vector<32xf32>
    %128 = vector.multi_reduction <add>, %127, %cst_45 [1] : vector<32x32xf32> to vector<32xf32>
    %129 = vector.shape_cast %128 : vector<32xf32> to vector<32x1xf32>
    %cst_46 = arith.constant 3.200000e+01 : f32
    %130 = vector.broadcast %cst_46 : f32 to vector<32x1xf32>
    %131 = arith.divf %129, %130 : vector<32x1xf32>
    %cst_47 = arith.constant 9.99999974E-6 : f32
    %132 = vector.broadcast %cst_47 : f32 to vector<32x1xf32>
    %133 = arith.addf %131, %132 : vector<32x1xf32>
    %134 = math.rsqrt %133 : vector<32x1xf32>
    %135 = vector.broadcast %134 : vector<32x1xf32> to vector<32x32xf32>
    %136 = arith.mulf %126, %135 : vector<32x32xf32>
    %137 = vector.broadcast %119 : vector<1x32xf32> to vector<32x32xf32>
    %138 = arith.mulf %136, %137 : vector<32x32xf32>
    %139 = vector.broadcast %120 : vector<1x32xf32> to vector<32x32xf32>
    %140 = arith.addf %138, %139 : vector<32x32xf32>
    %c0_48 = arith.constant 0 : index
    %c0_49 = arith.constant 0 : index
    %c0_50 = arith.constant 0 : index
    %141 = vector.load %arg9[%c0_48, %c0_49, %c0_50] : memref<3x32x32xf32, #tpu.memory_space<vmem>>, vector<1x32x32xf32>
    %142 = vector.shape_cast %141 : vector<1x32x32xf32> to vector<32x32xf32>
    %cst_51 = arith.constant dense<0.000000e+00> : vector<32x32xf32>
    %143 = tpu.matmul %140, %142, %cst_51 {dimension_numbers = #tpu.dot_dimension_numbers<[1], [0], [0], [1], [0, 0, 1, 1], [], []>} : vector<32x32xf32>, vector<32x32xf32>, vector<32x32xf32> -> vector<32x32xf32>
    %144 = vector.extract_strided_slice %1 {offsets = [3, 0], sizes = [1, 32], strides = [1, 1]} : vector<29x32xf32> to vector<1x32xf32>
    %145 = vector.broadcast %144 : vector<1x32xf32> to vector<32x32xf32>
    %146 = arith.addf %143, %145 : vector<32x32xf32>
    %cst_52 = arith.constant 5.000000e-01 : f32
    %147 = vector.broadcast %cst_52 : f32 to vector<32x32xf32>
    %148 = arith.mulf %147, %146 : vector<32x32xf32>
    %cst_53 = arith.constant 4.471500e-02 : f32
    %149 = vector.broadcast %cst_53 : f32 to vector<32x32xf32>
    %150 = arith.mulf %149, %146 : vector<32x32xf32>
    %151 = arith.mulf %150, %146 : vector<32x32xf32>
    %152 = arith.mulf %151, %146 : vector<32x32xf32>
    %153 = arith.addf %146, %152 : vector<32x32xf32>
    %cst_54 = arith.constant 0.797884583 : f32
    %154 = vector.broadcast %cst_54 : f32 to vector<32x32xf32>
    %155 = arith.mulf %154, %153 : vector<32x32xf32>
    %156 = math.tanh %155 : vector<32x32xf32>
    %cst_55 = arith.constant 1.000000e+00 : f32
    %157 = vector.broadcast %cst_55 : f32 to vector<32x32xf32>
    %158 = arith.addf %157, %156 : vector<32x32xf32>
    %159 = arith.mulf %148, %158 : vector<32x32xf32>
    %c0_56 = arith.constant 0 : index
    %c0_57 = arith.constant 0 : index
    %c0_58 = arith.constant 0 : index
    %160 = vector.load %arg10[%c0_56, %c0_57, %c0_58] : memref<3x32x32xf32, #tpu.memory_space<vmem>>, vector<1x32x32xf32>
    %161 = vector.shape_cast %160 : vector<1x32x32xf32> to vector<32x32xf32>
    %cst_59 = arith.constant dense<0.000000e+00> : vector<32x32xf32>
    %162 = tpu.matmul %159, %161, %cst_59 {dimension_numbers = #tpu.dot_dimension_numbers<[1], [0], [0], [1], [0, 0, 1, 1], [], []>} : vector<32x32xf32>, vector<32x32xf32>, vector<32x32xf32> -> vector<32x32xf32>
    %163 = vector.extract_strided_slice %1 {offsets = [4, 0], sizes = [1, 32], strides = [1, 1]} : vector<29x32xf32> to vector<1x32xf32>
    %164 = vector.broadcast %163 : vector<1x32xf32> to vector<32x32xf32>
    %165 = arith.addf %162, %164 : vector<32x32xf32>
    %166 = arith.addf %140, %165 : vector<32x32xf32>
    %167 = vector.extract_strided_slice %1 {offsets = [5, 0], sizes = [1, 32], strides = [1, 1]} : vector<29x32xf32> to vector<1x32xf32>
    %168 = vector.extract_strided_slice %1 {offsets = [6, 0], sizes = [1, 32], strides = [1, 1]} : vector<29x32xf32> to vector<1x32xf32>
    %cst_60 = arith.constant dense<0.000000e+00> : vector<32xf32>
    %169 = vector.multi_reduction <add>, %166, %cst_60 [1] : vector<32x32xf32> to vector<32xf32>
    %170 = vector.shape_cast %169 : vector<32xf32> to vector<32x1xf32>
    %cst_61 = arith.constant 3.200000e+01 : f32
    %171 = vector.broadcast %cst_61 : f32 to vector<32x1xf32>
    %172 = arith.divf %170, %171 : vector<32x1xf32>
    %173 = vector.broadcast %172 : vector<32x1xf32> to vector<32x32xf32>
    %174 = arith.subf %166, %173 : vector<32x32xf32>
    %175 = arith.mulf %174, %174 : vector<32x32xf32>
    %cst_62 = arith.constant dense<0.000000e+00> : vector<32xf32>
    %176 = vector.multi_reduction <add>, %175, %cst_62 [1] : vector<32x32xf32> to vector<32xf32>
    %177 = vector.shape_cast %176 : vector<32xf32> to vector<32x1xf32>
    %cst_63 = arith.constant 3.200000e+01 : f32
    %178 = vector.broadcast %cst_63 : f32 to vector<32x1xf32>
    %179 = arith.divf %177, %178 : vector<32x1xf32>
    %cst_64 = arith.constant 9.99999974E-6 : f32
    %180 = vector.broadcast %cst_64 : f32 to vector<32x1xf32>
    %181 = arith.addf %179, %180 : vector<32x1xf32>
    %182 = math.rsqrt %181 : vector<32x1xf32>
    %183 = vector.broadcast %182 : vector<32x1xf32> to vector<32x32xf32>
    %184 = arith.mulf %174, %183 : vector<32x32xf32>
    %185 = vector.broadcast %167 : vector<1x32xf32> to vector<32x32xf32>
    %186 = arith.mulf %184, %185 : vector<32x32xf32>
    %187 = vector.broadcast %168 : vector<1x32xf32> to vector<32x32xf32>
    %188 = arith.addf %186, %187 : vector<32x32xf32>
    %189 = vector.shape_cast %188 : vector<32x32xf32> to vector<2x16x32xf32>
    %190 = vector.extract_strided_slice %189 {offsets = [0, 15, 0], sizes = [2, 1, 32], strides = [1, 1, 1]} : vector<2x16x32xf32> to vector<2x1x32xf32>
    %191 = vector.extract_strided_slice %189 {offsets = [0, 0, 0], sizes = [2, 15, 32], strides = [1, 1, 1]} : vector<2x16x32xf32> to vector<2x15x32xf32>
    %192 = tpu.concatenate %190, %191 in 1 : vector<2x1x32xf32>, vector<2x15x32xf32> -> vector<2x16x32xf32>
    %193 = vector.extract_strided_slice %189 {offsets = [0, 1, 0], sizes = [2, 15, 32], strides = [1, 1, 1]} : vector<2x16x32xf32> to vector<2x15x32xf32>
    %194 = vector.extract_strided_slice %189 {offsets = [0, 0, 0], sizes = [2, 1, 32], strides = [1, 1, 1]} : vector<2x16x32xf32> to vector<2x1x32xf32>
    %195 = tpu.concatenate %193, %194 in 1 : vector<2x15x32xf32>, vector<2x1x32xf32> -> vector<2x16x32xf32>
    %c0_65 = arith.constant 0 : index
    %c0_66 = arith.constant 0 : index
    %c0_67 = arith.constant 0 : index
    %196 = vector.load %arg11[%c0_65, %c0_66, %c0_67] : memref<3x32x32xf32, #tpu.memory_space<vmem>>, vector<3x32x32xf32>
    %197 = vector.shape_cast %192 : vector<2x16x32xf32> to vector<32x32xf32>
    %198 = vector.extract_strided_slice %196 {offsets = [0, 0, 0], sizes = [1, 32, 32], strides = [1, 1, 1]} : vector<3x32x32xf32> to vector<1x32x32xf32>
    %199 = vector.shape_cast %198 : vector<1x32x32xf32> to vector<32x32xf32>
    %cst_68 = arith.constant dense<0.000000e+00> : vector<32x32xf32>
    %200 = tpu.matmul %197, %199, %cst_68 {dimension_numbers = #tpu.dot_dimension_numbers<[1], [0], [0], [1], [0, 0, 1, 1], [], []>} : vector<32x32xf32>, vector<32x32xf32>, vector<32x32xf32> -> vector<32x32xf32>
    %201 = vector.shape_cast %189 : vector<2x16x32xf32> to vector<32x32xf32>
    %202 = vector.extract_strided_slice %196 {offsets = [1, 0, 0], sizes = [1, 32, 32], strides = [1, 1, 1]} : vector<3x32x32xf32> to vector<1x32x32xf32>
    %203 = vector.shape_cast %202 : vector<1x32x32xf32> to vector<32x32xf32>
    %cst_69 = arith.constant dense<0.000000e+00> : vector<32x32xf32>
    %204 = tpu.matmul %201, %203, %cst_69 {dimension_numbers = #tpu.dot_dimension_numbers<[1], [0], [0], [1], [0, 0, 1, 1], [], []>} : vector<32x32xf32>, vector<32x32xf32>, vector<32x32xf32> -> vector<32x32xf32>
    %205 = arith.addf %200, %204 : vector<32x32xf32>
    %206 = vector.shape_cast %195 : vector<2x16x32xf32> to vector<32x32xf32>
    %207 = vector.extract_strided_slice %196 {offsets = [2, 0, 0], sizes = [1, 32, 32], strides = [1, 1, 1]} : vector<3x32x32xf32> to vector<1x32x32xf32>
    %208 = vector.shape_cast %207 : vector<1x32x32xf32> to vector<32x32xf32>
    %cst_70 = arith.constant dense<0.000000e+00> : vector<32x32xf32>
    %209 = tpu.matmul %206, %208, %cst_70 {dimension_numbers = #tpu.dot_dimension_numbers<[1], [0], [0], [1], [0, 0, 1, 1], [], []>} : vector<32x32xf32>, vector<32x32xf32>, vector<32x32xf32> -> vector<32x32xf32>
    %210 = arith.addf %205, %209 : vector<32x32xf32>
    %211 = vector.extract_strided_slice %1 {offsets = [14, 0], sizes = [1, 32], strides = [1, 1]} : vector<29x32xf32> to vector<1x32xf32>
    %212 = vector.broadcast %211 : vector<1x32xf32> to vector<32x32xf32>
    %213 = arith.addf %210, %212 : vector<32x32xf32>
    %cst_71 = arith.constant 0.000000e+00 : f32
    %214 = vector.broadcast %cst_71 : f32 to vector<32x32xf32>
    %215 = arith.cmpf ogt, %213, %214 : vector<32x32xf32>
    %cst_72 = arith.constant 0.000000e+00 : f32
    %216 = vector.broadcast %cst_72 : f32 to vector<32x32xf32>
    %217 = arith.minimumf %213, %216 : vector<32x32xf32>
    %218 = math.exp %217 : vector<32x32xf32>
    %cst_73 = arith.constant 1.000000e+00 : f32
    %219 = vector.broadcast %cst_73 : f32 to vector<32x32xf32>
    %220 = arith.subf %218, %219 : vector<32x32xf32>
    %221 = arith.select %215, %213, %220 : vector<32x32xi1>, vector<32x32xf32>
    %222 = vector.shape_cast %221 : vector<32x32xf32> to vector<2x16x32xf32>
    %223 = vector.extract_strided_slice %222 {offsets = [0, 0, 0], sizes = [2, 1, 32], strides = [1, 1, 1]} : vector<2x16x32xf32> to vector<2x1x32xf32>
    %224 = vector.extract_strided_slice %222 {offsets = [0, 1, 0], sizes = [2, 1, 32], strides = [1, 1, 1]} : vector<2x16x32xf32> to vector<2x1x32xf32>
    %225 = arith.maximumf %223, %224 : vector<2x1x32xf32>
    %226 = vector.extract_strided_slice %222 {offsets = [0, 1, 0], sizes = [2, 1, 32], strides = [1, 1, 1]} : vector<2x16x32xf32> to vector<2x1x32xf32>
    %227 = vector.extract_strided_slice %222 {offsets = [0, 2, 0], sizes = [2, 1, 32], strides = [1, 1, 1]} : vector<2x16x32xf32> to vector<2x1x32xf32>
    %228 = arith.maximumf %226, %227 : vector<2x1x32xf32>
    %229 = vector.extract_strided_slice %222 {offsets = [0, 3, 0], sizes = [2, 1, 32], strides = [1, 1, 1]} : vector<2x16x32xf32> to vector<2x1x32xf32>
    %230 = arith.maximumf %228, %229 : vector<2x1x32xf32>
    %231 = vector.extract_strided_slice %222 {offsets = [0, 3, 0], sizes = [2, 1, 32], strides = [1, 1, 1]} : vector<2x16x32xf32> to vector<2x1x32xf32>
    %232 = vector.extract_strided_slice %222 {offsets = [0, 4, 0], sizes = [2, 1, 32], strides = [1, 1, 1]} : vector<2x16x32xf32> to vector<2x1x32xf32>
    %233 = arith.maximumf %231, %232 : vector<2x1x32xf32>
    %234 = vector.extract_strided_slice %222 {offsets = [0, 5, 0], sizes = [2, 1, 32], strides = [1, 1, 1]} : vector<2x16x32xf32> to vector<2x1x32xf32>
    %235 = arith.maximumf %233, %234 : vector<2x1x32xf32>
    %236 = vector.extract_strided_slice %222 {offsets = [0, 5, 0], sizes = [2, 1, 32], strides = [1, 1, 1]} : vector<2x16x32xf32> to vector<2x1x32xf32>
    %237 = vector.extract_strided_slice %222 {offsets = [0, 6, 0], sizes = [2, 1, 32], strides = [1, 1, 1]} : vector<2x16x32xf32> to vector<2x1x32xf32>
    %238 = arith.maximumf %236, %237 : vector<2x1x32xf32>
    %239 = vector.extract_strided_slice %222 {offsets = [0, 7, 0], sizes = [2, 1, 32], strides = [1, 1, 1]} : vector<2x16x32xf32> to vector<2x1x32xf32>
    %240 = arith.maximumf %238, %239 : vector<2x1x32xf32>
    %241 = vector.extract_strided_slice %222 {offsets = [0, 7, 0], sizes = [2, 1, 32], strides = [1, 1, 1]} : vector<2x16x32xf32> to vector<2x1x32xf32>
    %242 = vector.extract_strided_slice %222 {offsets = [0, 8, 0], sizes = [2, 1, 32], strides = [1, 1, 1]} : vector<2x16x32xf32> to vector<2x1x32xf32>
    %243 = arith.maximumf %241, %242 : vector<2x1x32xf32>
    %244 = vector.extract_strided_slice %222 {offsets = [0, 9, 0], sizes = [2, 1, 32], strides = [1, 1, 1]} : vector<2x16x32xf32> to vector<2x1x32xf32>
    %245 = arith.maximumf %243, %244 : vector<2x1x32xf32>
    %246 = vector.extract_strided_slice %222 {offsets = [0, 9, 0], sizes = [2, 1, 32], strides = [1, 1, 1]} : vector<2x16x32xf32> to vector<2x1x32xf32>
    %247 = vector.extract_strided_slice %222 {offsets = [0, 10, 0], sizes = [2, 1, 32], strides = [1, 1, 1]} : vector<2x16x32xf32> to vector<2x1x32xf32>
    %248 = arith.maximumf %246, %247 : vector<2x1x32xf32>
    %249 = vector.extract_strided_slice %222 {offsets = [0, 11, 0], sizes = [2, 1, 32], strides = [1, 1, 1]} : vector<2x16x32xf32> to vector<2x1x32xf32>
    %250 = arith.maximumf %248, %249 : vector<2x1x32xf32>
    %251 = vector.extract_strided_slice %222 {offsets = [0, 11, 0], sizes = [2, 1, 32], strides = [1, 1, 1]} : vector<2x16x32xf32> to vector<2x1x32xf32>
    %252 = vector.extract_strided_slice %222 {offsets = [0, 12, 0], sizes = [2, 1, 32], strides = [1, 1, 1]} : vector<2x16x32xf32> to vector<2x1x32xf32>
    %253 = arith.maximumf %251, %252 : vector<2x1x32xf32>
    %254 = vector.extract_strided_slice %222 {offsets = [0, 13, 0], sizes = [2, 1, 32], strides = [1, 1, 1]} : vector<2x16x32xf32> to vector<2x1x32xf32>
    %255 = arith.maximumf %253, %254 : vector<2x1x32xf32>
    %256 = vector.extract_strided_slice %222 {offsets = [0, 13, 0], sizes = [2, 1, 32], strides = [1, 1, 1]} : vector<2x16x32xf32> to vector<2x1x32xf32>
    %257 = vector.extract_strided_slice %222 {offsets = [0, 14, 0], sizes = [2, 1, 32], strides = [1, 1, 1]} : vector<2x16x32xf32> to vector<2x1x32xf32>
    %258 = arith.maximumf %256, %257 : vector<2x1x32xf32>
    %259 = vector.extract_strided_slice %222 {offsets = [0, 15, 0], sizes = [2, 1, 32], strides = [1, 1, 1]} : vector<2x16x32xf32> to vector<2x1x32xf32>
    %260 = arith.maximumf %258, %259 : vector<2x1x32xf32>
    %261 = tpu.concatenate %225, %230, %235, %240, %245, %250, %255, %260 in 1 : vector<2x1x32xf32>, vector<2x1x32xf32>, vector<2x1x32xf32>, vector<2x1x32xf32>, vector<2x1x32xf32>, vector<2x1x32xf32>, vector<2x1x32xf32>, vector<2x1x32xf32> -> vector<2x8x32xf32>
    %262 = vector.shape_cast %261 : vector<2x8x32xf32> to vector<16x32xf32>
    %c1 = arith.constant 1 : index
    %c0_74 = arith.constant 0 : index
    %c0_75 = arith.constant 0 : index
    %263 = vector.load %arg6[%c1, %c0_74, %c0_75] : memref<4x32x96xf32, #tpu.memory_space<vmem>>, vector<1x32x96xf32>
    %264 = vector.shape_cast %263 : vector<1x32x96xf32> to vector<32x96xf32>
    %c1_76 = arith.constant 1 : index
    %c0_77 = arith.constant 0 : index
    %c0_78 = arith.constant 0 : index
    %265 = vector.load %arg7[%c1_76, %c0_77, %c0_78] : memref<4x1x96xf32, #tpu.memory_space<vmem>>, vector<1x1x96xf32>
    %266 = vector.shape_cast %265 : vector<1x1x96xf32> to vector<1x96xf32>
    %c1_79 = arith.constant 1 : index
    %c0_80 = arith.constant 0 : index
    %c0_81 = arith.constant 0 : index
    %267 = vector.load %arg8[%c1_79, %c0_80, %c0_81] : memref<4x32x32xf32, #tpu.memory_space<vmem>>, vector<1x32x32xf32>
    %268 = vector.shape_cast %267 : vector<1x32x32xf32> to vector<32x32xf32>
    %269 = vector.extract_strided_slice %1 {offsets = [7, 0], sizes = [1, 32], strides = [1, 1]} : vector<29x32xf32> to vector<1x32xf32>
    %cst_82 = arith.constant dense<0.000000e+00> : vector<16x96xf32>
    %270 = tpu.matmul %262, %264, %cst_82 {dimension_numbers = #tpu.dot_dimension_numbers<[1], [0], [0], [1], [0, 0, 1, 1], [], []>} : vector<16x32xf32>, vector<32x96xf32>, vector<16x96xf32> -> vector<16x96xf32>
    %271 = vector.broadcast %266 : vector<1x96xf32> to vector<16x96xf32>
    %272 = arith.addf %270, %271 : vector<16x96xf32>
    %273 = vector.extract_strided_slice %272 {offsets = [0, 0], sizes = [16, 32], strides = [1, 1]} : vector<16x96xf32> to vector<16x32xf32>
    %274 = vector.extract_strided_slice %272 {offsets = [0, 32], sizes = [16, 32], strides = [1, 1]} : vector<16x96xf32> to vector<16x32xf32>
    %275 = vector.extract_strided_slice %272 {offsets = [0, 64], sizes = [16, 32], strides = [1, 1]} : vector<16x96xf32> to vector<16x32xf32>
    %276 = vector.extract_strided_slice %273 {offsets = [0, 0], sizes = [16, 8], strides = [1, 1]} : vector<16x32xf32> to vector<16x8xf32>
    %277 = vector.shape_cast %276 : vector<16x8xf32> to vector<2x8x8xf32>
    %278 = vector.extract_strided_slice %274 {offsets = [0, 0], sizes = [16, 8], strides = [1, 1]} : vector<16x32xf32> to vector<16x8xf32>
    %279 = vector.shape_cast %278 : vector<16x8xf32> to vector<2x8x8xf32>
    %280 = vector.extract_strided_slice %275 {offsets = [0, 0], sizes = [16, 8], strides = [1, 1]} : vector<16x32xf32> to vector<16x8xf32>
    %281 = vector.shape_cast %280 : vector<16x8xf32> to vector<2x8x8xf32>
    "tpu.trace_start"() <{level = 10 : i32, message = "bld,bmd->blm"}> : () -> ()
    %cst_83 = arith.constant dense<0.000000e+00> : vector<2x8x8xf32>
    %282 = tpu.matmul %277, %279, %cst_83 {dimension_numbers = #tpu.dot_dimension_numbers<[2], [2], [1], [1], [0, 0, 0, 1, 1, 1], [0], [0]>} : vector<2x8x8xf32>, vector<2x8x8xf32>, vector<2x8x8xf32> -> vector<2x8x8xf32>
    "tpu.trace_stop"() : () -> ()
    %cst_84 = arith.constant 0.353553385 : f32
    %283 = vector.broadcast %cst_84 : f32 to vector<2x8x8xf32>
    %284 = arith.mulf %282, %283 : vector<2x8x8xf32>
    %cst_85 = arith.constant dense<0xFF800000> : vector<2x8xf32>
    %285 = vector.multi_reduction <maximumf>, %284, %cst_85 [2] : vector<2x8x8xf32> to vector<2x8xf32>
    %286 = vector.shape_cast %285 : vector<2x8xf32> to vector<2x8x1xf32>
    %287 = vector.broadcast %286 : vector<2x8x1xf32> to vector<2x8x8xf32>
    %288 = arith.subf %284, %287 : vector<2x8x8xf32>
    %289 = math.exp %288 : vector<2x8x8xf32>
    %cst_86 = arith.constant dense<0.000000e+00> : vector<2x8xf32>
    %290 = vector.multi_reduction <add>, %289, %cst_86 [2] : vector<2x8x8xf32> to vector<2x8xf32>
    %291 = vector.shape_cast %290 : vector<2x8xf32> to vector<2x8x1xf32>
    %292 = vector.broadcast %291 : vector<2x8x1xf32> to vector<2x8x8xf32>
    %293 = arith.divf %289, %292 : vector<2x8x8xf32>
    "tpu.trace_start"() <{level = 10 : i32, message = "blm,bmd->bld"}> : () -> ()
    %cst_87 = arith.constant dense<0.000000e+00> : vector<2x8x8xf32>
    %294 = tpu.matmul %293, %281, %cst_87 {dimension_numbers = #tpu.dot_dimension_numbers<[2], [1], [1], [2], [0, 0, 0, 1, 1, 2], [0], [0]>} : vector<2x8x8xf32>, vector<2x8x8xf32>, vector<2x8x8xf32> -> vector<2x8x8xf32>
    "tpu.trace_stop"() : () -> ()
    %295 = vector.shape_cast %294 : vector<2x8x8xf32> to vector<16x8xf32>
    %296 = vector.extract_strided_slice %273 {offsets = [0, 8], sizes = [16, 8], strides = [1, 1]} : vector<16x32xf32> to vector<16x8xf32>
    %297 = vector.shape_cast %296 : vector<16x8xf32> to vector<2x8x8xf32>
    %298 = vector.extract_strided_slice %274 {offsets = [0, 8], sizes = [16, 8], strides = [1, 1]} : vector<16x32xf32> to vector<16x8xf32>
    %299 = vector.shape_cast %298 : vector<16x8xf32> to vector<2x8x8xf32>
    %300 = vector.extract_strided_slice %275 {offsets = [0, 8], sizes = [16, 8], strides = [1, 1]} : vector<16x32xf32> to vector<16x8xf32>
    %301 = vector.shape_cast %300 : vector<16x8xf32> to vector<2x8x8xf32>
    "tpu.trace_start"() <{level = 10 : i32, message = "bld,bmd->blm"}> : () -> ()
    %cst_88 = arith.constant dense<0.000000e+00> : vector<2x8x8xf32>
    %302 = tpu.matmul %297, %299, %cst_88 {dimension_numbers = #tpu.dot_dimension_numbers<[2], [2], [1], [1], [0, 0, 0, 1, 1, 1], [0], [0]>} : vector<2x8x8xf32>, vector<2x8x8xf32>, vector<2x8x8xf32> -> vector<2x8x8xf32>
    "tpu.trace_stop"() : () -> ()
    %cst_89 = arith.constant 0.353553385 : f32
    %303 = vector.broadcast %cst_89 : f32 to vector<2x8x8xf32>
    %304 = arith.mulf %302, %303 : vector<2x8x8xf32>
    %cst_90 = arith.constant dense<0xFF800000> : vector<2x8xf32>
    %305 = vector.multi_reduction <maximumf>, %304, %cst_90 [2] : vector<2x8x8xf32> to vector<2x8xf32>
    %306 = vector.shape_cast %305 : vector<2x8xf32> to vector<2x8x1xf32>
    %307 = vector.broadcast %306 : vector<2x8x1xf32> to vector<2x8x8xf32>
    %308 = arith.subf %304, %307 : vector<2x8x8xf32>
    %309 = math.exp %308 : vector<2x8x8xf32>
    %cst_91 = arith.constant dense<0.000000e+00> : vector<2x8xf32>
    %310 = vector.multi_reduction <add>, %309, %cst_91 [2] : vector<2x8x8xf32> to vector<2x8xf32>
    %311 = vector.shape_cast %310 : vector<2x8xf32> to vector<2x8x1xf32>
    %312 = vector.broadcast %311 : vector<2x8x1xf32> to vector<2x8x8xf32>
    %313 = arith.divf %309, %312 : vector<2x8x8xf32>
    "tpu.trace_start"() <{level = 10 : i32, message = "blm,bmd->bld"}> : () -> ()
    %cst_92 = arith.constant dense<0.000000e+00> : vector<2x8x8xf32>
    %314 = tpu.matmul %313, %301, %cst_92 {dimension_numbers = #tpu.dot_dimension_numbers<[2], [1], [1], [2], [0, 0, 0, 1, 1, 2], [0], [0]>} : vector<2x8x8xf32>, vector<2x8x8xf32>, vector<2x8x8xf32> -> vector<2x8x8xf32>
    "tpu.trace_stop"() : () -> ()
    %315 = vector.shape_cast %314 : vector<2x8x8xf32> to vector<16x8xf32>
    %316 = vector.extract_strided_slice %273 {offsets = [0, 16], sizes = [16, 8], strides = [1, 1]} : vector<16x32xf32> to vector<16x8xf32>
    %317 = vector.shape_cast %316 : vector<16x8xf32> to vector<2x8x8xf32>
    %318 = vector.extract_strided_slice %274 {offsets = [0, 16], sizes = [16, 8], strides = [1, 1]} : vector<16x32xf32> to vector<16x8xf32>
    %319 = vector.shape_cast %318 : vector<16x8xf32> to vector<2x8x8xf32>
    %320 = vector.extract_strided_slice %275 {offsets = [0, 16], sizes = [16, 8], strides = [1, 1]} : vector<16x32xf32> to vector<16x8xf32>
    %321 = vector.shape_cast %320 : vector<16x8xf32> to vector<2x8x8xf32>
    "tpu.trace_start"() <{level = 10 : i32, message = "bld,bmd->blm"}> : () -> ()
    %cst_93 = arith.constant dense<0.000000e+00> : vector<2x8x8xf32>
    %322 = tpu.matmul %317, %319, %cst_93 {dimension_numbers = #tpu.dot_dimension_numbers<[2], [2], [1], [1], [0, 0, 0, 1, 1, 1], [0], [0]>} : vector<2x8x8xf32>, vector<2x8x8xf32>, vector<2x8x8xf32> -> vector<2x8x8xf32>
    "tpu.trace_stop"() : () -> ()
    %cst_94 = arith.constant 0.353553385 : f32
    %323 = vector.broadcast %cst_94 : f32 to vector<2x8x8xf32>
    %324 = arith.mulf %322, %323 : vector<2x8x8xf32>
    %cst_95 = arith.constant dense<0xFF800000> : vector<2x8xf32>
    %325 = vector.multi_reduction <maximumf>, %324, %cst_95 [2] : vector<2x8x8xf32> to vector<2x8xf32>
    %326 = vector.shape_cast %325 : vector<2x8xf32> to vector<2x8x1xf32>
    %327 = vector.broadcast %326 : vector<2x8x1xf32> to vector<2x8x8xf32>
    %328 = arith.subf %324, %327 : vector<2x8x8xf32>
    %329 = math.exp %328 : vector<2x8x8xf32>
    %cst_96 = arith.constant dense<0.000000e+00> : vector<2x8xf32>
    %330 = vector.multi_reduction <add>, %329, %cst_96 [2] : vector<2x8x8xf32> to vector<2x8xf32>
    %331 = vector.shape_cast %330 : vector<2x8xf32> to vector<2x8x1xf32>
    %332 = vector.broadcast %331 : vector<2x8x1xf32> to vector<2x8x8xf32>
    %333 = arith.divf %329, %332 : vector<2x8x8xf32>
    "tpu.trace_start"() <{level = 10 : i32, message = "blm,bmd->bld"}> : () -> ()
    %cst_97 = arith.constant dense<0.000000e+00> : vector<2x8x8xf32>
    %334 = tpu.matmul %333, %321, %cst_97 {dimension_numbers = #tpu.dot_dimension_numbers<[2], [1], [1], [2], [0, 0, 0, 1, 1, 2], [0], [0]>} : vector<2x8x8xf32>, vector<2x8x8xf32>, vector<2x8x8xf32> -> vector<2x8x8xf32>
    "tpu.trace_stop"() : () -> ()
    %335 = vector.shape_cast %334 : vector<2x8x8xf32> to vector<16x8xf32>
    %336 = vector.extract_strided_slice %273 {offsets = [0, 24], sizes = [16, 8], strides = [1, 1]} : vector<16x32xf32> to vector<16x8xf32>
    %337 = vector.shape_cast %336 : vector<16x8xf32> to vector<2x8x8xf32>
    %338 = vector.extract_strided_slice %274 {offsets = [0, 24], sizes = [16, 8], strides = [1, 1]} : vector<16x32xf32> to vector<16x8xf32>
    %339 = vector.shape_cast %338 : vector<16x8xf32> to vector<2x8x8xf32>
    %340 = vector.extract_strided_slice %275 {offsets = [0, 24], sizes = [16, 8], strides = [1, 1]} : vector<16x32xf32> to vector<16x8xf32>
    %341 = vector.shape_cast %340 : vector<16x8xf32> to vector<2x8x8xf32>
    "tpu.trace_start"() <{level = 10 : i32, message = "bld,bmd->blm"}> : () -> ()
    %cst_98 = arith.constant dense<0.000000e+00> : vector<2x8x8xf32>
    %342 = tpu.matmul %337, %339, %cst_98 {dimension_numbers = #tpu.dot_dimension_numbers<[2], [2], [1], [1], [0, 0, 0, 1, 1, 1], [0], [0]>} : vector<2x8x8xf32>, vector<2x8x8xf32>, vector<2x8x8xf32> -> vector<2x8x8xf32>
    "tpu.trace_stop"() : () -> ()
    %cst_99 = arith.constant 0.353553385 : f32
    %343 = vector.broadcast %cst_99 : f32 to vector<2x8x8xf32>
    %344 = arith.mulf %342, %343 : vector<2x8x8xf32>
    %cst_100 = arith.constant dense<0xFF800000> : vector<2x8xf32>
    %345 = vector.multi_reduction <maximumf>, %344, %cst_100 [2] : vector<2x8x8xf32> to vector<2x8xf32>
    %346 = vector.shape_cast %345 : vector<2x8xf32> to vector<2x8x1xf32>
    %347 = vector.broadcast %346 : vector<2x8x1xf32> to vector<2x8x8xf32>
    %348 = arith.subf %344, %347 : vector<2x8x8xf32>
    %349 = math.exp %348 : vector<2x8x8xf32>
    %cst_101 = arith.constant dense<0.000000e+00> : vector<2x8xf32>
    %350 = vector.multi_reduction <add>, %349, %cst_101 [2] : vector<2x8x8xf32> to vector<2x8xf32>
    %351 = vector.shape_cast %350 : vector<2x8xf32> to vector<2x8x1xf32>
    %352 = vector.broadcast %351 : vector<2x8x1xf32> to vector<2x8x8xf32>
    %353 = arith.divf %349, %352 : vector<2x8x8xf32>
    "tpu.trace_start"() <{level = 10 : i32, message = "blm,bmd->bld"}> : () -> ()
    %cst_102 = arith.constant dense<0.000000e+00> : vector<2x8x8xf32>
    %354 = tpu.matmul %353, %341, %cst_102 {dimension_numbers = #tpu.dot_dimension_numbers<[2], [1], [1], [2], [0, 0, 0, 1, 1, 2], [0], [0]>} : vector<2x8x8xf32>, vector<2x8x8xf32>, vector<2x8x8xf32> -> vector<2x8x8xf32>
    "tpu.trace_stop"() : () -> ()
    %355 = vector.shape_cast %354 : vector<2x8x8xf32> to vector<16x8xf32>
    %356 = tpu.concatenate %295, %315, %335, %355 in 1 : vector<16x8xf32>, vector<16x8xf32>, vector<16x8xf32>, vector<16x8xf32> -> vector<16x32xf32>
    %cst_103 = arith.constant dense<0.000000e+00> : vector<16x32xf32>
    %357 = tpu.matmul %356, %268, %cst_103 {dimension_numbers = #tpu.dot_dimension_numbers<[1], [0], [0], [1], [0, 0, 1, 1], [], []>} : vector<16x32xf32>, vector<32x32xf32>, vector<16x32xf32> -> vector<16x32xf32>
    %358 = vector.broadcast %269 : vector<1x32xf32> to vector<16x32xf32>
    %359 = arith.addf %357, %358 : vector<16x32xf32>
    %360 = arith.addf %262, %359 : vector<16x32xf32>
    %361 = vector.extract_strided_slice %1 {offsets = [8, 0], sizes = [1, 32], strides = [1, 1]} : vector<29x32xf32> to vector<1x32xf32>
    %362 = vector.extract_strided_slice %1 {offsets = [9, 0], sizes = [1, 32], strides = [1, 1]} : vector<29x32xf32> to vector<1x32xf32>
    %cst_104 = arith.constant dense<0.000000e+00> : vector<16xf32>
    %363 = vector.multi_reduction <add>, %360, %cst_104 [1] : vector<16x32xf32> to vector<16xf32>
    %364 = vector.shape_cast %363 : vector<16xf32> to vector<16x1xf32>
    %cst_105 = arith.constant 3.200000e+01 : f32
    %365 = vector.broadcast %cst_105 : f32 to vector<16x1xf32>
    %366 = arith.divf %364, %365 : vector<16x1xf32>
    %367 = vector.broadcast %366 : vector<16x1xf32> to vector<16x32xf32>
    %368 = arith.subf %360, %367 : vector<16x32xf32>
    %369 = arith.mulf %368, %368 : vector<16x32xf32>
    %cst_106 = arith.constant dense<0.000000e+00> : vector<16xf32>
    %370 = vector.multi_reduction <add>, %369, %cst_106 [1] : vector<16x32xf32> to vector<16xf32>
    %371 = vector.shape_cast %370 : vector<16xf32> to vector<16x1xf32>
    %cst_107 = arith.constant 3.200000e+01 : f32
    %372 = vector.broadcast %cst_107 : f32 to vector<16x1xf32>
    %373 = arith.divf %371, %372 : vector<16x1xf32>
    %cst_108 = arith.constant 9.99999974E-6 : f32
    %374 = vector.broadcast %cst_108 : f32 to vector<16x1xf32>
    %375 = arith.addf %373, %374 : vector<16x1xf32>
    %376 = math.rsqrt %375 : vector<16x1xf32>
    %377 = vector.broadcast %376 : vector<16x1xf32> to vector<16x32xf32>
    %378 = arith.mulf %368, %377 : vector<16x32xf32>
    %379 = vector.broadcast %361 : vector<1x32xf32> to vector<16x32xf32>
    %380 = arith.mulf %378, %379 : vector<16x32xf32>
    %381 = vector.broadcast %362 : vector<1x32xf32> to vector<16x32xf32>
    %382 = arith.addf %380, %381 : vector<16x32xf32>
    %c1_109 = arith.constant 1 : index
    %c0_110 = arith.constant 0 : index
    %c0_111 = arith.constant 0 : index
    %383 = vector.load %arg9[%c1_109, %c0_110, %c0_111] : memref<3x32x32xf32, #tpu.memory_space<vmem>>, vector<1x32x32xf32>
    %384 = vector.shape_cast %383 : vector<1x32x32xf32> to vector<32x32xf32>
    %cst_112 = arith.constant dense<0.000000e+00> : vector<16x32xf32>
    %385 = tpu.matmul %382, %384, %cst_112 {dimension_numbers = #tpu.dot_dimension_numbers<[1], [0], [0], [1], [0, 0, 1, 1], [], []>} : vector<16x32xf32>, vector<32x32xf32>, vector<16x32xf32> -> vector<16x32xf32>
    %386 = vector.extract_strided_slice %1 {offsets = [10, 0], sizes = [1, 32], strides = [1, 1]} : vector<29x32xf32> to vector<1x32xf32>
    %387 = vector.broadcast %386 : vector<1x32xf32> to vector<16x32xf32>
    %388 = arith.addf %385, %387 : vector<16x32xf32>
    %cst_113 = arith.constant 5.000000e-01 : f32
    %389 = vector.broadcast %cst_113 : f32 to vector<16x32xf32>
    %390 = arith.mulf %389, %388 : vector<16x32xf32>
    %cst_114 = arith.constant 4.471500e-02 : f32
    %391 = vector.broadcast %cst_114 : f32 to vector<16x32xf32>
    %392 = arith.mulf %391, %388 : vector<16x32xf32>
    %393 = arith.mulf %392, %388 : vector<16x32xf32>
    %394 = arith.mulf %393, %388 : vector<16x32xf32>
    %395 = arith.addf %388, %394 : vector<16x32xf32>
    %cst_115 = arith.constant 0.797884583 : f32
    %396 = vector.broadcast %cst_115 : f32 to vector<16x32xf32>
    %397 = arith.mulf %396, %395 : vector<16x32xf32>
    %398 = math.tanh %397 : vector<16x32xf32>
    %cst_116 = arith.constant 1.000000e+00 : f32
    %399 = vector.broadcast %cst_116 : f32 to vector<16x32xf32>
    %400 = arith.addf %399, %398 : vector<16x32xf32>
    %401 = arith.mulf %390, %400 : vector<16x32xf32>
    %c1_117 = arith.constant 1 : index
    %c0_118 = arith.constant 0 : index
    %c0_119 = arith.constant 0 : index
    %402 = vector.load %arg10[%c1_117, %c0_118, %c0_119] : memref<3x32x32xf32, #tpu.memory_space<vmem>>, vector<1x32x32xf32>
    %403 = vector.shape_cast %402 : vector<1x32x32xf32> to vector<32x32xf32>
    %cst_120 = arith.constant dense<0.000000e+00> : vector<16x32xf32>
    %404 = tpu.matmul %401, %403, %cst_120 {dimension_numbers = #tpu.dot_dimension_numbers<[1], [0], [0], [1], [0, 0, 1, 1], [], []>} : vector<16x32xf32>, vector<32x32xf32>, vector<16x32xf32> -> vector<16x32xf32>
    %405 = vector.extract_strided_slice %1 {offsets = [11, 0], sizes = [1, 32], strides = [1, 1]} : vector<29x32xf32> to vector<1x32xf32>
    %406 = vector.broadcast %405 : vector<1x32xf32> to vector<16x32xf32>
    %407 = arith.addf %404, %406 : vector<16x32xf32>
    %408 = arith.addf %382, %407 : vector<16x32xf32>
    %409 = vector.extract_strided_slice %1 {offsets = [12, 0], sizes = [1, 32], strides = [1, 1]} : vector<29x32xf32> to vector<1x32xf32>
    %410 = vector.extract_strided_slice %1 {offsets = [13, 0], sizes = [1, 32], strides = [1, 1]} : vector<29x32xf32> to vector<1x32xf32>
    %cst_121 = arith.constant dense<0.000000e+00> : vector<16xf32>
    %411 = vector.multi_reduction <add>, %408, %cst_121 [1] : vector<16x32xf32> to vector<16xf32>
    %412 = vector.shape_cast %411 : vector<16xf32> to vector<16x1xf32>
    %cst_122 = arith.constant 3.200000e+01 : f32
    %413 = vector.broadcast %cst_122 : f32 to vector<16x1xf32>
    %414 = arith.divf %412, %413 : vector<16x1xf32>
    %415 = vector.broadcast %414 : vector<16x1xf32> to vector<16x32xf32>
    %416 = arith.subf %408, %415 : vector<16x32xf32>
    %417 = arith.mulf %416, %416 : vector<16x32xf32>
    %cst_123 = arith.constant dense<0.000000e+00> : vector<16xf32>
    %418 = vector.multi_reduction <add>, %417, %cst_123 [1] : vector<16x32xf32> to vector<16xf32>
    %419 = vector.shape_cast %418 : vector<16xf32> to vector<16x1xf32>
    %cst_124 = arith.constant 3.200000e+01 : f32
    %420 = vector.broadcast %cst_124 : f32 to vector<16x1xf32>
    %421 = arith.divf %419, %420 : vector<16x1xf32>
    %cst_125 = arith.constant 9.99999974E-6 : f32
    %422 = vector.broadcast %cst_125 : f32 to vector<16x1xf32>
    %423 = arith.addf %421, %422 : vector<16x1xf32>
    %424 = math.rsqrt %423 : vector<16x1xf32>
    %425 = vector.broadcast %424 : vector<16x1xf32> to vector<16x32xf32>
    %426 = arith.mulf %416, %425 : vector<16x32xf32>
    %427 = vector.broadcast %409 : vector<1x32xf32> to vector<16x32xf32>
    %428 = arith.mulf %426, %427 : vector<16x32xf32>
    %429 = vector.broadcast %410 : vector<1x32xf32> to vector<16x32xf32>
    %430 = arith.addf %428, %429 : vector<16x32xf32>
    %431 = vector.extract_strided_slice %1 {offsets = [15, 0], sizes = [1, 32], strides = [1, 1]} : vector<29x32xf32> to vector<1x32xf32>
    %432 = vector.extract_strided_slice %1 {offsets = [16, 0], sizes = [1, 32], strides = [1, 1]} : vector<29x32xf32> to vector<1x32xf32>
    %cst_126 = arith.constant dense<0.000000e+00> : vector<16xf32>
    %433 = vector.multi_reduction <add>, %430, %cst_126 [1] : vector<16x32xf32> to vector<16xf32>
    %434 = vector.shape_cast %433 : vector<16xf32> to vector<16x1xf32>
    %cst_127 = arith.constant 3.200000e+01 : f32
    %435 = vector.broadcast %cst_127 : f32 to vector<16x1xf32>
    %436 = arith.divf %434, %435 : vector<16x1xf32>
    %437 = vector.broadcast %436 : vector<16x1xf32> to vector<16x32xf32>
    %438 = arith.subf %430, %437 : vector<16x32xf32>
    %439 = arith.mulf %438, %438 : vector<16x32xf32>
    %cst_128 = arith.constant dense<0.000000e+00> : vector<16xf32>
    %440 = vector.multi_reduction <add>, %439, %cst_128 [1] : vector<16x32xf32> to vector<16xf32>
    %441 = vector.shape_cast %440 : vector<16xf32> to vector<16x1xf32>
    %cst_129 = arith.constant 3.200000e+01 : f32
    %442 = vector.broadcast %cst_129 : f32 to vector<16x1xf32>
    %443 = arith.divf %441, %442 : vector<16x1xf32>
    %cst_130 = arith.constant 9.99999974E-6 : f32
    %444 = vector.broadcast %cst_130 : f32 to vector<16x1xf32>
    %445 = arith.addf %443, %444 : vector<16x1xf32>
    %446 = math.rsqrt %445 : vector<16x1xf32>
    %447 = vector.broadcast %446 : vector<16x1xf32> to vector<16x32xf32>
    %448 = arith.mulf %438, %447 : vector<16x32xf32>
    %449 = vector.broadcast %431 : vector<1x32xf32> to vector<16x32xf32>
    %450 = arith.mulf %448, %449 : vector<16x32xf32>
    %451 = vector.broadcast %432 : vector<1x32xf32> to vector<16x32xf32>
    %452 = arith.addf %450, %451 : vector<16x32xf32>
    %c0_131 = arith.constant 0 : index
    %c0_132 = arith.constant 0 : index
    %c0_133 = arith.constant 0 : index
    %453 = vector.load %arg2[%c0_131, %c0_132, %c0_133] : memref<2x16x4xf32, #tpu.memory_space<vmem>>, vector<2x16x4xf32>
    %c0_134 = arith.constant 0 : index
    %c0_135 = arith.constant 0 : index
    %c0_136 = arith.constant 0 : index
    %454 = vector.load %arg3[%c0_134, %c0_135, %c0_136] : memref<2x16x4xf32, #tpu.memory_space<vmem>>, vector<2x16x4xf32>
    %455 = vector.extract_strided_slice %2 {offsets = [1, 0, 0], sizes = [1, 16, 32], strides = [1, 1, 1]} : vector<2x16x32xf32> to vector<1x16x32xf32>
    %456 = vector.shape_cast %455 : vector<1x16x32xf32> to vector<16x32xf32>
    %457 = vector.extract_strided_slice %453 {offsets = [0, 15, 0], sizes = [2, 1, 4], strides = [1, 1, 1]} : vector<2x16x4xf32> to vector<2x1x4xf32>
    %458 = vector.extract_strided_slice %453 {offsets = [0, 0, 0], sizes = [2, 15, 4], strides = [1, 1, 1]} : vector<2x16x4xf32> to vector<2x15x4xf32>
    %459 = tpu.concatenate %457, %458 in 1 : vector<2x1x4xf32>, vector<2x15x4xf32> -> vector<2x16x4xf32>
    %460 = vector.extract_strided_slice %453 {offsets = [0, 1, 0], sizes = [2, 15, 4], strides = [1, 1, 1]} : vector<2x16x4xf32> to vector<2x15x4xf32>
    %461 = vector.extract_strided_slice %453 {offsets = [0, 0, 0], sizes = [2, 1, 4], strides = [1, 1, 1]} : vector<2x16x4xf32> to vector<2x1x4xf32>
    %462 = tpu.concatenate %460, %461 in 1 : vector<2x15x4xf32>, vector<2x1x4xf32> -> vector<2x16x4xf32>
    %463 = tpu.concatenate %459, %453, %462, %454 in 2 : vector<2x16x4xf32>, vector<2x16x4xf32>, vector<2x16x4xf32>, vector<2x16x4xf32> -> vector<2x16x16xf32>
    %464 = vector.shape_cast %463 : vector<2x16x16xf32> to vector<32x16xf32>
    %cst_137 = arith.constant dense<0.000000e+00> : vector<32x32xf32>
    %465 = tpu.matmul %464, %456, %cst_137 {dimension_numbers = #tpu.dot_dimension_numbers<[1], [0], [0], [1], [0, 0, 1, 1], [], []>} : vector<32x16xf32>, vector<16x32xf32>, vector<32x32xf32> -> vector<32x32xf32>
    %466 = vector.shape_cast %465 : vector<32x32xf32> to vector<2x16x32xf32>
    %467 = vector.shape_cast %0 : vector<16x32xf32> to vector<1x16x32xf32>
    %468 = vector.broadcast %467 : vector<1x16x32xf32> to vector<2x16x32xf32>
    %469 = arith.addf %466, %468 : vector<2x16x32xf32>
    %470 = vector.shape_cast %469 : vector<2x16x32xf32> to vector<32x32xf32>
    %c2 = arith.constant 2 : index
    %c0_138 = arith.constant 0 : index
    %c0_139 = arith.constant 0 : index
    %471 = vector.load %arg6[%c2, %c0_138, %c0_139] : memref<4x32x96xf32, #tpu.memory_space<vmem>>, vector<1x32x96xf32>
    %472 = vector.shape_cast %471 : vector<1x32x96xf32> to vector<32x96xf32>
    %c2_140 = arith.constant 2 : index
    %c0_141 = arith.constant 0 : index
    %c0_142 = arith.constant 0 : index
    %473 = vector.load %arg7[%c2_140, %c0_141, %c0_142] : memref<4x1x96xf32, #tpu.memory_space<vmem>>, vector<1x1x96xf32>
    %474 = vector.shape_cast %473 : vector<1x1x96xf32> to vector<1x96xf32>
    %c2_143 = arith.constant 2 : index
    %c0_144 = arith.constant 0 : index
    %c0_145 = arith.constant 0 : index
    %475 = vector.load %arg8[%c2_143, %c0_144, %c0_145] : memref<4x32x32xf32, #tpu.memory_space<vmem>>, vector<1x32x32xf32>
    %476 = vector.shape_cast %475 : vector<1x32x32xf32> to vector<32x32xf32>
    %477 = vector.extract_strided_slice %1 {offsets = [17, 0], sizes = [1, 32], strides = [1, 1]} : vector<29x32xf32> to vector<1x32xf32>
    %cst_146 = arith.constant dense<0.000000e+00> : vector<32x96xf32>
    %478 = tpu.matmul %470, %472, %cst_146 {dimension_numbers = #tpu.dot_dimension_numbers<[1], [0], [0], [1], [0, 0, 1, 1], [], []>} : vector<32x32xf32>, vector<32x96xf32>, vector<32x96xf32> -> vector<32x96xf32>
    %479 = vector.broadcast %474 : vector<1x96xf32> to vector<32x96xf32>
    %480 = arith.addf %478, %479 : vector<32x96xf32>
    %481 = vector.extract_strided_slice %480 {offsets = [0, 0], sizes = [32, 32], strides = [1, 1]} : vector<32x96xf32> to vector<32x32xf32>
    %482 = vector.extract_strided_slice %480 {offsets = [0, 32], sizes = [32, 32], strides = [1, 1]} : vector<32x96xf32> to vector<32x32xf32>
    %483 = vector.extract_strided_slice %480 {offsets = [0, 64], sizes = [32, 32], strides = [1, 1]} : vector<32x96xf32> to vector<32x32xf32>
    %484 = tpu.iota {dimensions = array<i32: 0>} : vector<16x16xi32>
    %485 = tpu.iota {dimensions = array<i32: 1>} : vector<16x16xi32>
    %c0_i32 = arith.constant 0 : i32
    %486 = vector.broadcast %c0_i32 : i32 to vector<16x16xi32>
    %487 = arith.addi %484, %486 : vector<16x16xi32>
    %488 = arith.cmpi sle, %485, %487 : vector<16x16xi32>
    %489 = vector.shape_cast %488 : vector<16x16xi1> to vector<1x16x16xi1>
    %490 = vector.extract_strided_slice %481 {offsets = [0, 0], sizes = [32, 8], strides = [1, 1]} : vector<32x32xf32> to vector<32x8xf32>
    %491 = vector.shape_cast %490 : vector<32x8xf32> to vector<2x16x8xf32>
    %492 = vector.extract_strided_slice %482 {offsets = [0, 0], sizes = [32, 8], strides = [1, 1]} : vector<32x32xf32> to vector<32x8xf32>
    %493 = vector.shape_cast %492 : vector<32x8xf32> to vector<2x16x8xf32>
    %494 = vector.extract_strided_slice %483 {offsets = [0, 0], sizes = [32, 8], strides = [1, 1]} : vector<32x32xf32> to vector<32x8xf32>
    %495 = vector.shape_cast %494 : vector<32x8xf32> to vector<2x16x8xf32>
    "tpu.trace_start"() <{level = 10 : i32, message = "bld,bmd->blm"}> : () -> ()
    %cst_147 = arith.constant dense<0.000000e+00> : vector<2x16x16xf32>
    %496 = tpu.matmul %491, %493, %cst_147 {dimension_numbers = #tpu.dot_dimension_numbers<[2], [2], [1], [1], [0, 0, 0, 1, 1, 1], [0], [0]>} : vector<2x16x8xf32>, vector<2x16x8xf32>, vector<2x16x16xf32> -> vector<2x16x16xf32>
    "tpu.trace_stop"() : () -> ()
    %cst_148 = arith.constant 0.353553385 : f32
    %497 = vector.broadcast %cst_148 : f32 to vector<2x16x16xf32>
    %498 = arith.mulf %496, %497 : vector<2x16x16xf32>
    %cst_149 = arith.constant -1.000000e+30 : f32
    %499 = vector.shape_cast %489 : vector<1x16x16xi1> to vector<1x16x16xi1>
    %500 = vector.broadcast %499 : vector<1x16x16xi1> to vector<2x16x16xi1>
    %501 = vector.broadcast %cst_149 : f32 to vector<2x16x16xf32>
    %502 = arith.select %500, %498, %501 : vector<2x16x16xi1>, vector<2x16x16xf32>
    %cst_150 = arith.constant dense<0xFF800000> : vector<2x16xf32>
    %503 = vector.multi_reduction <maximumf>, %502, %cst_150 [2] : vector<2x16x16xf32> to vector<2x16xf32>
    %504 = vector.shape_cast %503 : vector<2x16xf32> to vector<2x16x1xf32>
    %505 = vector.broadcast %504 : vector<2x16x1xf32> to vector<2x16x16xf32>
    %506 = arith.subf %502, %505 : vector<2x16x16xf32>
    %507 = math.exp %506 : vector<2x16x16xf32>
    %cst_151 = arith.constant dense<0.000000e+00> : vector<2x16xf32>
    %508 = vector.multi_reduction <add>, %507, %cst_151 [2] : vector<2x16x16xf32> to vector<2x16xf32>
    %509 = vector.shape_cast %508 : vector<2x16xf32> to vector<2x16x1xf32>
    %510 = vector.broadcast %509 : vector<2x16x1xf32> to vector<2x16x16xf32>
    %511 = arith.divf %507, %510 : vector<2x16x16xf32>
    "tpu.trace_start"() <{level = 10 : i32, message = "blm,bmd->bld"}> : () -> ()
    %cst_152 = arith.constant dense<0.000000e+00> : vector<2x16x8xf32>
    %512 = tpu.matmul %511, %495, %cst_152 {dimension_numbers = #tpu.dot_dimension_numbers<[2], [1], [1], [2], [0, 0, 0, 1, 1, 2], [0], [0]>} : vector<2x16x16xf32>, vector<2x16x8xf32>, vector<2x16x8xf32> -> vector<2x16x8xf32>
    "tpu.trace_stop"() : () -> ()
    %513 = vector.shape_cast %512 : vector<2x16x8xf32> to vector<32x8xf32>
    %514 = vector.extract_strided_slice %481 {offsets = [0, 8], sizes = [32, 8], strides = [1, 1]} : vector<32x32xf32> to vector<32x8xf32>
    %515 = vector.shape_cast %514 : vector<32x8xf32> to vector<2x16x8xf32>
    %516 = vector.extract_strided_slice %482 {offsets = [0, 8], sizes = [32, 8], strides = [1, 1]} : vector<32x32xf32> to vector<32x8xf32>
    %517 = vector.shape_cast %516 : vector<32x8xf32> to vector<2x16x8xf32>
    %518 = vector.extract_strided_slice %483 {offsets = [0, 8], sizes = [32, 8], strides = [1, 1]} : vector<32x32xf32> to vector<32x8xf32>
    %519 = vector.shape_cast %518 : vector<32x8xf32> to vector<2x16x8xf32>
    "tpu.trace_start"() <{level = 10 : i32, message = "bld,bmd->blm"}> : () -> ()
    %cst_153 = arith.constant dense<0.000000e+00> : vector<2x16x16xf32>
    %520 = tpu.matmul %515, %517, %cst_153 {dimension_numbers = #tpu.dot_dimension_numbers<[2], [2], [1], [1], [0, 0, 0, 1, 1, 1], [0], [0]>} : vector<2x16x8xf32>, vector<2x16x8xf32>, vector<2x16x16xf32> -> vector<2x16x16xf32>
    "tpu.trace_stop"() : () -> ()
    %cst_154 = arith.constant 0.353553385 : f32
    %521 = vector.broadcast %cst_154 : f32 to vector<2x16x16xf32>
    %522 = arith.mulf %520, %521 : vector<2x16x16xf32>
    %cst_155 = arith.constant -1.000000e+30 : f32
    %523 = vector.shape_cast %489 : vector<1x16x16xi1> to vector<1x16x16xi1>
    %524 = vector.broadcast %523 : vector<1x16x16xi1> to vector<2x16x16xi1>
    %525 = vector.broadcast %cst_155 : f32 to vector<2x16x16xf32>
    %526 = arith.select %524, %522, %525 : vector<2x16x16xi1>, vector<2x16x16xf32>
    %cst_156 = arith.constant dense<0xFF800000> : vector<2x16xf32>
    %527 = vector.multi_reduction <maximumf>, %526, %cst_156 [2] : vector<2x16x16xf32> to vector<2x16xf32>
    %528 = vector.shape_cast %527 : vector<2x16xf32> to vector<2x16x1xf32>
    %529 = vector.broadcast %528 : vector<2x16x1xf32> to vector<2x16x16xf32>
    %530 = arith.subf %526, %529 : vector<2x16x16xf32>
    %531 = math.exp %530 : vector<2x16x16xf32>
    %cst_157 = arith.constant dense<0.000000e+00> : vector<2x16xf32>
    %532 = vector.multi_reduction <add>, %531, %cst_157 [2] : vector<2x16x16xf32> to vector<2x16xf32>
    %533 = vector.shape_cast %532 : vector<2x16xf32> to vector<2x16x1xf32>
    %534 = vector.broadcast %533 : vector<2x16x1xf32> to vector<2x16x16xf32>
    %535 = arith.divf %531, %534 : vector<2x16x16xf32>
    "tpu.trace_start"() <{level = 10 : i32, message = "blm,bmd->bld"}> : () -> ()
    %cst_158 = arith.constant dense<0.000000e+00> : vector<2x16x8xf32>
    %536 = tpu.matmul %535, %519, %cst_158 {dimension_numbers = #tpu.dot_dimension_numbers<[2], [1], [1], [2], [0, 0, 0, 1, 1, 2], [0], [0]>} : vector<2x16x16xf32>, vector<2x16x8xf32>, vector<2x16x8xf32> -> vector<2x16x8xf32>
    "tpu.trace_stop"() : () -> ()
    %537 = vector.shape_cast %536 : vector<2x16x8xf32> to vector<32x8xf32>
    %538 = vector.extract_strided_slice %481 {offsets = [0, 16], sizes = [32, 8], strides = [1, 1]} : vector<32x32xf32> to vector<32x8xf32>
    %539 = vector.shape_cast %538 : vector<32x8xf32> to vector<2x16x8xf32>
    %540 = vector.extract_strided_slice %482 {offsets = [0, 16], sizes = [32, 8], strides = [1, 1]} : vector<32x32xf32> to vector<32x8xf32>
    %541 = vector.shape_cast %540 : vector<32x8xf32> to vector<2x16x8xf32>
    %542 = vector.extract_strided_slice %483 {offsets = [0, 16], sizes = [32, 8], strides = [1, 1]} : vector<32x32xf32> to vector<32x8xf32>
    %543 = vector.shape_cast %542 : vector<32x8xf32> to vector<2x16x8xf32>
    "tpu.trace_start"() <{level = 10 : i32, message = "bld,bmd->blm"}> : () -> ()
    %cst_159 = arith.constant dense<0.000000e+00> : vector<2x16x16xf32>
    %544 = tpu.matmul %539, %541, %cst_159 {dimension_numbers = #tpu.dot_dimension_numbers<[2], [2], [1], [1], [0, 0, 0, 1, 1, 1], [0], [0]>} : vector<2x16x8xf32>, vector<2x16x8xf32>, vector<2x16x16xf32> -> vector<2x16x16xf32>
    "tpu.trace_stop"() : () -> ()
    %cst_160 = arith.constant 0.353553385 : f32
    %545 = vector.broadcast %cst_160 : f32 to vector<2x16x16xf32>
    %546 = arith.mulf %544, %545 : vector<2x16x16xf32>
    %cst_161 = arith.constant -1.000000e+30 : f32
    %547 = vector.shape_cast %489 : vector<1x16x16xi1> to vector<1x16x16xi1>
    %548 = vector.broadcast %547 : vector<1x16x16xi1> to vector<2x16x16xi1>
    %549 = vector.broadcast %cst_161 : f32 to vector<2x16x16xf32>
    %550 = arith.select %548, %546, %549 : vector<2x16x16xi1>, vector<2x16x16xf32>
    %cst_162 = arith.constant dense<0xFF800000> : vector<2x16xf32>
    %551 = vector.multi_reduction <maximumf>, %550, %cst_162 [2] : vector<2x16x16xf32> to vector<2x16xf32>
    %552 = vector.shape_cast %551 : vector<2x16xf32> to vector<2x16x1xf32>
    %553 = vector.broadcast %552 : vector<2x16x1xf32> to vector<2x16x16xf32>
    %554 = arith.subf %550, %553 : vector<2x16x16xf32>
    %555 = math.exp %554 : vector<2x16x16xf32>
    %cst_163 = arith.constant dense<0.000000e+00> : vector<2x16xf32>
    %556 = vector.multi_reduction <add>, %555, %cst_163 [2] : vector<2x16x16xf32> to vector<2x16xf32>
    %557 = vector.shape_cast %556 : vector<2x16xf32> to vector<2x16x1xf32>
    %558 = vector.broadcast %557 : vector<2x16x1xf32> to vector<2x16x16xf32>
    %559 = arith.divf %555, %558 : vector<2x16x16xf32>
    "tpu.trace_start"() <{level = 10 : i32, message = "blm,bmd->bld"}> : () -> ()
    %cst_164 = arith.constant dense<0.000000e+00> : vector<2x16x8xf32>
    %560 = tpu.matmul %559, %543, %cst_164 {dimension_numbers = #tpu.dot_dimension_numbers<[2], [1], [1], [2], [0, 0, 0, 1, 1, 2], [0], [0]>} : vector<2x16x16xf32>, vector<2x16x8xf32>, vector<2x16x8xf32> -> vector<2x16x8xf32>
    "tpu.trace_stop"() : () -> ()
    %561 = vector.shape_cast %560 : vector<2x16x8xf32> to vector<32x8xf32>
    %562 = vector.extract_strided_slice %481 {offsets = [0, 24], sizes = [32, 8], strides = [1, 1]} : vector<32x32xf32> to vector<32x8xf32>
    %563 = vector.shape_cast %562 : vector<32x8xf32> to vector<2x16x8xf32>
    %564 = vector.extract_strided_slice %482 {offsets = [0, 24], sizes = [32, 8], strides = [1, 1]} : vector<32x32xf32> to vector<32x8xf32>
    %565 = vector.shape_cast %564 : vector<32x8xf32> to vector<2x16x8xf32>
    %566 = vector.extract_strided_slice %483 {offsets = [0, 24], sizes = [32, 8], strides = [1, 1]} : vector<32x32xf32> to vector<32x8xf32>
    %567 = vector.shape_cast %566 : vector<32x8xf32> to vector<2x16x8xf32>
    "tpu.trace_start"() <{level = 10 : i32, message = "bld,bmd->blm"}> : () -> ()
    %cst_165 = arith.constant dense<0.000000e+00> : vector<2x16x16xf32>
    %568 = tpu.matmul %563, %565, %cst_165 {dimension_numbers = #tpu.dot_dimension_numbers<[2], [2], [1], [1], [0, 0, 0, 1, 1, 1], [0], [0]>} : vector<2x16x8xf32>, vector<2x16x8xf32>, vector<2x16x16xf32> -> vector<2x16x16xf32>
    "tpu.trace_stop"() : () -> ()
    %cst_166 = arith.constant 0.353553385 : f32
    %569 = vector.broadcast %cst_166 : f32 to vector<2x16x16xf32>
    %570 = arith.mulf %568, %569 : vector<2x16x16xf32>
    %cst_167 = arith.constant -1.000000e+30 : f32
    %571 = vector.shape_cast %489 : vector<1x16x16xi1> to vector<1x16x16xi1>
    %572 = vector.broadcast %571 : vector<1x16x16xi1> to vector<2x16x16xi1>
    %573 = vector.broadcast %cst_167 : f32 to vector<2x16x16xf32>
    %574 = arith.select %572, %570, %573 : vector<2x16x16xi1>, vector<2x16x16xf32>
    %cst_168 = arith.constant dense<0xFF800000> : vector<2x16xf32>
    %575 = vector.multi_reduction <maximumf>, %574, %cst_168 [2] : vector<2x16x16xf32> to vector<2x16xf32>
    %576 = vector.shape_cast %575 : vector<2x16xf32> to vector<2x16x1xf32>
    %577 = vector.broadcast %576 : vector<2x16x1xf32> to vector<2x16x16xf32>
    %578 = arith.subf %574, %577 : vector<2x16x16xf32>
    %579 = math.exp %578 : vector<2x16x16xf32>
    %cst_169 = arith.constant dense<0.000000e+00> : vector<2x16xf32>
    %580 = vector.multi_reduction <add>, %579, %cst_169 [2] : vector<2x16x16xf32> to vector<2x16xf32>
    %581 = vector.shape_cast %580 : vector<2x16xf32> to vector<2x16x1xf32>
    %582 = vector.broadcast %581 : vector<2x16x1xf32> to vector<2x16x16xf32>
    %583 = arith.divf %579, %582 : vector<2x16x16xf32>
    "tpu.trace_start"() <{level = 10 : i32, message = "blm,bmd->bld"}> : () -> ()
    %cst_170 = arith.constant dense<0.000000e+00> : vector<2x16x8xf32>
    %584 = tpu.matmul %583, %567, %cst_170 {dimension_numbers = #tpu.dot_dimension_numbers<[2], [1], [1], [2], [0, 0, 0, 1, 1, 2], [0], [0]>} : vector<2x16x16xf32>, vector<2x16x8xf32>, vector<2x16x8xf32> -> vector<2x16x8xf32>
    "tpu.trace_stop"() : () -> ()
    %585 = vector.shape_cast %584 : vector<2x16x8xf32> to vector<32x8xf32>
    %586 = tpu.concatenate %513, %537, %561, %585 in 1 : vector<32x8xf32>, vector<32x8xf32>, vector<32x8xf32>, vector<32x8xf32> -> vector<32x32xf32>
    %cst_171 = arith.constant dense<0.000000e+00> : vector<32x32xf32>
    %587 = tpu.matmul %586, %476, %cst_171 {dimension_numbers = #tpu.dot_dimension_numbers<[1], [0], [0], [1], [0, 0, 1, 1], [], []>} : vector<32x32xf32>, vector<32x32xf32>, vector<32x32xf32> -> vector<32x32xf32>
    %588 = vector.broadcast %477 : vector<1x32xf32> to vector<32x32xf32>
    %589 = arith.addf %587, %588 : vector<32x32xf32>
    %590 = arith.addf %470, %589 : vector<32x32xf32>
    %591 = vector.extract_strided_slice %1 {offsets = [18, 0], sizes = [1, 32], strides = [1, 1]} : vector<29x32xf32> to vector<1x32xf32>
    %592 = vector.extract_strided_slice %1 {offsets = [19, 0], sizes = [1, 32], strides = [1, 1]} : vector<29x32xf32> to vector<1x32xf32>
    %cst_172 = arith.constant dense<0.000000e+00> : vector<32xf32>
    %593 = vector.multi_reduction <add>, %590, %cst_172 [1] : vector<32x32xf32> to vector<32xf32>
    %594 = vector.shape_cast %593 : vector<32xf32> to vector<32x1xf32>
    %cst_173 = arith.constant 3.200000e+01 : f32
    %595 = vector.broadcast %cst_173 : f32 to vector<32x1xf32>
    %596 = arith.divf %594, %595 : vector<32x1xf32>
    %597 = vector.broadcast %596 : vector<32x1xf32> to vector<32x32xf32>
    %598 = arith.subf %590, %597 : vector<32x32xf32>
    %599 = arith.mulf %598, %598 : vector<32x32xf32>
    %cst_174 = arith.constant dense<0.000000e+00> : vector<32xf32>
    %600 = vector.multi_reduction <add>, %599, %cst_174 [1] : vector<32x32xf32> to vector<32xf32>
    %601 = vector.shape_cast %600 : vector<32xf32> to vector<32x1xf32>
    %cst_175 = arith.constant 3.200000e+01 : f32
    %602 = vector.broadcast %cst_175 : f32 to vector<32x1xf32>
    %603 = arith.divf %601, %602 : vector<32x1xf32>
    %cst_176 = arith.constant 9.99999974E-6 : f32
    %604 = vector.broadcast %cst_176 : f32 to vector<32x1xf32>
    %605 = arith.addf %603, %604 : vector<32x1xf32>
    %606 = math.rsqrt %605 : vector<32x1xf32>
    %607 = vector.broadcast %606 : vector<32x1xf32> to vector<32x32xf32>
    %608 = arith.mulf %598, %607 : vector<32x32xf32>
    %609 = vector.broadcast %591 : vector<1x32xf32> to vector<32x32xf32>
    %610 = arith.mulf %608, %609 : vector<32x32xf32>
    %611 = vector.broadcast %592 : vector<1x32xf32> to vector<32x32xf32>
    %612 = arith.addf %610, %611 : vector<32x32xf32>
    %c3 = arith.constant 3 : index
    %c0_177 = arith.constant 0 : index
    %c0_178 = arith.constant 0 : index
    %613 = vector.load %arg6[%c3, %c0_177, %c0_178] : memref<4x32x96xf32, #tpu.memory_space<vmem>>, vector<1x32x96xf32>
    %614 = vector.shape_cast %613 : vector<1x32x96xf32> to vector<32x96xf32>
    %c3_179 = arith.constant 3 : index
    %c0_180 = arith.constant 0 : index
    %c0_181 = arith.constant 0 : index
    %615 = vector.load %arg7[%c3_179, %c0_180, %c0_181] : memref<4x1x96xf32, #tpu.memory_space<vmem>>, vector<1x1x96xf32>
    %616 = vector.shape_cast %615 : vector<1x1x96xf32> to vector<1x96xf32>
    %c3_182 = arith.constant 3 : index
    %c0_183 = arith.constant 0 : index
    %c0_184 = arith.constant 0 : index
    %617 = vector.load %arg8[%c3_182, %c0_183, %c0_184] : memref<4x32x32xf32, #tpu.memory_space<vmem>>, vector<1x32x32xf32>
    %618 = vector.shape_cast %617 : vector<1x32x32xf32> to vector<32x32xf32>
    %619 = vector.extract_strided_slice %1 {offsets = [20, 0], sizes = [1, 32], strides = [1, 1]} : vector<29x32xf32> to vector<1x32xf32>
    %620 = vector.extract_strided_slice %614 {offsets = [0, 0], sizes = [32, 32], strides = [1, 1]} : vector<32x96xf32> to vector<32x32xf32>
    %cst_185 = arith.constant dense<0.000000e+00> : vector<32x32xf32>
    %621 = tpu.matmul %612, %620, %cst_185 {dimension_numbers = #tpu.dot_dimension_numbers<[1], [0], [0], [1], [0, 0, 1, 1], [], []>} : vector<32x32xf32>, vector<32x32xf32>, vector<32x32xf32> -> vector<32x32xf32>
    %622 = vector.extract_strided_slice %616 {offsets = [0, 0], sizes = [1, 32], strides = [1, 1]} : vector<1x96xf32> to vector<1x32xf32>
    %623 = vector.broadcast %622 : vector<1x32xf32> to vector<32x32xf32>
    %624 = arith.addf %621, %623 : vector<32x32xf32>
    %625 = vector.extract_strided_slice %614 {offsets = [0, 32], sizes = [32, 64], strides = [1, 1]} : vector<32x96xf32> to vector<32x64xf32>
    %cst_186 = arith.constant dense<0.000000e+00> : vector<16x64xf32>
    %626 = tpu.matmul %452, %625, %cst_186 {dimension_numbers = #tpu.dot_dimension_numbers<[1], [0], [0], [1], [0, 0, 1, 1], [], []>} : vector<16x32xf32>, vector<32x64xf32>, vector<16x64xf32> -> vector<16x64xf32>
    %627 = vector.extract_strided_slice %616 {offsets = [0, 32], sizes = [1, 64], strides = [1, 1]} : vector<1x96xf32> to vector<1x64xf32>
    %628 = vector.broadcast %627 : vector<1x64xf32> to vector<16x64xf32>
    %629 = arith.addf %626, %628 : vector<16x64xf32>
    %630 = vector.extract_strided_slice %629 {offsets = [0, 0], sizes = [16, 32], strides = [1, 1]} : vector<16x64xf32> to vector<16x32xf32>
    %631 = vector.extract_strided_slice %629 {offsets = [0, 32], sizes = [16, 32], strides = [1, 1]} : vector<16x64xf32> to vector<16x32xf32>
    %632 = vector.extract_strided_slice %624 {offsets = [0, 0], sizes = [32, 8], strides = [1, 1]} : vector<32x32xf32> to vector<32x8xf32>
    %633 = vector.shape_cast %632 : vector<32x8xf32> to vector<2x16x8xf32>
    %634 = vector.extract_strided_slice %630 {offsets = [0, 0], sizes = [16, 8], strides = [1, 1]} : vector<16x32xf32> to vector<16x8xf32>
    %635 = vector.shape_cast %634 : vector<16x8xf32> to vector<2x8x8xf32>
    %636 = vector.extract_strided_slice %631 {offsets = [0, 0], sizes = [16, 8], strides = [1, 1]} : vector<16x32xf32> to vector<16x8xf32>
    %637 = vector.shape_cast %636 : vector<16x8xf32> to vector<2x8x8xf32>
    "tpu.trace_start"() <{level = 10 : i32, message = "bld,bmd->blm"}> : () -> ()
    %cst_187 = arith.constant dense<0.000000e+00> : vector<2x16x8xf32>
    %638 = tpu.matmul %633, %635, %cst_187 {dimension_numbers = #tpu.dot_dimension_numbers<[2], [2], [1], [1], [0, 0, 0, 1, 1, 1], [0], [0]>} : vector<2x16x8xf32>, vector<2x8x8xf32>, vector<2x16x8xf32> -> vector<2x16x8xf32>
    "tpu.trace_stop"() : () -> ()
    %cst_188 = arith.constant 0.353553385 : f32
    %639 = vector.broadcast %cst_188 : f32 to vector<2x16x8xf32>
    %640 = arith.mulf %638, %639 : vector<2x16x8xf32>
    %cst_189 = arith.constant dense<0xFF800000> : vector<2x16xf32>
    %641 = vector.multi_reduction <maximumf>, %640, %cst_189 [2] : vector<2x16x8xf32> to vector<2x16xf32>
    %642 = vector.shape_cast %641 : vector<2x16xf32> to vector<2x16x1xf32>
    %643 = vector.broadcast %642 : vector<2x16x1xf32> to vector<2x16x8xf32>
    %644 = arith.subf %640, %643 : vector<2x16x8xf32>
    %645 = math.exp %644 : vector<2x16x8xf32>
    %cst_190 = arith.constant dense<0.000000e+00> : vector<2x16xf32>
    %646 = vector.multi_reduction <add>, %645, %cst_190 [2] : vector<2x16x8xf32> to vector<2x16xf32>
    %647 = vector.shape_cast %646 : vector<2x16xf32> to vector<2x16x1xf32>
    %648 = vector.broadcast %647 : vector<2x16x1xf32> to vector<2x16x8xf32>
    %649 = arith.divf %645, %648 : vector<2x16x8xf32>
    "tpu.trace_start"() <{level = 10 : i32, message = "blm,bmd->bld"}> : () -> ()
    %cst_191 = arith.constant dense<0.000000e+00> : vector<2x16x8xf32>
    %650 = tpu.matmul %649, %637, %cst_191 {dimension_numbers = #tpu.dot_dimension_numbers<[2], [1], [1], [2], [0, 0, 0, 1, 1, 2], [0], [0]>} : vector<2x16x8xf32>, vector<2x8x8xf32>, vector<2x16x8xf32> -> vector<2x16x8xf32>
    "tpu.trace_stop"() : () -> ()
    %651 = vector.shape_cast %650 : vector<2x16x8xf32> to vector<32x8xf32>
    %652 = vector.extract_strided_slice %624 {offsets = [0, 8], sizes = [32, 8], strides = [1, 1]} : vector<32x32xf32> to vector<32x8xf32>
    %653 = vector.shape_cast %652 : vector<32x8xf32> to vector<2x16x8xf32>
    %654 = vector.extract_strided_slice %630 {offsets = [0, 8], sizes = [16, 8], strides = [1, 1]} : vector<16x32xf32> to vector<16x8xf32>
    %655 = vector.shape_cast %654 : vector<16x8xf32> to vector<2x8x8xf32>
    %656 = vector.extract_strided_slice %631 {offsets = [0, 8], sizes = [16, 8], strides = [1, 1]} : vector<16x32xf32> to vector<16x8xf32>
    %657 = vector.shape_cast %656 : vector<16x8xf32> to vector<2x8x8xf32>
    "tpu.trace_start"() <{level = 10 : i32, message = "bld,bmd->blm"}> : () -> ()
    %cst_192 = arith.constant dense<0.000000e+00> : vector<2x16x8xf32>
    %658 = tpu.matmul %653, %655, %cst_192 {dimension_numbers = #tpu.dot_dimension_numbers<[2], [2], [1], [1], [0, 0, 0, 1, 1, 1], [0], [0]>} : vector<2x16x8xf32>, vector<2x8x8xf32>, vector<2x16x8xf32> -> vector<2x16x8xf32>
    "tpu.trace_stop"() : () -> ()
    %cst_193 = arith.constant 0.353553385 : f32
    %659 = vector.broadcast %cst_193 : f32 to vector<2x16x8xf32>
    %660 = arith.mulf %658, %659 : vector<2x16x8xf32>
    %cst_194 = arith.constant dense<0xFF800000> : vector<2x16xf32>
    %661 = vector.multi_reduction <maximumf>, %660, %cst_194 [2] : vector<2x16x8xf32> to vector<2x16xf32>
    %662 = vector.shape_cast %661 : vector<2x16xf32> to vector<2x16x1xf32>
    %663 = vector.broadcast %662 : vector<2x16x1xf32> to vector<2x16x8xf32>
    %664 = arith.subf %660, %663 : vector<2x16x8xf32>
    %665 = math.exp %664 : vector<2x16x8xf32>
    %cst_195 = arith.constant dense<0.000000e+00> : vector<2x16xf32>
    %666 = vector.multi_reduction <add>, %665, %cst_195 [2] : vector<2x16x8xf32> to vector<2x16xf32>
    %667 = vector.shape_cast %666 : vector<2x16xf32> to vector<2x16x1xf32>
    %668 = vector.broadcast %667 : vector<2x16x1xf32> to vector<2x16x8xf32>
    %669 = arith.divf %665, %668 : vector<2x16x8xf32>
    "tpu.trace_start"() <{level = 10 : i32, message = "blm,bmd->bld"}> : () -> ()
    %cst_196 = arith.constant dense<0.000000e+00> : vector<2x16x8xf32>
    %670 = tpu.matmul %669, %657, %cst_196 {dimension_numbers = #tpu.dot_dimension_numbers<[2], [1], [1], [2], [0, 0, 0, 1, 1, 2], [0], [0]>} : vector<2x16x8xf32>, vector<2x8x8xf32>, vector<2x16x8xf32> -> vector<2x16x8xf32>
    "tpu.trace_stop"() : () -> ()
    %671 = vector.shape_cast %670 : vector<2x16x8xf32> to vector<32x8xf32>
    %672 = vector.extract_strided_slice %624 {offsets = [0, 16], sizes = [32, 8], strides = [1, 1]} : vector<32x32xf32> to vector<32x8xf32>
    %673 = vector.shape_cast %672 : vector<32x8xf32> to vector<2x16x8xf32>
    %674 = vector.extract_strided_slice %630 {offsets = [0, 16], sizes = [16, 8], strides = [1, 1]} : vector<16x32xf32> to vector<16x8xf32>
    %675 = vector.shape_cast %674 : vector<16x8xf32> to vector<2x8x8xf32>
    %676 = vector.extract_strided_slice %631 {offsets = [0, 16], sizes = [16, 8], strides = [1, 1]} : vector<16x32xf32> to vector<16x8xf32>
    %677 = vector.shape_cast %676 : vector<16x8xf32> to vector<2x8x8xf32>
    "tpu.trace_start"() <{level = 10 : i32, message = "bld,bmd->blm"}> : () -> ()
    %cst_197 = arith.constant dense<0.000000e+00> : vector<2x16x8xf32>
    %678 = tpu.matmul %673, %675, %cst_197 {dimension_numbers = #tpu.dot_dimension_numbers<[2], [2], [1], [1], [0, 0, 0, 1, 1, 1], [0], [0]>} : vector<2x16x8xf32>, vector<2x8x8xf32>, vector<2x16x8xf32> -> vector<2x16x8xf32>
    "tpu.trace_stop"() : () -> ()
    %cst_198 = arith.constant 0.353553385 : f32
    %679 = vector.broadcast %cst_198 : f32 to vector<2x16x8xf32>
    %680 = arith.mulf %678, %679 : vector<2x16x8xf32>
    %cst_199 = arith.constant dense<0xFF800000> : vector<2x16xf32>
    %681 = vector.multi_reduction <maximumf>, %680, %cst_199 [2] : vector<2x16x8xf32> to vector<2x16xf32>
    %682 = vector.shape_cast %681 : vector<2x16xf32> to vector<2x16x1xf32>
    %683 = vector.broadcast %682 : vector<2x16x1xf32> to vector<2x16x8xf32>
    %684 = arith.subf %680, %683 : vector<2x16x8xf32>
    %685 = math.exp %684 : vector<2x16x8xf32>
    %cst_200 = arith.constant dense<0.000000e+00> : vector<2x16xf32>
    %686 = vector.multi_reduction <add>, %685, %cst_200 [2] : vector<2x16x8xf32> to vector<2x16xf32>
    %687 = vector.shape_cast %686 : vector<2x16xf32> to vector<2x16x1xf32>
    %688 = vector.broadcast %687 : vector<2x16x1xf32> to vector<2x16x8xf32>
    %689 = arith.divf %685, %688 : vector<2x16x8xf32>
    "tpu.trace_start"() <{level = 10 : i32, message = "blm,bmd->bld"}> : () -> ()
    %cst_201 = arith.constant dense<0.000000e+00> : vector<2x16x8xf32>
    %690 = tpu.matmul %689, %677, %cst_201 {dimension_numbers = #tpu.dot_dimension_numbers<[2], [1], [1], [2], [0, 0, 0, 1, 1, 2], [0], [0]>} : vector<2x16x8xf32>, vector<2x8x8xf32>, vector<2x16x8xf32> -> vector<2x16x8xf32>
    "tpu.trace_stop"() : () -> ()
    %691 = vector.shape_cast %690 : vector<2x16x8xf32> to vector<32x8xf32>
    %692 = vector.extract_strided_slice %624 {offsets = [0, 24], sizes = [32, 8], strides = [1, 1]} : vector<32x32xf32> to vector<32x8xf32>
    %693 = vector.shape_cast %692 : vector<32x8xf32> to vector<2x16x8xf32>
    %694 = vector.extract_strided_slice %630 {offsets = [0, 24], sizes = [16, 8], strides = [1, 1]} : vector<16x32xf32> to vector<16x8xf32>
    %695 = vector.shape_cast %694 : vector<16x8xf32> to vector<2x8x8xf32>
    %696 = vector.extract_strided_slice %631 {offsets = [0, 24], sizes = [16, 8], strides = [1, 1]} : vector<16x32xf32> to vector<16x8xf32>
    %697 = vector.shape_cast %696 : vector<16x8xf32> to vector<2x8x8xf32>
    "tpu.trace_start"() <{level = 10 : i32, message = "bld,bmd->blm"}> : () -> ()
    %cst_202 = arith.constant dense<0.000000e+00> : vector<2x16x8xf32>
    %698 = tpu.matmul %693, %695, %cst_202 {dimension_numbers = #tpu.dot_dimension_numbers<[2], [2], [1], [1], [0, 0, 0, 1, 1, 1], [0], [0]>} : vector<2x16x8xf32>, vector<2x8x8xf32>, vector<2x16x8xf32> -> vector<2x16x8xf32>
    "tpu.trace_stop"() : () -> ()
    %cst_203 = arith.constant 0.353553385 : f32
    %699 = vector.broadcast %cst_203 : f32 to vector<2x16x8xf32>
    %700 = arith.mulf %698, %699 : vector<2x16x8xf32>
    %cst_204 = arith.constant dense<0xFF800000> : vector<2x16xf32>
    %701 = vector.multi_reduction <maximumf>, %700, %cst_204 [2] : vector<2x16x8xf32> to vector<2x16xf32>
    %702 = vector.shape_cast %701 : vector<2x16xf32> to vector<2x16x1xf32>
    %703 = vector.broadcast %702 : vector<2x16x1xf32> to vector<2x16x8xf32>
    %704 = arith.subf %700, %703 : vector<2x16x8xf32>
    %705 = math.exp %704 : vector<2x16x8xf32>
    %cst_205 = arith.constant dense<0.000000e+00> : vector<2x16xf32>
    %706 = vector.multi_reduction <add>, %705, %cst_205 [2] : vector<2x16x8xf32> to vector<2x16xf32>
    %707 = vector.shape_cast %706 : vector<2x16xf32> to vector<2x16x1xf32>
    %708 = vector.broadcast %707 : vector<2x16x1xf32> to vector<2x16x8xf32>
    %709 = arith.divf %705, %708 : vector<2x16x8xf32>
    "tpu.trace_start"() <{level = 10 : i32, message = "blm,bmd->bld"}> : () -> ()
    %cst_206 = arith.constant dense<0.000000e+00> : vector<2x16x8xf32>
    %710 = tpu.matmul %709, %697, %cst_206 {dimension_numbers = #tpu.dot_dimension_numbers<[2], [1], [1], [2], [0, 0, 0, 1, 1, 2], [0], [0]>} : vector<2x16x8xf32>, vector<2x8x8xf32>, vector<2x16x8xf32> -> vector<2x16x8xf32>
    "tpu.trace_stop"() : () -> ()
    %711 = vector.shape_cast %710 : vector<2x16x8xf32> to vector<32x8xf32>
    %712 = tpu.concatenate %651, %671, %691, %711 in 1 : vector<32x8xf32>, vector<32x8xf32>, vector<32x8xf32>, vector<32x8xf32> -> vector<32x32xf32>
    %cst_207 = arith.constant dense<0.000000e+00> : vector<32x32xf32>
    %713 = tpu.matmul %712, %618, %cst_207 {dimension_numbers = #tpu.dot_dimension_numbers<[1], [0], [0], [1], [0, 0, 1, 1], [], []>} : vector<32x32xf32>, vector<32x32xf32>, vector<32x32xf32> -> vector<32x32xf32>
    %714 = vector.broadcast %619 : vector<1x32xf32> to vector<32x32xf32>
    %715 = arith.addf %713, %714 : vector<32x32xf32>
    %716 = arith.addf %612, %715 : vector<32x32xf32>
    %717 = vector.extract_strided_slice %1 {offsets = [21, 0], sizes = [1, 32], strides = [1, 1]} : vector<29x32xf32> to vector<1x32xf32>
    %718 = vector.extract_strided_slice %1 {offsets = [22, 0], sizes = [1, 32], strides = [1, 1]} : vector<29x32xf32> to vector<1x32xf32>
    %cst_208 = arith.constant dense<0.000000e+00> : vector<32xf32>
    %719 = vector.multi_reduction <add>, %716, %cst_208 [1] : vector<32x32xf32> to vector<32xf32>
    %720 = vector.shape_cast %719 : vector<32xf32> to vector<32x1xf32>
    %cst_209 = arith.constant 3.200000e+01 : f32
    %721 = vector.broadcast %cst_209 : f32 to vector<32x1xf32>
    %722 = arith.divf %720, %721 : vector<32x1xf32>
    %723 = vector.broadcast %722 : vector<32x1xf32> to vector<32x32xf32>
    %724 = arith.subf %716, %723 : vector<32x32xf32>
    %725 = arith.mulf %724, %724 : vector<32x32xf32>
    %cst_210 = arith.constant dense<0.000000e+00> : vector<32xf32>
    %726 = vector.multi_reduction <add>, %725, %cst_210 [1] : vector<32x32xf32> to vector<32xf32>
    %727 = vector.shape_cast %726 : vector<32xf32> to vector<32x1xf32>
    %cst_211 = arith.constant 3.200000e+01 : f32
    %728 = vector.broadcast %cst_211 : f32 to vector<32x1xf32>
    %729 = arith.divf %727, %728 : vector<32x1xf32>
    %cst_212 = arith.constant 9.99999974E-6 : f32
    %730 = vector.broadcast %cst_212 : f32 to vector<32x1xf32>
    %731 = arith.addf %729, %730 : vector<32x1xf32>
    %732 = math.rsqrt %731 : vector<32x1xf32>
    %733 = vector.broadcast %732 : vector<32x1xf32> to vector<32x32xf32>
    %734 = arith.mulf %724, %733 : vector<32x32xf32>
    %735 = vector.broadcast %717 : vector<1x32xf32> to vector<32x32xf32>
    %736 = arith.mulf %734, %735 : vector<32x32xf32>
    %737 = vector.broadcast %718 : vector<1x32xf32> to vector<32x32xf32>
    %738 = arith.addf %736, %737 : vector<32x32xf32>
    %c2_213 = arith.constant 2 : index
    %c0_214 = arith.constant 0 : index
    %c0_215 = arith.constant 0 : index
    %739 = vector.load %arg9[%c2_213, %c0_214, %c0_215] : memref<3x32x32xf32, #tpu.memory_space<vmem>>, vector<1x32x32xf32>
    %740 = vector.shape_cast %739 : vector<1x32x32xf32> to vector<32x32xf32>
    %cst_216 = arith.constant dense<0.000000e+00> : vector<32x32xf32>
    %741 = tpu.matmul %738, %740, %cst_216 {dimension_numbers = #tpu.dot_dimension_numbers<[1], [0], [0], [1], [0, 0, 1, 1], [], []>} : vector<32x32xf32>, vector<32x32xf32>, vector<32x32xf32> -> vector<32x32xf32>
    %742 = vector.extract_strided_slice %1 {offsets = [23, 0], sizes = [1, 32], strides = [1, 1]} : vector<29x32xf32> to vector<1x32xf32>
    %743 = vector.broadcast %742 : vector<1x32xf32> to vector<32x32xf32>
    %744 = arith.addf %741, %743 : vector<32x32xf32>
    %cst_217 = arith.constant 5.000000e-01 : f32
    %745 = vector.broadcast %cst_217 : f32 to vector<32x32xf32>
    %746 = arith.mulf %745, %744 : vector<32x32xf32>
    %cst_218 = arith.constant 4.471500e-02 : f32
    %747 = vector.broadcast %cst_218 : f32 to vector<32x32xf32>
    %748 = arith.mulf %747, %744 : vector<32x32xf32>
    %749 = arith.mulf %748, %744 : vector<32x32xf32>
    %750 = arith.mulf %749, %744 : vector<32x32xf32>
    %751 = arith.addf %744, %750 : vector<32x32xf32>
    %cst_219 = arith.constant 0.797884583 : f32
    %752 = vector.broadcast %cst_219 : f32 to vector<32x32xf32>
    %753 = arith.mulf %752, %751 : vector<32x32xf32>
    %754 = math.tanh %753 : vector<32x32xf32>
    %cst_220 = arith.constant 1.000000e+00 : f32
    %755 = vector.broadcast %cst_220 : f32 to vector<32x32xf32>
    %756 = arith.addf %755, %754 : vector<32x32xf32>
    %757 = arith.mulf %746, %756 : vector<32x32xf32>
    %c2_221 = arith.constant 2 : index
    %c0_222 = arith.constant 0 : index
    %c0_223 = arith.constant 0 : index
    %758 = vector.load %arg10[%c2_221, %c0_222, %c0_223] : memref<3x32x32xf32, #tpu.memory_space<vmem>>, vector<1x32x32xf32>
    %759 = vector.shape_cast %758 : vector<1x32x32xf32> to vector<32x32xf32>
    %cst_224 = arith.constant dense<0.000000e+00> : vector<32x32xf32>
    %760 = tpu.matmul %757, %759, %cst_224 {dimension_numbers = #tpu.dot_dimension_numbers<[1], [0], [0], [1], [0, 0, 1, 1], [], []>} : vector<32x32xf32>, vector<32x32xf32>, vector<32x32xf32> -> vector<32x32xf32>
    %761 = vector.extract_strided_slice %1 {offsets = [24, 0], sizes = [1, 32], strides = [1, 1]} : vector<29x32xf32> to vector<1x32xf32>
    %762 = vector.broadcast %761 : vector<1x32xf32> to vector<32x32xf32>
    %763 = arith.addf %760, %762 : vector<32x32xf32>
    %764 = arith.addf %738, %763 : vector<32x32xf32>
    %765 = vector.extract_strided_slice %1 {offsets = [25, 0], sizes = [1, 32], strides = [1, 1]} : vector<29x32xf32> to vector<1x32xf32>
    %766 = vector.extract_strided_slice %1 {offsets = [26, 0], sizes = [1, 32], strides = [1, 1]} : vector<29x32xf32> to vector<1x32xf32>
    %cst_225 = arith.constant dense<0.000000e+00> : vector<32xf32>
    %767 = vector.multi_reduction <add>, %764, %cst_225 [1] : vector<32x32xf32> to vector<32xf32>
    %768 = vector.shape_cast %767 : vector<32xf32> to vector<32x1xf32>
    %cst_226 = arith.constant 3.200000e+01 : f32
    %769 = vector.broadcast %cst_226 : f32 to vector<32x1xf32>
    %770 = arith.divf %768, %769 : vector<32x1xf32>
    %771 = vector.broadcast %770 : vector<32x1xf32> to vector<32x32xf32>
    %772 = arith.subf %764, %771 : vector<32x32xf32>
    %773 = arith.mulf %772, %772 : vector<32x32xf32>
    %cst_227 = arith.constant dense<0.000000e+00> : vector<32xf32>
    %774 = vector.multi_reduction <add>, %773, %cst_227 [1] : vector<32x32xf32> to vector<32xf32>
    %775 = vector.shape_cast %774 : vector<32xf32> to vector<32x1xf32>
    %cst_228 = arith.constant 3.200000e+01 : f32
    %776 = vector.broadcast %cst_228 : f32 to vector<32x1xf32>
    %777 = arith.divf %775, %776 : vector<32x1xf32>
    %cst_229 = arith.constant 9.99999974E-6 : f32
    %778 = vector.broadcast %cst_229 : f32 to vector<32x1xf32>
    %779 = arith.addf %777, %778 : vector<32x1xf32>
    %780 = math.rsqrt %779 : vector<32x1xf32>
    %781 = vector.broadcast %780 : vector<32x1xf32> to vector<32x32xf32>
    %782 = arith.mulf %772, %781 : vector<32x32xf32>
    %783 = vector.broadcast %765 : vector<1x32xf32> to vector<32x32xf32>
    %784 = arith.mulf %782, %783 : vector<32x32xf32>
    %785 = vector.broadcast %766 : vector<1x32xf32> to vector<32x32xf32>
    %786 = arith.addf %784, %785 : vector<32x32xf32>
    %787 = vector.extract_strided_slice %1 {offsets = [27, 0], sizes = [1, 32], strides = [1, 1]} : vector<29x32xf32> to vector<1x32xf32>
    %788 = vector.extract_strided_slice %1 {offsets = [28, 0], sizes = [1, 32], strides = [1, 1]} : vector<29x32xf32> to vector<1x32xf32>
    %cst_230 = arith.constant dense<0.000000e+00> : vector<32xf32>
    %789 = vector.multi_reduction <add>, %786, %cst_230 [1] : vector<32x32xf32> to vector<32xf32>
    %790 = vector.shape_cast %789 : vector<32xf32> to vector<32x1xf32>
    %cst_231 = arith.constant 3.200000e+01 : f32
    %791 = vector.broadcast %cst_231 : f32 to vector<32x1xf32>
    %792 = arith.divf %790, %791 : vector<32x1xf32>
    %793 = vector.broadcast %792 : vector<32x1xf32> to vector<32x32xf32>
    %794 = arith.subf %786, %793 : vector<32x32xf32>
    %795 = arith.mulf %794, %794 : vector<32x32xf32>
    %cst_232 = arith.constant dense<0.000000e+00> : vector<32xf32>
    %796 = vector.multi_reduction <add>, %795, %cst_232 [1] : vector<32x32xf32> to vector<32xf32>
    %797 = vector.shape_cast %796 : vector<32xf32> to vector<32x1xf32>
    %cst_233 = arith.constant 3.200000e+01 : f32
    %798 = vector.broadcast %cst_233 : f32 to vector<32x1xf32>
    %799 = arith.divf %797, %798 : vector<32x1xf32>
    %cst_234 = arith.constant 9.99999974E-6 : f32
    %800 = vector.broadcast %cst_234 : f32 to vector<32x1xf32>
    %801 = arith.addf %799, %800 : vector<32x1xf32>
    %802 = math.rsqrt %801 : vector<32x1xf32>
    %803 = vector.broadcast %802 : vector<32x1xf32> to vector<32x32xf32>
    %804 = arith.mulf %794, %803 : vector<32x32xf32>
    %805 = vector.broadcast %787 : vector<1x32xf32> to vector<32x32xf32>
    %806 = arith.mulf %804, %805 : vector<32x32xf32>
    %807 = vector.broadcast %788 : vector<1x32xf32> to vector<32x32xf32>
    %808 = arith.addf %806, %807 : vector<32x32xf32>
    %c0_235 = arith.constant 0 : index
    %c0_236 = arith.constant 0 : index
    %809 = vector.load %arg13[%c0_235, %c0_236] : memref<4x32xf32, #tpu.memory_space<vmem>>, vector<4x32xf32>
    %c0_237 = arith.constant 0 : index
    %c0_238 = arith.constant 0 : index
    %810 = vector.load %arg14[%c0_237, %c0_238] : memref<4x1xf32, #tpu.memory_space<vmem>>, vector<4x1xf32>
    %811 = vector.extract_strided_slice %808 {offsets = [8, 0], sizes = [8, 32], strides = [1, 1]} : vector<32x32xf32> to vector<8x32xf32>
    "tpu.trace_start"() <{level = 10 : i32, message = "cd,pd->cp"}> : () -> ()
    %cst_239 = arith.constant dense<0.000000e+00> : vector<4x8xf32>
    %812 = tpu.matmul %809, %811, %cst_239 {dimension_numbers = #tpu.dot_dimension_numbers<[1], [1], [0], [0], [0, 0, 1, 0], [], []>} : vector<4x32xf32>, vector<8x32xf32>, vector<4x8xf32> -> vector<4x8xf32>
    "tpu.trace_stop"() : () -> ()
    %813 = vector.broadcast %810 : vector<4x1xf32> to vector<4x8xf32>
    %814 = arith.addf %812, %813 : vector<4x8xf32>
    %815 = vector.extract_strided_slice %808 {offsets = [24, 0], sizes = [8, 32], strides = [1, 1]} : vector<32x32xf32> to vector<8x32xf32>
    "tpu.trace_start"() <{level = 10 : i32, message = "cd,pd->cp"}> : () -> ()
    %cst_240 = arith.constant dense<0.000000e+00> : vector<4x8xf32>
    %816 = tpu.matmul %809, %815, %cst_240 {dimension_numbers = #tpu.dot_dimension_numbers<[1], [1], [0], [0], [0, 0, 1, 0], [], []>} : vector<4x32xf32>, vector<8x32xf32>, vector<4x8xf32> -> vector<4x8xf32>
    "tpu.trace_stop"() : () -> ()
    %817 = vector.broadcast %810 : vector<4x1xf32> to vector<4x8xf32>
    %818 = arith.addf %816, %817 : vector<4x8xf32>
    %819 = tpu.concatenate %814, %818 in 0 : vector<4x8xf32>, vector<4x8xf32> -> vector<8x8xf32>
    %c0_241 = arith.constant 0 : index
    %c0_242 = arith.constant 0 : index
    %820 = vector.load %arg24[%c0_241, %c0_242] : memref<8x8xf32, #tpu.memory_space<vmem>>, vector<8x8xf32>
    tpu.vector_store %arg24[%c0_241, %c0_242], %819 {strides = array<i32>} : memref<8x8xf32, #tpu.memory_space<vmem>>, vector<8x8xf32>,
    %c0_243 = arith.constant 0 : index
    %c0_244 = arith.constant 0 : index
    %821 = vector.load %arg15[%c0_243, %c0_244] : memref<8x48xf32, #tpu.memory_space<vmem>>, vector<8x48xf32>
    %cst_245 = arith.constant dense<0.000000e+00> : vector<8x48xf32>
    %822 = tpu.matmul %819, %821, %cst_245 {dimension_numbers = #tpu.dot_dimension_numbers<[1], [0], [0], [1], [0, 0, 1, 1], [], []>} : vector<8x8xf32>, vector<8x48xf32>, vector<8x48xf32> -> vector<8x48xf32>
    %c0_246 = arith.constant 0 : index
    %c0_247 = arith.constant 0 : index
    %823 = vector.load %arg16[%c0_246, %c0_247] : memref<1x48xf32, #tpu.memory_space<vmem>>, vector<1x48xf32>
    %824 = vector.broadcast %823 : vector<1x48xf32> to vector<8x48xf32>
    %825 = arith.addf %822, %824 : vector<8x48xf32>
    %c0_248 = arith.constant 0 : index
    %c0_249 = arith.constant 0 : index
    %826 = vector.load %arg21[%c0_248, %c0_249] : memref<8x48xf32, #tpu.memory_space<vmem>>, vector<8x48xf32>
    tpu.vector_store %arg21[%c0_248, %c0_249], %825 {strides = array<i32>} : memref<8x48xf32, #tpu.memory_space<vmem>>, vector<8x48xf32>,
    %827 = vector.extract_strided_slice %825 {offsets = [0, 0], sizes = [8, 16], strides = [1, 1]} : vector<8x48xf32> to vector<8x16xf32>
    %828 = vector.extract_strided_slice %825 {offsets = [0, 16], sizes = [8, 16], strides = [1, 1]} : vector<8x48xf32> to vector<8x16xf32>
    %c0_250 = arith.constant 0 : index
    %c0_251 = arith.constant 0 : index
    %829 = vector.load %arg17[%c0_250, %c0_251] : memref<16x64xf32, #tpu.memory_space<vmem>>, vector<16x64xf32>
    %cst_252 = arith.constant dense<0.000000e+00> : vector<8x64xf32>
    %830 = tpu.matmul %827, %829, %cst_252 {dimension_numbers = #tpu.dot_dimension_numbers<[1], [0], [0], [1], [0, 0, 1, 1], [], []>} : vector<8x16xf32>, vector<16x64xf32>, vector<8x64xf32> -> vector<8x64xf32>
    %c0_253 = arith.constant 0 : index
    %c0_254 = arith.constant 0 : index
    %831 = vector.load %arg18[%c0_253, %c0_254] : memref<1x64xf32, #tpu.memory_space<vmem>>, vector<1x64xf32>
    %832 = vector.broadcast %831 : vector<1x64xf32> to vector<8x64xf32>
    %833 = arith.addf %830, %832 : vector<8x64xf32>
    %c0_255 = arith.constant 0 : index
    %c0_256 = arith.constant 0 : index
    %834 = vector.load %arg22[%c0_255, %c0_256] : memref<8x64xf32, #tpu.memory_space<vmem>>, vector<8x64xf32>
    tpu.vector_store %arg22[%c0_255, %c0_256], %833 {strides = array<i32>} : memref<8x64xf32, #tpu.memory_space<vmem>>, vector<8x64xf32>,
    %c0_257 = arith.constant 0 : index
    %c0_258 = arith.constant 0 : index
    %835 = vector.load %arg19[%c0_257, %c0_258] : memref<16x128xf32, #tpu.memory_space<vmem>>, vector<16x128xf32>
    %cst_259 = arith.constant dense<0.000000e+00> : vector<8x128xf32>
    %836 = tpu.matmul %828, %835, %cst_259 {dimension_numbers = #tpu.dot_dimension_numbers<[1], [0], [0], [1], [0, 0, 1, 1], [], []>} : vector<8x16xf32>, vector<16x128xf32>, vector<8x128xf32> -> vector<8x128xf32>
    %c0_260 = arith.constant 0 : index
    %c0_261 = arith.constant 0 : index
    %837 = vector.load %arg20[%c0_260, %c0_261] : memref<1x128xf32, #tpu.memory_space<vmem>>, vector<1x128xf32>
    %838 = vector.broadcast %837 : vector<1x128xf32> to vector<8x128xf32>
    %839 = arith.addf %836, %838 : vector<8x128xf32>
    %c0_262 = arith.constant 0 : index
    %c0_263 = arith.constant 0 : index
    %840 = vector.load %arg23[%c0_262, %c0_263] : memref<8x128xf32, #tpu.memory_space<vmem>>, vector<8x128xf32>
    tpu.vector_store %arg23[%c0_262, %c0_263], %839 {strides = array<i32>} : memref<8x128xf32, #tpu.memory_space<vmem>>, vector<8x128xf32>,
    return
  }
}

module attributes {stable_mosaic.version = 11 : i64} {
  func.func @_head_mix_kernel(%arg0: memref<2x4x16xf32, #tpu.memory_space<vmem>>, %arg1: memref<2x16x4xf32, #tpu.memory_space<vmem>>, %arg2: memref<2x4x16xf32, #tpu.memory_space<vmem>>, %arg3: memref<8x8xf32, #tpu.memory_space<vmem>>, %arg4: memref<16x8xf32, #tpu.memory_space<vmem>>, %arg5: memref<1x8xf32, #tpu.memory_space<vmem>>, %arg6: memref<8x8xf32, #tpu.memory_space<vmem>>, %arg7: memref<1x8xf32, #tpu.memory_space<vmem>>, %arg8: memref<8x8xf32, #tpu.memory_space<vmem>>) attributes {dimension_semantics = [], scalar_prefetch = 0 : i64, scratch_operands = 0 : i64, tpu.core_type = #tpu.core_type<tc>} {
    %c0 = arith.constant 0 : index
    %c0_0 = arith.constant 0 : index
    %c0_1 = arith.constant 0 : index
    %0 = vector.load %arg0[%c0, %c0_0, %c0_1] : memref<2x4x16xf32, #tpu.memory_space<vmem>>, vector<2x4x16xf32>
    %c0_2 = arith.constant 0 : index
    %c0_3 = arith.constant 0 : index
    %c0_4 = arith.constant 0 : index
    %1 = vector.load %arg1[%c0_2, %c0_3, %c0_4] : memref<2x16x4xf32, #tpu.memory_space<vmem>>, vector<2x16x4xf32>
    %c0_5 = arith.constant 0 : index
    %c0_6 = arith.constant 0 : index
    %c0_7 = arith.constant 0 : index
    %2 = vector.load %arg2[%c0_5, %c0_6, %c0_7] : memref<2x4x16xf32, #tpu.memory_space<vmem>>, vector<2x4x16xf32>
    "tpu.trace_start"() <{level = 10 : i32, message = "bkd,bdm->bkm"}> : () -> ()
    %cst = arith.constant dense<0.000000e+00> : vector<2x4x4xf32>
    %3 = tpu.matmul %0, %1, %cst {dimension_numbers = #tpu.dot_dimension_numbers<[2], [1], [1], [2], [0, 0, 0, 1, 1, 2], [0], [0]>} : vector<2x4x16xf32>, vector<2x16x4xf32>, vector<2x4x4xf32> -> vector<2x4x4xf32>
    "tpu.trace_stop"() : () -> ()
    %cst_8 = arith.constant dense<0xFF800000> : vector<2x4xf32>
    %4 = vector.multi_reduction <maximumf>, %3, %cst_8 [2] : vector<2x4x4xf32> to vector<2x4xf32>
    %5 = vector.shape_cast %4 : vector<2x4xf32> to vector<2x4x1xf32>
    %6 = vector.broadcast %5 : vector<2x4x1xf32> to vector<2x4x4xf32>
    %7 = arith.subf %3, %6 : vector<2x4x4xf32>
    %8 = math.exp %7 : vector<2x4x4xf32>
    %cst_9 = arith.constant dense<0.000000e+00> : vector<2x4xf32>
    %9 = vector.multi_reduction <add>, %8, %cst_9 [2] : vector<2x4x4xf32> to vector<2x4xf32>
    %10 = vector.shape_cast %9 : vector<2x4xf32> to vector<2x4x1xf32>
    %11 = vector.broadcast %10 : vector<2x4x1xf32> to vector<2x4x4xf32>
    %12 = arith.divf %8, %11 : vector<2x4x4xf32>
    "tpu.trace_start"() <{level = 10 : i32, message = "bkm,bmd->bkd"}> : () -> ()
    %cst_10 = arith.constant dense<0.000000e+00> : vector<2x4x16xf32>
    %13 = tpu.matmul %12, %2, %cst_10 {dimension_numbers = #tpu.dot_dimension_numbers<[2], [1], [1], [2], [0, 0, 0, 1, 1, 2], [0], [0]>} : vector<2x4x4xf32>, vector<2x4x16xf32>, vector<2x4x16xf32> -> vector<2x4x16xf32>
    "tpu.trace_stop"() : () -> ()
    %14 = vector.shape_cast %13 : vector<2x4x16xf32> to vector<8x16xf32>
    %c0_11 = arith.constant 0 : index
    %c0_12 = arith.constant 0 : index
    %15 = vector.load %arg4[%c0_11, %c0_12] : memref<16x8xf32, #tpu.memory_space<vmem>>, vector<16x8xf32>
    %cst_13 = arith.constant dense<0.000000e+00> : vector<8x8xf32>
    %16 = tpu.matmul %14, %15, %cst_13 {dimension_numbers = #tpu.dot_dimension_numbers<[1], [0], [0], [1], [0, 0, 1, 1], [], []>} : vector<8x16xf32>, vector<16x8xf32>, vector<8x8xf32> -> vector<8x8xf32>
    %c0_14 = arith.constant 0 : index
    %c0_15 = arith.constant 0 : index
    %17 = vector.load %arg5[%c0_14, %c0_15] : memref<1x8xf32, #tpu.memory_space<vmem>>, vector<1x8xf32>
    %18 = vector.broadcast %17 : vector<1x8xf32> to vector<8x8xf32>
    %19 = arith.addf %16, %18 : vector<8x8xf32>
    %c0_16 = arith.constant 0 : index
    %c0_17 = arith.constant 0 : index
    %20 = vector.load %arg3[%c0_16, %c0_17] : memref<8x8xf32, #tpu.memory_space<vmem>>, vector<8x8xf32>
    %21 = arith.addf %19, %20 : vector<8x8xf32>
    %c0_18 = arith.constant 0 : index
    %c0_19 = arith.constant 0 : index
    %22 = vector.load %arg6[%c0_18, %c0_19] : memref<8x8xf32, #tpu.memory_space<vmem>>, vector<8x8xf32>
    %cst_20 = arith.constant dense<0.000000e+00> : vector<8x8xf32>
    %23 = tpu.matmul %21, %22, %cst_20 {dimension_numbers = #tpu.dot_dimension_numbers<[1], [0], [0], [1], [0, 0, 1, 1], [], []>} : vector<8x8xf32>, vector<8x8xf32>, vector<8x8xf32> -> vector<8x8xf32>
    %c0_21 = arith.constant 0 : index
    %c0_22 = arith.constant 0 : index
    %24 = vector.load %arg7[%c0_21, %c0_22] : memref<1x8xf32, #tpu.memory_space<vmem>>, vector<1x8xf32>
    %25 = vector.broadcast %24 : vector<1x8xf32> to vector<8x8xf32>
    %26 = arith.addf %23, %25 : vector<8x8xf32>
    %c0_23 = arith.constant 0 : index
    %c0_24 = arith.constant 0 : index
    %27 = vector.load %arg8[%c0_23, %c0_24] : memref<8x8xf32, #tpu.memory_space<vmem>>, vector<8x8xf32>
    tpu.vector_store %arg8[%c0_23, %c0_24], %26 {strides = array<i32>} : memref<8x8xf32, #tpu.memory_space<vmem>>, vector<8x8xf32>,
    return
  }
}

</mosaic_0001>

<bundles_post_ra>
// kernel: model_forward.3
= control target key start
LH: loop header
LB: loop body
LE: loop exit
PB: predicated region body
PF: predicated region fallthrough
CT: control target
= control target key end

     0   :  { %v651_v2 = vmov 0.0|0.0   ;;  %vm652_vm0 = vmmov 0   ;;  %v653_v4 = vmov 0.0   ;;  %s767_s0 = inlined_call_operand.vmem [shape: f32[2,4,16], index: 0, kind: input, shape index: {}]   ;;  %s768_s1 = inlined_call_operand.vmem [shape: f32[2,16,4], index: 1, kind: input, shape index: {}]   ;;  %s769_s2 = inlined_call_operand.vmem [shape: f32[2,4,16], index: 2, kind: input, shape index: {}]   ;;  %s770_s3 = inlined_call_operand.vmem [shape: f32[8,8], index: 3, kind: input, shape index: {}]   ;;  %s771_s4 = inlined_call_operand.vmem [shape: f32[16,8], index: 4, kind: input, shape index: {}]   ;;  %s772_s5 = inlined_call_operand.vmem [shape: f32[1,8], index: 5, kind: input, shape index: {}]   ;;  %s773_s6 = inlined_call_operand.vmem [shape: f32[8,8], index: 6, kind: input, shape index: {}]   ;;  %s774_s7 = inlined_call_operand.vmem [shape: f32[1,8], index: 7, kind: input, shape index: {}]   ;;  %s775_s8 = inlined_call_operand.hbm [shape: f32[8,8], index: 8, kind: output, shape index: {}]  }
   0x1   :  { %v32_v0 = vld [vmem:[%s768_s1] sm:$0xff]  ;;  %v33_v1 = vld [vmem:[%s768_s1 + $0x8] sm:$0xff]  ;;  %606 = vmatprep.subr.bf16.mxu0 %v651_v2  ;;  %574 = vmatprep.mubr.msk.f32.mxu0 %vm652_vm0, %v653_v4  ;;  %v34_v5 = vld [vmem:[%s768_s1 + $0x10] sm:$0xff] }
   0x2   :  { %v607_v3 = vpack.c.bf16 %v33_v1, %v32_v0  ;;  %v35_v6 = vld [vmem:[%s768_s1 + $0x18] sm:$0xff]  ;;  %609 = vmatprep.subr.bf16.mxu1 %v651_v2  ;;  %581 = vmatprep.mubr.msk.f32.mxu1 %vm652_vm0, %v653_v4 }
   0x3   :  { %v610_v7 = vpack.c.bf16 %v35_v6, %v34_v5 }
   0x4   :  { %13 = vsyncpa [#allocation3], 0  ;;  %608 = vmatpush3.bf16.msra.mxu0 %v607_v3  ;;  %v30_v8 = vld [vmem:[%s767_s0] sm:$0xf]  ;;  %vm38_vm1 = vcmask 130048   ;;  %vm185_vm2 = vcmask 27648  }
   0x5   :  { %611 = vmatpush3.bf16.msra.mxu1 %v610_v7  ;;  %v31_v9 = vld [vmem:[%s767_s0 + $0x4] sm:$0xf]  ;;  %584 = vmatprep.subr.mxu0 %v653_v4  ;;  %v36_v26 = vld [vmem:[%s769_s2] sm:$0xf]  ;;  %vm212_vm3 = vcmask 1043456   ;;  %vm208_vm4 = vcmask 31744  }
   0x6   :  { %589 = vmatprep.subr.mxu1 %v653_v4  ;;  %v37_v27 = vld [vmem:[%s769_s2 + $0x4] sm:$0xf]  ;;  %v363_v35 = vld [vmem:[%s771_s4 + $0x8] sm:$0xff]  ;;  %v551_v43 = vld [vmem:[%s772_s5] ss:$0 sm:$0xff]  ;;  %vm456_vm5 = vcmask 64512  }
   0x7   :  { %575 = vmatmul.mubr.msk.f32.vlgmr.msra.gmra.mrb[0].mxu0 %vm38_vm1, %v30_v8  ;;  %v362_v34 = vld [vmem:[%s771_s4] sm:$0xff] }
   0x8   :  { %582 = vmatmul.mubr.msk.f32.vlgmr.msra.gmra.mrb[0].mxu1 %vm38_vm1, %v31_v9  ;;  %586 = vmatprep.mubr.msk.f32.mxu0 %vm652_vm0, %v653_v4  ;;  %v613_v36 = vpack.c.bf16 %v363_v35, %v362_v34  ;;  %v448_v42 = vld [vmem:[%s773_s6] sm:$0xff]  ;;  %s654_s6 = smov [#allocation2]  }
   0x9   :  { %591 = vmatprep.mubr.msk.f32.mxu1 %vm652_vm0, %v653_v4  ;;  %585 = vmatpush3.msk.msra.mxu0 %vm212_vm3, %v36_v26  ;;  %v446_v45 = vld [vmem:[%s770_s3] sm:$0xff]  ;;  %s537_s29 = sshll.u32 %s654_s6, 4  ;;  %s538_s29 = int_to_ptr.vmem [resolvable:$true] %s537_s29 }
   0xa   :  { %612 = vmatprep.subr.bf16.mxu0 %v651_v2  ;;  %590 = vmatpush3.msk.msra.mxu1 %vm212_vm3, %v37_v27  ;;  %v553_v49 = vld [vmem:[%s774_s7] ss:$0 sm:$0xff]  ;;  %s627_s5 = scalar_lea.vmem %s538_s29, 128  ;;  %p632_p1 = scmp.lt.s32.totalorder %s538_s29, %s538_s29 }
   0xb   :  { %601 = vmatprep.subr.mxu1 %v653_v4  ;;  %p628_p0 = scmp.ne.s32.totalorder %s538_s29, %s627_s5  ;;  %p633_p2 = scmp.lt.s32.totalorder %s627_s5, %s627_s5 }
   0xd   :  { %p634_p3 = por %p633_p2, %p632_p1 }
   0xf   :  { %p635_p4 = pnand %p634_p3, %p628_p0 }
  0xda   :  { %v108_v10 = vpop.f32.mrb[0].mxu0 }
  0xdb   :  { %v576_v11 = vpop.f32.mrb[1].mxu0  ;;  %v186_v12 = vsel %vm185_vm2, %v108_v10, -inf  ;;  %v181_v13 = vpop.f32.mrb[0].mxu1 }
  0xdc   :  { %187 = vmax.xlane.f32.xlu0 %v186_v12  ;;  %v583_v14 = vpop.f32.mrb[1].mxu1  ;;  %v189_v15 = vsel %vm185_vm2, %v181_v13, -inf }
  0xe0   :  { %190 = vmax.xlane.f32.xlu0 %v189_v15 }
 0x169   :  { %v188_v16 = vpop.xlane.xlu0 %187 }
 0x16a   :  { %v192_v17 = vsub.f32 %v108_v10, %v188_v16 }
 0x16c   :  { %v194_v18 = vmul.f32 1.442695, %v192_v17 }
 0x16d   :  { %v191_v19 = vpop.xlane.xlu0 %190 }
 0x16e   :  { %619 = vpow2.f32 %v194_v18  ;;  %v193_v20 = vsub.f32 %v181_v13, %v191_v19 }
 0x170   :  { %v196_v21 = vmul.f32 1.442695, %v193_v20 }
 0x172   :  { %621 = vpow2.f32 %v196_v21 }
 0x178   :  { %v620_v22 = vpop.eup %619 }
 0x179   :  { %v198_v23 = vsel %vm185_vm2, %v620_v22, 0.0 }
 0x17a   :  { %199 = vadd.xlane.f32.xlu1 %v198_v23 }
 0x17c   :  { %v622_v24 = vpop.eup %621 }
 0x17d   :  { %v201_v25 = vsel %vm185_vm2, %v622_v24, 0.0 }
 0x17e   :  { %202 = vadd.xlane.f32.xlu1 %v201_v25 }
 0x207   :  { %v200_v28 = vpop.xlane.xlu1 %199 }
 0x208   :  { %623 = vrcp.f32 %v200_v28 }
 0x20b   :  { %v203_v29 = vpop.xlane.xlu1 %202 }
 0x20c   :  { %625 = vrcp.f32 %v203_v29 }
 0x212   :  { %v624_v30 = vpop.eup %623 }
 0x213   :  { %v205_v31 = vmul.f32 %v624_v30, %v620_v22 }
 0x215   :  { %587 = vmatmul.mubr.msk.f32.vlgmr.msra.gmra.mrb[2].mxu0 %vm208_vm4, %v205_v31 }
 0x216   :  { %v626_v32 = vpop.eup %625  ;;  %598 = vmatprep.mubr.msk.f32.mxu0 %vm652_vm0, %v653_v4  ;;  %614 = vmatpush3.bf16.msra.mxu0 %v613_v36 }
 0x217   :  { %v207_v33 = vmul.f32 %v626_v32, %v622_v24 }
 0x219   :  { %592 = vmatmul.mubr.msk.f32.vlgmr.msra.gmra.mrb[2].mxu1 %vm208_vm4, %v207_v33 }
 0x21a   :  { %603 = vmatprep.mubr.msk.f32.mxu1 %vm652_vm0, %v653_v4  ;;  %602 = vmatpush3.msra.mxu1 %v448_v42 }
 0x2e8   :  { %v282_v37 = vpop.f32.mrb[2].mxu0 }
 0x2e9   :  { %v588_v38 = vpop.f32.mrb[3].mxu0 }
 0x2ec   :  { %v358_v39 = vpop.f32.mrb[2].mxu1 }
 0x2ed   :  { %v373_v40 = vcombine.low %v282_v37, %v358_v39  ;;  %v593_v41 = vpop.f32.mrb[3].mxu1 }
 0x2ef   :  { %599 = vmatmul.mubr.msk.f32.vlgmr.msra.gmra.mrb[4].mxu0 %vm38_vm1, %v373_v40 }
 0x3c2   :  { %v442_v44 = vpop.f32.mrb[4].mxu0 }
 0x3c3   :  { %v443_v46 = vadd.f32 %v551_v43, %v442_v44  ;;  %v600_v47 = vpop.f32.mrb[5].mxu0 }
 0x3c5   :  { %v447_v48 = vadd.f32 %v446_v45, %v443_v46 }
 0x3c7   :  { %604 = vmatmul.mubr.msk.f32.vlgmr.msra.gmra.mrb[4].mxu1 %vm456_vm5, %v447_v48 }
 0x49a   :  { %v526_v50 = vpop.f32.mrb[4].mxu1 }
 0x49b   :  { %v527_v51 = vadd.f32 %v553_v49, %v526_v50  ;;  %v605_v52 = vpop.f32.mrb[5].mxu1 }
 0x49d   :  { %530 = vst.msk [vmem:[#allocation2] sm:$0xff] %vm456_vm5, %v527_v51 }
 0x49e   :  { %638 = shalt.err (!%p635_p4)
}
 0x49f   :  { %s639_s9 = scalar_lea.hbm %s775_s8, 128 }
 0x4a0   :  { %p640_p5 = scmp.ne.s32.totalorder %s775_s8, %s639_s9  ;;  %p643_p6 = scmp.lt.u32.totalorder %s639_s9, %s775_s8 }
 0x4a2   :  { %p645_p7 = pnand %p643_p6, %p640_p5 }
 0x4a4   :  { %648 = shalt.err (!%p645_p7)
}
 0x4a5   :  { %540 = dma.vmem_to_hbm [thread:$0]  %s538_s29, 128, %s775_s8, [#allocation3]  }
 0x4a6   :  { %649 = dma.done.wait [#allocation3], 128  }
 0x4a7   :  { %650 = vsyncadd [#allocation3], 4294967168 }
 0x4a8   :  { %544 = vsyncpa [#allocation3], 1 }

// kernel: model_forward.2
= control target key start
LH: loop header
LB: loop body
LE: loop exit
PB: predicated region body
PF: predicated region fallthrough
CT: control target
= control target key end

     0   :  { %s14331_s0 = inlined_call_operand.vmem [shape: f32[2,16,4], index: 0, kind: input, shape index: {}]   ;;  %s14332_s1 = inlined_call_operand.vmem [shape: f32[2,16,4], index: 1, kind: input, shape index: {}]   ;;  %s14333_s2 = inlined_call_operand.vmem [shape: f32[2,16,4], index: 2, kind: input, shape index: {}]   ;;  %s14334_s3 = inlined_call_operand.vmem [shape: f32[2,16,4], index: 3, kind: input, shape index: {}]   ;;  %s14335_s4 = inlined_call_operand.hbm [shape: f32[16,32], index: 4, kind: input, shape index: {}]   ;;  %s14336_s5 = inlined_call_operand.hbm [shape: f32[2,16,32], index: 5, kind: input, shape index: {}]   ;;  %s14337_s6 = inlined_call_operand.vmem [shape: f32[4,32,96], index: 6, kind: input, shape index: {}]   ;;  %s14338_s7 = inlined_call_operand.hbm [shape: f32[4,1,96], index: 7, kind: input, shape index: {}]   ;;  %s14339_s8 = inlined_call_operand.hbm [shape: f32[4,32,32], index: 8, kind: input, shape index: {}]   ;;  %s14340_s9 = inlined_call_operand.vmem [shape: f32[3,32,32], index: 9, kind: input, shape index: {}]   ;;  %s14341_s10 = inlined_call_operand.hbm [shape: f32[3,32,32], index: 10, kind: input, shape index: {}]   ;;  %s14342_s11 = inlined_call_operand.hbm [shape: f32[3,32,32], index: 11, kind: input, shape index: {}]   ;;  %s14343_s12 = inlined_call_operand.hbm [shape: f32[29,32], index: 12, kind: input, shape index: {}]   ;;  %s14344_s13 = inlined_call_operand.hbm [shape: f32[4,32], index: 13, kind: input, shape index: {}]   ;;  %s14345_s14 = inlined_call_operand.vmem [shape: f32[4,1], index: 14, kind: input, shape index: {}]   ;;  %s14346_s15 = inlined_call_operand.hbm [shape: f32[8,48], index: 15, kind: input, shape index: {}]   ;;  %s14347_s16 = inlined_call_operand.hbm [shape: f32[1,48], index: 16, kind: input, shape index: {}]   ;;  %s14348_s17 = inlined_call_operand.hbm [shape: f32[16,64], index: 17, kind: input, shape index: {}]   ;;  %s14349_s18 = inlined_call_operand.hbm [shape: f32[1,64], index: 18, kind: input, shape index: {}]   ;;  %s14350_s19 = inlined_call_operand.hbm [shape: f32[16,128], index: 19, kind: input, shape index: {}]   ;;  %s14351_s20 = inlined_call_operand.hbm [shape: f32[1,128], index: 20, kind: input, shape index: {}]   ;;  %s14352_s21 = inlined_call_operand.vmem [shape: f32[8,48], index: 21, kind: output, shape index: {0}]   ;;  %s14353_s22 = inlined_call_operand.vmem [shape: f32[8,64], index: 22, kind: output, shape index: {1}]   ;;  %s14354_s23 = inlined_call_operand.vmem [shape: f32[8,128], index: 23, kind: output, shape index: {2}]   ;;  %s14355_s24 = inlined_call_operand.vmem [shape: f32[8,8], index: 24, kind: output, shape index: {3}]  }
   0x1   :  { %14367 = sst [smem:[#allocation32_spill]] %s14331_s0 }
   0x2   :  { %14368 = sst [smem:[#allocation33_spill]] %s14332_s1 }
   0x3   :  { %14369 = sst [smem:[#allocation34_spill]] %s14333_s2 }
   0x4   :  { %14370 = sst [smem:[#allocation35_spill]] %s14334_s3 }
   0x5   :  { %14371 = sst [smem:[#allocation36_spill]] %s14335_s4 }
   0x6   :  { %14372 = sst [smem:[#allocation37_spill]] %s14336_s5 }
   0x7   :  { %14373 = sst [smem:[#allocation38_spill]] %s14337_s6 }
   0x8   :  { %14374 = sst [smem:[#allocation39_spill]] %s14338_s7 }
   0x9   :  { %14375 = sst [smem:[#allocation40_spill]] %s14339_s8 }
   0xa   :  { %14376 = sst [smem:[#allocation41_spill]] %s14353_s22 }
   0xb   :  { %14377 = sst [smem:[#allocation42_spill]] %s14354_s23 }
   0xc   :  { %30 = vsyncpa [#allocation3], 0 }
   0xd   :  { %31 = vsyncpa [#allocation5], 0 }
   0xe   :  { %32 = vsyncpa [#allocation8], 0 }
   0xf   :  { %33 = vsyncpa [#allocation11], 0 }
  0x10   :  { %34 = vsyncpa [#allocation14], 0 }
  0x11   :  { %35 = vsyncpa [#allocation17], 0 }
  0x12   :  { %36 = vsyncpa [#allocation20], 0 }
  0x13   :  { %37 = vsyncpa [#allocation23], 0  ;;  %s12448_s5 = smov [#allocation4]   ;;  %s12449_s27 = smov [#allocation7]  }
  0x14   :  { %s63_s26 = sshll.u32 %s12448_s5, 4  ;;  %s89_s28 = sshll.u32 %s12449_s27, 4  ;;  %s64_s26 = int_to_ptr.vmem [resolvable:$true] %s63_s26  ;;  %s12609_s28 = int_to_ptr.vmem [resolvable:$true] %s89_s28 }
  0x15   :  { %s14378_s29 = sld [smem:[#allocation37_spill]] }
  0x1b   :  { %s12124_s0 = scalar_lea.hbm %s14378_s29, 512 }
  0x1c   :  { %p12125_p0 = scmp.ne.s32.totalorder %s14378_s29, %s12124_s0  ;;  %p12128_p1 = scmp.lt.u32.totalorder %s12124_s0, %s14378_s29 }
  0x1e   :  { %p12130_p2 = pnand %p12128_p1, %p12125_p0 }
  0x20   :  { %12133 = shalt.err (!%p12130_p2)
}
  0x21   :  { %s12134_s8 = scalar_lea.vmem %s64_s26, 512  ;;  %p12139_p4 = scmp.lt.s32.totalorder %s64_s26, %s64_s26 }
  0x22   :  { %p12135_p3 = scmp.ne.s32.totalorder %s64_s26, %s12134_s8  ;;  %p12140_p5 = scmp.lt.s32.totalorder %s12134_s8, %s12134_s8 }
  0x24   :  { %p12141_p6 = por %p12140_p5, %p12139_p4 }
  0x26   :  { %p12142_p7 = pnand %p12141_p6, %p12135_p3 }
  0x28   :  { %12145 = shalt.err (!%p12142_p7)
}
  0x29   :  { %s12450_s4 = smov 128   ;;  %s12451_s1 = smov 8  }
  0x2a   :  { %69 = dma.hbm_to_vmem [thread:$0]  %s14378_s29, 512, %s64_s26, [#allocation5], %s12450_s4, %s12450_s4, %s12451_s1  }
  0x2b   :  { %s14379_s0 = sld [smem:[#allocation40_spill]] }
  0x31   :  { %s12146_s7 = scalar_lea.hbm %s14379_s0, 2048 }
  0x32   :  { %p12147_p8 = scmp.ne.s32.totalorder %s14379_s0, %s12146_s7  ;;  %p12150_p9 = scmp.lt.u32.totalorder %s12146_s7, %s14379_s0 }
  0x34   :  { %p12152_p10 = pnand %p12150_p9, %p12147_p8 }
  0x36   :  { %12155 = shalt.err (!%p12152_p10)
}
  0x37   :  { %s12156_s23 = scalar_lea.vmem %s12609_s28, 2048  ;;  %p12161_p12 = scmp.lt.s32.totalorder %s12609_s28, %s12609_s28 }
  0x38   :  { %p12157_p11 = scmp.ne.s32.totalorder %s12609_s28, %s12156_s23  ;;  %p12162_p13 = scmp.lt.s32.totalorder %s12156_s23, %s12156_s23 }
  0x3a   :  { %p12163_p0 = por %p12162_p13, %p12161_p12 }
  0x3c   :  { %p12164_p1 = pnand %p12163_p0, %p12157_p11 }
  0x3e   :  { %12167 = shalt.err (!%p12164_p1)
}
  0x3f   :  { %95 = dma.hbm_to_vmem [thread:$0]  %s14379_s0, 2048, %s12609_s28, [#allocation8], %s12450_s4, %s12450_s4, %s12451_s1  }
  0x40   :  { %s12452_s5 = smov [#allocation10]   ;;  %s12453_s6 = smov [#allocation13]  }
  0x41   :  { %s115_s27 = sshll.u32 %s12452_s5, 4  ;;  %s140_s2 = sshll.u32 %s12453_s6, 4  ;;  %s116_s27 = int_to_ptr.vmem [resolvable:$true] %s115_s27  ;;  %s141_s2 = int_to_ptr.vmem [resolvable:$true] %s140_s2 }
  0x42   :  { %s12168_s23 = scalar_lea.hbm %s14342_s11, 1536 }
  0x43   :  { %p12169_p2 = scmp.ne.s32.totalorder %s14342_s11, %s12168_s23  ;;  %p12172_p3 = scmp.lt.u32.totalorder %s12168_s23, %s14342_s11 }
  0x45   :  { %p12174_p4 = pnand %p12172_p3, %p12169_p2 }
  0x47   :  { %12177 = shalt.err (!%p12174_p4)
}
  0x48   :  { %s12178_s28 = scalar_lea.vmem %s116_s27, 1536  ;;  %p12183_p6 = scmp.lt.s32.totalorder %s116_s27, %s116_s27 }
  0x49   :  { %p12179_p5 = scmp.ne.s32.totalorder %s116_s27, %s12178_s28  ;;  %p12184_p7 = scmp.lt.s32.totalorder %s12178_s28, %s12178_s28 }
  0x4b   :  { %p12185_p8 = por %p12184_p7, %p12183_p6 }
  0x4d   :  { %p12186_p9 = pnand %p12185_p8, %p12179_p5 }
  0x4f   :  { %12189 = shalt.err (!%p12186_p9)
}
  0x50   :  { %121 = dma.hbm_to_vmem [thread:$0]  %s14342_s11, 1536, %s116_s27, [#allocation11], %s12450_s4, %s12450_s4, %s12451_s1  }
  0x51   :  { %s12190_s22 = scalar_lea.hbm %s14344_s13, 64 }
  0x52   :  { %p12191_p10 = scmp.ne.s32.totalorder %s14344_s13, %s12190_s22  ;;  %p12194_p11 = scmp.lt.u32.totalorder %s12190_s22, %s14344_s13 }
  0x54   :  { %p12196_p12 = pnand %p12194_p11, %p12191_p10 }
  0x56   :  { %12199 = shalt.err (!%p12196_p12)
}
  0x57   :  { %s12200_s3 = scalar_lea.vmem %s141_s2, 64  ;;  %p12205_p0 = scmp.lt.s32.totalorder %s141_s2, %s141_s2 }
  0x58   :  { %p12201_p13 = scmp.ne.s32.totalorder %s141_s2, %s12200_s3  ;;  %p12206_p1 = scmp.lt.s32.totalorder %s12200_s3, %s12200_s3 }
  0x5a   :  { %p12207_p2 = por %p12206_p1, %p12205_p0 }
  0x5c   :  { %p12208_p3 = pnand %p12207_p2, %p12201_p13 }
  0x5e   :  { %12211 = shalt.err (!%p12208_p3)
}
  0x5f   :  { %143 = dma.hbm_to_vmem [thread:$0]  %s14344_s13, 64, %s141_s2, [#allocation14]  }
  0x60   :  { %s12454_s25 = smov [#allocation16]   ;;  %s12455_s28 = smov [#allocation19]  }
  0x61   :  { %s162_s8 = sshll.u32 %s12454_s25, 4  ;;  %s184_s0 = sshll.u32 %s12455_s28, 4  ;;  %s163_s8 = int_to_ptr.vmem [resolvable:$true] %s162_s8  ;;  %s185_s0 = int_to_ptr.vmem [resolvable:$true] %s184_s0 }
  0x62   :  { %s12212_s5 = scalar_lea.hbm %s14347_s16, 16 }
  0x63   :  { %p12213_p4 = scmp.ne.s32.totalorder %s14347_s16, %s12212_s5  ;;  %p12216_p5 = scmp.lt.u32.totalorder %s12212_s5, %s14347_s16 }
  0x65   :  { %p12218_p6 = pnand %p12216_p5, %p12213_p4 }
  0x67   :  { %12221 = shalt.err (!%p12218_p6)
}
  0x68   :  { %s12222_s13 = scalar_lea.vmem %s163_s8, 16  ;;  %s12226_s2 = scalar_lea.vmem %s163_s8, 32 }
  0x69   :  { %p12223_p7 = scmp.ne.s32.totalorder %s163_s8, %s12222_s13  ;;  %p12227_p8 = scmp.lt.s32.totalorder %s163_s8, %s163_s8 }
  0x6a   :  { %p12228_p9 = scmp.lt.s32.totalorder %s12226_s2, %s12222_s13 }
  0x6c   :  { %p12229_p10 = por %p12228_p9, %p12227_p8 }
  0x6e   :  { %p12230_p11 = pnand %p12229_p10, %p12223_p7 }
  0x70   :  { %12233 = shalt.err (!%p12230_p11)
}
  0x71   :  { %165 = dma.hbm_to_vmem [thread:$0]  %s14347_s16, 16, %s163_s8, [#allocation17]  }
  0x72   :  { %s12234_s25 = scalar_lea.hbm %s14349_s18, 16 }
  0x73   :  { %p12235_p12 = scmp.ne.s32.totalorder %s14349_s18, %s12234_s25  ;;  %p12238_p13 = scmp.lt.u32.totalorder %s12234_s25, %s14349_s18 }
  0x75   :  { %p12240_p0 = pnand %p12238_p13, %p12235_p12 }
  0x77   :  { %12243 = shalt.err (!%p12240_p0)
}
  0x78   :  { %s12244_s22 = scalar_lea.vmem %s185_s0, 16  ;;  %s12248_s6 = scalar_lea.vmem %s185_s0, 32 }
  0x79   :  { %p12245_p1 = scmp.ne.s32.totalorder %s185_s0, %s12244_s22  ;;  %p12249_p2 = scmp.lt.s32.totalorder %s185_s0, %s185_s0 }
  0x7a   :  { %p12250_p3 = scmp.lt.s32.totalorder %s12248_s6, %s12244_s22 }
  0x7c   :  { %p12251_p4 = por %p12250_p3, %p12249_p2 }
  0x7e   :  { %p12252_p5 = pnand %p12251_p4, %p12245_p1 }
  0x80   :  { %12255 = shalt.err (!%p12252_p5)
}
  0x81   :  { %187 = dma.hbm_to_vmem [thread:$0]  %s14349_s18, 16, %s185_s0, [#allocation20]  }
  0x82   :  { %s12456_s7 = smov [#allocation2]   ;;  %s12457_s13 = smov [#allocation6]  }
  0x83   :  { %s51_s30 = sshll.u32 %s12456_s7, 4  ;;  %s77_s2 = sshll.u32 %s12457_s13, 4  ;;  %s52_s30 = int_to_ptr.vmem [resolvable:$true] %s51_s30  ;;  %s12697_s2 = int_to_ptr.vmem [resolvable:$true] %s77_s2 }
  0x84   :  { %s14380_s11 = sld [smem:[#allocation36_spill]] }
  0x8a   :  { %s12256_s27 = scalar_lea.hbm %s14380_s11, 256 }
  0x8b   :  { %p12257_p6 = scmp.ne.s32.totalorder %s14380_s11, %s12256_s27  ;;  %p12260_p7 = scmp.lt.u32.totalorder %s12256_s27, %s14380_s11 }
  0x8d   :  { %p12262_p8 = pnand %p12260_p7, %p12257_p6 }
  0x8f   :  { %12265 = shalt.err (!%p12262_p8)
}
  0x90   :  { %s12266_s18 = scalar_lea.vmem %s52_s30, 256  ;;  %p12271_p10 = scmp.lt.s32.totalorder %s52_s30, %s52_s30 }
  0x91   :  { %p12267_p9 = scmp.ne.s32.totalorder %s52_s30, %s12266_s18  ;;  %p12272_p11 = scmp.lt.s32.totalorder %s12266_s18, %s12266_s18 }
  0x93   :  { %p12273_p12 = por %p12272_p11, %p12271_p10 }
  0x95   :  { %p12274_p13 = pnand %p12273_p12, %p12267_p9 }
  0x97   :  { %12277 = shalt.err (!%p12274_p13)
}
  0x98   :  { %57 = dma.hbm_to_vmem [thread:$0]  %s14380_s11, 256, %s52_s30, [#allocation3], %s12450_s4, %s12450_s4, %s12451_s1  }
  0x99   :  { %s14381_s16 = sld [smem:[#allocation39_spill]] }
  0x9f   :  { %s12278_s8 = scalar_lea.hbm %s14381_s16, 64 }
  0xa0   :  { %p12279_p0 = scmp.ne.s32.totalorder %s14381_s16, %s12278_s8  ;;  %p12282_p1 = scmp.lt.u32.totalorder %s12278_s8, %s14381_s16 }
  0xa2   :  { %p12284_p2 = pnand %p12282_p1, %p12279_p0 }
  0xa4   :  { %12287 = shalt.err (!%p12284_p2)
}
  0xa5   :  { %s12288_s27 = scalar_lea.vmem %s12697_s2, 64  ;;  %p12293_p4 = scmp.lt.s32.totalorder %s12697_s2, %s12697_s2 }
  0xa6   :  { %p12289_p3 = scmp.ne.s32.totalorder %s12697_s2, %s12288_s27  ;;  %p12294_p5 = scmp.lt.s32.totalorder %s12288_s27, %s12288_s27 }
  0xa8   :  { %p12295_p6 = por %p12294_p5, %p12293_p4 }
  0xaa   :  { %p12296_p7 = pnand %p12295_p6, %p12289_p3 }
  0xac   :  { %12299 = shalt.err (!%p12296_p7)
}
  0xad   :  { %s12458_s30 = smov 16   ;;  %s12459_s11 = smov 1  }
  0xae   :  { %83 = dma.hbm_to_vmem [thread:$0]  %s14381_s16, 64, %s12697_s2, [#allocation5], %s12458_s30, %s12458_s30, %s12459_s11  }
  0xaf   :  { %s12460_s26 = smov [#allocation9]   ;;  %s12461_s18 = smov [#allocation12]  }
  0xb0   :  { %s103_s29 = sshll.u32 %s12460_s26, 4  ;;  %s127_s0 = sshll.u32 %s12461_s18, 4  ;;  %s104_s29 = int_to_ptr.vmem [resolvable:$true] %s103_s29  ;;  %s12733_s0 = int_to_ptr.vmem [resolvable:$true] %s127_s0 }
  0xb1   :  { %s12300_s6 = scalar_lea.hbm %s14341_s10, 1536 }
  0xb2   :  { %p12301_p8 = scmp.ne.s32.totalorder %s14341_s10, %s12300_s6  ;;  %p12304_p9 = scmp.lt.u32.totalorder %s12300_s6, %s14341_s10 }
  0xb4   :  { %p12306_p10 = pnand %p12304_p9, %p12301_p8 }
  0xb6   :  { %12309 = shalt.err (!%p12306_p10)
}
  0xb7   :  { %s12310_s2 = scalar_lea.vmem %s104_s29, 1536  ;;  %p12315_p12 = scmp.lt.s32.totalorder %s104_s29, %s104_s29 }
  0xb8   :  { %p12311_p11 = scmp.ne.s32.totalorder %s104_s29, %s12310_s2  ;;  %p12316_p13 = scmp.lt.s32.totalorder %s12310_s2, %s12310_s2 }
  0xba   :  { %p12317_p0 = por %p12316_p13, %p12315_p12 }
  0xbc   :  { %p12318_p1 = pnand %p12317_p0, %p12311_p11 }
  0xbe   :  { %12321 = shalt.err (!%p12318_p1)
}
  0xbf   :  { %109 = dma.hbm_to_vmem [thread:$0]  %s14341_s10, 1536, %s104_s29, [#allocation8], %s12450_s4, %s12450_s4, %s12451_s1  }
  0xc0   :  { %s12322_s25 = scalar_lea.hbm %s14343_s12, 512 }
  0xc1   :  { %p12323_p2 = scmp.ne.s32.totalorder %s14343_s12, %s12322_s25  ;;  %p12326_p3 = scmp.lt.u32.totalorder %s12322_s25, %s14343_s12 }
  0xc3   :  { %p12328_p4 = pnand %p12326_p3, %p12323_p2 }
  0xc5   :  { %12331 = shalt.err (!%p12328_p4)
}
  0xc6   :  { %s12332_s22 = scalar_lea.vmem %s12733_s0, 512  ;;  %p12337_p6 = scmp.lt.s32.totalorder %s12733_s0, %s12733_s0 }
  0xc7   :  { %p12333_p5 = scmp.ne.s32.totalorder %s12733_s0, %s12332_s22  ;;  %p12338_p7 = scmp.lt.s32.totalorder %s12332_s22, %s12332_s22 }
  0xc9   :  { %p12339_p8 = por %p12338_p7, %p12337_p6 }
  0xcb   :  { %p12340_p9 = pnand %p12339_p8, %p12333_p5 }
  0xcd   :  { %12343 = shalt.err (!%p12340_p9)
}
  0xce   :  { %133 = dma.hbm_to_vmem [thread:$0]  %s14343_s12, 512, %s12733_s0, [#allocation11], %s12450_s4, %s12450_s4, %s12451_s1  }
  0xcf   :  { %s12462_s6 = smov [#allocation15]   ;;  %s12463_s7 = smov [#allocation18]  }
  0xd0   :  { %s152_s8 = sshll.u32 %s12462_s6, 4  ;;  %s171_s13 = sshll.u32 %s12463_s7, 4  ;;  %s153_s8 = int_to_ptr.vmem [resolvable:$true] %s152_s8  ;;  %s12770_s13 = int_to_ptr.vmem [resolvable:$true] %s171_s13 }
  0xd1   :  { %s12344_s16 = scalar_lea.hbm %s14346_s15, 128 }
  0xd2   :  { %p12345_p10 = scmp.ne.s32.totalorder %s14346_s15, %s12344_s16  ;;  %p12348_p11 = scmp.lt.u32.totalorder %s12344_s16, %s14346_s15 }
  0xd4   :  { %p12350_p12 = pnand %p12348_p11, %p12345_p10 }
  0xd6   :  { %12353 = shalt.err (!%p12350_p12)
}
  0xd7   :  { %s12354_s12 = scalar_lea.vmem %s153_s8, 128  ;;  %p12359_p0 = scmp.lt.s32.totalorder %s153_s8, %s153_s8 }
  0xd8   :  { %p12355_p13 = scmp.ne.s32.totalorder %s153_s8, %s12354_s12  ;;  %p12360_p1 = scmp.lt.s32.totalorder %s12354_s12, %s12354_s12 }
  0xda   :  { %p12361_p2 = por %p12360_p1, %p12359_p0 }
  0xdc   :  { %p12362_p3 = pnand %p12361_p2, %p12355_p13 }
  0xde   :  { %12365 = shalt.err (!%p12362_p3)
}
  0xdf   :  { %155 = dma.hbm_to_vmem [thread:$0]  %s14346_s15, 128, %s153_s8, [#allocation14]  }
  0xe0   :  { %s12366_s5 = scalar_lea.hbm %s14348_s17, 256 }
  0xe1   :  { %p12367_p4 = scmp.ne.s32.totalorder %s14348_s17, %s12366_s5  ;;  %p12370_p5 = scmp.lt.u32.totalorder %s12366_s5, %s14348_s17 }
  0xe3   :  { %p12372_p6 = pnand %p12370_p5, %p12367_p4 }
  0xe5   :  { %12375 = shalt.err (!%p12372_p6)
}
  0xe6   :  { %s12376_s7 = scalar_lea.vmem %s12770_s13, 256  ;;  %p12381_p8 = scmp.lt.s32.totalorder %s12770_s13, %s12770_s13 }
  0xe7   :  { %p12377_p7 = scmp.ne.s32.totalorder %s12770_s13, %s12376_s7  ;;  %p12382_p9 = scmp.lt.s32.totalorder %s12376_s7, %s12376_s7 }
  0xe9   :  { %p12383_p10 = por %p12382_p9, %p12381_p8 }
  0xeb   :  { %p12384_p11 = pnand %p12383_p10, %p12377_p7 }
  0xed   :  { %12387 = shalt.err (!%p12384_p11)
}
  0xee   :  { %177 = dma.hbm_to_vmem [thread:$0]  %s14348_s17, 256, %s12770_s13, [#allocation17], %s12450_s4, %s12450_s4, %s12451_s1  }
  0xef   :  { %s12464_s23 = smov [#allocation21]   ;;  %s12465_s16 = smov [#allocation22]  }
  0xf0   :  { %s193_s2 = sshll.u32 %s12464_s23, 4  ;;  %s206_s3 = sshll.u32 %s12465_s16, 4  ;;  %s194_s2 = int_to_ptr.vmem [resolvable:$true] %s193_s2  ;;  %s207_s3 = int_to_ptr.vmem [resolvable:$true] %s206_s3 }
  0xf1   :  { %s12388_s25 = scalar_lea.hbm %s14350_s19, 256 }
  0xf2   :  { %p12389_p12 = scmp.ne.s32.totalorder %s14350_s19, %s12388_s25  ;;  %p12392_p13 = scmp.lt.u32.totalorder %s12388_s25, %s14350_s19 }
  0xf4   :  { %p12394_p0 = pnand %p12392_p13, %p12389_p12 }
  0xf6   :  { %12397 = shalt.err (!%p12394_p0)
}
  0xf7   :  { %s12398_s17 = scalar_lea.vmem %s194_s2, 256  ;;  %p12403_p2 = scmp.lt.s32.totalorder %s194_s2, %s194_s2 }
  0xf8   :  { %p12399_p1 = scmp.ne.s32.totalorder %s194_s2, %s12398_s17  ;;  %p12404_p3 = scmp.lt.s32.totalorder %s12398_s17, %s12398_s17 }
  0xfa   :  { %p12405_p4 = por %p12404_p3, %p12403_p2 }
  0xfc   :  { %p12406_p5 = pnand %p12405_p4, %p12399_p1 }
  0xfe   :  { %12409 = shalt.err (!%p12406_p5)
}
  0xff   :  { %199 = dma.hbm_to_vmem [thread:$0]  %s14350_s19, 256, %s194_s2, [#allocation20], %s12450_s4, %s12450_s4, %s12451_s1  }
 0x100   :  { %s12410_s10 = scalar_lea.hbm %s14351_s20, 16 }
 0x101   :  { %p12411_p6 = scmp.ne.s32.totalorder %s14351_s20, %s12410_s10  ;;  %p12414_p7 = scmp.lt.u32.totalorder %s12410_s10, %s14351_s20 }
 0x103   :  { %p12416_p8 = pnand %p12414_p7, %p12411_p6 }
 0x105   :  { %12419 = shalt.err (!%p12416_p8)
}
 0x106   :  { %s12420_s8 = scalar_lea.vmem %s207_s3, 16  ;;  %s12424_s23 = scalar_lea.vmem %s207_s3, 32 }
 0x107   :  { %p12421_p9 = scmp.ne.s32.totalorder %s207_s3, %s12420_s8  ;;  %p12425_p10 = scmp.lt.s32.totalorder %s207_s3, %s207_s3 }
 0x108   :  { %p12426_p11 = scmp.lt.s32.totalorder %s12424_s23, %s12420_s8 }
 0x10a   :  { %p12427_p12 = por %p12426_p11, %p12425_p10 }
 0x10c   :  { %p12428_p13 = pnand %p12427_p12, %p12421_p9 }
 0x10e   :  { %12431 = shalt.err (!%p12428_p13)
}
 0x10f   :  { %209 = dma.hbm_to_vmem [thread:$0]  %s14351_s20, 16, %s207_s3, [#allocation23]  }
 0x110   :  { %12432 = dma.done.wait [#allocation3], 256  }
 0x111   :  { %12433 = vsyncadd [#allocation3], 4294967040 }
 0x112   :  { %12434 = dma.done.wait [#allocation5], 576  }
 0x113   :  { %12435 = vsyncadd [#allocation5], 4294966720 }
 0x114   :  { %12436 = dma.done.wait [#allocation8], 3584  }
 0x115   :  { %12437 = vsyncadd [#allocation8], 4294963712 }
 0x116   :  { %12438 = dma.done.wait [#allocation11], 2048  }
 0x117   :  { %12439 = vsyncadd [#allocation11], 4294965248 }
 0x118   :  { %12440 = dma.done.wait [#allocation14], 192  }
 0x119   :  { %12441 = vsyncadd [#allocation14], 4294967104 }
 0x11a   :  { %12442 = dma.done.wait [#allocation17], 272  }
 0x11b   :  { %12443 = vsyncadd [#allocation17], 4294967024 }
 0x11c   :  { %12444 = dma.done.wait [#allocation20], 272  }
 0x11d   :  { %12445 = vsyncadd [#allocation20], 4294967024 }
 0x11e   :  { %12446 = dma.done.wait [#allocation23], 16  }
 0x11f   :  { %12447 = vsyncadd [#allocation23], 4294967280  ;;  %s14382_s27 = sld [smem:[#allocation33_spill]]  ;;  %s14383_s11 = sld [smem:[#allocation32_spill]]  ;;  %vm289_vm0 = vcmask 1046528   ;;  %vm278_vm1 = vcmask 1040384  }
 0x120   :  { %s12466_s0 = smov 12   ;;  %s12467_s28 = smov 4   ;;  %v258_v12 = vld [vmem:[#allocation4] sm:$0xff]  ;;  %v259_v13 = vld [vmem:[#allocation4 + $0x8] sm:$0xff]  ;;  %vm344_vm2 = vcmask 31744   ;;  %vm349_vm3 = vcmask 64512  }
 0x121   :  { %v11281_v16 = vpack.c.bf16 %v259_v13, %v258_v12  ;;  %s14384_s6 = sld [smem:[#allocation38_spill]]  ;;  %vm354_vm4 = vcmask 97280   ;;  %vm359_vm5 = vcmask 130048   ;;  %v252_v57 = vld [vmem:[#allocation2] sm:$0xff]  ;;  %v253_v58 = vld [vmem:[#allocation2 + $0x8] sm:$0xff]  ;;  %vm476_vm6 = vcmask 261120   ;;  %vm12945_vm7 = vmpackc.low %vm349_vm3, %vm349_vm3 }
 0x122   :  { %s12468_s3 = smov 96   ;;  %s12470_s25 = smov 88   ;;  %vm2242_vm8 = vcmask 195584   ;;  %vm3162_vm13 = vcmask 1041408   ;;  %vm3165_vm14 = vcmask 1042432   ;;  %vm3168_vm15 = vcmask 1043456  }
 0x123   :  { %11282 = vmatprep.subr.bf16.mxu0 %v11281_v16  ;;  %s12471_s12 = smov 120   ;;  %s12472_s26 = smov 56  }
 0x124   :  { %11284 = vmatpush3.bf16.msra.mxu0 %v11281_v16  ;;  %s12473_s17 = smov 80   ;;  %s12474_s13 = smov 112  }
 0x125   :  { %v267_v0 = vld [vmem:[%s14382_s27 + $0x8] sm:$0xff]  ;;  %v262_v1 = vld [vmem:[%s14383_s11] sm:$0xff]  ;;  %v264_v7 = vld [vmem:[%s14383_s11 + $0x10] sm:$0xff]  ;;  %s12475_s18 = smov 48   ;;  %s12476_s5 = smov 72  }
 0x126   :  { %v263_v2 = vld [vmem:[%s14383_s11 + $0x8] sm:$0xff]  ;;  %334 = vrot.lane.b32.xlu1 %v267_v0, %s12466_s0  ;;  %302 = vrot.lane.b32.xlu0 %v262_v1, %s12467_s28  ;;  %v279_v3 = vrot.slane %v262_v1, 7  ;;  %v290_v4 = vrot.slane %v262_v1, 1  ;;  %v281_v8 = vrot.slane %v264_v7, 7  ;;  %v265_v9 = vld [vmem:[%s14383_s11 + $0x18] sm:$0xff]  ;;  %v293_v21 = vrot.slane %v264_v7, 1 }
 0x127   :  { %v272_v5 = vrot.slane %v263_v2, 7  ;;  %v291_v6 = vrot.slane %v263_v2, 1  ;;  %v273_v11 = vrot.slane %v265_v9, 7  ;;  %v266_v18 = vld [vmem:[%s14382_s27] sm:$0xff]  ;;  %v294_v22 = vrot.slane %v265_v9, 1  ;;  %v462_v24 = vld [vmem:[%s14384_s6 + $0x8] sm:$0xff] }
 0x128   :  { %v461_v23 = vld [vmem:[%s14384_s6] sm:$0xff]  ;;  %v268_v28 = vld [vmem:[%s14382_s27 + $0x10] sm:$0xff]  ;;  %v269_v29 = vld [vmem:[%s14382_s27 + $0x18] sm:$0xff]  ;;  %s12469_s11 = smov 64   ;;  %s12477_s22 = smov 104  }
 0x129   :  { %v292_v10 = vsel %vm289_vm0, %v290_v4, %v291_v6  ;;  %v287_v14 = vsel %vm278_vm1, %v272_v5, %v279_v3  ;;  %v280_v15 = vsel %vm278_vm1, %v279_v3, %v272_v5  ;;  %v288_v17 = vsel %vm278_vm1, %v273_v11, %v281_v8  ;;  %v463_v54 = vld [vmem:[%s14384_s6 + $0x10] sm:$0xff]  ;;  %v464_v55 = vld [vmem:[%s14384_s6 + $0x18] sm:$0xff]  ;;  %s12478_s10 = smov 40   ;;  %s14365_s29 = smov 24  }
 0x12a   :  { %304 = vrot.lane.b32.xlu0 %v263_v2, %s12467_s28  ;;  %316 = vrot.lane.b32.xlu1 %v292_v10, %s12451_s1  ;;  %v300_v19 = vsel %vm289_vm0, %v291_v6, %v290_v4  ;;  %v282_v20 = vsel %vm278_vm1, %v281_v8, %v273_v11  ;;  %v11285_v25 = vpack.c.bf16 %v462_v24, %v461_v23  ;;  %v9981_v3 = vld [vmem:[#allocation6] ss:$0 sm:$0xff]  ;;  %s14387_s27 = sld [smem:[#allocation34_spill]]  ;;  %s14388_s23 = sld [smem:[#allocation35_spill]] }
 0x12b   :  { %v295_v26 = vsel %vm289_vm0, %v293_v21, %v294_v22  ;;  %v301_v27 = vsel %vm289_vm0, %v294_v22, %v293_v21  ;;  %v11289_v56 = vpack.c.bf16 %v464_v55, %v463_v54  ;;  %s14394_s8 = sld [smem:[#allocation41_spill]]  ;;  %s14395_s19 = sld [smem:[#allocation42_spill]] }
 0x12c   :  { %11286 = vmatprep.subr.bf16.mxu1 %v11285_v25 }
 0x12d   :  { %11288 = vmatpush3.bf16.msra.mxu1 %v11285_v25 }
 0x12e   :  { %332 = vrot.lane.b32.xlu0 %v266_v18, %s12466_s0  ;;  %318 = vrot.lane.b32.xlu1 %v300_v19, %s12451_s1 }
 0x12f   :  { %11290 = vmatprep.subr.bf16.mxu1 %v11289_v56 }
 0x131   :  { %11292 = vmatpush3.bf16.msra.mxu1 %v11289_v56 }
 0x132   :  { %306 = vrot.lane.b32.xlu0 %v264_v7, %s12467_s28  ;;  %308 = vrot.lane.b32.xlu1 %v265_v9, %s12467_s28 }
 0x136   :  { %320 = vrot.lane.b32.xlu0 %v295_v26, %s12451_s1  ;;  %322 = vrot.lane.b32.xlu1 %v301_v27, %s12451_s1 }
 0x13a   :  { %336 = vrot.lane.b32.xlu0 %v268_v28, %s12466_s0  ;;  %338 = vrot.lane.b32.xlu1 %v269_v29, %s12466_s0 }
 0x198   :  { %v335_v30 = vpop.permute.xlu1 %334  ;;  %v303_v31 = vpop.permute.xlu0 %302 }
 0x199   :  { %v345_v34 = vsel %vm344_vm2, %v287_v14, %v303_v31 }
 0x19c   :  { %v305_v32 = vpop.permute.xlu0 %304  ;;  %v317_v33 = vpop.permute.xlu1 %316 }
 0x19d   :  { %v346_v35 = vsel %vm344_vm2, %v280_v15, %v305_v32  ;;  %v350_v36 = vsel %vm349_vm3, %v345_v34, %v317_v33 }
 0x1a0   :  { %v333_v37 = vpop.permute.xlu0 %332  ;;  %v319_v38 = vpop.permute.xlu1 %318 }
 0x1a1   :  { %v351_v39 = vsel %vm349_vm3, %v346_v35, %v319_v38  ;;  %v355_v40 = vsel %vm354_vm4, %v350_v36, %v333_v37 }
 0x1a2   :  { %10615 = vmatprep.mubr.msk.f32.mxu0 %vm359_vm5, %v355_v40  ;;  %v356_v41 = vsel %vm354_vm4, %v351_v39, %v335_v30 }
 0x1a3   :  { %10616 = vmatmul.mubr.msk.f32.vlgmr.msra.gmra.mrb[0].mxu0 %vm359_vm5, %v356_v41 }
 0x1a4   :  { %v307_v42 = vpop.permute.xlu0 %306  ;;  %v309_v43 = vpop.permute.xlu1 %308 }
 0x1a5   :  { %v347_v44 = vsel %vm344_vm2, %v288_v17, %v307_v42  ;;  %v348_v45 = vsel %vm344_vm2, %v282_v20, %v309_v43 }
 0x1a8   :  { %v321_v46 = vpop.permute.xlu0 %320  ;;  %v323_v47 = vpop.permute.xlu1 %322 }
 0x1a9   :  { %v352_v48 = vsel %vm349_vm3, %v347_v44, %v321_v46  ;;  %v353_v49 = vsel %vm349_vm3, %v348_v45, %v323_v47 }
 0x1ac   :  { %v337_v50 = vpop.permute.xlu0 %336  ;;  %v339_v51 = vpop.permute.xlu1 %338 }
 0x1ad   :  { %v357_v52 = vsel %vm354_vm4, %v352_v48, %v337_v50  ;;  %v358_v53 = vsel %vm354_vm4, %v353_v49, %v339_v51 }
 0x1ae   :  { %10618 = vmatprep.mubr.msk.f32.mxu0 %vm359_vm5, %v357_v52 }
 0x1af   :  { %10619 = vmatmul.mubr.msk.f32.gmra.mrb[2].mxu0 %vm359_vm5, %v358_v53 }
 0x276   :  { %v10617_v59 = vpop.f32.mrb[0].mxu0 }
 0x277   :  { %v438_v60 = vpop.f32.mrb[1].mxu0  ;;  %v12905_v62 = vadd.f32 %v10617_v59, %v253_v58 }
 0x278   :  { %v12903_v61 = vadd.f32 %v438_v60, %v252_v57 }
 0x27a   :  { %10629 = vmatprep.mubr.msk.f32.mxu1 %vm476_vm6, %v12903_v61 }
 0x27b   :  { %10630 = vmatmul.mubr.msk.f32.vlgmr.msra.gmra.mrb[0].mxu1 %vm476_vm6, %v12905_v62 }
 0x282   :  { %v10620_v63 = vpop.f32.mrb[2].mxu0 }
 0x283   :  { %v12911_v0 = vadd.f32 %v10620_v63, %v253_v58  ;;  %v448_v1 = vpop.f32.mrb[3].mxu0 }
 0x284   :  { %v12913_v2 = vadd.f32 %v448_v1, %v252_v57 }
 0x286   :  { %10632 = vmatprep.mubr.msk.f32.mxu1 %vm476_vm6, %v12913_v2 }
 0x287   :  { %10633 = vmatmul.mubr.msk.f32.gmra.mrb[2].mxu1 %vm476_vm6, %v12911_v0 }
 0x34e   :  { %v10631_v4 = vpop.f32.mrb[0].mxu1 }
 0x34f   :  { %v12919_v5 = vadd.f32 %v10631_v4, %v9981_v3  ;;  %v555_v6 = vpop.f32.mrb[1].mxu1 }
 0x350   :  { %v12921_v7 = vadd.f32 %v9981_v3, %v555_v6 }
 0x352   :  { %10639 = vmatprep.mubr.msk.f32.mxu0 %vm349_vm3, %v12921_v7  ;;  %v12927_v8 = vpack.i.bf16 %v12919_v5, %v12921_v7 }
 0x354   :  { %11644 = vrot.lane.b32.xlu0 %v12927_v8, %s12468_s3 }
 0x35a   :  { %v10634_v9 = vpop.f32.mrb[2].mxu1 }
 0x35b   :  { %v12931_v10 = vadd.f32 %v10634_v9, %v9981_v3  ;;  %v565_v11 = vpop.f32.mrb[3].mxu1 }
 0x35c   :  { %v12933_v12 = vadd.f32 %v9981_v3, %v565_v11 }
 0x35e   :  { %v12937_v13 = vpack.i.bf16 %v12931_v10, %v12933_v12  ;;  %10646 = vmatprep.mubr.msk.f32.mxu1 %vm349_vm3, %v12933_v12 }
 0x360   :  { %11649 = vrot.lane.b32.xlu1 %v12937_v13, %s12468_s3 }
 0x3c6   :  { %v11645_v14 = vpop.permute.xlu0 %11644 }
 0x3c7   :  { %v11647_v15 = vunpack.i.h.bf16 %v11645_v14  ;;  %v11646_v16 = vunpack.i.l.bf16 %v11645_v14 }
 0x3c9   :  { %v11293_v18 = vpack.c.bf16 %v11647_v15, %v11646_v16 }
 0x3cb   :  { %11295 = vmatprep.subr.msk.bf16.mxu0 %vm12945_vm7, %v11293_v18 }
 0x3cc   :  { %11298 = vmatpush3.bf16.xpose.msk.msra.mxu0 %vm12945_vm7, %v11293_v18 }
 0x3d2   :  { %v11650_v19 = vpop.permute.xlu1 %11649 }
 0x3d3   :  { %v11652_v20 = vunpack.i.h.bf16 %v11650_v19  ;;  %v11651_v21 = vunpack.i.l.bf16 %v11650_v19  ;;  %10640 = vmatmul.mubr.msk.f32.vlgmr.msra.gmra.mrb[4].mxu0 %vm349_vm3, %v12919_v5 }
 0x3d5   :  { %v11299_v22 = vpack.c.bf16 %v11652_v20, %v11651_v21 }
 0x3d7   :  { %11301 = vmatprep.subr.msk.bf16.mxu1 %vm12945_vm7, %v11299_v22 }
 0x3d8   :  { %11304 = vmatpush3.bf16.xpose.msk.msra.mxu1 %vm12945_vm7, %v11299_v22 }
 0x3df   :  { %10647 = vmatmul.mubr.msk.f32.vlgmr.msra.gmra.mrb[4].mxu1 %vm349_vm3, %v12931_v10 }
 0x4a6   :  { %v10641_v23 = vpop.f32.mrb[4].mxu0 }
 0x4a7   :  { %v753_v24 = vmul.f32 0.35355338, %v10641_v23  ;;  %v654_v25 = vpop.f32.mrb[5].mxu0 }
 0x4a8   :  { %v752_v26 = vmul.f32 0.35355338, %v654_v25 }
 0x4a9   :  { %v759_v27 = vsel %vm359_vm5, %v753_v24, -inf }
 0x4aa   :  { %760 = vmax.xlane.f32.xlu1 %v759_v27  ;;  %v756_v28 = vsel %vm359_vm5, %v752_v26, -inf }
 0x4ab   :  { %757 = vmax.xlane.f32.xlu0 %v756_v28 }
 0x4b2   :  { %v10648_v29 = vpop.f32.mrb[4].mxu1 }
 0x4b3   :  { %v743_v30 = vpop.f32.mrb[5].mxu1  ;;  %v755_v32 = vmul.f32 0.35355338, %v10648_v29 }
 0x4b4   :  { %v754_v31 = vmul.f32 0.35355338, %v743_v30 }
 0x4b5   :  { %v765_v34 = vsel %vm359_vm5, %v755_v32, -inf }
 0x4b6   :  { %v762_v33 = vsel %vm359_vm5, %v754_v31, -inf }
 0x4b7   :  { %763 = vmax.xlane.f32.xlu0 %v762_v33 }
 0x4bb   :  { %11654 = vrot.lane.b32.xlu1 %v12927_v8, %s12469_s11  ;;  %766 = vmax.xlane.f32.xlu0 %v765_v34 }
 0x4bf   :  { %11664 = vrot.lane.b32.xlu1 %v12927_v8, %s12470_s25 }
 0x4c3   :  { %11669 = vrot.lane.b32.xlu1 %v12937_v13, %s12470_s25 }
 0x537   :  { %v761_v35 = vpop.xlane.xlu1 %760 }
 0x538   :  { %v769_v36 = vsub.f32 %v753_v24, %v761_v35  ;;  %v758_v37 = vpop.xlane.xlu0 %757 }
 0x539   :  { %v768_v38 = vsub.f32 %v752_v26, %v758_v37 }
 0x53a   :  { %v774_v39 = vmul.f32 1.442695, %v769_v36 }
 0x53b   :  { %v772_v40 = vmul.f32 1.442695, %v768_v38  ;;  %v11655_v41 = vpop.permute.xlu1 %11654 }
 0x53c   :  { %11814 = vpow2.f32 %v774_v39  ;;  %v11657_v42 = vunpack.i.h.bf16 %v11655_v41  ;;  %v11656_v43 = vunpack.i.l.bf16 %v11655_v41 }
 0x53d   :  { %11816 = vpow2.f32 %v772_v40 }
 0x53e   :  { %v11305_v44 = vpack.c.bf16 %v11657_v42, %v11656_v43 }
 0x53f   :  { %v11665_v45 = vpop.permute.xlu1 %11664 }
 0x540   :  { %v11667_v46 = vunpack.i.h.bf16 %v11665_v45  ;;  %v11666_v47 = vunpack.i.l.bf16 %v11665_v45  ;;  %11306 = vmatprep.subr.bf16.mxu0 %v11305_v44 }
 0x541   :  { %11308 = vmatpush3.bf16.msra.mxu0 %v11305_v44 }
 0x542   :  { %v11313_v48 = vpack.c.bf16 %v11667_v46, %v11666_v47 }
 0x543   :  { %v11670_v3 = vpop.permute.xlu1 %11669 }
 0x544   :  { %11315 = vmatprep.subr.msk.bf16.mxu1 %vm12945_vm7, %v11313_v48  ;;  %v764_v53 = vpop.xlane.xlu0 %763  ;;  %v11672_v19 = vunpack.i.h.bf16 %v11670_v3  ;;  %v11671_v20 = vunpack.i.l.bf16 %v11670_v3 }
 0x545   :  { %11318 = vmatpush3.bf16.xpose.msk.msra.mxu1 %vm12945_vm7, %v11313_v48  ;;  %v770_v56 = vsub.f32 %v754_v31, %v764_v53 }
 0x546   :  { %v11815_v49 = vpop.eup %11814  ;;  %v11319_v23 = vpack.c.bf16 %v11672_v19, %v11671_v20 }
 0x547   :  { %v11817_v50 = vpop.eup %11816  ;;  %v783_v51 = vsel %vm359_vm5, %v11815_v49, 0.0  ;;  %v776_v58 = vmul.f32 1.442695, %v770_v56 }
 0x548   :  { %784 = vadd.xlane.f32.xlu0 %v783_v51  ;;  %v780_v52 = vsel %vm359_vm5, %v11817_v50, 0.0  ;;  %v767_v54 = vpop.xlane.xlu0 %766 }
 0x549   :  { %781 = vadd.xlane.f32.xlu1 %v780_v52  ;;  %v771_v55 = vsub.f32 %v755_v32, %v767_v54 }
 0x54b   :  { %v778_v57 = vmul.f32 1.442695, %v771_v55 }
 0x54d   :  { %11818 = vpow2.f32 %v778_v57 }
 0x54e   :  { %11820 = vpow2.f32 %v776_v58 }
 0x557   :  { %v11819_v59 = vpop.eup %11818 }
 0x558   :  { %v11821_v60 = vpop.eup %11820  ;;  %v789_v63 = vsel %vm359_vm5, %v11819_v59, 0.0 }
 0x559   :  { %v786_v1 = vsel %vm359_vm5, %v11821_v60, 0.0 }
 0x55a   :  { %976 = vrot.lane.b32.xlu1 %v12919_v5, %s12471_s12 }
 0x55e   :  { %11659 = vrot.lane.b32.xlu0 %v12937_v13, %s12469_s11 }
 0x57d   :  { %790 = vadd.xlane.f32.xlu0 %v789_v63 }
 0x57e   :  { %787 = vadd.xlane.f32.xlu1 %v786_v1 }
 0x58f   :  { %1067 = vrot.lane.b32.xlu1 %v12931_v10, %s12471_s12 }
 0x593   :  { %974 = vrot.lane.b32.xlu0 %v12921_v7, %s12471_s12 }
 0x597   :  { %1065 = vrot.lane.b32.xlu0 %v12933_v12, %s12471_s12 }
 0x5d5   :  { %v785_v4 = vpop.xlane.xlu0 %784 }
 0x5d6   :  { %11822 = vrcp.f32 %v785_v4  ;;  %v782_v6 = vpop.xlane.xlu1 %781 }
 0x5d7   :  { %11824 = vrcp.f32 %v782_v6 }
 0x5d9   :  { %v11660_v9 = vpop.permute.xlu0 %11659 }
 0x5da   :  { %v11662_v11 = vunpack.i.h.bf16 %v11660_v9  ;;  %v11661_v14 = vunpack.i.l.bf16 %v11660_v9  ;;  %v977_v24 = vpop.permute.xlu1 %976 }
 0x5dc   :  { %v11309_v15 = vpack.c.bf16 %v11662_v11, %v11661_v14 }
 0x5de   :  { %11310 = vmatprep.subr.bf16.mxu0 %v11309_v15 }
 0x5e0   :  { %v11823_v16 = vpop.eup %11822 }
 0x5e1   :  { %v11825_v18 = vpop.eup %11824  ;;  %v795_v22 = vmul.f32 %v11823_v16, %v11815_v49 }
 0x5e2   :  { %v793_v21 = vmul.f32 %v11825_v18, %v11817_v50 }
 0x5e4   :  { %10653 = vmatprep.mubr.msk.f32.mxu0 %vm359_vm5, %v793_v21 }
 0x5e5   :  { %10654 = vmatmul.mubr.msk.f32.vlgmr.msra.gmra.mrb[6].mxu0 %vm359_vm5, %v795_v22 }
 0x5e6   :  { %11312 = vmatpush3.bf16.msra.mxu0 %v11309_v15 }
 0x5e7   :  { %11321 = vmatprep.subr.msk.bf16.mxu0 %vm12945_vm7, %v11319_v23 }
 0x60a   :  { %v791_v25 = vpop.xlane.xlu0 %790 }
 0x60b   :  { %11826 = vrcp.f32 %v791_v25  ;;  %v788_v26 = vpop.xlane.xlu1 %787 }
 0x60c   :  { %11828 = vrcp.f32 %v788_v26 }
 0x60e   :  { %v975_v27 = vpop.permute.xlu0 %974 }
 0x60f   :  { %10667 = vmatprep.mubr.msk.f32.mxu1 %vm349_vm3, %v975_v27  ;;  %v1068_v33 = vpop.permute.xlu1 %1067 }
 0x610   :  { %10668 = vmatmul.mubr.msk.f32.vlgmr.msra.gmra.mrb[6].mxu1 %vm349_vm3, %v977_v24 }
 0x612   :  { %v1066_v32 = vpop.permute.xlu0 %1065 }
 0x615   :  { %v11827_v28 = vpop.eup %11826 }
 0x616   :  { %v11829_v29 = vpop.eup %11828  ;;  %v799_v31 = vmul.f32 %v11827_v28, %v11819_v59 }
 0x617   :  { %v797_v30 = vmul.f32 %v11829_v29, %v11821_v60 }
 0x619   :  { %10660 = vmatprep.mubr.msk.f32.mxu0 %vm359_vm5, %v797_v30 }
 0x61a   :  { %10661 = vmatmul.mubr.msk.f32.vlgmr.msra.gmra.mrb[8].mxu0 %vm359_vm5, %v799_v31 }
 0x61b   :  { %11324 = vmatpush3.bf16.xpose.msk.msra.mxu0 %vm12945_vm7, %v11319_v23  ;;  %10674 = vmatprep.mubr.msk.f32.mxu0 %vm349_vm3, %v1066_v32 }
 0x622   :  { %10675 = vmatmul.mubr.msk.f32.vlgmr.msra.gmra.mrb[10].mxu0 %vm349_vm3, %v1068_v33 }
 0x6b8   :  { %v13001_v34 = vpop.f32.mrb[6].mxu0 }
 0x6b9   :  { %v13003_v35 = vpop.f32.mrb[7].mxu0 }
 0x6e3   :  { %v10669_v36 = vpop.f32.mrb[6].mxu1 }
 0x6e4   :  { %v1157_v37 = vmul.f32 0.35355338, %v10669_v36  ;;  %v1056_v38 = vpop.f32.mrb[7].mxu1 }
 0x6e5   :  { %v1156_v39 = vmul.f32 0.35355338, %v1056_v38 }
 0x6e6   :  { %v1163_v40 = vsel %vm359_vm5, %v1157_v37, -inf }
 0x6e7   :  { %1164 = vmax.xlane.f32.xlu1 %v1163_v40  ;;  %v1160_v41 = vsel %vm359_vm5, %v1156_v39, -inf }
 0x6e8   :  { %1161 = vmax.xlane.f32.xlu0 %v1160_v41 }
 0x6ed   :  { %v13007_v42 = vpop.f32.mrb[8].mxu0 }
 0x6ee   :  { %v13009_v43 = vpop.f32.mrb[9].mxu0 }
 0x6f5   :  { %v10676_v44 = vpop.f32.mrb[10].mxu0 }
 0x6f6   :  { %v1147_v45 = vpop.f32.mrb[11].mxu0  ;;  %v1159_v47 = vmul.f32 0.35355338, %v10676_v44 }
 0x6f7   :  { %v1158_v46 = vmul.f32 0.35355338, %v1147_v45 }
 0x6f8   :  { %v1169_v49 = vsel %vm359_vm5, %v1159_v47, -inf }
 0x6f9   :  { %v1166_v48 = vsel %vm359_vm5, %v1158_v46, -inf }
 0x6fa   :  { %1167 = vmax.xlane.f32.xlu0 %v1166_v48 }
 0x6fe   :  { %1170 = vmax.xlane.f32.xlu0 %v1169_v49 }
 0x774   :  { %v1165_v50 = vpop.xlane.xlu1 %1164 }
 0x775   :  { %v1173_v51 = vsub.f32 %v1157_v37, %v1165_v50  ;;  %v1162_v52 = vpop.xlane.xlu0 %1161 }
 0x776   :  { %v1172_v53 = vsub.f32 %v1156_v39, %v1162_v52 }
 0x777   :  { %v1178_v54 = vmul.f32 1.442695, %v1173_v51 }
 0x778   :  { %v1176_v55 = vmul.f32 1.442695, %v1172_v53 }
 0x779   :  { %11830 = vpow2.f32 %v1178_v54 }
 0x77a   :  { %11832 = vpow2.f32 %v1176_v55 }
 0x783   :  { %v11831_v56 = vpop.eup %11830 }
 0x784   :  { %v11833_v57 = vpop.eup %11832  ;;  %v1187_v58 = vsel %vm359_vm5, %v11831_v56, 0.0 }
 0x785   :  { %1188 = vadd.xlane.f32.xlu0 %v1187_v58  ;;  %v1184_v59 = vsel %vm359_vm5, %v11833_v57, 0.0 }
 0x786   :  { %1185 = vadd.xlane.f32.xlu1 %v1184_v59 }
 0x787   :  { %v1168_v60 = vpop.xlane.xlu0 %1167 }
 0x788   :  { %v1174_v4 = vsub.f32 %v1158_v46, %v1168_v60 }
 0x78a   :  { %v1180_v6 = vmul.f32 1.442695, %v1174_v4 }
 0x78b   :  { %v1171_v63 = vpop.xlane.xlu0 %1170 }
 0x78c   :  { %v1175_v1 = vsub.f32 %v1159_v47, %v1171_v63 }
 0x78e   :  { %v1182_v3 = vmul.f32 1.442695, %v1175_v1 }
 0x790   :  { %11834 = vpow2.f32 %v1182_v3 }
 0x791   :  { %11836 = vpow2.f32 %v1180_v6 }
 0x797   :  { %11674 = vrot.lane.b32.xlu1 %v12927_v8, %s12472_s26 }
 0x79a   :  { %v11835_v9 = vpop.eup %11834 }
 0x79b   :  { %11684 = vrot.lane.b32.xlu1 %v12927_v8, %s12473_s17  ;;  %11679 = vrot.lane.b32.xlu0 %v12937_v13, %s12472_s26  ;;  %v1193_v11 = vsel %vm359_vm5, %v11835_v9, 0.0  ;;  %v11837_v14 = vpop.eup %11836 }
 0x79c   :  { %v1190_v15 = vsel %vm359_vm5, %v11837_v14, 0.0 }
 0x79f   :  { %11689 = vrot.lane.b32.xlu1 %v12937_v13, %s12473_s17 }
 0x7a3   :  { %1380 = vrot.lane.b32.xlu1 %v12919_v5, %s12474_s13 }
 0x7ba   :  { %1194 = vadd.xlane.f32.xlu0 %v1193_v11 }
 0x7c7   :  { %1191 = vadd.xlane.f32.xlu1 %v1190_v15 }
 0x7d0   :  { %1378 = vrot.lane.b32.xlu0 %v12921_v7, %s12474_s13 }
 0x7d4   :  { %1469 = vrot.lane.b32.xlu0 %v12933_v12, %s12474_s13 }
 0x7d8   :  { %1471 = vrot.lane.b32.xlu1 %v12931_v10, %s12474_s13 }
 0x812   :  { %v1189_v16 = vpop.xlane.xlu0 %1188 }
 0x813   :  { %11838 = vrcp.f32 %v1189_v16  ;;  %v1186_v18 = vpop.xlane.xlu1 %1185 }
 0x814   :  { %11840 = vrcp.f32 %v1186_v18 }
 0x816   :  { %v11680_v19 = vpop.permute.xlu0 %11679 }
 0x817   :  { %v11682_v20 = vunpack.i.h.bf16 %v11680_v19  ;;  %v11681_v21 = vunpack.i.l.bf16 %v11680_v19  ;;  %v11675_v22 = vpop.permute.xlu1 %11674 }
 0x818   :  { %v11677_v23 = vunpack.i.h.bf16 %v11675_v22  ;;  %v11676_v24 = vunpack.i.l.bf16 %v11675_v22 }
 0x819   :  { %v11329_v25 = vpack.c.bf16 %v11682_v20, %v11681_v21 }
 0x81a   :  { %v11325_v26 = vpack.c.bf16 %v11677_v23, %v11676_v24 }
 0x81b   :  { %v11685_v27 = vpop.permute.xlu1 %11684  ;;  %11330 = vmatprep.subr.bf16.mxu0 %v11329_v25 }
 0x81c   :  { %v11687_v28 = vunpack.i.h.bf16 %v11685_v27  ;;  %v11686_v29 = vunpack.i.l.bf16 %v11685_v27  ;;  %11326 = vmatprep.subr.bf16.mxu1 %v11325_v26  ;;  %11332 = vmatpush3.bf16.msra.mxu0 %v11329_v25 }
 0x81d   :  { %v11839_v30 = vpop.eup %11838  ;;  %11328 = vmatpush3.bf16.msra.mxu1 %v11325_v26 }
 0x81e   :  { %v11841_v31 = vpop.eup %11840  ;;  %v11333_v32 = vpack.c.bf16 %v11687_v28, %v11686_v29  ;;  %v1199_v39 = vmul.f32 %v11839_v30, %v11831_v56 }
 0x81f   :  { %v11690_v33 = vpop.permute.xlu1 %11689  ;;  %v1197_v36 = vmul.f32 %v11841_v31, %v11833_v57 }
 0x820   :  { %v11692_v37 = vunpack.i.h.bf16 %v11690_v33  ;;  %v11691_v38 = vunpack.i.l.bf16 %v11690_v33  ;;  %11335 = vmatprep.subr.msk.bf16.mxu1 %vm12945_vm7, %v11333_v32 }
 0x821   :  { %10681 = vmatprep.mubr.msk.f32.mxu1 %vm359_vm5, %v1197_v36 }
 0x822   :  { %v11339_v40 = vpack.c.bf16 %v11692_v37, %v11691_v38  ;;  %10682 = vmatmul.mubr.msk.f32.vlgmr.msra.gmra.mrb[8].mxu1 %vm359_vm5, %v1199_v39 }
 0x823   :  { %v1381_v45 = vpop.permute.xlu1 %1380 }
 0x824   :  { %11341 = vmatprep.subr.msk.bf16.mxu0 %vm12945_vm7, %v11339_v40 }
 0x826   :  { %11338 = vmatpush3.bf16.xpose.msk.msra.mxu1 %vm12945_vm7, %v11333_v32 }
 0x847   :  { %v1195_v41 = vpop.xlane.xlu0 %1194 }
 0x848   :  { %11842 = vrcp.f32 %v1195_v41 }
 0x84b   :  { %v1379_v44 = vpop.permute.xlu0 %1378 }
 0x84c   :  { %10695 = vmatprep.mubr.msk.f32.mxu1 %vm349_vm3, %v1379_v44 }
 0x84d   :  { %10696 = vmatmul.mubr.msk.f32.vlgmr.msra.gmra.mrb[10].mxu1 %vm349_vm3, %v1381_v45 }
 0x84f   :  { %v1470_v51 = vpop.permute.xlu0 %1469 }
 0x852   :  { %v11843_v47 = vpop.eup %11842 }
 0x853   :  { %v1203_v50 = vmul.f32 %v11843_v47, %v11835_v9 }
 0x854   :  { %v1192_v46 = vpop.xlane.xlu1 %1191 }
 0x855   :  { %11844 = vrcp.f32 %v1192_v46 }
 0x858   :  { %v1472_v52 = vpop.permute.xlu1 %1471 }
 0x85f   :  { %v11845_v48 = vpop.eup %11844 }
 0x860   :  { %v1201_v49 = vmul.f32 %v11845_v48, %v11837_v14 }
 0x862   :  { %10688 = vmatprep.mubr.msk.f32.mxu0 %vm359_vm5, %v1201_v49 }
 0x863   :  { %10689 = vmatmul.mubr.msk.f32.vlgmr.msra.gmra.mrb[12].mxu0 %vm359_vm5, %v1203_v50 }
 0x864   :  { %11344 = vmatpush3.bf16.xpose.msk.msra.mxu0 %vm12945_vm7, %v11339_v40  ;;  %10702 = vmatprep.mubr.msk.f32.mxu0 %vm349_vm3, %v1470_v51 }
 0x86b   :  { %10703 = vmatmul.mubr.msk.f32.vlgmr.msra.gmra.mrb[14].mxu0 %vm349_vm3, %v1472_v52 }
 0x8f5   :  { %v13049_v53 = vpop.f32.mrb[8].mxu1 }
 0x8f6   :  { %v13051_v54 = vpop.f32.mrb[9].mxu1 }
 0x920   :  { %v10697_v55 = vpop.f32.mrb[10].mxu1 }
 0x921   :  { %v1561_v56 = vmul.f32 0.35355338, %v10697_v55  ;;  %v1460_v57 = vpop.f32.mrb[11].mxu1 }
 0x922   :  { %v1560_v58 = vmul.f32 0.35355338, %v1460_v57 }
 0x923   :  { %v1567_v59 = vsel %vm359_vm5, %v1561_v56, -inf }
 0x924   :  { %1568 = vmax.xlane.f32.xlu1 %v1567_v59  ;;  %v1564_v60 = vsel %vm359_vm5, %v1560_v58, -inf }
 0x925   :  { %1565 = vmax.xlane.f32.xlu0 %v1564_v60 }
 0x936   :  { %v13055_v63 = vpop.f32.mrb[12].mxu0 }
 0x937   :  { %v13057_v1 = vpop.f32.mrb[13].mxu0 }
 0x93e   :  { %v10704_v3 = vpop.f32.mrb[14].mxu0 }
 0x93f   :  { %v1551_v4 = vpop.f32.mrb[15].mxu0  ;;  %v1563_v9 = vmul.f32 0.35355338, %v10704_v3 }
 0x940   :  { %v1562_v6 = vmul.f32 0.35355338, %v1551_v4 }
 0x941   :  { %v1573_v14 = vsel %vm359_vm5, %v1563_v9, -inf }
 0x942   :  { %v1570_v11 = vsel %vm359_vm5, %v1562_v6, -inf }
 0x943   :  { %1571 = vmax.xlane.f32.xlu0 %v1570_v11 }
 0x947   :  { %1574 = vmax.xlane.f32.xlu0 %v1573_v14 }
 0x9b1   :  { %v1569_v15 = vpop.xlane.xlu1 %1568 }
 0x9b2   :  { %v1577_v16 = vsub.f32 %v1561_v56, %v1569_v15  ;;  %v1566_v18 = vpop.xlane.xlu0 %1565 }
 0x9b3   :  { %v1576_v19 = vsub.f32 %v1560_v58, %v1566_v18 }
 0x9b4   :  { %v1582_v20 = vmul.f32 1.442695, %v1577_v16 }
 0x9b5   :  { %v1580_v21 = vmul.f32 1.442695, %v1576_v19 }
 0x9b6   :  { %11846 = vpow2.f32 %v1582_v20 }
 0x9b7   :  { %11848 = vpow2.f32 %v1580_v21 }
 0x9c0   :  { %v11847_v22 = vpop.eup %11846 }
 0x9c1   :  { %v11849_v23 = vpop.eup %11848  ;;  %v1591_v24 = vsel %vm359_vm5, %v11847_v22, 0.0 }
 0x9c2   :  { %1592 = vadd.xlane.f32.xlu0 %v1591_v24  ;;  %v1588_v25 = vsel %vm359_vm5, %v11849_v23, 0.0 }
 0x9c3   :  { %1589 = vadd.xlane.f32.xlu1 %v1588_v25 }
 0x9d0   :  { %v1572_v26 = vpop.xlane.xlu0 %1571 }
 0x9d1   :  { %v1578_v30 = vsub.f32 %v1562_v6, %v1572_v26 }
 0x9d3   :  { %v1584_v31 = vmul.f32 1.442695, %v1578_v30 }
 0x9d4   :  { %11694 = vrot.lane.b32.xlu1 %v12927_v8, %s12475_s18  ;;  %v1575_v27 = vpop.xlane.xlu0 %1574 }
 0x9d5   :  { %v1579_v28 = vsub.f32 %v1563_v9, %v1575_v27 }
 0x9d7   :  { %v1586_v29 = vmul.f32 1.442695, %v1579_v28 }
 0x9d8   :  { %11704 = vrot.lane.b32.xlu1 %v12927_v8, %s12476_s5  ;;  %11699 = vrot.lane.b32.xlu0 %v12937_v13, %s12475_s18 }
 0x9d9   :  { %11850 = vpow2.f32 %v1586_v29 }
 0x9da   :  { %11852 = vpow2.f32 %v1584_v31 }
 0x9dc   :  { %11709 = vrot.lane.b32.xlu1 %v12937_v13, %s12476_s5 }
 0x9e0   :  { %1784 = vrot.lane.b32.xlu1 %v12919_v5, %s12477_s22 }
 0x9e3   :  { %v11851_v32 = vpop.eup %11850 }
 0x9e4   :  { %v1597_v33 = vsel %vm359_vm5, %v11851_v32, 0.0  ;;  %v11853_v36 = vpop.eup %11852 }
 0x9e5   :  { %v1594_v37 = vsel %vm359_vm5, %v11853_v36, 0.0 }
 0x9f7   :  { %1598 = vadd.xlane.f32.xlu0 %v1597_v33 }
 0xa04   :  { %1595 = vadd.xlane.f32.xlu1 %v1594_v37 }
 0xa0d   :  { %1782 = vrot.lane.b32.xlu0 %v12921_v7, %s12477_s22 }
 0xa11   :  { %1873 = vrot.lane.b32.xlu0 %v12933_v12, %s12477_s22 }
 0xa15   :  { %1875 = vrot.lane.b32.xlu1 %v12931_v10, %s12477_s22 }
 0xa4f   :  { %v1593_v5 = vpop.xlane.xlu0 %1592 }
 0xa50   :  { %11854 = vrcp.f32 %v1593_v5  ;;  %v1590_v38 = vpop.xlane.xlu1 %1589 }
 0xa51   :  { %11856 = vrcp.f32 %v1590_v38 }
 0xa53   :  { %v11700_v39 = vpop.permute.xlu0 %11699 }
 0xa54   :  { %v11702_v40 = vunpack.i.h.bf16 %v11700_v39  ;;  %v11701_v41 = vunpack.i.l.bf16 %v11700_v39  ;;  %v11695_v44 = vpop.permute.xlu1 %11694 }
 0xa55   :  { %v11697_v45 = vunpack.i.h.bf16 %v11695_v44  ;;  %v11696_v46 = vunpack.i.l.bf16 %v11695_v44 }
 0xa56   :  { %v11349_v47 = vpack.c.bf16 %v11702_v40, %v11701_v41 }
 0xa57   :  { %v11345_v48 = vpack.c.bf16 %v11697_v45, %v11696_v46 }
 0xa58   :  { %v11705_v49 = vpop.permute.xlu1 %11704  ;;  %11350 = vmatprep.subr.bf16.mxu0 %v11349_v47 }
 0xa59   :  { %v11707_v7 = vunpack.i.h.bf16 %v11705_v49  ;;  %v11706_v50 = vunpack.i.l.bf16 %v11705_v49  ;;  %11346 = vmatprep.subr.bf16.mxu1 %v11345_v48  ;;  %11352 = vmatpush3.bf16.msra.mxu0 %v11349_v47 }
 0xa5a   :  { %v11855_v12 = vpop.eup %11854  ;;  %11348 = vmatpush3.bf16.msra.mxu1 %v11345_v48 }
 0xa5b   :  { %v11857_v10 = vpop.eup %11856  ;;  %v11353_v51 = vpack.c.bf16 %v11707_v7, %v11706_v50  ;;  %v1603_v58 = vmul.f32 %v11855_v12, %v11847_v22 }
 0xa5c   :  { %v11710_v52 = vpop.permute.xlu1 %11709  ;;  %v1601_v55 = vmul.f32 %v11857_v10, %v11849_v23 }
 0xa5d   :  { %v11712_v56 = vunpack.i.h.bf16 %v11710_v52  ;;  %v11711_v57 = vunpack.i.l.bf16 %v11710_v52  ;;  %11355 = vmatprep.subr.msk.bf16.mxu1 %vm12945_vm7, %v11353_v51 }
 0xa5e   :  { %10709 = vmatprep.mubr.msk.f32.mxu1 %vm359_vm5, %v1601_v55 }
 0xa5f   :  { %v11359_v59 = vpack.c.bf16 %v11712_v56, %v11711_v57  ;;  %10710 = vmatmul.mubr.msk.f32.vlgmr.msra.gmra.mrb[12].mxu1 %vm359_vm5, %v1603_v58 }
 0xa60   :  { %v1785_v4 = vpop.permute.xlu1 %1784 }
 0xa61   :  { %11361 = vmatprep.subr.msk.bf16.mxu0 %vm12945_vm7, %v11359_v59 }
 0xa63   :  { %11358 = vmatpush3.bf16.xpose.msk.msra.mxu1 %vm12945_vm7, %v11353_v51 }
 0xa84   :  { %v1599_v60 = vpop.xlane.xlu0 %1598 }
 0xa85   :  { %11858 = vrcp.f32 %v1599_v60 }
 0xa88   :  { %v1783_v3 = vpop.permute.xlu0 %1782 }
 0xa89   :  { %10723 = vmatprep.mubr.msk.f32.mxu1 %vm349_vm3, %v1783_v3 }
 0xa8a   :  { %10724 = vmatmul.mubr.msk.f32.vlgmr.msra.gmra.mrb[14].mxu1 %vm349_vm3, %v1785_v4 }
 0xa8c   :  { %v1874_v16 = vpop.permute.xlu0 %1873 }
 0xa8f   :  { %v11859_v9 = vpop.eup %11858 }
 0xa90   :  { %v1607_v15 = vmul.f32 %v11859_v9, %v11851_v32 }
 0xa91   :  { %v1596_v6 = vpop.xlane.xlu1 %1595 }
 0xa92   :  { %11860 = vrcp.f32 %v1596_v6 }
 0xa95   :  { %v1876_v18 = vpop.permute.xlu1 %1875 }
 0xa9c   :  { %v11861_v11 = vpop.eup %11860 }
 0xa9d   :  { %v1605_v14 = vmul.f32 %v11861_v11, %v11853_v36 }
 0xa9f   :  { %10716 = vmatprep.mubr.msk.f32.mxu0 %vm359_vm5, %v1605_v14 }
 0xaa0   :  { %10717 = vmatmul.mubr.msk.f32.vlgmr.msra.gmra.mrb[16].mxu0 %vm359_vm5, %v1607_v15 }
 0xaa1   :  { %11364 = vmatpush3.bf16.xpose.msk.msra.mxu0 %vm12945_vm7, %v11359_v59  ;;  %10730 = vmatprep.mubr.msk.f32.mxu0 %vm349_vm3, %v1874_v16 }
 0xaa8   :  { %10731 = vmatmul.mubr.msk.f32.vlgmr.msra.gmra.mrb[18].mxu0 %vm349_vm3, %v1876_v18 }
 0xb32   :  { %v10711_v19 = vpop.f32.mrb[12].mxu1 }
 0xb33   :  { %v1686_v20 = vpop.f32.mrb[13].mxu1 }
 0xb5d   :  { %v10725_v21 = vpop.f32.mrb[14].mxu1 }
 0xb5e   :  { %v1965_v22 = vmul.f32 0.35355338, %v10725_v21  ;;  %v1864_v23 = vpop.f32.mrb[15].mxu1 }
 0xb5f   :  { %v1964_v24 = vmul.f32 0.35355338, %v1864_v23  ;;  %v467_v23 = vld [vmem:[#allocation7 + $0x8] sm:$0xff] }
 0xb60   :  { %v1971_v25 = vsel %vm359_vm5, %v1965_v22, -inf }
 0xb61   :  { %1972 = vmax.xlane.f32.xlu1 %v1971_v25  ;;  %v1968_v26 = vsel %vm359_vm5, %v1964_v24, -inf }
 0xb62   :  { %1969 = vmax.xlane.f32.xlu0 %v1968_v26  ;;  %v469_v26 = vld [vmem:[#allocation7 + $0x18] sm:$0xff] }
 0xb73   :  { %v13099_v27 = vpop.f32.mrb[16].mxu0 }
 0xb74   :  { %v13101_v28 = vpop.f32.mrb[17].mxu0 }
 0xb7b   :  { %v10732_v29 = vpop.f32.mrb[18].mxu0 }
 0xb7c   :  { %v1955_v30 = vpop.f32.mrb[19].mxu0  ;;  %v1967_v32 = vmul.f32 0.35355338, %v10732_v29 }
 0xb7d   :  { %v1966_v31 = vmul.f32 0.35355338, %v1955_v30 }
 0xb7e   :  { %v1977_v36 = vsel %vm359_vm5, %v1967_v32, -inf }
 0xb7f   :  { %v1974_v33 = vsel %vm359_vm5, %v1966_v31, -inf }
 0xb80   :  { %1975 = vmax.xlane.f32.xlu0 %v1974_v33 }
 0xb84   :  { %1978 = vmax.xlane.f32.xlu0 %v1977_v36 }
 0xbee   :  { %v1973_v37 = vpop.xlane.xlu1 %1972 }
 0xbef   :  { %v1981_v5 = vsub.f32 %v1965_v22, %v1973_v37  ;;  %v1970_v38 = vpop.xlane.xlu0 %1969  ;;  %v466_v22 = vld [vmem:[#allocation7] sm:$0xff] }
 0xbf0   :  { %v1980_v39 = vsub.f32 %v1964_v24, %v1970_v38  ;;  %v468_v24 = vld [vmem:[#allocation7 + $0x10] sm:$0xff]  ;;  %v11373_v25 = vpack.c.bf16 %v467_v23, %v466_v22 }
 0xbf1   :  { %v1986_v40 = vmul.f32 1.442695, %v1981_v5  ;;  %v11377_v29 = vpack.c.bf16 %v469_v26, %v468_v24 }
 0xbf2   :  { %v1984_v41 = vmul.f32 1.442695, %v1980_v39 }
 0xbf3   :  { %11862 = vpow2.f32 %v1986_v40 }
 0xbf4   :  { %11864 = vpow2.f32 %v1984_v41 }
 0xbfd   :  { %v11863_v44 = vpop.eup %11862 }
 0xbfe   :  { %v11865_v45 = vpop.eup %11864  ;;  %v1995_v46 = vsel %vm359_vm5, %v11863_v44, 0.0 }
 0xbff   :  { %1996 = vadd.xlane.f32.xlu0 %v1995_v46  ;;  %v1992_v47 = vsel %vm359_vm5, %v11865_v45, 0.0 }
 0xc00   :  { %1993 = vadd.xlane.f32.xlu1 %v1992_v47 }
 0xc0d   :  { %v1976_v48 = vpop.xlane.xlu0 %1975 }
 0xc0e   :  { %v1982_v49 = vsub.f32 %v1966_v31, %v1976_v48 }
 0xc10   :  { %v1988_v7 = vmul.f32 1.442695, %v1982_v49 }
 0xc11   :  { %v1979_v50 = vpop.xlane.xlu0 %1978 }
 0xc12   :  { %11866 = vpow2.f32 %v1988_v7  ;;  %v1983_v12 = vsub.f32 %v1967_v32, %v1979_v50 }
 0xc14   :  { %v1990_v10 = vmul.f32 1.442695, %v1983_v12 }
 0xc16   :  { %11868 = vpow2.f32 %v1990_v10 }
 0xc1c   :  { %v11867_v51 = vpop.eup %11866 }
 0xc1d   :  { %v1998_v52 = vsel %vm359_vm5, %v11867_v51, 0.0 }
 0xc1e   :  { %1999 = vadd.xlane.f32.xlu1 %v1998_v52  ;;  %v2247_v52 = vlaneseq }
 0xc20   :  { %v11869_v55 = vpop.eup %11868 }
 0xc21   :  { %v2001_v56 = vsel %vm359_vm5, %v11869_v55, 0.0 }
 0xc22   :  { %2002 = vadd.xlane.f32.xlu0 %v2001_v56 }
 0xc2f   :  { %11714 = vrot.lane.b32.xlu1 %v12927_v8, %s12478_s10 }
 0xc33   :  { %2190 = vrot.lane.b32.xlu1 %v13051_v54, %s12451_s1 }
 0xc37   :  { %2192 = vrot.lane.b32.xlu1 %v13049_v53, %s12451_s1 }
 0xc38   :  { %11719 = vrot.lane.b32.xlu0 %v12937_v13, %s12478_s10 }
 0xc3b   :  { %2208 = vrot.lane.b32.xlu1 %v10711_v19, %s12458_s30 }
 0xc3c   :  { %2206 = vrot.lane.b32.xlu0 %v1686_v20, %s12458_s30 }
 0xc8c   :  { %v1997_v8 = vpop.xlane.xlu0 %1996 }
 0xc8d   :  { %v1994_v57 = vpop.xlane.xlu1 %1993 }
 0xc8e   :  { %11870 = vrcp.f32 %v1994_v57 }
 0xc8f   :  { %11872 = vrcp.f32 %v1997_v8 }
 0xc98   :  { %v11871_v58 = vpop.eup %11870 }
 0xc99   :  { %v2005_v59 = vmul.f32 %v11871_v58, %v11865_v45  ;;  %v11873_v6 = vpop.eup %11872 }
 0xc9a   :  { %v2007_v16 = vmul.f32 %v11873_v6, %v11863_v44 }
 0xc9b   :  { %10737 = vmatprep.mubr.msk.f32.mxu1 %vm359_vm5, %v2005_v59 }
 0xcab   :  { %v2000_v60 = vpop.xlane.xlu1 %1999 }
 0xcac   :  { %11874 = vrcp.f32 %v2000_v60 }
 0xcaf   :  { %v11715_v54 = vpop.permute.xlu1 %11714  ;;  %v2003_v3 = vpop.xlane.xlu0 %2002 }
 0xcb0   :  { %v11717_v53 = vunpack.i.h.bf16 %v11715_v54  ;;  %v11716_v4 = vunpack.i.l.bf16 %v11715_v54  ;;  %11876 = vrcp.f32 %v2003_v3 }
 0xcb2   :  { %v11365_v13 = vpack.c.bf16 %v11717_v53, %v11716_v4 }
 0xcb3   :  { %v11720_v9 = vpop.permute.xlu0 %11719  ;;  %v2191_v36 = vpop.permute.xlu1 %2190 }
 0xcb4   :  { %v11722_v11 = vunpack.i.h.bf16 %v11720_v9  ;;  %v11721_v14 = vunpack.i.l.bf16 %v11720_v9  ;;  %11366 = vmatprep.subr.bf16.mxu1 %v11365_v13 }
 0xcb5   :  { %11368 = vmatpush3.bf16.msra.mxu1 %v11365_v13 }
 0xcb6   :  { %v11875_v15 = vpop.eup %11874  ;;  %v11369_v18 = vpack.c.bf16 %v11722_v11, %v11721_v14  ;;  %11374 = vmatprep.subr.bf16.mxu1 %v11373_v25 }
 0xcb7   :  { %v2009_v19 = vmul.f32 %v11875_v15, %v11867_v51  ;;  %v2193_v37 = vpop.permute.xlu1 %2192  ;;  %v2207_v38 = vpop.permute.xlu0 %2206 }
 0xcb8   :  { %10738 = vmatmul.mubr.msk.f32.vlgmr.msra.gmra.mrb[16].mxu1 %vm359_vm5, %v2007_v16  ;;  %11370 = vmatprep.subr.bf16.mxu0 %v11369_v18  ;;  %v2235_v39 = vsel %vm349_vm3, %v13001_v34, %v2193_v37 }
 0xcb9   :  { %11372 = vmatpush3.bf16.msra.mxu0 %v11369_v18  ;;  %10744 = vmatprep.mubr.msk.f32.mxu0 %vm359_vm5, %v2009_v19 }
 0xcba   :  { %v11877_v20 = vpop.eup %11876  ;;  %11376 = vmatpush3.bf16.msra.mxu1 %v11373_v25 }
 0xcbb   :  { %v2011_v21 = vmul.f32 %v11877_v20, %v11869_v55  ;;  %11378 = vmatprep.subr.bf16.mxu1 %v11377_v29  ;;  %v2209_v5 = vpop.permute.xlu1 %2208 }
 0xcbd   :  { %10745 = vmatmul.mubr.msk.f32.vlgmr.msra.gmra.mrb[20].mxu0 %vm359_vm5, %v2011_v21 }
 0xcbe   :  { %11380 = vmatpush3.bf16.msra.mxu1 %v11377_v29 }
 0xd8b   :  { %v10739_v30 = vpop.f32.mrb[16].mxu1 }
 0xd8c   :  { %2224 = vrot.lane.b32.xlu1 %v10739_v30, %s14365_s29  ;;  %v2090_v31 = vpop.f32.mrb[17].mxu1 }
 0xd8d   :  { %2222 = vrot.lane.b32.xlu0 %v2090_v31, %s14365_s29 }
 0xd90   :  { %2196 = vrot.lane.b32.xlu1 %v13055_v63, %s12451_s1  ;;  %v10746_v32 = vpop.f32.mrb[20].mxu0  ;;  %v2234_v63 = vsel %vm349_vm3, %v13003_v35, %v2191_v36 }
 0xd91   :  { %2194 = vrot.lane.b32.xlu0 %v13057_v1, %s12451_s1  ;;  %v2177_v33 = vpop.f32.mrb[21].mxu0 }
 0xd94   :  { %2212 = vrot.lane.b32.xlu1 %v13099_v27, %s12458_s30  ;;  %v2238_v27 = vsel %vm359_vm5, %v2234_v63, %v2207_v38  ;;  %v2422_v38 = vld [vmem:[%s14340_s9 + $0x8] sm:$0xff] }
 0xd95   :  { %2210 = vrot.lane.b32.xlu0 %v13101_v28, %s12458_s30  ;;  %v2239_v28 = vsel %vm359_vm5, %v2235_v39, %v2209_v5  ;;  %v2421_v5 = vld [vmem:[%s14340_s9] sm:$0xff]  ;;  %v2424_v39 = vld [vmem:[%s14340_s9 + $0x18] sm:$0xff] }
 0xd96   :  { %v11381_v63 = vpack.c.bf16 %v2422_v38, %v2421_v5 }
 0xd98   :  { %2228 = vrot.lane.b32.xlu1 %v10746_v32, %s14365_s29  ;;  %11382 = vmatprep.subr.bf16.mxu0 %v11381_v63 }
 0xd99   :  { %2226 = vrot.lane.b32.xlu0 %v2177_v33, %s14365_s29  ;;  %11384 = vmatpush3.bf16.msra.mxu0 %v11381_v63 }
 0xdfe   :  { %v2225_v1 = vpop.permute.xlu1 %2224 }
 0xdff   :  { %v2223_v40 = vpop.permute.xlu0 %2222  ;;  %v2244_v44 = vsel %vm2242_vm8, %v2239_v28, %v2225_v1  ;;  %v2423_v1 = vld [vmem:[%s14340_s9 + $0x10] sm:$0xff] }
 0xe00   :  { %v2243_v41 = vsel %vm2242_vm8, %v2238_v27, %v2223_v40  ;;  %v11385_v27 = vpack.c.bf16 %v2424_v39, %v2423_v1 }
 0xe01   :  { %10755 = vmatprep.mubr.msk.f32.mxu1 %vm476_vm6, %v2243_v41 }
 0xe02   :  { %v2197_v45 = vpop.permute.xlu1 %2196  ;;  %10756 = vmatmul.mubr.msk.f32.vlgmr.msra.gmra.mrb[18].mxu1 %vm476_vm6, %v2244_v44  ;;  %11386 = vmatprep.subr.bf16.mxu0 %v11385_v27 }
 0xe03   :  { %v2195_v46 = vpop.permute.xlu0 %2194  ;;  %v2237_v49 = vsel %vm349_vm3, %v13007_v42, %v2197_v45  ;;  %v13161_v42 = vld [vmem:[#allocation12] sm:$0xff]  ;;  %11388 = vmatpush3.bf16.msra.mxu0 %v11385_v27 }
 0xe04   :  { %v2236_v34 = vsel %vm349_vm3, %v13009_v43, %v2195_v46  ;;  %v13156_v43 = vshrl.u32 %v2247_v52, 7 }
 0xe06   :  { %v2213_v35 = vpop.permute.xlu1 %2212  ;;  %v13159_v55 = vsub.s32 0, %v13156_v43 }
 0xe07   :  { %v2211_v47 = vpop.permute.xlu0 %2210  ;;  %v2241_v12 = vsel %vm359_vm5, %v2237_v49, %v2213_v35  ;;  %v13190_v35 = vsub.s32 1, %v13156_v43 }
 0xe08   :  { %v2240_v7 = vsel %vm359_vm5, %v2236_v34, %v2211_v47  ;;  %v2250_v56 = vrot.slane %v13161_v42, %v13159_v55  ;;  %v13193_v34 = vsub.s32 2, %v13156_v43 }
 0xe09   :  { %v2408_v49 = vrot.slane %v13161_v42, %v13190_v35 }
 0xe0a   :  { %v2229_v48 = vpop.permute.xlu1 %2228 }
 0xe0b   :  { %v2227_v50 = vpop.permute.xlu0 %2226  ;;  %v2246_v51 = vsel %vm2242_vm8, %v2241_v12, %v2229_v48 }
 0xe0c   :  { %v2245_v10 = vsel %vm2242_vm8, %v2240_v7, %v2227_v50 }
 0xe0d   :  { %10758 = vmatprep.mubr.msk.f32.mxu1 %vm476_vm6, %v2245_v10 }
 0xe0e   :  { %10759 = vmatmul.mubr.msk.f32.gmra.mrb[20].mxu1 %vm476_vm6, %v2246_v51 }
 0xed5   :  { %v10757_v57 = vpop.f32.mrb[18].mxu1 }
 0xed6   :  { %v2335_v58 = vadd.f32 %v10757_v57, %v2250_v56  ;;  %v2329_v59 = vpop.f32.mrb[19].mxu1  ;;  %v2416_v57 = vrot.slane %v13161_v42, %v13193_v34 }
 0xed7   :  { %v2330_v8 = vadd.f32 %v2329_v59, %v2250_v56 }
 0xed8   :  { %v2349_v60 = vadd.f32 %v2335_v58, %v12905_v62 }
 0xed9   :  { %v2348_v54 = vadd.f32 %v2330_v8, %v12903_v61 }
 0xeda   :  { %v2355_v3 = vsel %vm476_vm6, %v2349_v60, 0.0 }
 0xedb   :  { %2356 = vadd.xlane.f32.xlu1 %v2355_v3  ;;  %v2352_v53 = vsel %vm476_vm6, %v2348_v54, 0.0 }
 0xedc   :  { %2353 = vadd.xlane.f32.xlu0 %v2352_v53 }
 0xee1   :  { %v10760_v4 = vpop.f32.mrb[20].mxu1 }
 0xee2   :  { %v2339_v13 = vpop.f32.mrb[21].mxu1  ;;  %v2345_v6 = vadd.f32 %v10760_v4, %v2250_v56 }
 0xee3   :  { %v2340_v9 = vadd.f32 %v2339_v13, %v2250_v56 }
 0xee4   :  { %v2351_v15 = vadd.f32 %v2345_v6, %v12911_v0 }
 0xee5   :  { %v2350_v11 = vadd.f32 %v2340_v9, %v12913_v2 }
 0xee6   :  { %v2361_v62 = vsel %vm476_vm6, %v2351_v15, 0.0 }
 0xee7   :  { %v2358_v14 = vsel %vm476_vm6, %v2350_v11, 0.0 }
 0xee8   :  { %2359 = vadd.xlane.f32.xlu0 %v2358_v14 }
 0xeec   :  { %2362 = vadd.xlane.f32.xlu0 %v2361_v62  ;;  %v2562_v62 = vld [vmem:[#allocation9] sm:$0xff] }
 0xf68   :  { %v2357_v61 = vpop.xlane.xlu1 %2356 }
 0xf69   :  { %v2366_v16 = vmul.f32 0.03125, %v2357_v61  ;;  %v2354_v18 = vpop.xlane.xlu0 %2353  ;;  %v2563_v61 = vld [vmem:[#allocation9 + $0x8] sm:$0xff] }
 0xf6a   :  { %v2365_v19 = vmul.f32 0.03125, %v2354_v18  ;;  %v2564_v18 = vld [vmem:[#allocation9 + $0x10] sm:$0xff] }
 0xf6b   :  { %v2370_v20 = vsub.f32 %v2349_v60, %v2366_v16  ;;  %v11389_v16 = vpack.c.bf16 %v2563_v61, %v2562_v62 }
 0xf6c   :  { %v2369_v21 = vsub.f32 %v2348_v54, %v2365_v19  ;;  %v2565_v19 = vld [vmem:[#allocation9 + $0x18] sm:$0xff] }
 0xf6d   :  { %v2374_v22 = vmul.f32 %v2370_v20, %v2370_v20  ;;  %11390 = vmatprep.subr.bf16.mxu1 %v11389_v16 }
 0xf6e   :  { %v2373_v23 = vmul.f32 %v2369_v21, %v2369_v21  ;;  %11392 = vmatpush3.bf16.msra.mxu1 %v11389_v16 }
 0xf6f   :  { %v2380_v24 = vsel %vm476_vm6, %v2374_v22, 0.0 }
 0xf70   :  { %2381 = vadd.xlane.f32.xlu0 %v2380_v24  ;;  %v2377_v2 = vsel %vm476_vm6, %v2373_v23, 0.0 }
 0xf71   :  { %2378 = vadd.xlane.f32.xlu1 %v2377_v2 }
 0xf75   :  { %v2360_v25 = vpop.xlane.xlu0 %2359 }
 0xf76   :  { %v2367_v0 = vmul.f32 0.03125, %v2360_v25 }
 0xf78   :  { %v2371_v26 = vsub.f32 %v2350_v11, %v2367_v0 }
 0xf79   :  { %v2363_v29 = vpop.xlane.xlu0 %2362 }
 0xf7a   :  { %v2368_v30 = vmul.f32 0.03125, %v2363_v29  ;;  %v2375_v31 = vmul.f32 %v2371_v26, %v2371_v26 }
 0xf7c   :  { %v2372_v32 = vsub.f32 %v2351_v15, %v2368_v30  ;;  %v2383_v33 = vsel %vm476_vm6, %v2375_v31, 0.0 }
 0xf7d   :  { %2384 = vadd.xlane.f32.xlu1 %v2383_v33 }
 0xf7e   :  { %v2376_v36 = vmul.f32 %v2372_v32, %v2372_v32 }
 0xf80   :  { %v2386_v37 = vsel %vm476_vm6, %v2376_v36, 0.0 }
 0xf81   :  { %2387 = vadd.xlane.f32.xlu0 %v2386_v37 }
 0xffd   :  { %v2382_v40 = vpop.xlane.xlu0 %2381 }
 0xffe   :  { %v2390_v28 = vmul.f32 0.03125, %v2382_v40  ;;  %v2379_v41 = vpop.xlane.xlu1 %2378 }
 0xfff   :  { %v2389_v44 = vmul.f32 0.03125, %v2379_v41 }
0x1000   :  { %v2394_v45 = vadd.f32 1e-05, %v2390_v28 }
0x1001   :  { %v2393_v46 = vadd.f32 1e-05, %v2389_v44 }
0x1002   :  { %11878 = vrsqrt.f32 %v2394_v45 }
0x1003   :  { %11880 = vrsqrt.f32 %v2393_v46 }
0x100a   :  { %v2385_v47 = vpop.xlane.xlu1 %2384 }
0x100b   :  { %v2391_v48 = vmul.f32 0.03125, %v2385_v47 }
0x100c   :  { %v11879_v7 = vpop.eup %11878 }
0x100d   :  { %v11881_v50 = vpop.eup %11880  ;;  %v2402_v12 = vmul.f32 %v11879_v7, %v2370_v20  ;;  %v2395_v10 = vadd.f32 1e-05, %v2391_v48  ;;  %v11393_v20 = vpack.c.bf16 %v2565_v19, %v2564_v18 }
0x100e   :  { %v2388_v51 = vpop.xlane.xlu0 %2387  ;;  %v2401_v56 = vmul.f32 %v11881_v50, %v2369_v21  ;;  %v13216_v21 = vsub.s32 3, %v13156_v43 }
0x100f   :  { %11882 = vrsqrt.f32 %v2395_v10  ;;  %v2392_v58 = vmul.f32 0.03125, %v2388_v51  ;;  %v2410_v59 = vmul.f32 %v2408_v49, %v2402_v12  ;;  %11394 = vmatprep.subr.bf16.mxu1 %v11393_v20 }
0x1010   :  { %v2409_v8 = vmul.f32 %v2408_v49, %v2401_v56  ;;  %11396 = vmatpush3.bf16.msra.mxu1 %v11393_v20  ;;  %v2428_v22 = vrot.slane %v13161_v42, %v13216_v21 }
0x1011   :  { %v2396_v60 = vadd.f32 1e-05, %v2392_v58  ;;  %v13201_v3 = vadd.f32 %v2416_v57, %v2410_v59 }
0x1012   :  { %v13199_v54 = vadd.f32 %v2416_v57, %v2409_v8 }
0x1013   :  { %11884 = vrsqrt.f32 %v2396_v60 }
0x1014   :  { %10769 = vmatprep.mubr.msk.f32.mxu0 %vm476_vm6, %v13199_v54 }
0x1015   :  { %10770 = vmatmul.mubr.msk.f32.vlgmr.msra.gmra.mrb[22].mxu0 %vm476_vm6, %v13201_v3 }
0x1019   :  { %v11883_v53 = vpop.eup %11882 }
0x101a   :  { %v2403_v4 = vmul.f32 %v11883_v53, %v2371_v26 }
0x101c   :  { %v2411_v13 = vmul.f32 %v2408_v49, %v2403_v4 }
0x101d   :  { %v11885_v6 = vpop.eup %11884 }
0x101e   :  { %v13207_v9 = vadd.f32 %v2416_v57, %v2411_v13  ;;  %v2404_v11 = vmul.f32 %v11885_v6, %v2372_v32 }
0x1020   :  { %10772 = vmatprep.mubr.msk.f32.mxu0 %vm476_vm6, %v13207_v9  ;;  %v2412_v14 = vmul.f32 %v2408_v49, %v2404_v11 }
0x1022   :  { %v13211_v15 = vadd.f32 %v2416_v57, %v2412_v14  ;;  %v13225_v14 = vsub.s32 4, %v13156_v43 }
0x1024   :  { %10773 = vmatmul.mubr.msk.f32.gmra.mrb[24].mxu0 %vm476_vm6, %v13211_v15  ;;  %v2569_v62 = vrot.slane %v13161_v42, %v13225_v14 }
0x10e8   :  { %v10771_v23 = vpop.f32.mrb[22].mxu0 }
0x10e9   :  { %v2513_v24 = vadd.f32 %v10771_v23, %v2428_v22  ;;  %v2507_v2 = vpop.f32.mrb[23].mxu0 }
0x10ea   :  { %v2508_v25 = vadd.f32 %v2507_v2, %v2428_v22 }
0x10eb   :  { %v2531_v0 = vmul.f32 0.044715, %v2513_v24  ;;  %v2527_v10 = vmul.f32 0.5, %v2513_v24 }
0x10ec   :  { %v2530_v26 = vmul.f32 0.044715, %v2508_v25  ;;  %v2526_v50 = vmul.f32 0.5, %v2508_v25 }
0x10ed   :  { %v2535_v29 = vmul.f32 %v2531_v0, %v2513_v24 }
0x10ee   :  { %v2534_v30 = vmul.f32 %v2530_v26, %v2508_v25 }
0x10ef   :  { %v2539_v31 = vmul.f32 %v2535_v29, %v2513_v24 }
0x10f0   :  { %v2538_v32 = vmul.f32 %v2534_v30, %v2508_v25 }
0x10f1   :  { %v2543_v33 = vadd.f32 %v2539_v31, %v2513_v24 }
0x10f2   :  { %v2542_v36 = vadd.f32 %v2538_v32, %v2508_v25 }
0x10f3   :  { %v2547_v37 = vmul.f32 0.7978846, %v2543_v33 }
0x10f4   :  { %v2546_v5 = vmul.f32 0.7978846, %v2542_v36 }
0x10f5   :  { %11886 = vtanh.f32 %v2547_v37 }
0x10f6   :  { %11888 = vtanh.f32 %v2546_v5 }
0x10f7   :  { %v10774_v38 = vpop.f32.mrb[24].mxu0 }
0x10f8   :  { %v2523_v63 = vadd.f32 %v10774_v38, %v2428_v22  ;;  %v2517_v1 = vpop.f32.mrb[25].mxu0 }
0x10f9   :  { %v2518_v39 = vadd.f32 %v2517_v1, %v2428_v22 }
0x10fa   :  { %v2533_v27 = vmul.f32 0.044715, %v2523_v63  ;;  %v2529_v13 = vmul.f32 0.5, %v2523_v63 }
0x10fb   :  { %v2532_v40 = vmul.f32 0.044715, %v2518_v39  ;;  %v2528_v53 = vmul.f32 0.5, %v2518_v39 }
0x10fc   :  { %v2537_v28 = vmul.f32 %v2533_v27, %v2523_v63 }
0x10fd   :  { %v2536_v41 = vmul.f32 %v2532_v40, %v2518_v39 }
0x10fe   :  { %v2541_v44 = vmul.f32 %v2537_v28, %v2523_v63 }
0x10ff   :  { %v11887_v45 = vpop.eup %11886  ;;  %v2540_v46 = vmul.f32 %v2536_v41, %v2518_v39 }
0x1100   :  { %v11889_v47 = vpop.eup %11888  ;;  %v2555_v48 = vadd.f32 1.0, %v11887_v45  ;;  %v2545_v49 = vadd.f32 %v2541_v44, %v2523_v63 }
0x1101   :  { %v2544_v7 = vadd.f32 %v2540_v46, %v2518_v39  ;;  %v2554_v12 = vadd.f32 1.0, %v11889_v47 }
0x1102   :  { %v2549_v51 = vmul.f32 0.7978846, %v2545_v49  ;;  %v2559_v58 = vmul.f32 %v2555_v48, %v2527_v10  ;;  %v2771_v48 = vld [vmem:[#allocation10 + $0x20] sm:$0xff]  ;;  %v2772_v49 = vld [vmem:[#allocation10 + $0x28] sm:$0xff] }
0x1103   :  { %v2558_v56 = vmul.f32 %v2554_v12, %v2526_v50  ;;  %v2548_v57 = vmul.f32 0.7978846, %v2544_v7  ;;  %v11397_v7 = vpack.c.bf16 %v2772_v49, %v2771_v48  ;;  %v2773_v50 = vld [vmem:[#allocation10 + $0x30] sm:$0xff]  ;;  %v2774_v12 = vld [vmem:[#allocation10 + $0x38] sm:$0xff] }
0x1104   :  { %11890 = vtanh.f32 %v2549_v51  ;;  %v11401_v10 = vpack.c.bf16 %v2774_v12, %v2773_v50  ;;  %v2767_v51 = vld [vmem:[#allocation10] sm:$0xff] }
0x1105   :  { %10783 = vmatprep.mubr.msk.f32.mxu1 %vm476_vm6, %v2558_v56  ;;  %11892 = vtanh.f32 %v2548_v57  ;;  %11398 = vmatprep.subr.bf16.mxu0 %v11397_v7  ;;  %v2768_v56 = vld [vmem:[#allocation10 + $0x8] sm:$0xff] }
0x1106   :  { %10784 = vmatmul.mubr.msk.f32.vlgmr.msra.gmra.mrb[22].mxu1 %vm476_vm6, %v2559_v58  ;;  %11400 = vmatpush3.bf16.msra.mxu0 %v11397_v7  ;;  %v11405_v57 = vpack.c.bf16 %v2768_v56, %v2767_v51 }
0x1107   :  { %11402 = vmatprep.subr.bf16.mxu0 %v11401_v10 }
0x110a   :  { %11404 = vmatpush3.bf16.msra.mxu0 %v11401_v10 }
0x110b   :  { %11406 = vmatprep.subr.bf16.mxu0 %v11405_v57 }
0x110e   :  { %v11891_v59 = vpop.eup %11890 }
0x110f   :  { %v11893_v8 = vpop.eup %11892  ;;  %v2557_v60 = vadd.f32 1.0, %v11891_v59 }
0x1110   :  { %v2556_v4 = vadd.f32 1.0, %v11893_v8 }
0x1111   :  { %v2561_v11 = vmul.f32 %v2557_v60, %v2529_v13  ;;  %v13250_v13 = vsub.s32 5, %v13156_v43 }
0x1112   :  { %v2560_v6 = vmul.f32 %v2556_v4, %v2528_v53 }
0x1114   :  { %10786 = vmatprep.mubr.msk.f32.mxu1 %vm476_vm6, %v2560_v6  ;;  %v13253_v6 = vsub.s32 6, %v13156_v43 }
0x1115   :  { %10787 = vmatmul.mubr.msk.f32.gmra.mrb[24].mxu1 %vm476_vm6, %v2561_v11  ;;  %v2726_v11 = vrot.slane %v13161_v42, %v13250_v13 }
0x11d9   :  { %v10785_v61 = vpop.f32.mrb[22].mxu1 }
0x11da   :  { %v2654_v16 = vadd.f32 %v10785_v61, %v2569_v62  ;;  %v2648_v18 = vpop.f32.mrb[23].mxu1 }
0x11db   :  { %v2649_v19 = vadd.f32 %v2648_v18, %v2569_v62 }
0x11dc   :  { %v2668_v20 = vadd.f32 %v2654_v16, %v13201_v3 }
0x11dd   :  { %v2667_v22 = vadd.f32 %v2649_v19, %v13199_v54 }
0x11de   :  { %v2674_v23 = vsel %vm476_vm6, %v2668_v20, 0.0 }
0x11df   :  { %2675 = vadd.xlane.f32.xlu0 %v2674_v23  ;;  %v2671_v24 = vsel %vm476_vm6, %v2667_v22, 0.0 }
0x11e0   :  { %2672 = vadd.xlane.f32.xlu1 %v2671_v24  ;;  %v2734_v24 = vrot.slane %v13161_v42, %v13253_v6 }
0x11e8   :  { %v10788_v2 = vpop.f32.mrb[24].mxu1 }
0x11e9   :  { %v2664_v25 = vadd.f32 %v10788_v2, %v2569_v62  ;;  %v2658_v0 = vpop.f32.mrb[25].mxu1 }
0x11ea   :  { %v2659_v26 = vadd.f32 %v2658_v0, %v2569_v62 }
0x11eb   :  { %v2670_v29 = vadd.f32 %v2664_v25, %v13211_v15 }
0x11ec   :  { %v2669_v30 = vadd.f32 %v2659_v26, %v13207_v9 }
0x11ed   :  { %v2680_v31 = vsel %vm476_vm6, %v2670_v29, 0.0 }
0x11ee   :  { %2681 = vadd.xlane.f32.xlu0 %v2680_v31  ;;  %v2677_v3 = vsel %vm476_vm6, %v2669_v30, 0.0 }
0x11ef   :  { %2678 = vadd.xlane.f32.xlu1 %v2677_v3 }
0x126c   :  { %v2676_v54 = vpop.xlane.xlu0 %2675 }
0x126d   :  { %v2684_v32 = vmul.f32 0.03125, %v2676_v54  ;;  %v2673_v33 = vpop.xlane.xlu1 %2672 }
0x126e   :  { %v2683_v36 = vmul.f32 0.03125, %v2673_v33  ;;  %v2776_v33 = vld [vmem:[#allocation10 + $0x48] sm:$0xff] }
0x126f   :  { %v2688_v37 = vsub.f32 %v2668_v20, %v2684_v32  ;;  %v2775_v32 = vld [vmem:[#allocation10 + $0x40] sm:$0xff] }
0x1270   :  { %v2687_v5 = vsub.f32 %v2667_v22, %v2683_v36  ;;  %v11413_v42 = vpack.c.bf16 %v2776_v33, %v2775_v32 }
0x1271   :  { %v2692_v38 = vmul.f32 %v2688_v37, %v2688_v37 }
0x1272   :  { %v2691_v63 = vmul.f32 %v2687_v5, %v2687_v5 }
0x1273   :  { %v2698_v1 = vsel %vm476_vm6, %v2692_v38, 0.0 }
0x1274   :  { %2699 = vadd.xlane.f32.xlu0 %v2698_v1  ;;  %v2695_v15 = vsel %vm476_vm6, %v2691_v63, 0.0 }
0x1275   :  { %2696 = vadd.xlane.f32.xlu1 %v2695_v15 }
0x127b   :  { %v2682_v9 = vpop.xlane.xlu0 %2681 }
0x127c   :  { %v2686_v39 = vmul.f32 0.03125, %v2682_v9  ;;  %v2679_v27 = vpop.xlane.xlu1 %2678 }
0x127d   :  { %v2685_v40 = vmul.f32 0.03125, %v2679_v27 }
0x127e   :  { %v13239_v28 = vsub.f32 %v2670_v29, %v2686_v39  ;;  %v2769_v29 = vld [vmem:[#allocation10 + $0x10] sm:$0xff] }
0x127f   :  { %v13241_v41 = vsub.f32 %v2669_v30, %v2685_v40  ;;  %v2770_v30 = vld [vmem:[#allocation10 + $0x18] sm:$0xff]  ;;  %v2777_v40 = vld [vmem:[#allocation10 + $0x50] sm:$0xff] }
0x1280   :  { %v2694_v44 = vmul.f32 %v13239_v28, %v13239_v28  ;;  %v11409_v54 = vpack.c.bf16 %v2770_v30, %v2769_v29 }
0x1281   :  { %v2693_v45 = vmul.f32 %v13241_v41, %v13241_v41 }
0x1282   :  { %v2704_v46 = vsel %vm476_vm6, %v2694_v44, 0.0  ;;  %v2778_v44 = vld [vmem:[#allocation10 + $0x58] sm:$0xff] }
0x1283   :  { %2705 = vadd.xlane.f32.xlu0 %v2704_v46  ;;  %v2701_v47 = vsel %vm476_vm6, %v2693_v45, 0.0 }
0x1284   :  { %2702 = vadd.xlane.f32.xlu1 %v2701_v47 }
0x1301   :  { %v2700_v58 = vpop.xlane.xlu0 %2699 }
0x1302   :  { %v2708_v59 = vmul.f32 0.03125, %v2700_v58  ;;  %v2697_v8 = vpop.xlane.xlu1 %2696 }
0x1303   :  { %v2707_v60 = vmul.f32 0.03125, %v2697_v8  ;;  %v10063_v8 = vld [vmem:[%s14384_s6 + $0x28] sm:$0xff] }
0x1304   :  { %v2712_v53 = vadd.f32 1e-05, %v2708_v59  ;;  %v10062_v59 = vld [vmem:[%s14384_s6 + $0x20] sm:$0xff] }
0x1305   :  { %v2711_v4 = vadd.f32 1e-05, %v2707_v60  ;;  %v11421_v60 = vpack.c.bf16 %v10063_v8, %v10062_v59 }
0x1306   :  { %11894 = vrsqrt.f32 %v2712_v53  ;;  %v10064_v53 = vld [vmem:[%s14384_s6 + $0x30] sm:$0xff] }
0x1307   :  { %11896 = vrsqrt.f32 %v2711_v4  ;;  %11422 = vmatprep.subr.bf16.mxu1 %v11421_v60  ;;  %v10065_v4 = vld [vmem:[%s14384_s6 + $0x38] sm:$0xff] }
0x1308   :  { %11424 = vmatpush3.bf16.msra.mxu1 %v11421_v60 }
0x1310   :  { %v11895_v62 = vpop.eup %11894  ;;  %v2706_v61 = vpop.xlane.xlu0 %2705 }
0x1311   :  { %v11897_v16 = vpop.eup %11896  ;;  %v2720_v18 = vmul.f32 %v11895_v62, %v2688_v37  ;;  %v2710_v19 = vmul.f32 0.03125, %v2706_v61  ;;  %v2703_v20 = vpop.xlane.xlu1 %2702  ;;  %v13293_v62 = vld [vmem:[#allocation12 + $0x8] sm:$0xff] }
0x1312   :  { %v2709_v22 = vmul.f32 0.03125, %v2703_v20  ;;  %v2719_v23 = vmul.f32 %v11897_v16, %v2687_v5  ;;  %v3069_v61 = vrot.slane %v13293_v62, %v13253_v6 }
0x1313   :  { %v2728_v2 = vmul.f32 %v2726_v11, %v2720_v18  ;;  %v2714_v25 = vadd.f32 1e-05, %v2710_v19 }
0x1314   :  { %v2713_v0 = vadd.f32 1e-05, %v2709_v22  ;;  %v2727_v26 = vmul.f32 %v2726_v11, %v2719_v23 }
0x1315   :  { %11898 = vrsqrt.f32 %v2714_v25  ;;  %v2736_v3 = vadd.f32 %v2734_v24, %v2728_v2 }
0x1316   :  { %11900 = vrsqrt.f32 %v2713_v0  ;;  %v2735_v31 = vadd.f32 %v2734_v24, %v2727_v26 }
0x1317   :  { %v2741_v9 = vrot.slane %v2736_v3, 7  ;;  %v2756_v7 = vrot.slane %v2736_v3, 1 }
0x1318   :  { %10797 = vmatprep.mubr.msk.f32.mxu0 %vm476_vm6, %v2735_v31  ;;  %v2747_v39 = vrot.slane %v2735_v31, 7  ;;  %v2755_v49 = vrot.slane %v2735_v31, 1 }
0x1319   :  { %10798 = vmatmul.mubr.msk.f32.vlgmr.msra.gmra.mrb[26].mxu0 %vm476_vm6, %v2736_v3 }
0x131a   :  { %11408 = vmatpush3.bf16.msra.mxu0 %v11405_v57  ;;  %v2753_v45 = vsel %vm278_vm1, %v2741_v9, %v2747_v39  ;;  %v2757_v12 = vsel %vm289_vm0, %v2755_v49, %v2756_v7  ;;  %v2765_v56 = vsel %vm289_vm0, %v2756_v7, %v2755_v49 }
0x131b   :  { %11410 = vmatprep.subr.bf16.mxu0 %v11409_v54 }
0x131e   :  { %11412 = vmatpush3.bf16.msra.mxu0 %v11409_v54 }
0x131f   :  { %v11899_v36 = vpop.eup %11898  ;;  %11414 = vmatprep.subr.bf16.mxu0 %v11413_v42 }
0x1320   :  { %v11901_v37 = vpop.eup %11900  ;;  %v2722_v5 = vmul.f32 %v11899_v36, %v13239_v28  ;;  %v11417_v28 = vpack.c.bf16 %v2778_v44, %v2777_v40 }
0x1321   :  { %v2721_v38 = vmul.f32 %v11901_v37, %v13241_v41  ;;  %v2748_v41 = vsel %vm278_vm1, %v2747_v39, %v2741_v9 }
0x1322   :  { %v2730_v63 = vmul.f32 %v2726_v11, %v2722_v5 }
0x1323   :  { %v2729_v1 = vmul.f32 %v2726_v11, %v2721_v38  ;;  %v11425_v11 = vpack.c.bf16 %v10065_v4, %v10064_v53 }
0x1324   :  { %v2738_v15 = vadd.f32 %v2734_v24, %v2730_v63 }
0x1325   :  { %v2737_v27 = vadd.f32 %v2734_v24, %v2729_v1  ;;  %11426 = vmatprep.subr.bf16.mxu1 %v11425_v11 }
0x1326   :  { %v2742_v46 = vrot.slane %v2738_v15, 7  ;;  %v2759_v51 = vrot.slane %v2738_v15, 1  ;;  %11428 = vmatpush3.bf16.msra.mxu1 %v11425_v11 }
0x1327   :  { %10800 = vmatprep.mubr.msk.f32.mxu0 %vm476_vm6, %v2737_v27  ;;  %v2749_v47 = vrot.slane %v2737_v27, 7  ;;  %v2758_v10 = vrot.slane %v2737_v27, 1 }
0x1328   :  { %10801 = vmatmul.mubr.msk.f32.gmra.mrb[28].mxu0 %vm476_vm6, %v2738_v15 }
0x1329   :  { %10811 = vmatprep.mubr.msk.f32.mxu0 %vm476_vm6, %v2753_v45  ;;  %v2754_v48 = vsel %vm278_vm1, %v2742_v46, %v2749_v47  ;;  %v2750_v50 = vsel %vm278_vm1, %v2749_v47, %v2742_v46  ;;  %v2760_v57 = vsel %vm289_vm0, %v2758_v10, %v2759_v51  ;;  %v2766_v58 = vsel %vm289_vm0, %v2759_v51, %v2758_v10 }
0x132c   :  { %10812 = vmatmul.mubr.msk.f32.vlgmr.msra.gmra.mrb[26].mxu0 %vm476_vm6, %v2748_v41 }
0x132d   :  { %10814 = vmatprep.mubr.msk.f32.mxu0 %vm476_vm6, %v2754_v48  ;;  %11416 = vmatpush3.bf16.msra.mxu0 %v11413_v42 }
0x132e   :  { %11418 = vmatprep.subr.bf16.mxu0 %v11417_v28 }
0x1330   :  { %10815 = vmatmul.mubr.msk.f32.gmra.mrb[28].mxu0 %vm476_vm6, %v2750_v50 }
0x1331   :  { %11420 = vmatpush3.bf16.msra.mxu0 %v11417_v28  ;;  %10825 = vmatprep.mubr.msk.f32.mxu0 %vm476_vm6, %v2757_v12 }
0x1334   :  { %10826 = vmatmul.mubr.msk.f32.vlgmr.msra.gmra.mrb[26].mxu0 %vm476_vm6, %v2765_v56 }
0x1335   :  { %10828 = vmatprep.mubr.msk.f32.mxu0 %vm476_vm6, %v2760_v57 }
0x1338   :  { %10829 = vmatmul.mubr.msk.f32.gmra.mrb[28].mxu0 %vm476_vm6, %v2766_v58 }
0x1407   :  { %v10827_v16 = vpop.f32.mrb[26].mxu0 }
0x1408   :  { %v3071_v18 = vadd.f32 %v10827_v16, %v3069_v61  ;;  %v3043_v19 = vpop.f32.mrb[27].mxu0 }
0x1409   :  { %v3070_v20 = vadd.f32 %v3069_v61, %v3043_v19 }
0x140a   :  { %v3079_v22 = vmin.f32 %v3071_v18, 0.0  ;;  %vm3075_vm9 = vcmp.gt.f32.partialorder %v3071_v18, 0.0 }
0x140b   :  { %v3078_v23 = vmin.f32 %v3070_v20, 0.0  ;;  %v10830_v24 = vpop.f32.mrb[28].mxu0  ;;  %vm3074_vm10 = vcmp.gt.f32.partialorder %v3070_v20, 0.0 }
0x140c   :  { %v3084_v2 = vmul.f32 1.442695, %v3079_v22  ;;  %v3073_v25 = vadd.f32 %v10830_v24, %v3069_v61  ;;  %v3053_v0 = vpop.f32.mrb[29].mxu0 }
0x140d   :  { %v3082_v26 = vmul.f32 1.442695, %v3078_v23  ;;  %v3072_v29 = vadd.f32 %v3069_v61, %v3053_v0 }
0x140e   :  { %11902 = vpow2.f32 %v3084_v2  ;;  %v3081_v30 = vmin.f32 %v3073_v25, 0.0  ;;  %vm3077_vm11 = vcmp.gt.f32.partialorder %v3073_v25, 0.0 }
0x140f   :  { %11904 = vpow2.f32 %v3082_v26  ;;  %v3080_v31 = vmin.f32 %v3072_v29, 0.0  ;;  %vm3076_vm12 = vcmp.gt.f32.partialorder %v3072_v29, 0.0 }
0x1410   :  { %v3088_v3 = vmul.f32 1.442695, %v3081_v30 }
0x1411   :  { %v3086_v54 = vmul.f32 1.442695, %v3080_v31 }
0x1412   :  { %11906 = vpow2.f32 %v3088_v3 }
0x1413   :  { %11908 = vpow2.f32 %v3086_v54 }
0x1418   :  { %v11903_v32 = vpop.eup %11902 }
0x1419   :  { %v11905_v33 = vpop.eup %11904  ;;  %v10059_v42 = vadd.f32 -1.0, %v11903_v32 }
0x141a   :  { %v10058_v36 = vadd.f32 -1.0, %v11905_v33 }
0x141b   :  { %v3095_v37 = vsel %vm3075_vm9, %v3071_v18, %v10059_v42  ;;  %vm3171_vm9 = vcmask 1044480  }
0x141c   :  { %v11907_v5 = vpop.eup %11906  ;;  %v3114_v38 = vrot.slane %v3095_v37, 1  ;;  %v3094_v63 = vsel %vm3074_vm10, %v3070_v20, %v10058_v36  ;;  %v3120_v39 = vrot.slane %v3095_v37, 2  ;;  %vm3174_vm10 = vcmask 1045504  }
0x141d   :  { %v11909_v1 = vpop.eup %11908  ;;  %v3100_v15 = vrot.slane %v3094_v63, 1  ;;  %v10061_v9 = vadd.f32 -1.0, %v11907_v5  ;;  %v3106_v46 = vrot.slane %v3094_v63, 2  ;;  %v12480_v5 = vmov 0.0  }
0x141e   :  { %v3126_v27 = vmax.f32 %v3095_v37, %v3114_v38  ;;  %v3118_v40 = vmax.f32 %v3094_v63, %v3114_v38  ;;  %v10060_v44 = vadd.f32 -1.0, %v11909_v1  ;;  %10842 = vmatprep.subr.mxu1 %v12480_v5  ;;  %10862 = vmatprep.subr.mxu0 %v12480_v5  ;;  %v10066_v38 = vld [vmem:[#allocation6 + $0x1] ss:$0 sm:$0xff] }
0x141f   :  { %v3104_v45 = vmax.f32 %v3094_v63, %v3100_v15  ;;  %v3097_v47 = vsel %vm3077_vm11, %v3073_v25, %v10061_v9  ;;  %vm12481_vm11 = vmmov 0  }
0x1420   :  { %v3124_v28 = vmax.f32 %v3118_v40, %v3120_v39  ;;  %v3115_v41 = vrot.slane %v3097_v47, 1  ;;  %v3096_v49 = vsel %vm3076_vm12, %v3072_v29, %v10060_v44  ;;  %v3128_v7 = vmax.f32 %v3126_v27, %v3120_v39  ;;  %10864 = vmatprep.mubr.msk.f32.mxu0 %vm12481_vm11, %v12480_v5 }
0x1421   :  { %v3110_v48 = vmax.f32 %v3104_v45, %v3106_v46  ;;  %v3121_v50 = vrot.slane %v3097_v47, 2  ;;  %v3101_v10 = vrot.slane %v3096_v49, 1  ;;  %v3107_v8 = vrot.slane %v3096_v49, 2 }
0x1422   :  { %v3127_v12 = vmax.f32 %v3097_v47, %v3115_v41  ;;  %v3119_v58 = vmax.f32 %v3096_v49, %v3115_v41  ;;  %v3142_v60 = vrot.slane %v3124_v28, 3  ;;  %v3148_v61 = vrot.slane %v3128_v7, 4 }
0x1423   :  { %v3132_v51 = vrot.slane %v3110_v48, 1  ;;  %v3136_v56 = vrot.slane %v3110_v48, 2  ;;  %v3160_v57 = vsel %vm278_vm1, %v3104_v45, %v3110_v48  ;;  %v3105_v59 = vmax.f32 %v3096_v49, %v3101_v10 }
0x1424   :  { %v3125_v53 = vmax.f32 %v3119_v58, %v3121_v50  ;;  %v3129_v18 = vmax.f32 %v3127_v12, %v3121_v50  ;;  %v3152_v19 = vrot.slane %v3128_v7, 5  ;;  %v3156_v20 = vrot.slane %v3128_v7, 6 }
0x1425   :  { %v3163_v4 = vsel %vm3162_vm13, %v3160_v57, %v3132_v51  ;;  %v3111_v11 = vmax.f32 %v3105_v59, %v3107_v8 }
0x1426   :  { %v3166_v16 = vsel %vm3165_vm14, %v3163_v4, %v3136_v56  ;;  %v3143_v26 = vrot.slane %v3125_v53, 3  ;;  %v3149_v31 = vrot.slane %v3129_v18, 4  ;;  %v3153_v54 = vrot.slane %v3129_v18, 5 }
0x1427   :  { %v3169_v22 = vsel %vm3168_vm15, %v3166_v16, %v3142_v60  ;;  %v3133_v23 = vrot.slane %v3111_v11, 1  ;;  %v3137_v24 = vrot.slane %v3111_v11, 2  ;;  %v3161_v2 = vsel %vm278_vm1, %v3105_v59, %v3111_v11 }
0x1428   :  { %v3172_v25 = vsel %vm3171_vm9, %v3169_v22, %v3148_v61  ;;  %v3157_v42 = vrot.slane %v3129_v18, 6 }
0x1429   :  { %v3175_v0 = vsel %vm3174_vm10, %v3172_v25, %v3152_v19  ;;  %v3164_v29 = vsel %vm3162_vm13, %v3161_v2, %v3133_v23 }
0x142a   :  { %v13306_v30 = vsel %vm289_vm0, %v3175_v0, %v3156_v20  ;;  %v3167_v3 = vsel %vm3165_vm14, %v3164_v29, %v3137_v24 }
0x142b   :  { %10839 = vmatprep.mubr.msk.f32.mxu1 %vm476_vm6, %v13306_v30  ;;  %v3170_v32 = vsel %vm3168_vm15, %v3167_v3, %v3143_v26 }
0x142c   :  { %v3173_v33 = vsel %vm3171_vm9, %v3170_v32, %v3149_v31 }
0x142d   :  { %v3176_v36 = vsel %vm3174_vm10, %v3173_v33, %v3153_v54 }
0x142e   :  { %v13315_v37 = vsel %vm289_vm0, %v3176_v36, %v3157_v42 }
0x142f   :  { %10840 = vmatmul.mubr.msk.f32.vlgmr.msra.gmra.mrb[26].mxu1 %vm476_vm6, %v13315_v37 }
0x1430   :  { %10844 = vmatprep.mubr.msk.f32.mxu1 %vm12481_vm11, %v12480_v5 }
0x1502   :  { %v10841_v63 = vpop.f32.mrb[26].mxu1 }
0x1503   :  { %v13325_v1 = vadd.f32 %v10841_v63, %v10066_v38  ;;  %v3269_v15 = vpop.f32.mrb[27].mxu1 }
0x1504   :  { %v13327_v9 = vadd.f32 %v10066_v38, %v3269_v15 }
0x1505   :  { %3356 = vrot.lane.b32.xlu0 %v13325_v1, %s12468_s3 }
0x1506   :  { %3279 = vrot.lane.b32.xlu1 %v13327_v9, %s12468_s3 }
0x1577   :  { %v3357_v27 = vpop.permute.xlu0 %3356 }
0x1578   :  { %v3280_v39 = vpop.permute.xlu1 %3279 }
0x1579   :  { %10843 = vmatpush3.xpose.msk.msra.mxu1 %vm349_vm3, %v3280_v39 }
0x157a   :  { %10847 = vmatprep.subr.mxu1 %v12480_v5 }
0x157c   :  { %10845 = vmatmul.mubr.msk.f32.vlgmr.msra.gmra.mrb[28].mxu1 %vm349_vm3, %v13327_v9 }
0x157d   :  { %10848 = vmatpush3.xpose.msk.msra.mxu1 %vm349_vm3, %v3357_v27  ;;  %10849 = vmatprep.mubr.msk.f32.mxu1 %vm12481_vm11, %v12480_v5 }
0x157e   :  { %10852 = vmatprep.subr.mxu1 %v12480_v5 }
0x1580   :  { %10850 = vmatmul.mubr.msk.f32.vlgmr.msra.gmra.mrb[30].mxu1 %vm349_vm3, %v13325_v1 }
0x1581   :  { %10854 = vmatprep.mubr.msk.f32.mxu1 %vm12481_vm11, %v12480_v5 }
0x164f   :  { %v3351_v40 = vpop.f32.mrb[28].mxu1 }
0x1650   :  { %v3432_v44 = vmul.f32 0.35355338, %v3351_v40  ;;  %v10846_v45 = vpop.f32.mrb[29].mxu1 }
0x1652   :  { %v3434_v46 = vsel %vm349_vm3, %v3432_v44, -inf }
0x1653   :  { %3435 = vmax.xlane.f32.xlu1 %v3434_v46  ;;  %v3428_v47 = vpop.f32.mrb[30].mxu1 }
0x1654   :  { %v3433_v28 = vmul.f32 0.35355338, %v3428_v47  ;;  %v10851_v41 = vpop.f32.mrb[31].mxu1 }
0x1656   :  { %v3437_v48 = vsel %vm349_vm3, %v3433_v28, -inf }
0x1657   :  { %3438 = vmax.xlane.f32.xlu0 %v3437_v48 }
0x1664   :  { %3456 = vrot.lane.b32.xlu1 %v13327_v9, %s12469_s11 }
0x1668   :  { %3610 = vrot.lane.b32.xlu1 %v13327_v9, %s12470_s25 }
0x166d   :  { %3532 = vrot.lane.b32.xlu0 %v13325_v1, %s12469_s11 }
0x16e0   :  { %v3436_v49 = vpop.xlane.xlu1 %3435 }
0x16e1   :  { %v3440_v7 = vsub.f32 %v3432_v44, %v3436_v49 }
0x16e3   :  { %v3442_v50 = vmul.f32 1.442695, %v3440_v7 }
0x16e4   :  { %v3457_v12 = vpop.permute.xlu1 %3456  ;;  %v3439_v10 = vpop.xlane.xlu0 %3438 }
0x16e5   :  { %11910 = vpow2.f32 %v3442_v50  ;;  %v3441_v51 = vsub.f32 %v3433_v28, %v3439_v10  ;;  %10853 = vmatpush3.msra.mxu1 %v3457_v12 }
0x16e6   :  { %10857 = vmatprep.subr.mxu1 %v12480_v5 }
0x16e7   :  { %v3444_v56 = vmul.f32 1.442695, %v3441_v51 }
0x16e8   :  { %v3611_v57 = vpop.permute.xlu1 %3610  ;;  %v3533_v53 = vpop.permute.xlu0 %3532 }
0x16e9   :  { %11912 = vpow2.f32 %v3444_v56  ;;  %10863 = vmatpush3.xpose.msk.msra.mxu0 %vm349_vm3, %v3611_v57 }
0x16ea   :  { %10872 = vmatprep.subr.mxu0 %v12480_v5 }
0x16ef   :  { %v11911_v58 = vpop.eup %11910 }
0x16f0   :  { %v3446_v59 = vsel %vm349_vm3, %v11911_v58, 0.0 }
0x16f1   :  { %3447 = vadd.xlane.f32.xlu1 %v3446_v59 }
0x16f3   :  { %v11913_v8 = vpop.eup %11912 }
0x16f4   :  { %v3449_v60 = vsel %vm349_vm3, %v11913_v8, 0.0 }
0x16f5   :  { %3450 = vadd.xlane.f32.xlu0 %v3449_v60 }
0x1702   :  { %3688 = vrot.lane.b32.xlu1 %v13325_v1, %s12470_s25 }
0x1706   :  { %3686 = vrot.lane.b32.xlu1 %v13325_v1, %s12471_s12 }
0x170b   :  { %3608 = vrot.lane.b32.xlu0 %v13327_v9, %s12471_s12 }
0x177e   :  { %v3448_v4 = vpop.xlane.xlu1 %3447 }
0x177f   :  { %11914 = vrcp.f32 %v3448_v4 }
0x1782   :  { %v3451_v11 = vpop.xlane.xlu0 %3450  ;;  %v3689_v22 = vpop.permute.xlu1 %3688 }
0x1783   :  { %11916 = vrcp.f32 %v3451_v11 }
0x1786   :  { %v3609_v61 = vpop.permute.xlu0 %3608  ;;  %v3687_v23 = vpop.permute.xlu1 %3686 }
0x1787   :  { %10865 = vmatmul.mubr.msk.f32.vlgmr.msra.gmra.mrb[30].mxu0 %vm349_vm3, %v3609_v61 }
0x1788   :  { %10874 = vmatprep.mubr.msk.f32.mxu0 %vm12481_vm11, %v12480_v5 }
0x1789   :  { %v11915_v16 = vpop.eup %11914 }
0x178a   :  { %v3453_v18 = vmul.f32 %v11915_v16, %v11911_v58 }
0x178c   :  { %10855 = vmatmul.mubr.msk.f32.vlgmr.msra.gmra.mrb[32].mxu1 %vm349_vm3, %v3453_v18 }
0x178d   :  { %v11917_v19 = vpop.eup %11916  ;;  %10858 = vmatpush3.msra.mxu1 %v3533_v53  ;;  %10859 = vmatprep.mubr.msk.f32.mxu1 %vm12481_vm11, %v12480_v5 }
0x178e   :  { %v3455_v20 = vmul.f32 %v11917_v19, %v11913_v8  ;;  %10867 = vmatprep.subr.mxu1 %v12480_v5 }
0x1790   :  { %10860 = vmatmul.mubr.msk.f32.vlgmr.msra.gmra.mrb[34].mxu1 %vm349_vm3, %v3455_v20 }
0x1791   :  { %10869 = vmatprep.mubr.msk.f32.mxu1 %vm12481_vm11, %v12480_v5 }
0x1794   :  { %10868 = vmatpush3.xpose.msk.msra.mxu1 %vm349_vm3, %v3689_v22 }
0x1795   :  { %10877 = vmatprep.subr.mxu1 %v12480_v5 }
0x1797   :  { %10870 = vmatmul.mubr.msk.f32.vlgmr.msra.gmra.mrb[36].mxu1 %vm349_vm3, %v3687_v23 }
0x1798   :  { %10879 = vmatprep.mubr.msk.f32.mxu1 %vm12481_vm11, %v12480_v5 }
0x185a   :  { %v3682_v24 = vpop.f32.mrb[30].mxu0 }
0x185b   :  { %v3764_v2 = vmul.f32 0.35355338, %v3682_v24  ;;  %v10866_v25 = vpop.f32.mrb[31].mxu0 }
0x185d   :  { %v3766_v0 = vsel %vm349_vm3, %v3764_v2, -inf }
0x185e   :  { %3767 = vmax.xlane.f32.xlu0 %v3766_v0 }
0x185f   :  { %v13380_v26 = vpop.f32.mrb[32].mxu1 }
0x1860   :  { %v10856_v29 = vpop.f32.mrb[33].mxu1 }
0x1863   :  { %v13382_v31 = vpop.f32.mrb[34].mxu1 }
0x1864   :  { %v10861_v3 = vpop.f32.mrb[35].mxu1 }
0x186a   :  { %v3760_v54 = vpop.f32.mrb[36].mxu1 }
0x186b   :  { %v3765_v32 = vmul.f32 0.35355338, %v3760_v54  ;;  %v10871_v33 = vpop.f32.mrb[37].mxu1 }
0x186d   :  { %v3769_v42 = vsel %vm349_vm3, %v3765_v32, -inf }
0x186e   :  { %3770 = vmax.xlane.f32.xlu1 %v3769_v42 }
0x187f   :  { %3788 = vrot.lane.b32.xlu1 %v13327_v9, %s12472_s26 }
0x1883   :  { %3942 = vrot.lane.b32.xlu1 %v13327_v9, %s12473_s17 }
0x1887   :  { %4020 = vrot.lane.b32.xlu1 %v13325_v1, %s12473_s17 }
0x188b   :  { %4018 = vrot.lane.b32.xlu1 %v13325_v1, %s12474_s13 }
0x18eb   :  { %v3768_v36 = vpop.xlane.xlu0 %3767 }
0x18ec   :  { %v3772_v38 = vsub.f32 %v3764_v2, %v3768_v36 }
0x18ee   :  { %v3774_v63 = vmul.f32 1.442695, %v3772_v38 }
0x18f0   :  { %11918 = vpow2.f32 %v3774_v63 }
0x18fa   :  { %v11919_v15 = vpop.eup %11918 }
0x18fb   :  { %v3771_v39 = vpop.xlane.xlu1 %3770  ;;  %v3778_v27 = vsel %vm349_vm3, %v11919_v15, 0.0 }
0x18fc   :  { %3779 = vadd.xlane.f32.xlu0 %v3778_v27  ;;  %v3773_v44 = vsub.f32 %v3765_v32, %v3771_v39 }
0x18fe   :  { %v3776_v45 = vmul.f32 1.442695, %v3773_v44 }
0x18ff   :  { %v3789_v40 = vpop.permute.xlu1 %3788 }
0x1900   :  { %10873 = vmatpush3.msra.mxu0 %v3789_v40  ;;  %11920 = vpow2.f32 %v3776_v45 }
0x1901   :  { %10882 = vmatprep.subr.mxu0 %v12480_v5 }
0x1903   :  { %v3943_v7 = vpop.permute.xlu1 %3942 }
0x1907   :  { %v4021_v51 = vpop.permute.xlu1 %4020 }
0x190a   :  { %v11921_v46 = vpop.eup %11920 }
0x190b   :  { %v3781_v47 = vsel %vm349_vm3, %v11921_v46, 0.0  ;;  %v4019_v57 = vpop.permute.xlu1 %4018 }
0x1912   :  { %3864 = vrot.lane.b32.xlu0 %v13325_v1, %s12472_s26 }
0x1931   :  { %3782 = vadd.xlane.f32.xlu0 %v3781_v47 }
0x1947   :  { %3940 = vrot.lane.b32.xlu0 %v13327_v9, %s12474_s13 }
0x1989   :  { %v3780_v28 = vpop.xlane.xlu0 %3779 }
0x198a   :  { %11922 = vrcp.f32 %v3780_v28 }
0x198d   :  { %v3865_v41 = vpop.permute.xlu0 %3864 }
0x198e   :  { %10878 = vmatpush3.msra.mxu1 %v3865_v41 }
0x198f   :  { %10887 = vmatprep.subr.mxu1 %v12480_v5 }
0x1994   :  { %v11923_v48 = vpop.eup %11922 }
0x1995   :  { %v3785_v49 = vmul.f32 %v11923_v48, %v11919_v15 }
0x1997   :  { %10875 = vmatmul.mubr.msk.f32.vlgmr.msra.gmra.mrb[32].mxu0 %vm349_vm3, %v3785_v49 }
0x1998   :  { %10883 = vmatpush3.xpose.msk.msra.mxu0 %vm349_vm3, %v3943_v7  ;;  %10884 = vmatprep.mubr.msk.f32.mxu0 %vm12481_vm11, %v12480_v5 }
0x1999   :  { %10892 = vmatprep.subr.mxu0 %v12480_v5 }
0x19be   :  { %v3783_v50 = vpop.xlane.xlu0 %3782 }
0x19bf   :  { %11924 = vrcp.f32 %v3783_v50 }
0x19c2   :  { %v3941_v12 = vpop.permute.xlu0 %3940 }
0x19c3   :  { %10885 = vmatmul.mubr.msk.f32.vlgmr.msra.gmra.mrb[34].mxu0 %vm349_vm3, %v3941_v12 }
0x19c4   :  { %10894 = vmatprep.mubr.msk.f32.mxu0 %vm12481_vm11, %v12480_v5 }
0x19c9   :  { %v11925_v10 = vpop.eup %11924 }
0x19ca   :  { %v3787_v56 = vmul.f32 %v11925_v10, %v11921_v46 }
0x19cc   :  { %10880 = vmatmul.mubr.msk.f32.vlgmr.msra.gmra.mrb[38].mxu1 %vm349_vm3, %v3787_v56 }
0x19cd   :  { %10888 = vmatpush3.xpose.msk.msra.mxu1 %vm349_vm3, %v4021_v51  ;;  %10889 = vmatprep.mubr.msk.f32.mxu1 %vm12481_vm11, %v12480_v5 }
0x19ce   :  { %10897 = vmatprep.subr.mxu1 %v12480_v5 }
0x19d0   :  { %10890 = vmatmul.mubr.msk.f32.vlgmr.msra.gmra.mrb[40].mxu1 %vm349_vm3, %v4019_v57 }
0x19d1   :  { %10899 = vmatprep.mubr.msk.f32.mxu1 %vm12481_vm11, %v12480_v5 }
0x1a6a   :  { %v13417_v58 = vpop.f32.mrb[32].mxu0 }
0x1a6b   :  { %v10876_v59 = vpop.f32.mrb[33].mxu0 }
0x1a96   :  { %v4014_v8 = vpop.f32.mrb[34].mxu0 }
0x1a97   :  { %v4096_v60 = vmul.f32 0.35355338, %v4014_v8  ;;  %v10886_v53 = vpop.f32.mrb[35].mxu0 }
0x1a99   :  { %v4098_v4 = vsel %vm349_vm3, %v4096_v60, -inf }
0x1a9a   :  { %4099 = vmax.xlane.f32.xlu0 %v4098_v4 }
0x1a9f   :  { %v13420_v11 = vpop.f32.mrb[38].mxu1 }
0x1aa0   :  { %v10881_v61 = vpop.f32.mrb[39].mxu1 }
0x1aa3   :  { %v4092_v16 = vpop.f32.mrb[40].mxu1 }
0x1aa4   :  { %v4097_v18 = vmul.f32 0.35355338, %v4092_v16  ;;  %v10891_v19 = vpop.f32.mrb[41].mxu1 }
0x1aa6   :  { %v4101_v20 = vsel %vm349_vm3, %v4097_v18, -inf }
0x1aa7   :  { %4102 = vmax.xlane.f32.xlu1 %v4101_v20 }
0x1ab8   :  { %4120 = vrot.lane.b32.xlu1 %v13327_v9, %s12475_s18 }
0x1abc   :  { %4274 = vrot.lane.b32.xlu1 %v13327_v9, %s12476_s5 }
0x1ac0   :  { %4352 = vrot.lane.b32.xlu1 %v13325_v1, %s12476_s5 }
0x1ac4   :  { %4350 = vrot.lane.b32.xlu1 %v13325_v1, %s12477_s22 }
0x1b27   :  { %v4100_v22 = vpop.xlane.xlu0 %4099 }
0x1b28   :  { %v4104_v23 = vsub.f32 %v4096_v60, %v4100_v22 }
0x1b2a   :  { %v4106_v24 = vmul.f32 1.442695, %v4104_v23 }
0x1b2c   :  { %11926 = vpow2.f32 %v4106_v24 }
0x1b34   :  { %v4103_v2 = vpop.xlane.xlu1 %4102 }
0x1b35   :  { %v4105_v3 = vsub.f32 %v4097_v18, %v4103_v2 }
0x1b36   :  { %v11927_v25 = vpop.eup %11926 }
0x1b37   :  { %v4110_v0 = vsel %vm349_vm3, %v11927_v25, 0.0  ;;  %v4108_v54 = vmul.f32 1.442695, %v4105_v3  ;;  %v3189_v3 = vld [vmem:[#allocation7 + $0x30] sm:$0xff] }
0x1b38   :  { %4111 = vadd.xlane.f32.xlu0 %v4110_v0  ;;  %v4121_v29 = vpop.permute.xlu1 %4120  ;;  %v3187_v0 = vld [vmem:[#allocation7 + $0x20] sm:$0xff] }
0x1b39   :  { %10893 = vmatpush3.msra.mxu0 %v4121_v29  ;;  %11928 = vpow2.f32 %v4108_v54  ;;  %v3188_v29 = vld [vmem:[#allocation7 + $0x28] sm:$0xff]  ;;  %v3190_v54 = vld [vmem:[#allocation7 + $0x38] sm:$0xff] }
0x1b3a   :  { %10902 = vmatprep.subr.mxu0 %v12480_v5 }
0x1b3c   :  { %v4275_v15 = vpop.permute.xlu1 %4274 }
0x1b40   :  { %v4353_v44 = vpop.permute.xlu1 %4352 }
0x1b43   :  { %v11929_v32 = vpop.eup %11928 }
0x1b44   :  { %v4113_v33 = vsel %vm349_vm3, %v11929_v32, 0.0  ;;  %v4351_v46 = vpop.permute.xlu1 %4350 }
0x1b4e   :  { %4196 = vrot.lane.b32.xlu0 %v13325_v1, %s12475_s18 }
0x1b6d   :  { %4114 = vadd.xlane.f32.xlu0 %v4113_v33 }
0x1b83   :  { %4272 = vrot.lane.b32.xlu0 %v13327_v9, %s12477_s22 }
0x1bc5   :  { %v4112_v42 = vpop.xlane.xlu0 %4111 }
0x1bc6   :  { %11930 = vrcp.f32 %v4112_v42 }
0x1bc9   :  { %v4197_v36 = vpop.permute.xlu0 %4196 }
0x1bca   :  { %10898 = vmatpush3.msra.mxu1 %v4197_v36 }
0x1bcb   :  { %10907 = vmatprep.subr.mxu1 %v12480_v5 }
0x1bd0   :  { %v11931_v38 = vpop.eup %11930 }
0x1bd1   :  { %v4117_v63 = vmul.f32 %v11931_v38, %v11927_v25 }
0x1bd3   :  { %10895 = vmatmul.mubr.msk.f32.vlgmr.msra.gmra.mrb[36].mxu0 %vm349_vm3, %v4117_v63 }
0x1bd4   :  { %10903 = vmatpush3.xpose.msk.msra.mxu0 %vm349_vm3, %v4275_v15  ;;  %10904 = vmatprep.mubr.msk.f32.mxu0 %vm12481_vm11, %v12480_v5 }
0x1bd5   :  { %10912 = vmatprep.subr.mxu0 %v12480_v5 }
0x1bfa   :  { %v4115_v39 = vpop.xlane.xlu0 %4114 }
0x1bfb   :  { %11932 = vrcp.f32 %v4115_v39 }
0x1bfe   :  { %v4273_v27 = vpop.permute.xlu0 %4272 }
0x1bff   :  { %10905 = vmatmul.mubr.msk.f32.vlgmr.msra.gmra.mrb[38].mxu0 %vm349_vm3, %v4273_v27 }
0x1c00   :  { %10914 = vmatprep.mubr.msk.f32.mxu0 %vm12481_vm11, %v12480_v5 }
0x1c05   :  { %v11933_v40 = vpop.eup %11932 }
0x1c06   :  { %v4119_v45 = vmul.f32 %v11933_v40, %v11929_v32  ;;  %v11433_v32 = vpack.c.bf16 %v3190_v54, %v3189_v3 }
0x1c08   :  { %10900 = vmatmul.mubr.msk.f32.vlgmr.msra.gmra.mrb[42].mxu1 %vm349_vm3, %v4119_v45 }
0x1c09   :  { %10908 = vmatpush3.xpose.msk.msra.mxu1 %vm349_vm3, %v4353_v44  ;;  %10909 = vmatprep.mubr.msk.f32.mxu1 %vm12481_vm11, %v12480_v5 }
0x1c0a   :  { %10917 = vmatprep.subr.mxu1 %v12480_v5 }
0x1c0c   :  { %10910 = vmatmul.mubr.msk.f32.vlgmr.msra.gmra.mrb[44].mxu1 %vm349_vm3, %v4351_v46 }
0x1c0d   :  { %10919 = vmatprep.mubr.msk.f32.mxu1 %vm12481_vm11, %v12480_v5 }
0x1ca6   :  { %v4192_v47 = vpop.f32.mrb[36].mxu0 }
0x1ca7   :  { %v10896_v28 = vpop.f32.mrb[37].mxu0 }
0x1cd2   :  { %v4346_v41 = vpop.f32.mrb[38].mxu0 }
0x1cd3   :  { %v4428_v48 = vmul.f32 0.35355338, %v4346_v41  ;;  %v10906_v49 = vpop.f32.mrb[39].mxu0 }
0x1cd4   :  { %v12118_v49 = vld [vmem:[#allocation12] sm:$0xff] }
0x1cd5   :  { %v4430_v7 = vsel %vm349_vm3, %v4428_v48, -inf }
0x1cd6   :  { %4431 = vmax.xlane.f32.xlu0 %v4430_v7 }
0x1cdb   :  { %v4268_v50 = vpop.f32.mrb[42].mxu1 }
0x1cdc   :  { %v10901_v12 = vpop.f32.mrb[43].mxu1 }
0x1cdf   :  { %v4424_v10 = vpop.f32.mrb[44].mxu1 }
0x1ce0   :  { %v4429_v51 = vmul.f32 0.35355338, %v4424_v10  ;;  %v10911_v56 = vpop.f32.mrb[45].mxu1 }
0x1ce2   :  { %v4433_v57 = vsel %vm349_vm3, %v4429_v51, -inf }
0x1ce3   :  { %4434 = vmax.xlane.f32.xlu1 %v4433_v57 }
0x1cf4   :  { %4452 = vrot.lane.b32.xlu1 %v13327_v9, %s12478_s10 }
0x1cf8   :  { %4606 = vrot.lane.b32.xlu1 %v13417_v58, %s12451_s1 }
0x1cfc   :  { %4608 = vrot.lane.b32.xlu1 %v13420_v11, %s12451_s1 }
0x1d00   :  { %4616 = vrot.lane.b32.xlu1 %v4268_v50, %s12458_s30 }
0x1d63   :  { %v4432_v59 = vpop.xlane.xlu0 %4431 }
0x1d64   :  { %v4436_v8 = vsub.f32 %v4428_v48, %v4432_v59 }
0x1d66   :  { %v4438_v60 = vmul.f32 1.442695, %v4436_v8  ;;  %v13494_v8 = vld [vmem:[%s14387_s27] sm:$0xff] }
0x1d68   :  { %11934 = vpow2.f32 %v4438_v60  ;;  %v13499_v60 = vld [vmem:[%s14387_s27 + $0x8] sm:$0xff] }
0x1d70   :  { %v4435_v53 = vpop.xlane.xlu1 %4434 }
0x1d71   :  { %v4437_v4 = vsub.f32 %v4429_v51, %v4435_v53 }
0x1d72   :  { %v11935_v61 = vpop.eup %11934 }
0x1d73   :  { %v4440_v16 = vmul.f32 1.442695, %v4437_v4  ;;  %v4442_v18 = vsel %vm349_vm3, %v11935_v61, 0.0 }
0x1d74   :  { %4443 = vadd.xlane.f32.xlu0 %v4442_v18  ;;  %v4453_v9 = vpop.permute.xlu1 %4452 }
0x1d75   :  { %11936 = vpow2.f32 %v4440_v16  ;;  %10913 = vmatpush3.msra.mxu0 %v4453_v9  ;;  %v13515_v16 = vld [vmem:[%s14387_s27 + $0x10] sm:$0xff]  ;;  %v13522_v9 = vld [vmem:[%s14387_s27 + $0x18] sm:$0xff] }
0x1d76   :  { %v5064_v18 = vrot.slane %v13515_v16, 1 }
0x1d78   :  { %v4607_v63 = vpop.permute.xlu1 %4606 }
0x1d79   :  { %v4628_v39 = vsel %vm349_vm3, %v13380_v26, %v4607_v63  ;;  %v13484_v26 = vsub.s32 7, %v13156_v43  ;;  %v10098_v63 = vld [vmem:[%s14340_s9 + $0x38] sm:$0xff] }
0x1d7b   :  { %v4637_v7 = vrot.slane %v12118_v49, %v13484_v26 }
0x1d7c   :  { %v4609_v45 = vpop.permute.xlu1 %4608 }
0x1d7f   :  { %v11937_v58 = vpop.eup %11936 }
0x1d80   :  { %v4445_v19 = vsel %vm349_vm3, %v11937_v58, 0.0  ;;  %v4617_v46 = vpop.permute.xlu1 %4616 }
0x1d81   :  { %4446 = vadd.xlane.f32.xlu0 %v4445_v19 }
0x1d97   :  { %4528 = vrot.lane.b32.xlu0 %v13325_v1, %s12478_s10  ;;  %v11429_v1 = vpack.c.bf16 %v3188_v29, %v3187_v0 }
0x1d99   :  { %11430 = vmatprep.subr.bf16.mxu0 %v11429_v1 }
0x1d9b   :  { %4614 = vrot.lane.b32.xlu0 %v4192_v47, %s12458_s30  ;;  %v4629_v47 = vsel %vm349_vm3, %v13382_v31, %v4609_v45 }
0x1d9c   :  { %v4631_v28 = vsel %vm359_vm5, %v4629_v47, %v4617_v46 }
0x1e01   :  { %v4444_v11 = vpop.xlane.xlu0 %4443 }
0x1e02   :  { %11938 = vrcp.f32 %v4444_v11 }
0x1e0c   :  { %v11939_v20 = vpop.eup %11938 }
0x1e0d   :  { %v4449_v22 = vmul.f32 %v11939_v20, %v11935_v61  ;;  %v5040_v61 = vld [vmem:[%s14388_s23 + $0x8] sm:$0xff]  ;;  %v5042_v20 = vld [vmem:[%s14388_s23 + $0x18] sm:$0xff] }
0x1e0e   :  { %v4447_v23 = vpop.xlane.xlu0 %4446 }
0x1e0f   :  { %11940 = vrcp.f32 %v4447_v23  ;;  %10915 = vmatmul.mubr.msk.f32.vlgmr.msra.gmra.mrb[40].mxu0 %vm349_vm3, %v4449_v22 }
0x1e10   :  { %11432 = vmatpush3.bf16.msra.mxu0 %v11429_v1 }
0x1e11   :  { %11434 = vmatprep.subr.bf16.mxu0 %v11433_v32 }
0x1e12   :  { %v4529_v24 = vpop.permute.xlu0 %4528 }
0x1e13   :  { %10918 = vmatpush3.msra.mxu1 %v4529_v24 }
0x1e14   :  { %11436 = vmatpush3.bf16.msra.mxu0 %v11433_v32  ;;  %v5039_v32 = vld [vmem:[%s14388_s23] sm:$0xff] }
0x1e16   :  { %v4615_v15 = vpop.permute.xlu0 %4614 }
0x1e17   :  { %v4630_v27 = vsel %vm359_vm5, %v4628_v39, %v4615_v15  ;;  %v5041_v39 = vld [vmem:[%s14388_s23 + $0x10] sm:$0xff] }
0x1e19   :  { %v11941_v2 = vpop.eup %11940 }
0x1e1a   :  { %v4451_v25 = vmul.f32 %v11941_v2, %v11937_v58  ;;  %v5065_v58 = vrot.slane %v13522_v9, 1 }
0x1e1c   :  { %10920 = vmatmul.mubr.msk.f32.vlgmr.msra.gmra.mrb[46].mxu1 %vm349_vm3, %v4451_v25  ;;  %v5066_v19 = vsel %vm289_vm0, %v5064_v18, %v5065_v58  ;;  %v5072_v11 = vsel %vm289_vm0, %v5065_v58, %v5064_v18 }
0x1ee2   :  { %v4524_v33 = vpop.f32.mrb[40].mxu0 }
0x1ee3   :  { %4622 = vrot.lane.b32.xlu0 %v4524_v33, %s14365_s29  ;;  %v10916_v42 = vpop.f32.mrb[41].mxu0  ;;  %v10095_v33 = vld [vmem:[%s14340_s9 + $0x20] sm:$0xff] }
0x1ee4   :  { %v10096_v42 = vld [vmem:[%s14340_s9 + $0x28] sm:$0xff] }
0x1eef   :  { %v4600_v36 = vpop.f32.mrb[46].mxu1 }
0x1ef0   :  { %4624 = vrot.lane.b32.xlu1 %v4600_v36, %s14365_s29  ;;  %v10921_v38 = vpop.f32.mrb[47].mxu1  ;;  %v10097_v36 = vld [vmem:[%s14340_s9 + $0x30] sm:$0xff] }
0x1ef1   :  { %v11437_v38 = vpack.c.bf16 %v10096_v42, %v10095_v33  ;;  %v11441_v15 = vpack.c.bf16 %v10098_v63, %v10097_v36 }
0x1ef3   :  { %11438 = vmatprep.subr.bf16.mxu1 %v11437_v38 }
0x1ef4   :  { %11440 = vmatpush3.bf16.msra.mxu1 %v11437_v38 }
0x1ef5   :  { %11442 = vmatprep.subr.bf16.mxu1 %v11441_v15 }
0x1ef8   :  { %11444 = vmatpush3.bf16.msra.mxu1 %v11441_v15 }
0x1f55   :  { %v4623_v40 = vpop.permute.xlu0 %4622 }
0x1f56   :  { %v4632_v44 = vsel %vm2242_vm8, %v4630_v27, %v4623_v40  ;;  %v260_v27 = vld [vmem:[#allocation4 + $0x10] sm:$0xff]  ;;  %v261_v40 = vld [vmem:[#allocation4 + $0x18] sm:$0xff] }
0x1f57   :  { %10930 = vmatprep.mubr.msk.f32.mxu0 %vm476_vm6, %v4632_v44  ;;  %v11453_v44 = vpack.c.bf16 %v261_v40, %v260_v27  ;;  %v10108_v27 = vld [vmem:[%s14384_s6 + $0x48] sm:$0xff] }
0x1f59   :  { %11454 = vmatprep.subr.bf16.mxu1 %v11453_v44 }
0x1f62   :  { %v4625_v41 = vpop.permute.xlu1 %4624 }
0x1f63   :  { %v4633_v48 = vsel %vm2242_vm8, %v4631_v28, %v4625_v41 }
0x1f64   :  { %10931 = vmatmul.mubr.msk.f32.vlgmr.msra.gmra.mrb[42].mxu0 %vm476_vm6, %v4633_v48 }
0x2037   :  { %v10932_v50 = vpop.f32.mrb[42].mxu0 }
0x2038   :  { %v4716_v12 = vadd.f32 %v10932_v50, %v4637_v7  ;;  %v4710_v10 = vpop.f32.mrb[43].mxu0 }
0x2039   :  { %v4711_v51 = vadd.f32 %v4710_v10, %v4637_v7 }
0x203a   :  { %v4720_v56 = vadd.f32 %v4716_v12, %v13315_v37  ;;  %v5061_v37 = vrot.slane %v13494_v8, 1 }
0x203b   :  { %v4719_v31 = vadd.f32 %v4711_v51, %v13306_v30  ;;  %v5062_v30 = vrot.slane %v13499_v60, 1 }
0x203c   :  { %v4724_v57 = vsel %vm476_vm6, %v4720_v56, 0.0 }
0x203d   :  { %4725 = vadd.xlane.f32.xlu1 %v4724_v57  ;;  %v4721_v59 = vsel %vm476_vm6, %v4719_v31, 0.0  ;;  %v5063_v53 = vsel %vm289_vm0, %v5061_v37, %v5062_v30  ;;  %v5071_v4 = vsel %vm289_vm0, %v5062_v30, %v5061_v37  ;;  %v5046_v37 = vrot.slane %v13522_v9, 7 }
0x203e   :  { %4722 = vadd.xlane.f32.xlu0 %v4721_v59  ;;  %v5053_v59 = vrot.slane %v13515_v16, 7 }
0x204e   :  { %5073 = vrot.lane.b32.xlu1 %v13494_v8, %s12467_s28 }
0x2052   :  { %5087 = vrot.lane.b32.xlu1 %v5063_v53, %s12451_s1 }
0x2056   :  { %5089 = vrot.lane.b32.xlu1 %v5071_v4, %s12451_s1 }
0x205a   :  { %5105 = vrot.lane.b32.xlu1 %v5040_v61, %s12466_s0  ;;  %v4750_v61 = vrot.slane %v13293_v62, %v13159_v55 }
0x205e   :  { %5079 = vrot.lane.b32.xlu1 %v13522_v9, %s12467_s28  ;;  %v4756_v9 = vrot.slane %v13293_v62, %v13190_v35 }
0x2062   :  { %5093 = vrot.lane.b32.xlu1 %v5072_v11, %s12451_s1 }
0x2066   :  { %5109 = vrot.lane.b32.xlu1 %v5042_v20, %s12466_s0 }
0x20ca   :  { %v4726_v22 = vpop.xlane.xlu1 %4725 }
0x20cb   :  { %v4728_v23 = vmul.f32 0.03125, %v4726_v22  ;;  %v4723_v24 = vpop.xlane.xlu0 %4722 }
0x20cc   :  { %v4727_v2 = vmul.f32 0.03125, %v4723_v24  ;;  %v5054_v24 = vsel %vm278_vm1, %v5053_v59, %v5046_v37 }
0x20cd   :  { %v4730_v25 = vsub.f32 %v4720_v56, %v4728_v23  ;;  %v5051_v56 = vrot.slane %v13494_v8, 7 }
0x20ce   :  { %v4729_v0 = vsub.f32 %v4719_v31, %v4727_v2  ;;  %v5074_v45 = vpop.permute.xlu1 %5073  ;;  %v5045_v31 = vrot.slane %v13499_v60, 7 }
0x20cf   :  { %v4732_v29 = vmul.f32 %v4730_v25, %v4730_v25 }
0x20d0   :  { %v4731_v1 = vmul.f32 %v4729_v0, %v4729_v0  ;;  %v5059_v18 = vsel %vm278_vm1, %v5045_v31, %v5051_v56  ;;  %v5052_v20 = vsel %vm278_vm1, %v5051_v56, %v5045_v31 }
0x20d1   :  { %v4736_v3 = vsel %vm476_vm6, %v4732_v29, 0.0 }
0x20d2   :  { %4737 = vadd.xlane.f32.xlu0 %v4736_v3  ;;  %v4733_v54 = vsel %vm476_vm6, %v4731_v1, 0.0  ;;  %v5088_v46 = vpop.permute.xlu1 %5087 }
0x20d6   :  { %4734 = vadd.xlane.f32.xlu0 %v4733_v54  ;;  %v5090_v7 = vpop.permute.xlu1 %5089 }
0x20da   :  { %v5106_v10 = vpop.permute.xlu1 %5105 }
0x20de   :  { %v5080_v4 = vpop.permute.xlu1 %5079 }
0x20df   :  { %v5118_v1 = vsel %vm344_vm2, %v5054_v24, %v5080_v4 }
0x20e2   :  { %v5094_v2 = vpop.permute.xlu1 %5093 }
0x20e3   :  { %v5122_v42 = vsel %vm349_vm3, %v5118_v1, %v5094_v2 }
0x20e6   :  { %v5110_v38 = vpop.permute.xlu1 %5109 }
0x20e7   :  { %v5126_v15 = vsel %vm354_vm4, %v5122_v42, %v5110_v38 }
0x20ec   :  { %5075 = vrot.lane.b32.xlu0 %v13499_v60, %s12467_s28  ;;  %v5115_v60 = vsel %vm344_vm2, %v5059_v18, %v5074_v45  ;;  %v10110_v45 = vld [vmem:[%s14384_s6 + $0x58] sm:$0xff] }
0x20f0   :  { %5103 = vrot.lane.b32.xlu0 %v5039_v32, %s12466_s0 }
0x20f4   :  { %5077 = vrot.lane.b32.xlu0 %v13515_v16, %s12467_s28 }
0x20f8   :  { %5091 = vrot.lane.b32.xlu0 %v5066_v19, %s12451_s1  ;;  %v5060_v19 = vsel %vm278_vm1, %v5046_v37, %v5053_v59 }
0x20fc   :  { %5107 = vrot.lane.b32.xlu0 %v5041_v39, %s12466_s0  ;;  %v10107_v39 = vld [vmem:[%s14384_s6 + $0x40] sm:$0xff] }
0x20fd   :  { %v11457_v40 = vpack.c.bf16 %v10108_v27, %v10107_v39 }
0x215f   :  { %v4738_v47 = vpop.xlane.xlu0 %4737 }
0x2160   :  { %v4740_v28 = vmul.f32 0.03125, %v4738_v47  ;;  %v4868_v47 = vld [vmem:[#allocation9 + $0x20] sm:$0xff] }
0x2162   :  { %v4742_v41 = vadd.f32 1e-05, %v4740_v28  ;;  %v4869_v28 = vld [vmem:[#allocation9 + $0x28] sm:$0xff] }
0x2163   :  { %v4735_v48 = vpop.xlane.xlu0 %4734 }
0x2164   :  { %11942 = vrsqrt.f32 %v4742_v41  ;;  %v4739_v49 = vmul.f32 0.03125, %v4735_v48  ;;  %v4870_v41 = vld [vmem:[#allocation9 + $0x30] sm:$0xff]  ;;  %v11445_v48 = vpack.c.bf16 %v4869_v28, %v4868_v47 }
0x2166   :  { %v4741_v50 = vadd.f32 1e-05, %v4739_v49  ;;  %v4871_v49 = vld [vmem:[#allocation9 + $0x38] sm:$0xff]  ;;  %11446 = vmatprep.subr.bf16.mxu0 %v11445_v48 }
0x2167   :  { %v5076_v12 = vpop.permute.xlu0 %5075  ;;  %11448 = vmatpush3.bf16.msra.mxu0 %v11445_v48 }
0x2168   :  { %11944 = vrsqrt.f32 %v4741_v50  ;;  %v5116_v29 = vsel %vm344_vm2, %v5052_v20, %v5076_v12  ;;  %v12119_v50 = vld [vmem:[#allocation12 + $0x8] sm:$0xff] }
0x2169   :  { %v5120_v32 = vsel %vm349_vm3, %v5116_v29, %v5090_v7  ;;  %v11449_v7 = vpack.c.bf16 %v4871_v49, %v4870_v41  ;;  %v4767_v12 = vrot.slane %v12119_v50, %v13193_v34 }
0x216a   :  { %v5124_v63 = vsel %vm354_vm4, %v5120_v32, %v5106_v10 }
0x216b   :  { %v5104_v51 = vpop.permute.xlu0 %5103  ;;  %11450 = vmatprep.subr.bf16.mxu0 %v11449_v7 }
0x216c   :  { %11452 = vmatpush3.bf16.msra.mxu0 %v11449_v7 }
0x216e   :  { %v11943_v57 = vpop.eup %11942 }
0x216f   :  { %v5078_v30 = vpop.permute.xlu0 %5077  ;;  %v4746_v53 = vmul.f32 %v11943_v57, %v4730_v25  ;;  %v5119_v25 = vsel %vm349_vm3, %v5115_v60, %v5088_v46 }
0x2170   :  { %v5117_v23 = vsel %vm344_vm2, %v5060_v19, %v5078_v30  ;;  %v5123_v33 = vsel %vm354_vm4, %v5119_v25, %v5104_v51  ;;  %v12121_v19 = vld [vmem:[#allocation2 + $0x8] sm:$0xff]  ;;  %vm9783_vm2 = vcmask 392192  }
0x2171   :  { %v4752_v16 = vmul.f32 %v4750_v61, %v4746_v53 }
0x2172   :  { %v11945_v58 = vpop.eup %11944 }
0x2173   :  { %v4745_v11 = vmul.f32 %v11945_v58, %v4729_v0  ;;  %v5092_v8 = vpop.permute.xlu0 %5091  ;;  %v13579_v3 = vadd.f32 %v4756_v9, %v4752_v16 }
0x2174   :  { %v5121_v62 = vsel %vm349_vm3, %v5117_v23, %v5092_v8 }
0x2175   :  { %v4751_v22 = vmul.f32 %v4750_v61, %v4745_v11  ;;  %v12120_v61 = vld [vmem:[#allocation2] sm:$0xff] }
0x2177   :  { %v13577_v0 = vadd.f32 %v4756_v9, %v4751_v22  ;;  %v5108_v54 = vpop.permute.xlu0 %5107 }
0x2178   :  { %v5125_v36 = vsel %vm354_vm4, %v5121_v62, %v5108_v54 }
0x2179   :  { %10941 = vmatprep.mubr.msk.f32.mxu1 %vm476_vm6, %v13577_v0 }
0x217a   :  { %10942 = vmatmul.mubr.msk.f32.vlgmr.msra.gmra.mrb[48].mxu1 %vm476_vm6, %v13579_v3 }
0x217b   :  { %11456 = vmatpush3.bf16.msra.mxu1 %v11453_v44  ;;  %10959 = vmatprep.mubr.msk.f32.mxu1 %vm359_vm5, %v5123_v33  ;;  %v10109_v44 = vld [vmem:[%s14384_s6 + $0x50] sm:$0xff] }
0x217c   :  { %11458 = vmatprep.subr.bf16.mxu1 %v11457_v40  ;;  %v11461_v46 = vpack.c.bf16 %v10110_v45, %v10109_v44 }
0x217e   :  { %10960 = vmatmul.mubr.msk.f32.vlgmr.msra.gmra.mrb[50].mxu1 %vm359_vm5, %v5124_v63 }
0x217f   :  { %10962 = vmatprep.mubr.msk.f32.mxu1 %vm359_vm5, %v5125_v36  ;;  %11460 = vmatpush3.bf16.msra.mxu1 %v11457_v40  ;;  %v10111_v36 = vld [vmem:[#allocation6 + $0x2] ss:$0 sm:$0xff] }
0x2180   :  { %11462 = vmatprep.subr.bf16.mxu1 %v11461_v46 }
0x2182   :  { %10963 = vmatmul.mubr.msk.f32.gmra.mrb[52].mxu1 %vm359_vm5, %v5126_v15 }
0x2183   :  { %11464 = vmatpush3.bf16.msra.mxu1 %v11461_v46 }
0x224d   :  { %v10943_v10 = vpop.f32.mrb[48].mxu1 }
0x224e   :  { %v4846_v51 = vadd.f32 %v10943_v10, %v4767_v12  ;;  %v4840_v56 = vpop.f32.mrb[49].mxu1 }
0x224f   :  { %v4841_v31 = vadd.f32 %v4840_v56, %v4767_v12 }
0x2250   :  { %v4852_v57 = vmul.f32 0.044715, %v4846_v51  ;;  %v4850_v32 = vmul.f32 0.5, %v4846_v51 }
0x2251   :  { %v4851_v59 = vmul.f32 0.044715, %v4841_v31  ;;  %v10961_v37 = vpop.f32.mrb[50].mxu1  ;;  %v4849_v62 = vmul.f32 0.5, %v4841_v31 }
0x2252   :  { %v4854_v30 = vmul.f32 %v4852_v57, %v4846_v51  ;;  %v5205_v53 = vpop.f32.mrb[51].mxu1  ;;  %v13612_v11 = vadd.f32 %v12121_v19, %v10961_v37  ;;  %v5347_v57 = vand.u32 127, %v2247_v52 }
0x2253   :  { %v4853_v4 = vmul.f32 %v4851_v59, %v4841_v31  ;;  %v13610_v18 = vadd.f32 %v12120_v61, %v5205_v53 }
0x2254   :  { %v4856_v58 = vmul.f32 %v4854_v30, %v4846_v51  ;;  %vm13675_vm1 = vcmp.le.s32.totalorder %v5347_v57, %v13156_v43 }
0x2255   :  { %v4855_v8 = vmul.f32 %v4853_v4, %v4841_v31  ;;  %v10964_v60 = vpop.f32.mrb[52].mxu1  ;;  %10973 = vmatprep.mubr.msk.f32.mxu1 %vm476_vm6, %v13610_v18 }
0x2256   :  { %v4858_v20 = vadd.f32 %v4856_v58, %v4846_v51  ;;  %v13616_v16 = vadd.f32 %v12121_v19, %v10964_v60  ;;  %v5215_v9 = vpop.f32.mrb[53].mxu1  ;;  %10974 = vmatmul.mubr.msk.f32.vlgmr.msra.gmra.mrb[54].mxu1 %vm476_vm6, %v13612_v11 }
0x2257   :  { %v4857_v22 = vadd.f32 %v4855_v8, %v4841_v31  ;;  %v13620_v23 = vadd.f32 %v12120_v61, %v5215_v9  ;;  %v5345_v31 = vadd.s32 8, %v13156_v43 }
0x2258   :  { %v4860_v24 = vmul.f32 0.7978846, %v4858_v20 }
0x2259   :  { %10976 = vmatprep.mubr.msk.f32.mxu1 %vm476_vm6, %v13620_v23  ;;  %v4859_v2 = vmul.f32 0.7978846, %v4857_v22  ;;  %vm13670_vm0 = vcmp.le.s32.totalorder %v5347_v57, %v5345_v31 }
0x225a   :  { %11946 = vtanh.f32 %v4860_v24  ;;  %10977 = vmatmul.mubr.msk.f32.gmra.mrb[56].mxu1 %vm476_vm6, %v13616_v16 }
0x225b   :  { %11948 = vtanh.f32 %v4859_v2 }
0x2264   :  { %v11947_v25 = vpop.eup %11946 }
0x2265   :  { %v11949_v29 = vpop.eup %11948  ;;  %v4864_v1 = vadd.f32 1.0, %v11947_v25 }
0x2266   :  { %v4863_v54 = vadd.f32 1.0, %v11949_v29 }
0x2267   :  { %v4866_v42 = vmul.f32 %v4864_v1, %v4850_v32 }
0x2268   :  { %v4865_v33 = vmul.f32 %v4863_v54, %v4849_v62 }
0x226a   :  { %10952 = vmatprep.mubr.msk.f32.mxu0 %vm476_vm6, %v4865_v33 }
0x226b   :  { %10953 = vmatmul.mubr.msk.f32.vlgmr.msra.gmra.mrb[44].mxu0 %vm476_vm6, %v4866_v42 }
0x2329   :  { %v10975_v38 = vpop.f32.mrb[54].mxu1 }
0x232a   :  { %v13628_v63 = vadd.f32 %v10975_v38, %v10111_v36  ;;  %v5324_v15 = vpop.f32.mrb[55].mxu1 }
0x232b   :  { %v13630_v39 = vadd.f32 %v10111_v36, %v5324_v15 }
0x232d   :  { %v10978_v27 = vpop.f32.mrb[56].mxu1  ;;  %10983 = vmatprep.mubr.msk.f32.mxu0 %vm349_vm3, %v13630_v39  ;;  %v13636_v40 = vpack.i.bf16 %v13628_v63, %v13630_v39 }
0x232e   :  { %v13638_v44 = vadd.f32 %v10978_v27, %v10111_v36  ;;  %v5334_v45 = vpop.f32.mrb[57].mxu1 }
0x232f   :  { %v13640_v46 = vadd.f32 %v10111_v36, %v5334_v45  ;;  %11724 = vrot.lane.b32.xlu0 %v13636_v40, %s12468_s3 }
0x2331   :  { %v13646_v47 = vpack.i.bf16 %v13638_v44, %v13640_v46  ;;  %10990 = vmatprep.mubr.msk.f32.mxu1 %vm349_vm3, %v13640_v46 }
0x2333   :  { %11729 = vrot.lane.b32.xlu1 %v13646_v47, %s12468_s3 }
0x233e   :  { %v13652_v28 = vpop.f32.mrb[44].mxu0 }
0x233f   :  { %v13654_v41 = vpop.f32.mrb[45].mxu0 }
0x23a1   :  { %v11725_v48 = vpop.permute.xlu0 %11724 }
0x23a2   :  { %v11727_v49 = vunpack.i.h.bf16 %v11725_v48  ;;  %v11726_v7 = vunpack.i.l.bf16 %v11725_v48 }
0x23a4   :  { %v11465_v50 = vpack.c.bf16 %v11727_v49, %v11726_v7 }
0x23a5   :  { %v11730_v12 = vpop.permute.xlu1 %11729 }
0x23a6   :  { %v11732_v10 = vunpack.i.h.bf16 %v11730_v12  ;;  %v11731_v51 = vunpack.i.l.bf16 %v11730_v12  ;;  %11467 = vmatprep.subr.msk.bf16.mxu0 %vm12945_vm7, %v11465_v50 }
0x23a7   :  { %11470 = vmatpush3.bf16.xpose.msk.msra.mxu0 %vm12945_vm7, %v11465_v50 }
0x23a8   :  { %v11471_v56 = vpack.c.bf16 %v11732_v10, %v11731_v51 }
0x23aa   :  { %11473 = vmatprep.subr.msk.bf16.mxu1 %vm12945_vm7, %v11471_v56 }
0x23ab   :  { %11476 = vmatpush3.bf16.xpose.msk.msra.mxu1 %vm12945_vm7, %v11471_v56 }
0x23ae   :  { %10984 = vmatmul.mubr.msk.f32.vlgmr.msra.gmra.mrb[46].mxu0 %vm349_vm3, %v13628_v63 }
0x23b2   :  { %10991 = vmatmul.mubr.msk.f32.vlgmr.msra.gmra.mrb[58].mxu1 %vm349_vm3, %v13638_v44 }
0x2481   :  { %v10985_v37 = vpop.f32.mrb[46].mxu0 }
0x2482   :  { %v5529_v30 = vmul.f32 0.35355338, %v10985_v37  ;;  %v5430_v4 = vpop.f32.mrb[47].mxu0 }
0x2483   :  { %v5528_v61 = vmul.f32 0.35355338, %v5430_v4 }
0x2484   :  { %v5537_v58 = vsel %vm13670_vm0, %v5529_v30, -1e+30 }
0x2485   :  { %v5536_v19 = vsel %vm13675_vm1, %v5528_v61, -1e+30  ;;  %v10992_v52 = vpop.f32.mrb[58].mxu1  ;;  %v5543_v8 = vsel %vm359_vm5, %v5537_v58, -inf }
0x2486   :  { %v5519_v60 = vpop.f32.mrb[59].mxu1  ;;  %5544 = vmax.xlane.f32.xlu1 %v5543_v8  ;;  %v5540_v20 = vsel %vm359_vm5, %v5536_v19, -inf  ;;  %v5531_v9 = vmul.f32 0.35355338, %v10992_v52 }
0x2487   :  { %v5530_v43 = vmul.f32 0.35355338, %v5519_v60  ;;  %5541 = vmax.xlane.f32.xlu0 %v5540_v20 }
0x2488   :  { %v5539_v2 = vsel %vm13670_vm0, %v5531_v9, -1e+30 }
0x2489   :  { %v5538_v22 = vsel %vm13675_vm1, %v5530_v43, -1e+30  ;;  %v5549_v25 = vsel %vm359_vm5, %v5539_v2, -inf }
0x248a   :  { %v5546_v24 = vsel %vm359_vm5, %v5538_v22, -inf }
0x248b   :  { %5547 = vmax.xlane.f32.xlu0 %v5546_v24 }
0x248f   :  { %5550 = vmax.xlane.f32.xlu0 %v5549_v25 }
0x2497   :  { %11734 = vrot.lane.b32.xlu1 %v13636_v40, %s12469_s11 }
0x249b   :  { %11744 = vrot.lane.b32.xlu1 %v13636_v40, %s12470_s25 }
0x249f   :  { %11749 = vrot.lane.b32.xlu1 %v13646_v47, %s12470_s25 }
0x2513   :  { %v5545_v29 = vpop.xlane.xlu1 %5544 }
0x2514   :  { %v5553_v1 = vsub.f32 %v5537_v58, %v5545_v29  ;;  %v5542_v62 = vpop.xlane.xlu0 %5541 }
0x2515   :  { %v5552_v54 = vsub.f32 %v5536_v19, %v5542_v62 }
0x2516   :  { %v5558_v32 = vmul.f32 1.442695, %v5553_v1 }
0x2517   :  { %v5556_v33 = vmul.f32 1.442695, %v5552_v54  ;;  %v11735_v42 = vpop.permute.xlu1 %11734 }
0x2518   :  { %11950 = vpow2.f32 %v5558_v32  ;;  %v11737_v36 = vunpack.i.h.bf16 %v11735_v42  ;;  %v11736_v38 = vunpack.i.l.bf16 %v11735_v42  ;;  %v5548_v51 = vpop.xlane.xlu0 %5547 }
0x2519   :  { %11952 = vpow2.f32 %v5556_v33  ;;  %v5554_v57 = vsub.f32 %v5538_v22, %v5548_v51 }
0x251a   :  { %v11477_v15 = vpack.c.bf16 %v11737_v36, %v11736_v38 }
0x251b   :  { %v11745_v27 = vpop.permute.xlu1 %11744  ;;  %v5560_v30 = vmul.f32 1.442695, %v5554_v57 }
0x251c   :  { %v11747_v45 = vunpack.i.h.bf16 %v11745_v27  ;;  %v11746_v48 = vunpack.i.l.bf16 %v11745_v27  ;;  %11478 = vmatprep.subr.bf16.mxu0 %v11477_v15  ;;  %v5551_v56 = vpop.xlane.xlu0 %5550 }
0x251d   :  { %11480 = vmatpush3.bf16.msra.mxu0 %v11477_v15  ;;  %v5555_v31 = vsub.f32 %v5539_v2, %v5551_v56 }
0x251e   :  { %v11485_v49 = vpack.c.bf16 %v11747_v45, %v11746_v48 }
0x251f   :  { %v5562_v37 = vmul.f32 1.442695, %v5555_v31  ;;  %v11750_v52 = vpop.permute.xlu1 %11749 }
0x2520   :  { %11487 = vmatprep.subr.msk.bf16.mxu1 %vm12945_vm7, %v11485_v49  ;;  %v11752_v25 = vunpack.i.h.bf16 %v11750_v52  ;;  %v11751_v29 = vunpack.i.l.bf16 %v11750_v52 }
0x2521   :  { %11490 = vmatpush3.bf16.xpose.msk.msra.mxu1 %vm12945_vm7, %v11485_v49  ;;  %11954 = vpow2.f32 %v5562_v37 }
0x2522   :  { %v11951_v7 = vpop.eup %11950  ;;  %11956 = vpow2.f32 %v5560_v30  ;;  %v11491_v54 = vpack.c.bf16 %v11752_v25, %v11751_v29 }
0x2523   :  { %v11953_v50 = vpop.eup %11952  ;;  %v5567_v12 = vsel %vm359_vm5, %v11951_v7, 0.0 }
0x2524   :  { %5568 = vadd.xlane.f32.xlu0 %v5567_v12  ;;  %v5564_v10 = vsel %vm359_vm5, %v11953_v50, 0.0 }
0x2525   :  { %5565 = vadd.xlane.f32.xlu1 %v5564_v10 }
0x252b   :  { %v11955_v4 = vpop.eup %11954 }
0x252c   :  { %v11957_v61 = vpop.eup %11956  ;;  %v5573_v58 = vsel %vm359_vm5, %v11955_v4, 0.0 }
0x252d   :  { %v5570_v19 = vsel %vm359_vm5, %v11957_v61, 0.0 }
0x2536   :  { %5760 = vrot.lane.b32.xlu1 %v13628_v63, %s12471_s12 }
0x253a   :  { %11739 = vrot.lane.b32.xlu0 %v13646_v47, %s12469_s11  ;;  %s14393_s11 = smov 24  }
0x2559   :  { %5574 = vadd.xlane.f32.xlu0 %v5573_v58 }
0x255a   :  { %5571 = vadd.xlane.f32.xlu1 %v5570_v19 }
0x256b   :  { %5851 = vrot.lane.b32.xlu1 %v13638_v44, %s12471_s12 }
0x256f   :  { %5758 = vrot.lane.b32.xlu0 %v13630_v39, %s12471_s12 }
0x2573   :  { %5849 = vrot.lane.b32.xlu0 %v13640_v46, %s12471_s12 }
0x25b1   :  { %v5569_v8 = vpop.xlane.xlu0 %5568 }
0x25b2   :  { %11958 = vrcp.f32 %v5569_v8  ;;  %v5566_v60 = vpop.xlane.xlu1 %5565 }
0x25b3   :  { %11960 = vrcp.f32 %v5566_v60 }
0x25b5   :  { %v11740_v20 = vpop.permute.xlu0 %11739 }
0x25b6   :  { %v11742_v9 = vunpack.i.h.bf16 %v11740_v20  ;;  %v11741_v43 = vunpack.i.l.bf16 %v11740_v20  ;;  %v5761_v32 = vpop.permute.xlu1 %5760 }
0x25b8   :  { %v11481_v22 = vpack.c.bf16 %v11742_v9, %v11741_v43 }
0x25ba   :  { %11482 = vmatprep.subr.bf16.mxu0 %v11481_v22 }
0x25bc   :  { %v11959_v24 = vpop.eup %11958 }
0x25bd   :  { %v11961_v2 = vpop.eup %11960  ;;  %v5579_v62 = vmul.f32 %v11959_v24, %v11951_v7 }
0x25be   :  { %v5577_v1 = vmul.f32 %v11961_v2, %v11953_v50 }
0x25c0   :  { %10997 = vmatprep.mubr.msk.f32.mxu0 %vm359_vm5, %v5577_v1 }
0x25c1   :  { %10998 = vmatmul.mubr.msk.f32.vlgmr.msra.gmra.mrb[48].mxu0 %vm359_vm5, %v5579_v62 }
0x25c2   :  { %11484 = vmatpush3.bf16.msra.mxu0 %v11481_v22 }
0x25c3   :  { %11493 = vmatprep.subr.msk.bf16.mxu0 %vm12945_vm7, %v11491_v54 }
0x25e6   :  { %v5575_v33 = vpop.xlane.xlu0 %5574 }
0x25e7   :  { %11962 = vrcp.f32 %v5575_v33  ;;  %v5572_v42 = vpop.xlane.xlu1 %5571 }
0x25e8   :  { %11964 = vrcp.f32 %v5572_v42 }
0x25ea   :  { %v5759_v36 = vpop.permute.xlu0 %5758 }
0x25eb   :  { %11011 = vmatprep.mubr.msk.f32.mxu1 %vm349_vm3, %v5759_v36  ;;  %v5852_v49 = vpop.permute.xlu1 %5851 }
0x25ec   :  { %11012 = vmatmul.mubr.msk.f32.vlgmr.msra.gmra.mrb[60].mxu1 %vm349_vm3, %v5761_v32 }
0x25ee   :  { %v5850_v48 = vpop.permute.xlu0 %5849 }
0x25f1   :  { %v11963_v38 = vpop.eup %11962 }
0x25f2   :  { %v11965_v15 = vpop.eup %11964  ;;  %v5583_v45 = vmul.f32 %v11963_v38, %v11955_v4 }
0x25f3   :  { %v5581_v27 = vmul.f32 %v11965_v15, %v11957_v61 }
0x25f5   :  { %11004 = vmatprep.mubr.msk.f32.mxu0 %vm359_vm5, %v5581_v27 }
0x25f6   :  { %11005 = vmatmul.mubr.msk.f32.vlgmr.msra.gmra.mrb[50].mxu0 %vm359_vm5, %v5583_v45 }
0x25f7   :  { %11496 = vmatpush3.bf16.xpose.msk.msra.mxu0 %vm12945_vm7, %v11491_v54  ;;  %11018 = vmatprep.mubr.msk.f32.mxu0 %vm349_vm3, %v5850_v48 }
0x25fe   :  { %11019 = vmatmul.mubr.msk.f32.vlgmr.msra.gmra.mrb[52].mxu0 %vm349_vm3, %v5852_v49 }
0x2694   :  { %v13727_v7 = vpop.f32.mrb[48].mxu0 }
0x2695   :  { %v13729_v50 = vpop.f32.mrb[49].mxu0 }
0x26bf   :  { %v11013_v12 = vpop.f32.mrb[60].mxu1 }
0x26c0   :  { %v5941_v10 = vmul.f32 0.35355338, %v11013_v12  ;;  %v5840_v51 = vpop.f32.mrb[61].mxu1 }
0x26c1   :  { %v5940_v56 = vmul.f32 0.35355338, %v5840_v51 }
0x26c2   :  { %v5945_v31 = vsel %vm13670_vm0, %v5941_v10, -1e+30 }
0x26c3   :  { %v5944_v57 = vsel %vm13675_vm1, %v5940_v56, -1e+30  ;;  %v5951_v37 = vsel %vm359_vm5, %v5945_v31, -inf }
0x26c4   :  { %5952 = vmax.xlane.f32.xlu1 %v5951_v37  ;;  %v5948_v30 = vsel %vm359_vm5, %v5944_v57, -inf }
0x26c5   :  { %5949 = vmax.xlane.f32.xlu0 %v5948_v30 }
0x26c9   :  { %v13737_v4 = vpop.f32.mrb[50].mxu0 }
0x26ca   :  { %v13739_v61 = vpop.f32.mrb[51].mxu0 }
0x26d1   :  { %v11020_v58 = vpop.f32.mrb[52].mxu0 }
0x26d2   :  { %v5931_v19 = vpop.f32.mrb[53].mxu0  ;;  %v5943_v52 = vmul.f32 0.35355338, %v11020_v58 }
0x26d3   :  { %v5942_v8 = vmul.f32 0.35355338, %v5931_v19 }
0x26d4   :  { %v5947_v9 = vsel %vm13670_vm0, %v5943_v52, -1e+30 }
0x26d5   :  { %v5946_v60 = vsel %vm13675_vm1, %v5942_v8, -1e+30  ;;  %v5957_v43 = vsel %vm359_vm5, %v5947_v9, -inf }
0x26d6   :  { %v5954_v20 = vsel %vm359_vm5, %v5946_v60, -inf }
0x26d7   :  { %5955 = vmax.xlane.f32.xlu0 %v5954_v20 }
0x26db   :  { %5958 = vmax.xlane.f32.xlu0 %v5957_v43 }
0x2751   :  { %v5953_v22 = vpop.xlane.xlu1 %5952 }
0x2752   :  { %v5961_v24 = vsub.f32 %v5945_v31, %v5953_v22  ;;  %v5950_v2 = vpop.xlane.xlu0 %5949 }
0x2753   :  { %v5960_v25 = vsub.f32 %v5944_v57, %v5950_v2 }
0x2754   :  { %v5966_v29 = vmul.f32 1.442695, %v5961_v24 }
0x2755   :  { %v5964_v1 = vmul.f32 1.442695, %v5960_v25 }
0x2756   :  { %11966 = vpow2.f32 %v5966_v29 }
0x2757   :  { %11968 = vpow2.f32 %v5964_v1 }
0x2760   :  { %v11967_v62 = vpop.eup %11966 }
0x2761   :  { %v11969_v54 = vpop.eup %11968  ;;  %v5975_v32 = vsel %vm359_vm5, %v11967_v62, 0.0 }
0x2762   :  { %5976 = vadd.xlane.f32.xlu0 %v5975_v32  ;;  %v5972_v33 = vsel %vm359_vm5, %v11969_v54, 0.0 }
0x2763   :  { %5973 = vadd.xlane.f32.xlu1 %v5972_v33 }
0x2764   :  { %v5956_v42 = vpop.xlane.xlu0 %5955 }
0x2765   :  { %v5962_v27 = vsub.f32 %v5946_v60, %v5956_v42 }
0x2767   :  { %v5968_v45 = vmul.f32 1.442695, %v5962_v27 }
0x2768   :  { %v5959_v36 = vpop.xlane.xlu0 %5958 }
0x2769   :  { %v5963_v38 = vsub.f32 %v5947_v9, %v5959_v36 }
0x276b   :  { %v5970_v15 = vmul.f32 1.442695, %v5963_v38 }
0x276d   :  { %11970 = vpow2.f32 %v5970_v15 }
0x276e   :  { %11972 = vpow2.f32 %v5968_v45 }
0x2774   :  { %11754 = vrot.lane.b32.xlu1 %v13636_v40, %s12472_s26 }
0x2777   :  { %v11971_v48 = vpop.eup %11970 }
0x2778   :  { %11764 = vrot.lane.b32.xlu1 %v13636_v40, %s12473_s17  ;;  %11759 = vrot.lane.b32.xlu0 %v13646_v47, %s12472_s26  ;;  %v5981_v49 = vsel %vm359_vm5, %v11971_v48, 0.0  ;;  %v11973_v12 = vpop.eup %11972 }
0x2779   :  { %v5978_v10 = vsel %vm359_vm5, %v11973_v12, 0.0 }
0x277c   :  { %11769 = vrot.lane.b32.xlu1 %v13646_v47, %s12473_s17 }
0x2780   :  { %6168 = vrot.lane.b32.xlu1 %v13628_v63, %s12474_s13 }
0x2797   :  { %5982 = vadd.xlane.f32.xlu0 %v5981_v49 }
0x27a4   :  { %5979 = vadd.xlane.f32.xlu1 %v5978_v10 }
0x27ad   :  { %6166 = vrot.lane.b32.xlu0 %v13630_v39, %s12474_s13 }
0x27b1   :  { %6257 = vrot.lane.b32.xlu0 %v13640_v46, %s12474_s13 }
0x27b5   :  { %6259 = vrot.lane.b32.xlu1 %v13638_v44, %s12474_s13 }
0x27ef   :  { %v5977_v51 = vpop.xlane.xlu0 %5976 }
0x27f0   :  { %11974 = vrcp.f32 %v5977_v51  ;;  %v5974_v56 = vpop.xlane.xlu1 %5973 }
0x27f1   :  { %11976 = vrcp.f32 %v5974_v56 }
0x27f3   :  { %v11760_v31 = vpop.permute.xlu0 %11759 }
0x27f4   :  { %v11762_v57 = vunpack.i.h.bf16 %v11760_v31  ;;  %v11761_v37 = vunpack.i.l.bf16 %v11760_v31  ;;  %v11755_v30 = vpop.permute.xlu1 %11754 }
0x27f5   :  { %v11757_v58 = vunpack.i.h.bf16 %v11755_v30  ;;  %v11756_v19 = vunpack.i.l.bf16 %v11755_v30 }
0x27f6   :  { %v11501_v52 = vpack.c.bf16 %v11762_v57, %v11761_v37 }
0x27f7   :  { %v11497_v8 = vpack.c.bf16 %v11757_v58, %v11756_v19 }
0x27f8   :  { %v11765_v60 = vpop.permute.xlu1 %11764  ;;  %11502 = vmatprep.subr.bf16.mxu0 %v11501_v52 }
0x27f9   :  { %v11767_v20 = vunpack.i.h.bf16 %v11765_v60  ;;  %v11766_v9 = vunpack.i.l.bf16 %v11765_v60  ;;  %11498 = vmatprep.subr.bf16.mxu1 %v11497_v8  ;;  %11504 = vmatpush3.bf16.msra.mxu0 %v11501_v52 }
0x27fa   :  { %v11975_v43 = vpop.eup %11974  ;;  %11500 = vmatpush3.bf16.msra.mxu1 %v11497_v8 }
0x27fb   :  { %v11977_v22 = vpop.eup %11976  ;;  %v11505_v24 = vpack.c.bf16 %v11767_v20, %v11766_v9  ;;  %v5987_v32 = vmul.f32 %v11975_v43, %v11967_v62 }
0x27fc   :  { %v11770_v2 = vpop.permute.xlu1 %11769  ;;  %v5985_v25 = vmul.f32 %v11977_v22, %v11969_v54 }
0x27fd   :  { %v11772_v29 = vunpack.i.h.bf16 %v11770_v2  ;;  %v11771_v1 = vunpack.i.l.bf16 %v11770_v2  ;;  %11507 = vmatprep.subr.msk.bf16.mxu1 %vm12945_vm7, %v11505_v24 }
0x27fe   :  { %11025 = vmatprep.mubr.msk.f32.mxu1 %vm359_vm5, %v5985_v25 }
0x27ff   :  { %v11511_v33 = vpack.c.bf16 %v11772_v29, %v11771_v1  ;;  %11026 = vmatmul.mubr.msk.f32.vlgmr.msra.gmra.mrb[62].mxu1 %vm359_vm5, %v5987_v32 }
0x2800   :  { %v6169_v54 = vpop.permute.xlu1 %6168 }
0x2801   :  { %11513 = vmatprep.subr.msk.bf16.mxu0 %vm12945_vm7, %v11511_v33 }
0x2803   :  { %11510 = vmatpush3.bf16.xpose.msk.msra.mxu1 %vm12945_vm7, %v11505_v24 }
0x2824   :  { %v5983_v42 = vpop.xlane.xlu0 %5982 }
0x2825   :  { %11978 = vrcp.f32 %v5983_v42 }
0x2828   :  { %v6167_v36 = vpop.permute.xlu0 %6166 }
0x2829   :  { %11039 = vmatprep.mubr.msk.f32.mxu1 %vm349_vm3, %v6167_v36 }
0x282a   :  { %11040 = vmatmul.mubr.msk.f32.vlgmr.msra.gmra.mrb[64].mxu1 %vm349_vm3, %v6169_v54 }
0x282c   :  { %v6258_v49 = vpop.permute.xlu0 %6257 }
0x282f   :  { %v11979_v38 = vpop.eup %11978 }
0x2830   :  { %v5991_v45 = vmul.f32 %v11979_v38, %v11971_v48 }
0x2831   :  { %v5980_v62 = vpop.xlane.xlu1 %5979 }
0x2832   :  { %11980 = vrcp.f32 %v5980_v62 }
0x2835   :  { %v6260_v10 = vpop.permute.xlu1 %6259 }
0x283c   :  { %v11981_v15 = vpop.eup %11980 }
0x283d   :  { %v5989_v27 = vmul.f32 %v11981_v15, %v11973_v12 }
0x283f   :  { %11032 = vmatprep.mubr.msk.f32.mxu0 %vm359_vm5, %v5989_v27 }
0x2840   :  { %11033 = vmatmul.mubr.msk.f32.vlgmr.msra.gmra.mrb[54].mxu0 %vm359_vm5, %v5991_v45 }
0x2841   :  { %11516 = vmatpush3.bf16.xpose.msk.msra.mxu0 %vm12945_vm7, %v11511_v33  ;;  %11046 = vmatprep.mubr.msk.f32.mxu0 %vm349_vm3, %v6258_v49 }
0x2848   :  { %11047 = vmatmul.mubr.msk.f32.vlgmr.msra.gmra.mrb[56].mxu0 %vm349_vm3, %v6260_v10 }
0x28d2   :  { %v13783_v51 = vpop.f32.mrb[62].mxu1 }
0x28d3   :  { %v13785_v56 = vpop.f32.mrb[63].mxu1 }
0x28fd   :  { %v11041_v31 = vpop.f32.mrb[64].mxu1 }
0x28fe   :  { %v6349_v12 = vmul.f32 0.35355338, %v11041_v31  ;;  %v6248_v48 = vpop.f32.mrb[65].mxu1 }
0x28ff   :  { %v6348_v57 = vmul.f32 0.35355338, %v6248_v48 }
0x2900   :  { %v6353_v37 = vsel %vm13670_vm0, %v6349_v12, -1e+30 }
0x2901   :  { %v6352_v30 = vsel %vm13675_vm1, %v6348_v57, -1e+30  ;;  %v6359_v58 = vsel %vm359_vm5, %v6353_v37, -inf }
0x2902   :  { %6360 = vmax.xlane.f32.xlu1 %v6359_v58  ;;  %v6356_v19 = vsel %vm359_vm5, %v6352_v30, -inf }
0x2903   :  { %6357 = vmax.xlane.f32.xlu0 %v6356_v19 }
0x2913   :  { %v13793_v52 = vpop.f32.mrb[54].mxu0 }
0x2914   :  { %v13795_v8 = vpop.f32.mrb[55].mxu0 }
0x291b   :  { %v11048_v60 = vpop.f32.mrb[56].mxu0 }
0x291c   :  { %v6339_v20 = vpop.f32.mrb[57].mxu0  ;;  %v6351_v9 = vmul.f32 0.35355338, %v11048_v60 }
0x291d   :  { %v6350_v43 = vmul.f32 0.35355338, %v6339_v20 }
0x291e   :  { %v6355_v2 = vsel %vm13670_vm0, %v6351_v9, -1e+30 }
0x291f   :  { %v6354_v22 = vsel %vm13675_vm1, %v6350_v43, -1e+30  ;;  %v6365_v25 = vsel %vm359_vm5, %v6355_v2, -inf }
0x2920   :  { %v6362_v24 = vsel %vm359_vm5, %v6354_v22, -inf }
0x2921   :  { %6363 = vmax.xlane.f32.xlu0 %v6362_v24 }
0x2925   :  { %6366 = vmax.xlane.f32.xlu0 %v6365_v25 }
0x298f   :  { %v6361_v29 = vpop.xlane.xlu1 %6360 }
0x2990   :  { %v6369_v1 = vsub.f32 %v6353_v37, %v6361_v29  ;;  %v6358_v32 = vpop.xlane.xlu0 %6357 }
0x2991   :  { %v6368_v33 = vsub.f32 %v6352_v30, %v6358_v32 }
0x2992   :  { %v6374_v42 = vmul.f32 1.442695, %v6369_v1 }
0x2993   :  { %v6372_v36 = vmul.f32 1.442695, %v6368_v33 }
0x2994   :  { %11982 = vpow2.f32 %v6374_v42 }
0x2995   :  { %11984 = vpow2.f32 %v6372_v36 }
0x299e   :  { %v11983_v54 = vpop.eup %11982 }
0x299f   :  { %v11985_v62 = vpop.eup %11984  ;;  %v6383_v38 = vsel %vm359_vm5, %v11983_v54, 0.0 }
0x29a0   :  { %6384 = vadd.xlane.f32.xlu0 %v6383_v38  ;;  %v6380_v15 = vsel %vm359_vm5, %v11985_v62, 0.0 }
0x29a1   :  { %6381 = vadd.xlane.f32.xlu1 %v6380_v15 }
0x29ae   :  { %v6364_v27 = vpop.xlane.xlu0 %6363 }
0x29af   :  { %v6370_v31 = vsub.f32 %v6354_v22, %v6364_v27 }
0x29b1   :  { %v6376_v12 = vmul.f32 1.442695, %v6370_v31 }
0x29b2   :  { %11774 = vrot.lane.b32.xlu1 %v13636_v40, %s12475_s18  ;;  %v6367_v45 = vpop.xlane.xlu0 %6366 }
0x29b3   :  { %v6371_v49 = vsub.f32 %v6355_v2, %v6367_v45 }
0x29b5   :  { %v6378_v10 = vmul.f32 1.442695, %v6371_v49 }
0x29b6   :  { %11784 = vrot.lane.b32.xlu1 %v13636_v40, %s12476_s5  ;;  %11779 = vrot.lane.b32.xlu0 %v13646_v47, %s12475_s18 }
0x29b7   :  { %11986 = vpow2.f32 %v6378_v10 }
0x29b8   :  { %11988 = vpow2.f32 %v6376_v12 }
0x29ba   :  { %11789 = vrot.lane.b32.xlu1 %v13646_v47, %s12476_s5 }
0x29be   :  { %6576 = vrot.lane.b32.xlu1 %v13628_v63, %s12477_s22 }
0x29c1   :  { %v11987_v48 = vpop.eup %11986 }
0x29c2   :  { %v6389_v57 = vsel %vm359_vm5, %v11987_v48, 0.0  ;;  %v11989_v37 = vpop.eup %11988 }
0x29c3   :  { %v6386_v30 = vsel %vm359_vm5, %v11989_v37, 0.0 }
0x29d5   :  { %6390 = vadd.xlane.f32.xlu0 %v6389_v57 }
0x29e2   :  { %6387 = vadd.xlane.f32.xlu1 %v6386_v30 }
0x29eb   :  { %6574 = vrot.lane.b32.xlu0 %v13630_v39, %s12477_s22 }
0x29ef   :  { %6665 = vrot.lane.b32.xlu0 %v13640_v46, %s12477_s22 }
0x29f3   :  { %6667 = vrot.lane.b32.xlu1 %v13638_v44, %s12477_s22 }
0x2a2d   :  { %v6385_v63 = vpop.xlane.xlu0 %6384 }
0x2a2e   :  { %11990 = vrcp.f32 %v6385_v63  ;;  %v6382_v58 = vpop.xlane.xlu1 %6381 }
0x2a2f   :  { %11992 = vrcp.f32 %v6382_v58 }
0x2a31   :  { %v11780_v19 = vpop.permute.xlu0 %11779 }
0x2a32   :  { %v11782_v60 = vunpack.i.h.bf16 %v11780_v19  ;;  %v11781_v20 = vunpack.i.l.bf16 %v11780_v19  ;;  %v11775_v9 = vpop.permute.xlu1 %11774 }
0x2a33   :  { %v11777_v43 = vunpack.i.h.bf16 %v11775_v9  ;;  %v11776_v22 = vunpack.i.l.bf16 %v11775_v9 }
0x2a34   :  { %v11521_v24 = vpack.c.bf16 %v11782_v60, %v11781_v20 }
0x2a35   :  { %v11517_v2 = vpack.c.bf16 %v11777_v43, %v11776_v22 }
0x2a36   :  { %v11785_v25 = vpop.permute.xlu1 %11784  ;;  %11522 = vmatprep.subr.bf16.mxu0 %v11521_v24 }
0x2a37   :  { %v11787_v39 = vunpack.i.h.bf16 %v11785_v25  ;;  %v11786_v29 = vunpack.i.l.bf16 %v11785_v25  ;;  %11518 = vmatprep.subr.bf16.mxu1 %v11517_v2  ;;  %11524 = vmatpush3.bf16.msra.mxu0 %v11521_v24 }
0x2a38   :  { %v11991_v46 = vpop.eup %11990  ;;  %11520 = vmatpush3.bf16.msra.mxu1 %v11517_v2 }
0x2a39   :  { %v11993_v44 = vpop.eup %11992  ;;  %v11525_v1 = vpack.c.bf16 %v11787_v39, %v11786_v29  ;;  %v6395_v38 = vmul.f32 %v11991_v46, %v11983_v54 }
0x2a3a   :  { %v11790_v32 = vpop.permute.xlu1 %11789  ;;  %v6393_v33 = vmul.f32 %v11993_v44, %v11985_v62 }
0x2a3b   :  { %v11792_v42 = vunpack.i.h.bf16 %v11790_v32  ;;  %v11791_v36 = vunpack.i.l.bf16 %v11790_v32  ;;  %11527 = vmatprep.subr.msk.bf16.mxu1 %vm12945_vm7, %v11525_v1 }
0x2a3c   :  { %11053 = vmatprep.mubr.msk.f32.mxu1 %vm359_vm5, %v6393_v33 }
0x2a3d   :  { %v11531_v15 = vpack.c.bf16 %v11792_v42, %v11791_v36  ;;  %11054 = vmatmul.mubr.msk.f32.vlgmr.msra.gmra.mrb[66].mxu1 %vm359_vm5, %v6395_v38 }
0x2a3e   :  { %v6577_v62 = vpop.permute.xlu1 %6576 }
0x2a3f   :  { %11533 = vmatprep.subr.msk.bf16.mxu0 %vm12945_vm7, %v11531_v15 }
0x2a41   :  { %11530 = vmatpush3.bf16.xpose.msk.msra.mxu1 %vm12945_vm7, %v11525_v1 }
0x2a62   :  { %v6391_v27 = vpop.xlane.xlu0 %6390 }
0x2a63   :  { %11994 = vrcp.f32 %v6391_v27 }
0x2a66   :  { %v6575_v45 = vpop.permute.xlu0 %6574 }
0x2a67   :  { %11067 = vmatprep.mubr.msk.f32.mxu1 %vm349_vm3, %v6575_v45 }
0x2a68   :  { %11068 = vmatmul.mubr.msk.f32.vlgmr.msra.gmra.mrb[68].mxu1 %vm349_vm3, %v6577_v62 }
0x2a6a   :  { %v6666_v57 = vpop.permute.xlu0 %6665 }
0x2a6d   :  { %v11995_v49 = vpop.eup %11994 }
0x2a6e   :  { %v6399_v12 = vmul.f32 %v11995_v49, %v11987_v48 }
0x2a6f   :  { %v6388_v54 = vpop.xlane.xlu1 %6387 }
0x2a70   :  { %11996 = vrcp.f32 %v6388_v54 }
0x2a73   :  { %v6668_v30 = vpop.permute.xlu1 %6667 }
0x2a7a   :  { %v11997_v10 = vpop.eup %11996 }
0x2a7b   :  { %v6397_v31 = vmul.f32 %v11997_v10, %v11989_v37 }
0x2a7d   :  { %11060 = vmatprep.mubr.msk.f32.mxu0 %vm359_vm5, %v6397_v31 }
0x2a7e   :  { %11061 = vmatmul.mubr.msk.f32.vlgmr.msra.gmra.mrb[58].mxu0 %vm359_vm5, %v6399_v12 }
0x2a7f   :  { %11536 = vmatpush3.bf16.xpose.msk.msra.mxu0 %vm12945_vm7, %v11531_v15  ;;  %11074 = vmatprep.mubr.msk.f32.mxu0 %vm349_vm3, %v6666_v57 }
0x2a86   :  { %11075 = vmatmul.mubr.msk.f32.vlgmr.msra.gmra.mrb[60].mxu0 %vm349_vm3, %v6668_v30 }
0x2b10   :  { %v11055_v63 = vpop.f32.mrb[66].mxu1 }
0x2b11   :  { %v6478_v58 = vpop.f32.mrb[67].mxu1 }
0x2b3b   :  { %v11069_v19 = vpop.f32.mrb[68].mxu1 }
0x2b3c   :  { %v6757_v60 = vmul.f32 0.35355338, %v11069_v19  ;;  %v6656_v20 = vpop.f32.mrb[69].mxu1 }
0x2b3d   :  { %v6756_v37 = vmul.f32 0.35355338, %v6656_v20 }
0x2b3e   :  { %v6761_v48 = vsel %vm13670_vm0, %v6757_v60, -1e+30 }
0x2b3f   :  { %v6760_v9 = vsel %vm13675_vm1, %v6756_v37, -1e+30  ;;  %v6767_v17 = vsel %vm359_vm5, %v6761_v48, -inf }
0x2b40   :  { %6768 = vmax.xlane.f32.xlu1 %v6767_v17  ;;  %v6764_v43 = vsel %vm359_vm5, %v6760_v9, -inf }
0x2b41   :  { %6765 = vmax.xlane.f32.xlu0 %v6764_v43 }
0x2b51   :  { %v13845_v22 = vpop.f32.mrb[58].mxu0 }
0x2b52   :  { %v13847_v24 = vpop.f32.mrb[59].mxu0 }
0x2b59   :  { %v11076_v2 = vpop.f32.mrb[60].mxu0 }
0x2b5a   :  { %v6747_v25 = vpop.f32.mrb[61].mxu0  ;;  %v6759_v39 = vmul.f32 0.35355338, %v11076_v2 }
0x2b5b   :  { %v6758_v29 = vmul.f32 0.35355338, %v6747_v25 }
0x2b5c   :  { %v6763_v1 = vsel %vm13670_vm0, %v6759_v39, -1e+30 }
0x2b5d   :  { %v6762_v46 = vsel %vm13675_vm1, %v6758_v29, -1e+30  ;;  %v6773_v32 = vsel %vm359_vm5, %v6763_v1, -inf }
0x2b5e   :  { %v6770_v44 = vsel %vm359_vm5, %v6762_v46, -inf }
0x2b5f   :  { %6771 = vmax.xlane.f32.xlu0 %v6770_v44 }
0x2b63   :  { %6774 = vmax.xlane.f32.xlu0 %v6773_v32 }
0x2bcd   :  { %v6769_v33 = vpop.xlane.xlu1 %6768 }
0x2bce   :  { %v6777_v42 = vsub.f32 %v6761_v48, %v6769_v33  ;;  %v6766_v36 = vpop.xlane.xlu0 %6765 }
0x2bcf   :  { %v6776_v38 = vsub.f32 %v6760_v9, %v6766_v36  ;;  %v5237_v36 = vld [vmem:[#allocation7 + $0x48] sm:$0xff] }
0x2bd0   :  { %v6782_v15 = vmul.f32 1.442695, %v6777_v42  ;;  %v5236_v42 = vld [vmem:[#allocation7 + $0x40] sm:$0xff] }
0x2bd1   :  { %v6780_v27 = vmul.f32 1.442695, %v6776_v38  ;;  %v5238_v38 = vld [vmem:[#allocation7 + $0x50] sm:$0xff] }
0x2bd2   :  { %11998 = vpow2.f32 %v6782_v15  ;;  %v11545_v15 = vpack.c.bf16 %v5237_v36, %v5236_v42 }
0x2bd3   :  { %12000 = vpow2.f32 %v6780_v27  ;;  %v5239_v27 = vld [vmem:[#allocation7 + $0x58] sm:$0xff] }
0x2bdc   :  { %v11999_v45 = vpop.eup %11998 }
0x2bdd   :  { %v12001_v53 = vpop.eup %12000  ;;  %v6791_v62 = vsel %vm359_vm5, %v11999_v45, 0.0 }
0x2bde   :  { %6792 = vadd.xlane.f32.xlu0 %v6791_v62  ;;  %v6788_v59 = vsel %vm359_vm5, %v12001_v53, 0.0 }
0x2bdf   :  { %6789 = vadd.xlane.f32.xlu1 %v6788_v59 }
0x2bec   :  { %v6772_v54 = vpop.xlane.xlu0 %6771 }
0x2bed   :  { %v6778_v49 = vsub.f32 %v6762_v46, %v6772_v54 }
0x2bef   :  { %v6784_v10 = vmul.f32 1.442695, %v6778_v49  ;;  %v13885_v49 = vld [vmem:[#allocation12 + $0x8] sm:$0xff] }
0x2bf0   :  { %v6775_v31 = vpop.xlane.xlu0 %6774 }
0x2bf1   :  { %12002 = vpow2.f32 %v6784_v10  ;;  %v6779_v12 = vsub.f32 %v6763_v1, %v6775_v31 }
0x2bf3   :  { %v6786_v57 = vmul.f32 1.442695, %v6779_v12 }
0x2bf5   :  { %12004 = vpow2.f32 %v6786_v57 }
0x2bfb   :  { %v12003_v30 = vpop.eup %12002 }
0x2bfc   :  { %v6794_v19 = vsel %vm359_vm5, %v12003_v30, 0.0 }
0x2bfd   :  { %6795 = vadd.xlane.f32.xlu1 %v6794_v19 }
0x2bff   :  { %v12005_v60 = vpop.eup %12004 }
0x2c00   :  { %v6797_v20 = vsel %vm359_vm5, %v12005_v60, 0.0 }
0x2c01   :  { %6798 = vadd.xlane.f32.xlu0 %v6797_v20 }
0x2c0e   :  { %11794 = vrot.lane.b32.xlu1 %v13636_v40, %s12478_s10 }
0x2c12   :  { %6986 = vrot.lane.b32.xlu1 %v13785_v56, %s12451_s1 }
0x2c16   :  { %6988 = vrot.lane.b32.xlu1 %v13783_v51, %s12451_s1 }
0x2c17   :  { %11799 = vrot.lane.b32.xlu0 %v13646_v47, %s12478_s10 }
0x2c1a   :  { %7004 = vrot.lane.b32.xlu1 %v11055_v63, %s12458_s30 }
0x2c1b   :  { %7002 = vrot.lane.b32.xlu0 %v6478_v58, %s12458_s30 }
0x2c6b   :  { %v6793_v40 = vpop.xlane.xlu0 %6792 }
0x2c6c   :  { %v6790_v37 = vpop.xlane.xlu1 %6789 }
0x2c6d   :  { %12006 = vrcp.f32 %v6790_v37 }
0x2c6e   :  { %12008 = vrcp.f32 %v6793_v40 }
0x2c77   :  { %v12007_v48 = vpop.eup %12006 }
0x2c78   :  { %v6801_v9 = vmul.f32 %v12007_v48, %v12001_v53  ;;  %v12009_v25 = vpop.eup %12008  ;;  %v11549_v53 = vpack.c.bf16 %v5239_v27, %v5238_v38 }
0x2c79   :  { %v6803_v46 = vmul.f32 %v12009_v25, %v11999_v45 }
0x2c7a   :  { %11081 = vmatprep.mubr.msk.f32.mxu1 %vm359_vm5, %v6801_v9 }
0x2c8a   :  { %v6796_v17 = vpop.xlane.xlu1 %6795 }
0x2c8b   :  { %12010 = vrcp.f32 %v6796_v17 }
0x2c8e   :  { %v11795_v56 = vpop.permute.xlu1 %11794  ;;  %v6799_v43 = vpop.xlane.xlu0 %6798 }
0x2c8f   :  { %v11797_v51 = vunpack.i.h.bf16 %v11795_v56  ;;  %v11796_v2 = vunpack.i.l.bf16 %v11795_v56  ;;  %12012 = vrcp.f32 %v6799_v43 }
0x2c91   :  { %v11537_v47 = vpack.c.bf16 %v11797_v51, %v11796_v2 }
0x2c92   :  { %v11800_v63 = vpop.permute.xlu0 %11799  ;;  %v6987_v57 = vpop.permute.xlu1 %6986 }
0x2c93   :  { %v11802_v39 = vunpack.i.h.bf16 %v11800_v63  ;;  %v11801_v58 = vunpack.i.l.bf16 %v11800_v63  ;;  %11538 = vmatprep.subr.bf16.mxu1 %v11537_v47  ;;  %v7030_v20 = vsel %vm349_vm3, %v13729_v50, %v6987_v57 }
0x2c94   :  { %11540 = vmatpush3.bf16.msra.mxu1 %v11537_v47 }
0x2c95   :  { %v12011_v29 = vpop.eup %12010  ;;  %v11541_v44 = vpack.c.bf16 %v11802_v39, %v11801_v58  ;;  %11546 = vmatprep.subr.bf16.mxu1 %v11545_v15 }
0x2c96   :  { %v6805_v1 = vmul.f32 %v12011_v29, %v12003_v30  ;;  %v6989_v30 = vpop.permute.xlu1 %6988 }
0x2c97   :  { %11082 = vmatmul.mubr.msk.f32.vlgmr.msra.gmra.mrb[70].mxu1 %vm359_vm5, %v6803_v46  ;;  %11542 = vmatprep.subr.bf16.mxu0 %v11541_v44 }
0x2c98   :  { %11544 = vmatpush3.bf16.msra.mxu0 %v11541_v44  ;;  %11088 = vmatprep.mubr.msk.f32.mxu0 %vm359_vm5, %v6805_v1 }
0x2c99   :  { %v12013_v32 = vpop.eup %12012  ;;  %11548 = vmatpush3.bf16.msra.mxu1 %v11545_v15 }
0x2c9a   :  { %v6807_v33 = vmul.f32 %v12013_v32, %v12005_v60  ;;  %11550 = vmatprep.subr.bf16.mxu1 %v11549_v53  ;;  %v7005_v19 = vpop.permute.xlu1 %7004  ;;  %v7003_v60 = vpop.permute.xlu0 %7002 }
0x2c9c   :  { %11089 = vmatmul.mubr.msk.f32.vlgmr.msra.gmra.mrb[62].mxu0 %vm359_vm5, %v6807_v33 }
0x2c9d   :  { %11552 = vmatpush3.bf16.msra.mxu1 %v11549_v53 }
0x2d6a   :  { %v11083_v45 = vpop.f32.mrb[70].mxu1 }
0x2d6b   :  { %7020 = vrot.lane.b32.xlu1 %v11083_v45, %s14393_s11  ;;  %v6886_v62 = vpop.f32.mrb[71].mxu1 }
0x2d6c   :  { %7018 = vrot.lane.b32.xlu0 %v6886_v62, %s14393_s11 }
0x2d6f   :  { %6992 = vrot.lane.b32.xlu1 %v13793_v52, %s12451_s1  ;;  %v11090_v59 = vpop.f32.mrb[62].mxu0  ;;  %v4875_v52 = vrot.slane %v13885_v49, %v13216_v21 }
0x2d70   :  { %6990 = vrot.lane.b32.xlu0 %v13795_v8, %s12451_s1  ;;  %v6973_v54 = vpop.f32.mrb[63].mxu0 }
0x2d71   :  { %v4949_v10 = vadd.f32 %v13654_v41, %v4875_v52  ;;  %v4954_v8 = vadd.f32 %v13652_v28, %v4875_v52  ;;  %v7031_v28 = vsel %vm349_vm3, %v13727_v7, %v6989_v30 }
0x2d72   :  { %v7035_v37 = vsel %vm359_vm5, %v7031_v28, %v7005_v19 }
0x2d73   :  { %7008 = vrot.lane.b32.xlu1 %v13845_v22, %s12458_s30  ;;  %v4957_v31 = vadd.f32 %v4949_v10, %v13577_v0  ;;  %v4958_v22 = vadd.f32 %v4954_v8, %v13579_v3  ;;  %v7034_v0 = vsel %vm359_vm5, %v7030_v20, %v7003_v60  ;;  %v13917_v10 = vld [vmem:[#allocation12 + $0x10] sm:$0xff] }
0x2d74   :  { %7006 = vrot.lane.b32.xlu0 %v13847_v24, %s12458_s30  ;;  %v7045_v8 = vrot.slane %v13917_v10, %v13190_v35 }
0x2d75   :  { %v4959_v12 = vsel %vm476_vm6, %v4957_v31, 0.0  ;;  %v4962_v24 = vsel %vm476_vm6, %v4958_v22, 0.0 }
0x2d77   :  { %7024 = vrot.lane.b32.xlu1 %v11090_v59, %s14393_s11 }
0x2d78   :  { %7022 = vrot.lane.b32.xlu0 %v6973_v54, %s14393_s11 }
0x2d97   :  { %4960 = vadd.xlane.f32.xlu0 %v4959_v12 }
0x2d9b   :  { %4963 = vadd.xlane.f32.xlu1 %v4962_v24  ;;  %v4994_v24 = vrot.slane %v13885_v49, %v13250_v13 }
0x2ddd   :  { %v7021_v41 = vpop.permute.xlu1 %7020 }
0x2dde   :  { %v7019_v3 = vpop.permute.xlu0 %7018  ;;  %v7039_v9 = vsel %vm2242_vm8, %v7035_v37, %v7021_v41 }
0x2ddf   :  { %v7038_v48 = vsel %vm2242_vm8, %v7034_v0, %v7019_v3 }
0x2de0   :  { %11099 = vmatprep.mubr.msk.f32.mxu1 %vm476_vm6, %v7038_v48 }
0x2de1   :  { %v6993_v40 = vpop.permute.xlu1 %6992  ;;  %11100 = vmatmul.mubr.msk.f32.vlgmr.msra.gmra.mrb[72].mxu1 %vm476_vm6, %v7039_v9 }
0x2de2   :  { %v6991_v17 = vpop.permute.xlu0 %6990  ;;  %v7033_v51 = vsel %vm349_vm3, %v13737_v4, %v6993_v40 }
0x2de3   :  { %v7032_v7 = vsel %vm349_vm3, %v13739_v61, %v6991_v17 }
0x2de5   :  { %v7009_v50 = vpop.permute.xlu1 %7008 }
0x2de6   :  { %v7007_v56 = vpop.permute.xlu0 %7006  ;;  %v7037_v25 = vsel %vm359_vm5, %v7033_v51, %v7009_v50 }
0x2de7   :  { %v7036_v2 = vsel %vm359_vm5, %v7032_v7, %v7007_v56 }
0x2de9   :  { %v7025_v43 = vpop.permute.xlu1 %7024 }
0x2dea   :  { %v7023_v47 = vpop.permute.xlu0 %7022  ;;  %v7041_v39 = vsel %vm2242_vm8, %v7037_v25, %v7025_v43 }
0x2deb   :  { %v7040_v63 = vsel %vm2242_vm8, %v7036_v2, %v7023_v47 }
0x2dec   :  { %11102 = vmatprep.mubr.msk.f32.mxu1 %vm476_vm6, %v7040_v63 }
0x2ded   :  { %11103 = vmatmul.mubr.msk.f32.gmra.mrb[74].mxu1 %vm476_vm6, %v7041_v39 }
0x2e24   :  { %v4961_v58 = vpop.xlane.xlu0 %4960 }
0x2e25   :  { %v4965_v29 = vmul.f32 0.03125, %v4961_v58 }
0x2e27   :  { %v4967_v61 = vsub.f32 %v4957_v31, %v4965_v29  ;;  %v4988_v31 = vrot.slane %v13885_v49, %v13225_v14 }
0x2e28   :  { %v4964_v46 = vpop.xlane.xlu1 %4963 }
0x2e29   :  { %v4966_v44 = vmul.f32 0.03125, %v4964_v46  ;;  %v4969_v1 = vmul.f32 %v4967_v61, %v4967_v61 }
0x2e2b   :  { %v4968_v4 = vsub.f32 %v4958_v22, %v4966_v44  ;;  %v4971_v32 = vsel %vm476_vm6, %v4969_v1, 0.0 }
0x2e2c   :  { %4972 = vadd.xlane.f32.xlu0 %v4971_v32 }
0x2e2d   :  { %v4970_v33 = vmul.f32 %v4968_v4, %v4968_v4 }
0x2e2f   :  { %v4974_v42 = vsel %vm476_vm6, %v4970_v33, 0.0 }
0x2e30   :  { %4975 = vadd.xlane.f32.xlu0 %v4974_v42 }
0x2eb4   :  { %v11101_v36 = vpop.f32.mrb[72].mxu1 }
0x2eb5   :  { %v7124_v38 = vpop.f32.mrb[73].mxu1  ;;  %v7130_v41 = vadd.f32 %v11101_v36, %v7045_v8 }
0x2eb6   :  { %v7125_v57 = vadd.f32 %v7124_v38, %v7045_v8 }
0x2eb7   :  { %v7144_v9 = vadd.f32 %v7130_v41, %v13612_v11  ;;  %v13979_v41 = vld [vmem:[#allocation6 + $0x3] ss:$0 sm:$0xff] }
0x2eb8   :  { %v7143_v28 = vadd.f32 %v7125_v57, %v13610_v18  ;;  %v10170_v57 = vld [vmem:[%s14384_s6 + $0x70] sm:$0xff] }
0x2eb9   :  { %v4973_v15 = vpop.xlane.xlu0 %4972  ;;  %v7150_v43 = vsel %vm476_vm6, %v7144_v9, 0.0 }
0x2eba   :  { %v4977_v27 = vmul.f32 0.03125, %v4973_v15  ;;  %v7147_v50 = vsel %vm476_vm6, %v7143_v28, 0.0 }
0x2ebc   :  { %v4979_v53 = vadd.f32 1e-05, %v4977_v27 }
0x2ebd   :  { %v4976_v45 = vpop.xlane.xlu0 %4975 }
0x2ebe   :  { %12014 = vrsqrt.f32 %v4979_v53  ;;  %v4978_v62 = vmul.f32 0.03125, %v4976_v45 }
0x2ec0   :  { %v4980_v59 = vadd.f32 1e-05, %v4978_v62  ;;  %v11104_v54 = vpop.f32.mrb[74].mxu1 }
0x2ec1   :  { %v7134_v52 = vpop.f32.mrb[75].mxu1  ;;  %v7140_v40 = vadd.f32 %v11104_v54, %v7045_v8 }
0x2ec2   :  { %12016 = vrsqrt.f32 %v4980_v59  ;;  %v7135_v0 = vadd.f32 %v7134_v52, %v7045_v8 }
0x2ec3   :  { %v7146_v7 = vadd.f32 %v7140_v40, %v13616_v16 }
0x2ec4   :  { %v7145_v17 = vadd.f32 %v7135_v0, %v13620_v23 }
0x2ec5   :  { %v7156_v51 = vsel %vm476_vm6, %v7146_v7, 0.0 }
0x2ec6   :  { %v7153_v18 = vsel %vm476_vm6, %v7145_v17, 0.0 }
0x2ec8   :  { %v12015_v22 = vpop.eup %12014 }
0x2ec9   :  { %v4983_v12 = vmul.f32 %v12015_v22, %v4967_v61  ;;  %v10168_v22 = vld [vmem:[%s14384_s6 + $0x60] sm:$0xff] }
0x2ecb   :  { %v4989_v30 = vmul.f32 %v4988_v31, %v4983_v12  ;;  %v10169_v12 = vld [vmem:[%s14384_s6 + $0x68] sm:$0xff] }
0x2ecc   :  { %v12017_v19 = vpop.eup %12016 }
0x2ecd   :  { %v4995_v60 = vadd.f32 %v4994_v24, %v4989_v30  ;;  %v4984_v20 = vmul.f32 %v12017_v19, %v4968_v4  ;;  %v10171_v30 = vld [vmem:[%s14384_s6 + $0x78] sm:$0xff] }
0x2ece   :  { %v11808_v19 = vpack.i.bf16 %v10171_v30, %v10170_v57 }
0x2ecf   :  { %v4997_v3 = vsel %vm476_vm6, %v4995_v60, 0.0  ;;  %v4990_v37 = vmul.f32 %v4988_v31, %v4984_v20  ;;  %v11557_v20 = vpack.c.bf16 %v10171_v30, %v10170_v57 }
0x2ed0   :  { %4998 = vadd.xlane.f32.xlu1 %v4997_v3 }
0x2ed1   :  { %v4996_v48 = vadd.f32 %v4994_v24, %v4990_v37  ;;  %v11803_v24 = vpack.i.bf16 %v10169_v12, %v10168_v22 }
0x2ed3   :  { %v5000_v56 = vsel %vm476_vm6, %v4996_v48, 0.0 }
0x2ed4   :  { %7148 = vadd.xlane.f32.xlu1 %v7147_v50  ;;  %5001 = vadd.xlane.f32.xlu0 %v5000_v56 }
0x2ed8   :  { %7154 = vadd.xlane.f32.xlu1 %v7153_v18  ;;  %7151 = vadd.xlane.f32.xlu0 %v7150_v43 }
0x2edc   :  { %7157 = vadd.xlane.f32.xlu0 %v7156_v51 }
0x2f5d   :  { %v4999_v11 = vpop.xlane.xlu1 %4998 }
0x2f5e   :  { %v5003_v2 = vmul.f32 0.03125, %v4999_v11 }
0x2f60   :  { %v13935_v23 = vsub.f32 %v4995_v60, %v5003_v2  ;;  %v11553_v60 = vpack.c.bf16 %v10169_v12, %v10168_v22 }
0x2f61   :  { %v7149_v47 = vpop.xlane.xlu1 %7148  ;;  %v5002_v25 = vpop.xlane.xlu0 %5001 }
0x2f62   :  { %v7159_v63 = vmul.f32 0.03125, %v7149_v47  ;;  %v5004_v39 = vmul.f32 0.03125, %v5002_v25  ;;  %v5007_v16 = vmul.f32 %v13935_v23, %v13935_v23  ;;  %11554 = vmatprep.subr.bf16.mxu0 %v11553_v60 }
0x2f63   :  { %11556 = vmatpush3.bf16.msra.mxu0 %v11553_v60 }
0x2f64   :  { %v13939_v58 = vsub.f32 %v7143_v28, %v7159_v63  ;;  %v13941_v29 = vsub.f32 %v4996_v48, %v5004_v39  ;;  %v5009_v61 = vsel %vm476_vm6, %v5007_v16, 0.0  ;;  %11558 = vmatprep.subr.bf16.mxu0 %v11557_v20  ;;  %v5026_v16 = vrot.slane %v13885_v49, %v13484_v26 }
0x2f65   :  { %5010 = vadd.xlane.f32.xlu1 %v5009_v61  ;;  %v7155_v46 = vpop.xlane.xlu1 %7154  ;;  %v7152_v44 = vpop.xlane.xlu0 %7151 }
0x2f66   :  { %v7161_v1 = vmul.f32 0.03125, %v7155_v46  ;;  %v7160_v4 = vmul.f32 0.03125, %v7152_v44  ;;  %v7167_v32 = vmul.f32 %v13939_v58, %v13939_v58  ;;  %v5008_v33 = vmul.f32 %v13941_v29, %v13941_v29 }
0x2f67   :  { %11560 = vmatpush3.bf16.msra.mxu0 %v11557_v20 }
0x2f68   :  { %v13948_v42 = vsub.f32 %v7145_v17, %v7161_v1  ;;  %v13950_v36 = vsub.f32 %v7144_v9, %v7160_v4  ;;  %v7171_v38 = vsel %vm476_vm6, %v7167_v32, 0.0  ;;  %v5012_v15 = vsel %vm476_vm6, %v5008_v33, 0.0 }
0x2f69   :  { %7172 = vadd.xlane.f32.xlu1 %v7171_v38  ;;  %5013 = vadd.xlane.f32.xlu0 %v5012_v15  ;;  %v7158_v27 = vpop.xlane.xlu0 %7157  ;;  %v5032_v32 = vrot.slane %v13917_v10, %v13159_v55 }
0x2f6a   :  { %v7162_v53 = vmul.f32 0.03125, %v7158_v27  ;;  %v7169_v45 = vmul.f32 %v13948_v42, %v13948_v42  ;;  %v7168_v62 = vmul.f32 %v13950_v36, %v13950_v36  ;;  %v7202_v27 = vrot.slane %v13917_v10, %v13193_v34 }
0x2f6c   :  { %v13958_v59 = vsub.f32 %v7146_v7, %v7162_v53  ;;  %v7177_v54 = vsel %vm476_vm6, %v7169_v45, 0.0  ;;  %v7174_v52 = vsel %vm476_vm6, %v7168_v62, 0.0 }
0x2f6d   :  { %7178 = vadd.xlane.f32.xlu1 %v7177_v54  ;;  %7175 = vadd.xlane.f32.xlu0 %v7174_v52 }
0x2f6e   :  { %v7170_v8 = vmul.f32 %v13958_v59, %v13958_v59 }
0x2f70   :  { %v7180_v31 = vsel %vm476_vm6, %v7170_v8, 0.0 }
0x2f71   :  { %7181 = vadd.xlane.f32.xlu0 %v7180_v31 }
0x2f7e   :  { %11804 = vrot.lane.b32.xlu1 %v11803_v24, %s12468_s3 }
0x2f82   :  { %7346 = vrot.lane.b32.xlu1 %v13979_v41, %s12468_s3 }
0x2f87   :  { %11809 = vrot.lane.b32.xlu0 %v11808_v19, %s12468_s3 }
0x2ff2   :  { %v5011_v28 = vpop.xlane.xlu1 %5010 }
0x2ff3   :  { %v5015_v0 = vmul.f32 0.03125, %v5011_v28 }
0x2ff5   :  { %v5017_v3 = vadd.f32 1e-05, %v5015_v0 }
0x2ff6   :  { %v7173_v37 = vpop.xlane.xlu1 %7172  ;;  %v5014_v48 = vpop.xlane.xlu0 %5013 }
0x2ff7   :  { %12018 = vrsqrt.f32 %v5017_v3  ;;  %v7183_v9 = vmul.f32 0.03125, %v7173_v37  ;;  %v5016_v40 = vmul.f32 0.03125, %v5014_v48 }
0x2ff9   :  { %v7187_v17 = vadd.f32 1e-05, %v7183_v9  ;;  %v5018_v50 = vadd.f32 1e-05, %v5016_v40 }
0x2ffa   :  { %v7179_v56 = vpop.xlane.xlu1 %7178  ;;  %v7176_v7 = vpop.xlane.xlu0 %7175 }
0x2ffb   :  { %12020 = vrsqrt.f32 %v7187_v17  ;;  %v7185_v18 = vmul.f32 0.03125, %v7179_v56  ;;  %v7184_v43 = vmul.f32 0.03125, %v7176_v7 }
0x2ffc   :  { %12022 = vrsqrt.f32 %v5018_v50 }
0x2ffd   :  { %v7189_v51 = vadd.f32 1e-05, %v7185_v18  ;;  %v7188_v11 = vadd.f32 1e-05, %v7184_v43 }
0x2ffe   :  { %v11805_v2 = vpop.permute.xlu1 %11804  ;;  %v7182_v47 = vpop.xlane.xlu0 %7181 }
0x2fff   :  { %12024 = vrsqrt.f32 %v7189_v51  ;;  %v11807_v25 = vunpack.i.h.bf16 %v11805_v2  ;;  %v11806_v63 = vunpack.i.l.bf16 %v11805_v2  ;;  %v7186_v39 = vmul.f32 0.03125, %v7182_v47 }
0x3000   :  { %12026 = vrsqrt.f32 %v7188_v11 }
0x3001   :  { %v12019_v61 = vpop.eup %12018  ;;  %v11561_v46 = vpack.c.bf16 %v11807_v25, %v11806_v63  ;;  %v7190_v44 = vadd.f32 1e-05, %v7186_v39 }
0x3002   :  { %v11810_v1 = vpop.permute.xlu0 %11809  ;;  %v5021_v4 = vmul.f32 %v12019_v61, %v13935_v23  ;;  %v7210_v23 = vrot.slane %v13917_v10, %v13216_v21 }
0x3003   :  { %12028 = vrsqrt.f32 %v7190_v44  ;;  %v11812_v33 = vunpack.i.h.bf16 %v11810_v1  ;;  %v11811_v38 = vunpack.i.l.bf16 %v11810_v1  ;;  %11562 = vmatprep.subr.bf16.mxu1 %v11561_v46 }
0x3004   :  { %11564 = vmatpush3.bf16.msra.mxu1 %v11561_v46  ;;  %v5027_v15 = vmul.f32 %v5026_v16, %v5021_v4 }
0x3005   :  { %v12021_v53 = vpop.eup %12020  ;;  %v11565_v49 = vpack.c.bf16 %v11812_v33, %v11811_v38 }
0x3006   :  { %v12023_v45 = vpop.eup %12022  ;;  %v5033_v62 = vadd.f32 %v5032_v32, %v5027_v15  ;;  %v7195_v54 = vmul.f32 %v12021_v53, %v13939_v58 }
0x3007   :  { %v5022_v52 = vmul.f32 %v12023_v45, %v13941_v29  ;;  %11566 = vmatprep.subr.bf16.mxu1 %v11565_v49 }
0x3008   :  { %11568 = vmatpush3.bf16.msra.mxu1 %v11565_v49  ;;  %11127 = vmatprep.mubr.msk.f32.mxu1 %vm476_vm6, %v5033_v62  ;;  %v7203_v8 = vmul.f32 %v7202_v27, %v7195_v54 }
0x3009   :  { %v12025_v31 = vpop.eup %12024  ;;  %v5028_v22 = vmul.f32 %v5026_v16, %v5022_v52 }
0x300a   :  { %v12027_v12 = vpop.eup %12026  ;;  %v13995_v24 = vadd.f32 %v7210_v23, %v7203_v8  ;;  %v7197_v57 = vmul.f32 %v12025_v31, %v13948_v42 }
0x300b   :  { %v7196_v30 = vmul.f32 %v12027_v12, %v13950_v36  ;;  %v5034_v58 = vadd.f32 %v5032_v32, %v5028_v22  ;;  %v7347_v36 = vpop.permute.xlu1 %7346 }
0x300c   :  { %11113 = vmatprep.mubr.msk.f32.mxu0 %vm476_vm6, %v13995_v24  ;;  %v7205_v10 = vmul.f32 %v7202_v27, %v7197_v57 }
0x300d   :  { %v12029_v29 = vpop.eup %12028  ;;  %11128 = vmatmul.mubr.msk.f32.vlgmr.msra.gmra.mrb[76].mxu1 %vm476_vm6, %v5034_v58  ;;  %v7204_v19 = vmul.f32 %v7202_v27, %v7196_v30 }
0x300e   :  { %v14002_v60 = vadd.f32 %v7210_v23, %v7205_v10  ;;  %v7198_v20 = vmul.f32 %v12029_v29, %v13958_v59 }
0x300f   :  { %v14005_v28 = vadd.f32 %v7210_v23, %v7204_v19 }
0x3010   :  { %v7206_v0 = vmul.f32 %v7202_v27, %v7198_v20 }
0x3011   :  { %11114 = vmatmul.mubr.msk.f32.vlgmr.msra.gmra.mrb[64].mxu0 %vm476_vm6, %v14005_v28 }
0x3012   :  { %11116 = vmatprep.mubr.msk.f32.mxu0 %vm476_vm6, %v14002_v60  ;;  %v14011_v42 = vadd.f32 %v7210_v23, %v7206_v0 }
0x3015   :  { %11117 = vmatmul.mubr.msk.f32.gmra.mrb[66].mxu0 %vm476_vm6, %v14011_v42 }
0x30e0   :  { %v11129_v3 = vpop.f32.mrb[76].mxu1 }
0x30e1   :  { %v14015_v37 = vadd.f32 %v11129_v3, %v7347_v36  ;;  %v7421_v48 = vpop.f32.mrb[77].mxu1 }
0x30e2   :  { %v14017_v59 = vadd.f32 %v7421_v48, %v7347_v36 }
0x30e3   :  { %11135 = vmatprep.subr.msk.mxu1 %vm349_vm3, %v14015_v37 }
0x30e4   :  { %v11115_v9 = vpop.f32.mrb[64].mxu0  ;;  %11130 = vmatprep.subr.msk.mxu0 %vm349_vm3, %v14017_v59  ;;  %11136 = vmatpush3.xpose.msk.msra.mxu1 %vm349_vm3, %v14015_v37 }
0x30e5   :  { %v7311_v40 = vpop.f32.mrb[65].mxu0  ;;  %11131 = vmatpush3.xpose.msk.msra.mxu0 %vm349_vm3, %v14017_v59  ;;  %v14031_v50 = vadd.f32 %v11115_v9, %v13979_v41 }
0x30e6   :  { %v14028_v17 = vadd.f32 %v13979_v41, %v7311_v40 }
0x30e8   :  { %v11118_v56 = vpop.f32.mrb[66].mxu0  ;;  %11132 = vmatprep.mubr.msk.f32.mxu0 %vm349_vm3, %v14028_v17 }
0x30e9   :  { %v7321_v7 = vpop.f32.mrb[67].mxu0  ;;  %11133 = vmatmul.mubr.msk.f32.vlgmr.msra.gmra.mrb[68].mxu0 %vm349_vm3, %v14031_v50  ;;  %v14041_v43 = vadd.f32 %v11118_v56, %v13979_v41 }
0x30ea   :  { %v14038_v18 = vadd.f32 %v13979_v41, %v7321_v7 }
0x30ec   :  { %11137 = vmatprep.mubr.msk.f32.mxu1 %vm349_vm3, %v14038_v18 }
0x30ed   :  { %11138 = vmatmul.mubr.msk.f32.vlgmr.msra.gmra.mrb[78].mxu1 %vm349_vm3, %v14041_v43 }
0x31bc   :  { %v11134_v51 = vpop.f32.mrb[68].mxu0 }
0x31bd   :  { %v7599_v11 = vmul.f32 0.35355338, %v11134_v51  ;;  %v7505_v2 = vpop.f32.mrb[69].mxu0 }
0x31be   :  { %v7598_v47 = vmul.f32 0.35355338, %v7505_v2 }
0x31bf   :  { %v7605_v25 = vsel %vm349_vm3, %v7599_v11, -inf }
0x31c0   :  { %v11139_v63 = vpop.f32.mrb[78].mxu1  ;;  %7606 = vmax.xlane.f32.xlu0 %v7605_v25  ;;  %v7602_v39 = vsel %vm349_vm3, %v7598_v47, -inf }
0x31c1   :  { %v7601_v16 = vmul.f32 0.35355338, %v11139_v63  ;;  %v7589_v61 = vpop.f32.mrb[79].mxu1  ;;  %7603 = vmax.xlane.f32.xlu1 %v7602_v39 }
0x31c2   :  { %v7600_v41 = vmul.f32 0.35355338, %v7589_v61 }
0x31c3   :  { %v7611_v46 = vsel %vm349_vm3, %v7601_v16, -inf }
0x31c4   :  { %v7608_v44 = vsel %vm349_vm3, %v7600_v41, -inf }
0x31c5   :  { %7609 = vmax.xlane.f32.xlu0 %v7608_v44  ;;  %7612 = vmax.xlane.f32.xlu1 %v7611_v46 }
0x324d   :  { %v7607_v1 = vpop.xlane.xlu0 %7606 }
0x324e   :  { %v7615_v4 = vsub.f32 %v7599_v11, %v7607_v1  ;;  %v7604_v32 = vpop.xlane.xlu1 %7603 }
0x324f   :  { %v7614_v33 = vsub.f32 %v7598_v47, %v7604_v32 }
0x3250   :  { %v7620_v38 = vmul.f32 1.442695, %v7615_v4 }
0x3251   :  { %v7618_v15 = vmul.f32 1.442695, %v7614_v33 }
0x3252   :  { %12030 = vpow2.f32 %v7620_v38  ;;  %v7610_v62 = vpop.xlane.xlu0 %7609  ;;  %v7613_v23 = vpop.xlane.xlu1 %7612 }
0x3253   :  { %12032 = vpow2.f32 %v7618_v15  ;;  %v7616_v54 = vsub.f32 %v7600_v41, %v7610_v62  ;;  %v7617_v52 = vsub.f32 %v7601_v16, %v7613_v23 }
0x3255   :  { %v7622_v8 = vmul.f32 1.442695, %v7616_v54  ;;  %v7624_v31 = vmul.f32 1.442695, %v7617_v52 }
0x3257   :  { %12034 = vpow2.f32 %v7622_v8 }
0x3258   :  { %12036 = vpow2.f32 %v7624_v31 }
0x325c   :  { %v12031_v27 = vpop.eup %12030 }
0x325d   :  { %v12033_v53 = vpop.eup %12032  ;;  %v7629_v49 = vsel %vm349_vm3, %v12031_v27, 0.0 }
0x325e   :  { %7630 = vadd.xlane.f32.xlu1 %v7629_v49  ;;  %v7626_v45 = vsel %vm349_vm3, %v12033_v53, 0.0 }
0x325f   :  { %7627 = vadd.xlane.f32.xlu0 %v7626_v45 }
0x3261   :  { %v12035_v22 = vpop.eup %12034 }
0x3262   :  { %v12037_v12 = vpop.eup %12036  ;;  %v7632_v57 = vsel %vm349_vm3, %v12035_v22, 0.0 }
0x3263   :  { %v7635_v30 = vsel %vm349_vm3, %v12037_v12, 0.0 }
0x326f   :  { %7730 = vrot.lane.b32.xlu1 %v14015_v37, %s12468_s3 }
0x3273   :  { %7818 = vrot.lane.b32.xlu1 %v14017_v59, %s12471_s12 }
0x3275   :  { %7646 = vrot.lane.b32.xlu0 %v14017_v59, %s12468_s3 }
0x3277   :  { %7816 = vrot.lane.b32.xlu1 %v14031_v50, %s12471_s12 }
0x3279   :  { %7814 = vrot.lane.b32.xlu0 %v14028_v17, %s12471_s12 }
0x3298   :  { %7633 = vadd.xlane.f32.xlu0 %v7632_v57 }
0x329b   :  { %7636 = vadd.xlane.f32.xlu1 %v7635_v30 }
0x32ac   :  { %7901 = vrot.lane.b32.xlu1 %v14038_v18, %s12471_s12 }
0x32ae   :  { %7905 = vrot.lane.b32.xlu0 %v14015_v37, %s12471_s12 }
0x32b2   :  { %7903 = vrot.lane.b32.xlu0 %v14041_v43, %s12471_s12 }
0x32eb   :  { %v7631_v58 = vpop.xlane.xlu1 %7630 }
0x32ec   :  { %12038 = vrcp.f32 %v7631_v58  ;;  %v7628_v10 = vpop.xlane.xlu0 %7627 }
0x32ed   :  { %12040 = vrcp.f32 %v7628_v10 }
0x32ef   :  { %v7731_v29 = vpop.permute.xlu1 %7730 }
0x32f0   :  { %v7647_v19 = vpop.permute.xlu0 %7646  ;;  %11145 = vmatprep.subr.mxu1 %v7731_v29 }
0x32f1   :  { %11140 = vmatprep.subr.mxu0 %v7647_v19  ;;  %11146 = vmatpush3.msra.mxu1 %v7731_v29 }
0x32f2   :  { %11141 = vmatpush3.msra.mxu0 %v7647_v19 }
0x32f3   :  { %v7819_v20 = vpop.permute.xlu1 %7818 }
0x32f4   :  { %11150 = vmatprep.subr.msk.mxu0 %vm349_vm3, %v7819_v20  ;;  %v7815_v9 = vpop.permute.xlu0 %7814 }
0x32f6   :  { %v12039_v0 = vpop.eup %12038 }
0x32f7   :  { %v12041_v36 = vpop.eup %12040  ;;  %v7641_v48 = vmul.f32 %v12039_v0, %v12031_v27  ;;  %v7817_v40 = vpop.permute.xlu1 %7816 }
0x32f8   :  { %v7639_v3 = vmul.f32 %v12041_v36, %v12033_v53 }
0x32fa   :  { %11142 = vmatprep.mubr.msk.f32.mxu0 %vm349_vm3, %v7639_v3 }
0x32fb   :  { %11143 = vmatmul.mubr.msk.f32.vlgmr.msra.gmra.mrb[70].mxu0 %vm349_vm3, %v7641_v48 }
0x32fc   :  { %11151 = vmatpush3.xpose.msk.msra.mxu0 %vm349_vm3, %v7819_v20  ;;  %11152 = vmatprep.mubr.msk.f32.mxu0 %vm349_vm3, %v7815_v9 }
0x32ff   :  { %11153 = vmatmul.mubr.msk.f32.vlgmr.msra.gmra.mrb[72].mxu0 %vm349_vm3, %v7817_v40 }
0x3325   :  { %v7634_v56 = vpop.xlane.xlu0 %7633 }
0x3326   :  { %12042 = vrcp.f32 %v7634_v56 }
0x3328   :  { %v7637_v7 = vpop.xlane.xlu1 %7636 }
0x3329   :  { %12044 = vrcp.f32 %v7637_v7  ;;  %v7906_v51 = vpop.permute.xlu0 %7905 }
0x332a   :  { %11155 = vmatprep.subr.msk.mxu1 %vm349_vm3, %v7906_v51 }
0x332c   :  { %v7902_v63 = vpop.permute.xlu1 %7901 }
0x332d   :  { %v7904_v39 = vpop.permute.xlu0 %7903 }
0x3330   :  { %v12043_v11 = vpop.eup %12042 }
0x3331   :  { %v7643_v2 = vmul.f32 %v12043_v11, %v12035_v22 }
0x3333   :  { %v12045_v47 = vpop.eup %12044  ;;  %11147 = vmatprep.mubr.msk.f32.mxu1 %vm349_vm3, %v7643_v2 }
0x3334   :  { %v7645_v25 = vmul.f32 %v12045_v47, %v12037_v12 }
0x3336   :  { %11148 = vmatmul.mubr.msk.f32.vlgmr.msra.gmra.mrb[80].mxu1 %vm349_vm3, %v7645_v25 }
0x3337   :  { %11156 = vmatpush3.xpose.msk.msra.mxu1 %vm349_vm3, %v7906_v51  ;;  %11157 = vmatprep.mubr.msk.f32.mxu1 %vm349_vm3, %v7902_v63 }
0x333a   :  { %11158 = vmatmul.mubr.msk.f32.vlgmr.msra.gmra.mrb[82].mxu1 %vm349_vm3, %v7904_v39 }
0x33ce   :  { %v14083_v16 = vpop.f32.mrb[70].mxu0 }
0x33cf   :  { %v14085_v61 = vpop.f32.mrb[71].mxu0 }
0x33d2   :  { %v11154_v41 = vpop.f32.mrb[72].mxu0 }
0x33d3   :  { %v7989_v46 = vmul.f32 0.35355338, %v11154_v41  ;;  %v7892_v44 = vpop.f32.mrb[73].mxu0 }
0x33d4   :  { %v7988_v1 = vmul.f32 0.35355338, %v7892_v44 }
0x33d5   :  { %v7995_v4 = vsel %vm349_vm3, %v7989_v46, -inf }
0x33d6   :  { %7996 = vmax.xlane.f32.xlu0 %v7995_v4  ;;  %v7992_v32 = vsel %vm349_vm3, %v7988_v1, -inf }
0x33d7   :  { %7993 = vmax.xlane.f32.xlu1 %v7992_v32 }
0x3409   :  { %v14089_v33 = vpop.f32.mrb[80].mxu1 }
0x340a   :  { %v14091_v38 = vpop.f32.mrb[81].mxu1 }
0x340d   :  { %v11159_v15 = vpop.f32.mrb[82].mxu1 }
0x340e   :  { %v7991_v27 = vmul.f32 0.35355338, %v11159_v15  ;;  %v7979_v53 = vpop.f32.mrb[83].mxu1 }
0x340f   :  { %v7990_v49 = vmul.f32 0.35355338, %v7979_v53 }
0x3410   :  { %v8001_v45 = vsel %vm349_vm3, %v7991_v27, -inf }
0x3411   :  { %8002 = vmax.xlane.f32.xlu1 %v8001_v45  ;;  %v7998_v62 = vsel %vm349_vm3, %v7990_v49, -inf }
0x3412   :  { %7999 = vmax.xlane.f32.xlu0 %v7998_v62 }
0x3463   :  { %v7997_v54 = vpop.xlane.xlu0 %7996 }
0x3464   :  { %v8005_v23 = vsub.f32 %v7989_v46, %v7997_v54  ;;  %v7994_v52 = vpop.xlane.xlu1 %7993 }
0x3465   :  { %v8004_v8 = vsub.f32 %v7988_v1, %v7994_v52 }
0x3466   :  { %v8010_v31 = vmul.f32 1.442695, %v8005_v23 }
0x3467   :  { %v8008_v22 = vmul.f32 1.442695, %v8004_v8 }
0x3468   :  { %12046 = vpow2.f32 %v8010_v31 }
0x3469   :  { %12048 = vpow2.f32 %v8008_v22 }
0x3472   :  { %v12047_v12 = vpop.eup %12046 }
0x3473   :  { %v12049_v57 = vpop.eup %12048  ;;  %v8019_v30 = vsel %vm349_vm3, %v12047_v12, 0.0 }
0x3474   :  { %8020 = vadd.xlane.f32.xlu1 %v8019_v30  ;;  %v8016_v58 = vsel %vm349_vm3, %v12049_v57, 0.0 }
0x3475   :  { %8017 = vadd.xlane.f32.xlu0 %v8016_v58 }
0x3485   :  { %8120 = vrot.lane.b32.xlu1 %v14015_v37, %s12470_s25 }
0x3489   :  { %8208 = vrot.lane.b32.xlu1 %v14017_v59, %s12474_s13 }
0x348b   :  { %8036 = vrot.lane.b32.xlu0 %v14017_v59, %s12470_s25 }
0x348d   :  { %8206 = vrot.lane.b32.xlu1 %v14031_v50, %s12474_s13 }
0x348f   :  { %8204 = vrot.lane.b32.xlu0 %v14028_v17, %s12474_s13 }
0x349e   :  { %v8003_v10 = vpop.xlane.xlu1 %8002 }
0x349f   :  { %v8007_v29 = vsub.f32 %v7991_v27, %v8003_v10  ;;  %v8000_v19 = vpop.xlane.xlu0 %7999 }
0x34a0   :  { %v8006_v20 = vsub.f32 %v7990_v49, %v8000_v19 }
0x34a1   :  { %v8014_v0 = vmul.f32 1.442695, %v8007_v29 }
0x34a2   :  { %v8012_v36 = vmul.f32 1.442695, %v8006_v20 }
0x34a3   :  { %12050 = vpow2.f32 %v8014_v0 }
0x34a4   :  { %12052 = vpow2.f32 %v8012_v36 }
0x34ad   :  { %v12051_v3 = vpop.eup %12050 }
0x34ae   :  { %v12053_v48 = vpop.eup %12052  ;;  %v8025_v40 = vsel %vm349_vm3, %v12051_v3, 0.0 }
0x34af   :  { %v8022_v9 = vsel %vm349_vm3, %v12053_v48, 0.0 }
0x34b0   :  { %8023 = vadd.xlane.f32.xlu0 %v8022_v9 }
0x34b1   :  { %8026 = vadd.xlane.f32.xlu1 %v8025_v40 }
0x34c2   :  { %8291 = vrot.lane.b32.xlu1 %v14038_v18, %s12474_s13 }
0x34c6   :  { %8295 = vrot.lane.b32.xlu0 %v14015_v37, %s12474_s13 }
0x34ca   :  { %8293 = vrot.lane.b32.xlu0 %v14041_v43, %s12474_s13 }
0x3501   :  { %v8021_v56 = vpop.xlane.xlu1 %8020 }
0x3502   :  { %12054 = vrcp.f32 %v8021_v56  ;;  %v8018_v7 = vpop.xlane.xlu0 %8017 }
0x3503   :  { %12056 = vrcp.f32 %v8018_v7 }
0x3505   :  { %v8121_v51 = vpop.permute.xlu1 %8120 }
0x3506   :  { %v8037_v11 = vpop.permute.xlu0 %8036  ;;  %11165 = vmatprep.subr.mxu1 %v8121_v51 }
0x3507   :  { %11160 = vmatprep.subr.mxu0 %v8037_v11  ;;  %11166 = vmatpush3.msra.mxu1 %v8121_v51 }
0x3508   :  { %11161 = vmatpush3.msra.mxu0 %v8037_v11 }
0x3509   :  { %v8209_v2 = vpop.permute.xlu1 %8208 }
0x350a   :  { %11170 = vmatprep.subr.msk.mxu0 %vm349_vm3, %v8209_v2  ;;  %v8205_v41 = vpop.permute.xlu0 %8204 }
0x350c   :  { %v12055_v47 = vpop.eup %12054 }
0x350d   :  { %v12057_v25 = vpop.eup %12056  ;;  %v8031_v39 = vmul.f32 %v12055_v47, %v12047_v12  ;;  %v8207_v46 = vpop.permute.xlu1 %8206 }
0x350e   :  { %v8029_v63 = vmul.f32 %v12057_v25, %v12049_v57 }
0x3510   :  { %11162 = vmatprep.mubr.msk.f32.mxu0 %vm349_vm3, %v8029_v63 }
0x3511   :  { %11163 = vmatmul.mubr.msk.f32.vlgmr.msra.gmra.mrb[74].mxu0 %vm349_vm3, %v8031_v39 }
0x3512   :  { %11171 = vmatpush3.xpose.msk.msra.mxu0 %vm349_vm3, %v8209_v2  ;;  %11172 = vmatprep.mubr.msk.f32.mxu0 %vm349_vm3, %v8205_v41 }
0x3515   :  { %11173 = vmatmul.mubr.msk.f32.vlgmr.msra.gmra.mrb[76].mxu0 %vm349_vm3, %v8207_v46 }
0x353d   :  { %v8024_v44 = vpop.xlane.xlu0 %8023 }
0x353e   :  { %12058 = vrcp.f32 %v8024_v44  ;;  %v8027_v1 = vpop.xlane.xlu1 %8026 }
0x353f   :  { %12060 = vrcp.f32 %v8027_v1 }
0x3541   :  { %v8296_v4 = vpop.permute.xlu0 %8295 }
0x3542   :  { %11175 = vmatprep.subr.msk.mxu1 %vm349_vm3, %v8296_v4  ;;  %v8292_v49 = vpop.permute.xlu1 %8291 }
0x3545   :  { %v8294_v45 = vpop.permute.xlu0 %8293 }
0x3548   :  { %v12059_v32 = vpop.eup %12058 }
0x3549   :  { %v12061_v15 = vpop.eup %12060  ;;  %v8033_v27 = vmul.f32 %v12059_v32, %v12053_v48 }
0x354a   :  { %v8035_v53 = vmul.f32 %v12061_v15, %v12051_v3 }
0x354b   :  { %11167 = vmatprep.mubr.msk.f32.mxu1 %vm349_vm3, %v8033_v27 }
0x354c   :  { %11168 = vmatmul.mubr.msk.f32.vlgmr.msra.gmra.mrb[84].mxu1 %vm349_vm3, %v8035_v53 }
0x354d   :  { %11176 = vmatpush3.xpose.msk.msra.mxu1 %vm349_vm3, %v8296_v4  ;;  %11177 = vmatprep.mubr.msk.f32.mxu1 %vm349_vm3, %v8292_v49 }
0x3550   :  { %11178 = vmatmul.mubr.msk.f32.vlgmr.msra.gmra.mrb[86].mxu1 %vm349_vm3, %v8294_v45 }
0x35e4   :  { %v14127_v62 = vpop.f32.mrb[74].mxu0 }
0x35e5   :  { %v14129_v54 = vpop.f32.mrb[75].mxu0 }
0x35e8   :  { %v11174_v23 = vpop.f32.mrb[76].mxu0 }
0x35e9   :  { %v8379_v52 = vmul.f32 0.35355338, %v11174_v23  ;;  %v8282_v8 = vpop.f32.mrb[77].mxu0 }
0x35ea   :  { %v8378_v31 = vmul.f32 0.35355338, %v8282_v8 }
0x35eb   :  { %v8385_v22 = vsel %vm349_vm3, %v8379_v52, -inf }
0x35ec   :  { %8386 = vmax.xlane.f32.xlu0 %v8385_v22  ;;  %v8382_v12 = vsel %vm349_vm3, %v8378_v31, -inf }
0x35ed   :  { %8383 = vmax.xlane.f32.xlu1 %v8382_v12 }
0x361f   :  { %v14133_v57 = vpop.f32.mrb[84].mxu1 }
0x3620   :  { %v14135_v30 = vpop.f32.mrb[85].mxu1 }
0x3623   :  { %v11179_v58 = vpop.f32.mrb[86].mxu1 }
0x3624   :  { %v8381_v10 = vmul.f32 0.35355338, %v11179_v58  ;;  %v8369_v29 = vpop.f32.mrb[87].mxu1 }
0x3625   :  { %v8380_v19 = vmul.f32 0.35355338, %v8369_v29 }
0x3626   :  { %v8391_v20 = vsel %vm349_vm3, %v8381_v10, -inf }
0x3627   :  { %8392 = vmax.xlane.f32.xlu1 %v8391_v20  ;;  %v8388_v0 = vsel %vm349_vm3, %v8380_v19, -inf }
0x3628   :  { %8389 = vmax.xlane.f32.xlu0 %v8388_v0 }
0x3679   :  { %v8387_v36 = vpop.xlane.xlu0 %8386 }
0x367a   :  { %v8395_v3 = vsub.f32 %v8379_v52, %v8387_v36  ;;  %v8384_v48 = vpop.xlane.xlu1 %8383 }
0x367b   :  { %v8394_v9 = vsub.f32 %v8378_v31, %v8384_v48 }
0x367c   :  { %v8400_v40 = vmul.f32 1.442695, %v8395_v3 }
0x367d   :  { %v8398_v56 = vmul.f32 1.442695, %v8394_v9 }
0x367e   :  { %12062 = vpow2.f32 %v8400_v40 }
0x367f   :  { %12064 = vpow2.f32 %v8398_v56 }
0x3688   :  { %v12063_v7 = vpop.eup %12062 }
0x3689   :  { %v12065_v51 = vpop.eup %12064  ;;  %v8409_v11 = vsel %vm349_vm3, %v12063_v7, 0.0 }
0x368a   :  { %8410 = vadd.xlane.f32.xlu1 %v8409_v11  ;;  %v8406_v2 = vsel %vm349_vm3, %v12065_v51, 0.0 }
0x368b   :  { %8407 = vadd.xlane.f32.xlu0 %v8406_v2 }
0x369b   :  { %8510 = vrot.lane.b32.xlu1 %v14015_v37, %s12473_s17 }
0x369f   :  { %8598 = vrot.lane.b32.xlu1 %v14017_v59, %s12477_s22 }
0x36a1   :  { %8426 = vrot.lane.b32.xlu0 %v14017_v59, %s12473_s17 }
0x36a3   :  { %8596 = vrot.lane.b32.xlu1 %v14031_v50, %s12477_s22 }
0x36a5   :  { %8594 = vrot.lane.b32.xlu0 %v14028_v17, %s12477_s22 }
0x36b4   :  { %v8393_v47 = vpop.xlane.xlu1 %8392 }
0x36b5   :  { %v8397_v25 = vsub.f32 %v8381_v10, %v8393_v47  ;;  %v8390_v63 = vpop.xlane.xlu0 %8389 }
0x36b6   :  { %v8396_v39 = vsub.f32 %v8380_v19, %v8390_v63 }
0x36b7   :  { %v8404_v41 = vmul.f32 1.442695, %v8397_v25 }
0x36b8   :  { %v8402_v46 = vmul.f32 1.442695, %v8396_v39 }
0x36b9   :  { %12066 = vpow2.f32 %v8404_v41 }
0x36ba   :  { %12068 = vpow2.f32 %v8402_v46 }
0x36c3   :  { %v12067_v44 = vpop.eup %12066 }
0x36c4   :  { %v12069_v1 = vpop.eup %12068  ;;  %v8415_v32 = vsel %vm349_vm3, %v12067_v44, 0.0 }
0x36c5   :  { %v8412_v4 = vsel %vm349_vm3, %v12069_v1, 0.0 }
0x36c6   :  { %8413 = vadd.xlane.f32.xlu0 %v8412_v4 }
0x36c7   :  { %8416 = vadd.xlane.f32.xlu1 %v8415_v32 }
0x36d8   :  { %8681 = vrot.lane.b32.xlu1 %v14038_v18, %s12477_s22 }
0x36dc   :  { %8685 = vrot.lane.b32.xlu0 %v14015_v37, %s12477_s22 }
0x36e0   :  { %8683 = vrot.lane.b32.xlu0 %v14041_v43, %s12477_s22 }
0x3717   :  { %v8411_v17 = vpop.xlane.xlu1 %8410 }
0x3718   :  { %12070 = vrcp.f32 %v8411_v17  ;;  %v8408_v50 = vpop.xlane.xlu0 %8407 }
0x3719   :  { %12072 = vrcp.f32 %v8408_v50 }
0x371b   :  { %v8511_v15 = vpop.permute.xlu1 %8510 }
0x371c   :  { %v8427_v27 = vpop.permute.xlu0 %8426  ;;  %11185 = vmatprep.subr.mxu1 %v8511_v15 }
0x371d   :  { %11180 = vmatprep.subr.mxu0 %v8427_v27  ;;  %11186 = vmatpush3.msra.mxu1 %v8511_v15 }
0x371e   :  { %11181 = vmatpush3.msra.mxu0 %v8427_v27 }
0x371f   :  { %v8599_v53 = vpop.permute.xlu1 %8598 }
0x3720   :  { %11190 = vmatprep.subr.msk.mxu0 %vm349_vm3, %v8599_v53  ;;  %v8595_v43 = vpop.permute.xlu0 %8594 }
0x3722   :  { %v12071_v18 = vpop.eup %12070 }
0x3723   :  { %v12073_v49 = vpop.eup %12072  ;;  %v8421_v23 = vmul.f32 %v12071_v18, %v12063_v7  ;;  %v8597_v52 = vpop.permute.xlu1 %8596 }
0x3724   :  { %v8419_v45 = vmul.f32 %v12073_v49, %v12065_v51 }
0x3726   :  { %11182 = vmatprep.mubr.msk.f32.mxu0 %vm349_vm3, %v8419_v45 }
0x3727   :  { %11183 = vmatmul.mubr.msk.f32.vlgmr.msra.gmra.mrb[78].mxu0 %vm349_vm3, %v8421_v23 }
0x3728   :  { %11191 = vmatpush3.xpose.msk.msra.mxu0 %vm349_vm3, %v8599_v53  ;;  %11192 = vmatprep.mubr.msk.f32.mxu0 %vm349_vm3, %v8595_v43 }
0x372b   :  { %11193 = vmatmul.mubr.msk.f32.vlgmr.msra.gmra.mrb[80].mxu0 %vm349_vm3, %v8597_v52 }
0x3753   :  { %v8414_v8 = vpop.xlane.xlu0 %8413 }
0x3754   :  { %12074 = vrcp.f32 %v8414_v8  ;;  %v8417_v31 = vpop.xlane.xlu1 %8416 }
0x3755   :  { %12076 = vrcp.f32 %v8417_v31 }
0x3757   :  { %v8686_v22 = vpop.permute.xlu0 %8685 }
0x3758   :  { %11195 = vmatprep.subr.msk.mxu1 %vm349_vm3, %v8686_v22  ;;  %v8682_v19 = vpop.permute.xlu1 %8681 }
0x375b   :  { %v8684_v20 = vpop.permute.xlu0 %8683 }
0x375e   :  { %v12075_v12 = vpop.eup %12074 }
0x375f   :  { %v12077_v58 = vpop.eup %12076  ;;  %v8423_v10 = vmul.f32 %v12075_v12, %v12069_v1 }
0x3760   :  { %v8425_v29 = vmul.f32 %v12077_v58, %v12067_v44 }
0x3761   :  { %11187 = vmatprep.mubr.msk.f32.mxu1 %vm349_vm3, %v8423_v10 }
0x3762   :  { %11188 = vmatmul.mubr.msk.f32.vlgmr.msra.gmra.mrb[88].mxu1 %vm349_vm3, %v8425_v29 }
0x3763   :  { %11196 = vmatpush3.xpose.msk.msra.mxu1 %vm349_vm3, %v8686_v22  ;;  %11197 = vmatprep.mubr.msk.f32.mxu1 %vm349_vm3, %v8682_v19 }
0x3766   :  { %11198 = vmatmul.mubr.msk.f32.vlgmr.msra.gmra.mrb[90].mxu1 %vm349_vm3, %v8684_v20 }
0x37fa   :  { %v11184_v0 = vpop.f32.mrb[78].mxu0 }
0x37fb   :  { %v8501_v36 = vpop.f32.mrb[79].mxu0 }
0x37fe   :  { %v11194_v3 = vpop.f32.mrb[80].mxu0 }
0x37ff   :  { %v8769_v48 = vmul.f32 0.35355338, %v11194_v3  ;;  %v8672_v9 = vpop.f32.mrb[81].mxu0 }
0x3800   :  { %v8768_v40 = vmul.f32 0.35355338, %v8672_v9  ;;  %v7224_v9 = vld [vmem:[#allocation7 + $0x68] sm:$0xff] }
0x3801   :  { %v8775_v56 = vsel %vm349_vm3, %v8769_v48, -inf }
0x3802   :  { %8776 = vmax.xlane.f32.xlu0 %v8775_v56  ;;  %v8772_v7 = vsel %vm349_vm3, %v8768_v40, -inf }
0x3803   :  { %8773 = vmax.xlane.f32.xlu1 %v8772_v7  ;;  %v7226_v7 = vld [vmem:[#allocation7 + $0x78] sm:$0xff] }
0x3835   :  { %v11189_v51 = vpop.f32.mrb[88].mxu1 }
0x3836   :  { %v8585_v11 = vpop.f32.mrb[89].mxu1 }
0x3839   :  { %v11199_v2 = vpop.f32.mrb[90].mxu1 }
0x383a   :  { %v8771_v47 = vmul.f32 0.35355338, %v11199_v2  ;;  %v8759_v25 = vpop.f32.mrb[91].mxu1 }
0x383b   :  { %v8770_v63 = vmul.f32 0.35355338, %v8759_v25 }
0x383c   :  { %v8781_v39 = vsel %vm349_vm3, %v8771_v47, -inf }
0x383d   :  { %8782 = vmax.xlane.f32.xlu1 %v8781_v39  ;;  %v8778_v41 = vsel %vm349_vm3, %v8770_v63, -inf }
0x383e   :  { %8779 = vmax.xlane.f32.xlu0 %v8778_v41 }
0x388f   :  { %v8777_v46 = vpop.xlane.xlu0 %8776 }
0x3890   :  { %v8785_v44 = vsub.f32 %v8769_v48, %v8777_v46  ;;  %v8774_v1 = vpop.xlane.xlu1 %8773  ;;  %v7223_v48 = vld [vmem:[#allocation7 + $0x60] sm:$0xff] }
0x3891   :  { %v8784_v4 = vsub.f32 %v8768_v40, %v8774_v1  ;;  %v7225_v40 = vld [vmem:[#allocation7 + $0x70] sm:$0xff]  ;;  %v11569_v56 = vpack.c.bf16 %v7224_v9, %v7223_v48 }
0x3892   :  { %v8790_v32 = vmul.f32 1.442695, %v8785_v44 }
0x3893   :  { %v8788_v17 = vmul.f32 1.442695, %v8784_v4 }
0x3894   :  { %12078 = vpow2.f32 %v8790_v32 }
0x3895   :  { %12080 = vpow2.f32 %v8788_v17 }
0x389e   :  { %v12079_v50 = vpop.eup %12078 }
0x389f   :  { %v12081_v15 = vpop.eup %12080  ;;  %v8799_v27 = vsel %vm349_vm3, %v12079_v50, 0.0 }
0x38a0   :  { %8800 = vadd.xlane.f32.xlu1 %v8799_v27  ;;  %v8796_v53 = vsel %vm349_vm3, %v12081_v15, 0.0 }
0x38a1   :  { %8797 = vadd.xlane.f32.xlu0 %v8796_v53 }
0x38ca   :  { %v8783_v18 = vpop.xlane.xlu1 %8782 }
0x38cb   :  { %v8787_v49 = vsub.f32 %v8771_v47, %v8783_v18  ;;  %v8780_v45 = vpop.xlane.xlu0 %8779 }
0x38cc   :  { %v8786_v23 = vsub.f32 %v8770_v63, %v8780_v45 }
0x38cd   :  { %v8794_v43 = vmul.f32 1.442695, %v8787_v49 }
0x38ce   :  { %v8792_v52 = vmul.f32 1.442695, %v8786_v23 }
0x38cf   :  { %12082 = vpow2.f32 %v8794_v43 }
0x38d0   :  { %12084 = vpow2.f32 %v8792_v52 }
0x38d9   :  { %v12083_v8 = vpop.eup %12082 }
0x38da   :  { %v12085_v31 = vpop.eup %12084  ;;  %v8805_v22 = vsel %vm349_vm3, %v12083_v8, 0.0 }
0x38db   :  { %8806 = vadd.xlane.f32.xlu1 %v8805_v22  ;;  %v8802_v12 = vsel %vm349_vm3, %v12085_v31, 0.0 }
0x38dc   :  { %8803 = vadd.xlane.f32.xlu0 %v8802_v12  ;;  %v14223_v12 = vld [vmem:[#allocation12 + $0x10] sm:$0xff] }
0x38ec   :  { %8900 = vrot.lane.b32.xlu1 %v14015_v37, %s12476_s5 }
0x38f0   :  { %8988 = vrot.lane.b32.xlu1 %v14129_v54, %s12451_s1 }
0x38f2   :  { %8816 = vrot.lane.b32.xlu0 %v14017_v59, %s12476_s5 }
0x38f4   :  { %9004 = vrot.lane.b32.xlu1 %v8501_v36, %s12458_s30 }
0x38f6   :  { %8990 = vrot.lane.b32.xlu0 %v14127_v62, %s12451_s1 }
0x38f8   :  { %8992 = vrot.lane.b32.xlu1 %v14135_v30, %s12451_s1 }
0x38fa   :  { %9006 = vrot.lane.b32.xlu0 %v11184_v0, %s12458_s30 }
0x38fc   :  { %9008 = vrot.lane.b32.xlu1 %v8585_v11, %s12458_s30 }
0x38fe   :  { %8994 = vrot.lane.b32.xlu0 %v14133_v57, %s12451_s1 }
0x3902   :  { %9010 = vrot.lane.b32.xlu0 %v11189_v51, %s12458_s30  ;;  %v11573_v51 = vpack.c.bf16 %v7226_v7, %v7225_v40 }
0x392d   :  { %v8801_v58 = vpop.xlane.xlu1 %8800 }
0x392e   :  { %v8798_v37 = vpop.xlane.xlu0 %8797 }
0x392f   :  { %12086 = vrcp.f32 %v8798_v37 }
0x3930   :  { %12088 = vrcp.f32 %v8801_v58 }
0x3939   :  { %v12087_v59 = vpop.eup %12086 }
0x393a   :  { %v8809_v54 = vmul.f32 %v12087_v59, %v12081_v15  ;;  %v12089_v10 = vpop.eup %12088 }
0x393b   :  { %v8811_v20 = vmul.f32 %v12089_v10, %v12079_v50 }
0x393c   :  { %11202 = vmatprep.mubr.msk.f32.mxu0 %vm349_vm3, %v8809_v54 }
0x3968   :  { %v8807_v62 = vpop.xlane.xlu1 %8806 }
0x3969   :  { %12090 = vrcp.f32 %v8807_v62  ;;  %v8804_v30 = vpop.xlane.xlu0 %8803 }
0x396a   :  { %12092 = vrcp.f32 %v8804_v30 }
0x396c   :  { %v8901_v29 = vpop.permute.xlu1 %8900 }
0x396d   :  { %v8817_v19 = vpop.permute.xlu0 %8816  ;;  %11205 = vmatprep.subr.mxu1 %v8901_v29 }
0x396e   :  { %11200 = vmatprep.subr.mxu0 %v8817_v19  ;;  %11206 = vmatpush3.msra.mxu1 %v8901_v29 }
0x396f   :  { %11201 = vmatpush3.msra.mxu0 %v8817_v19 }
0x3970   :  { %11203 = vmatmul.mubr.msk.f32.vlgmr.msra.gmra.mrb[82].mxu0 %vm349_vm3, %v8811_v20  ;;  %11570 = vmatprep.subr.bf16.mxu0 %v11569_v56  ;;  %v8989_v39 = vpop.permute.xlu1 %8988 }
0x3971   :  { %11572 = vmatpush3.bf16.msra.mxu0 %v11569_v56  ;;  %v8991_v63 = vpop.permute.xlu0 %8990  ;;  %v9032_v17 = vsel %vm349_vm3, %v14085_v61, %v8989_v39 }
0x3972   :  { %11574 = vmatprep.subr.bf16.mxu0 %v11573_v51  ;;  %v9033_v15 = vsel %vm349_vm3, %v14083_v16, %v8991_v63 }
0x3973   :  { %v12091_v57 = vpop.eup %12090 }
0x3974   :  { %v12093_v0 = vpop.eup %12092  ;;  %v8815_v3 = vmul.f32 %v12091_v57, %v12083_v8  ;;  %v9005_v46 = vpop.permute.xlu1 %9004 }
0x3975   :  { %v8813_v36 = vmul.f32 %v12093_v0, %v12085_v31  ;;  %11576 = vmatpush3.bf16.msra.mxu0 %v11573_v51  ;;  %v9007_v41 = vpop.permute.xlu0 %9006  ;;  %v9036_v27 = vsel %vm359_vm5, %v9032_v17, %v9005_v46  ;;  %v10224_v17 = vld [vmem:[%s14340_s9 + $0x48] sm:$0xff] }
0x3976   :  { %v9037_v18 = vsel %vm359_vm5, %v9033_v15, %v9007_v41  ;;  %v10225_v15 = vld [vmem:[%s14340_s9 + $0x50] sm:$0xff] }
0x3977   :  { %11207 = vmatprep.mubr.msk.f32.mxu1 %vm349_vm3, %v8813_v36 }
0x3978   :  { %11208 = vmatmul.mubr.msk.f32.vlgmr.msra.gmra.mrb[92].mxu1 %vm349_vm3, %v8815_v3  ;;  %v8993_v1 = vpop.permute.xlu1 %8992 }
0x3979   :  { %v8995_v44 = vpop.permute.xlu0 %8994  ;;  %v9034_v61 = vsel %vm349_vm3, %v14091_v38, %v8993_v1  ;;  %v9047_v38 = vrot.slane %v14223_v12, %v13225_v14 }
0x397a   :  { %v9035_v16 = vsel %vm349_vm3, %v14089_v33, %v8995_v44 }
0x397c   :  { %v9009_v32 = vpop.permute.xlu1 %9008 }
0x397d   :  { %v9011_v4 = vpop.permute.xlu0 %9010  ;;  %v9038_v43 = vsel %vm359_vm5, %v9034_v61, %v9009_v32  ;;  %v10223_v32 = vld [vmem:[%s14340_s9 + $0x40] sm:$0xff] }
0x397e   :  { %v9039_v8 = vsel %vm359_vm5, %v9035_v16, %v9011_v4 }
0x3a43   :  { %v11204_v11 = vpop.f32.mrb[82].mxu0 }
0x3a44   :  { %9022 = vrot.lane.b32.xlu0 %v11204_v11, %s14393_s11  ;;  %v8891_v2 = vpop.f32.mrb[83].mxu0 }
0x3a45   :  { %9020 = vrot.lane.b32.xlu1 %v8891_v2, %s14393_s11 }
0x3a4b   :  { %v11209_v47 = vpop.f32.mrb[92].mxu1 }
0x3a4c   :  { %9026 = vrot.lane.b32.xlu0 %v11209_v47, %s14393_s11  ;;  %v8975_v25 = vpop.f32.mrb[93].mxu1 }
0x3a4d   :  { %9024 = vrot.lane.b32.xlu1 %v8975_v25, %s14393_s11 }
0x3ab6   :  { %v9023_v50 = vpop.permute.xlu0 %9022 }
0x3ab7   :  { %v9021_v53 = vpop.permute.xlu1 %9020  ;;  %v9041_v45 = vsel %vm2242_vm8, %v9037_v18, %v9023_v50  ;;  %v11577_v50 = vpack.c.bf16 %v10224_v17, %v10223_v32 }
0x3ab8   :  { %v9040_v49 = vsel %vm2242_vm8, %v9036_v27, %v9021_v53  ;;  %v10226_v27 = vld [vmem:[%s14340_s9 + $0x58] sm:$0xff] }
0x3ab9   :  { %11218 = vmatprep.mubr.msk.f32.mxu0 %vm476_vm6, %v9040_v49  ;;  %11578 = vmatprep.subr.bf16.mxu1 %v11577_v50  ;;  %v11581_v53 = vpack.c.bf16 %v10226_v27, %v10225_v15 }
0x3aba   :  { %11219 = vmatmul.mubr.msk.f32.vlgmr.msra.gmra.mrb[84].mxu0 %vm476_vm6, %v9041_v45  ;;  %11580 = vmatpush3.bf16.msra.mxu1 %v11577_v50 }
0x3abb   :  { %11582 = vmatprep.subr.bf16.mxu1 %v11581_v53 }
0x3abe   :  { %v9027_v23 = vpop.permute.xlu0 %9026  ;;  %11584 = vmatpush3.bf16.msra.mxu1 %v11581_v53 }
0x3abf   :  { %v9025_v52 = vpop.permute.xlu1 %9024  ;;  %v9043_v22 = vsel %vm2242_vm8, %v9039_v8, %v9027_v23  ;;  %11252 = vmatprep.subr.mxu1 %v12480_v5 }
0x3ac0   :  { %v9042_v31 = vsel %vm2242_vm8, %v9038_v43, %v9025_v52 }
0x3ac1   :  { %11221 = vmatprep.mubr.msk.f32.mxu0 %vm476_vm6, %v9042_v31 }
0x3ac2   :  { %11222 = vmatmul.mubr.msk.f32.gmra.mrb[86].mxu0 %vm476_vm6, %v9043_v22 }
0x3b8d   :  { %v11220_v37 = vpop.f32.mrb[84].mxu0 }
0x3b8e   :  { %v9132_v33 = vadd.f32 %v11220_v37, %v9047_v38  ;;  %v9126_v59 = vpop.f32.mrb[85].mxu0  ;;  %v9204_v37 = vrot.slane %v14223_v12, %v13250_v13 }
0x3b8f   :  { %v9127_v54 = vadd.f32 %v9126_v59, %v9047_v38 }
0x3b90   :  { %v9146_v58 = vadd.f32 %v9132_v33, %v14005_v28 }
0x3b91   :  { %v9145_v62 = vadd.f32 %v9127_v54, %v13995_v24 }
0x3b92   :  { %v9152_v30 = vsel %vm476_vm6, %v9146_v58, 0.0 }
0x3b93   :  { %9153 = vadd.xlane.f32.xlu0 %v9152_v30  ;;  %v9149_v10 = vsel %vm476_vm6, %v9145_v62, 0.0 }
0x3b94   :  { %9150 = vadd.xlane.f32.xlu1 %v9149_v10 }
0x3b95   :  { %v11223_v29 = vpop.f32.mrb[86].mxu0 }
0x3b96   :  { %v9142_v19 = vadd.f32 %v11223_v29, %v9047_v38  ;;  %v9136_v20 = vpop.f32.mrb[87].mxu0 }
0x3b97   :  { %v9137_v57 = vadd.f32 %v9136_v20, %v9047_v38 }
0x3b98   :  { %v9148_v0 = vadd.f32 %v9142_v19, %v14011_v42 }
0x3b99   :  { %v9147_v36 = vadd.f32 %v9137_v57, %v14002_v60 }
0x3b9a   :  { %v9158_v3 = vsel %vm476_vm6, %v9148_v0, 0.0 }
0x3b9b   :  { %9159 = vadd.xlane.f32.xlu1 %v9158_v3  ;;  %v9155_v28 = vsel %vm476_vm6, %v9147_v36, 0.0 }
0x3b9c   :  { %9156 = vadd.xlane.f32.xlu0 %v9155_v28 }
0x3c20   :  { %v9154_v24 = vpop.xlane.xlu0 %9153 }
0x3c21   :  { %v9162_v48 = vmul.f32 0.03125, %v9154_v24  ;;  %v9151_v9 = vpop.xlane.xlu1 %9150 }
0x3c22   :  { %v9161_v40 = vmul.f32 0.03125, %v9151_v9 }
0x3c23   :  { %v9166_v56 = vsub.f32 %v9146_v58, %v9162_v48  ;;  %v9361_v48 = vld [vmem:[#allocation9 + $0x48] sm:$0xff] }
0x3c24   :  { %v9165_v7 = vsub.f32 %v9145_v62, %v9161_v40  ;;  %v9212_v62 = vrot.slane %v14223_v12, %v13253_v6  ;;  %v9360_v6 = vld [vmem:[#allocation9 + $0x40] sm:$0xff]  ;;  %v9362_v40 = vld [vmem:[#allocation9 + $0x50] sm:$0xff] }
0x3c25   :  { %v9170_v51 = vmul.f32 %v9166_v56, %v9166_v56  ;;  %v11585_v9 = vpack.c.bf16 %v9361_v48, %v9360_v6 }
0x3c26   :  { %v9169_v11 = vmul.f32 %v9165_v7, %v9165_v7 }
0x3c27   :  { %v9176_v2 = vsel %vm476_vm6, %v9170_v51, 0.0  ;;  %11586 = vmatprep.subr.bf16.mxu0 %v11585_v9  ;;  %v9225_v51 = vrot.slane %v14223_v12, %v13484_v26 }
0x3c28   :  { %9177 = vadd.xlane.f32.xlu1 %v9176_v2  ;;  %v9160_v42 = vpop.xlane.xlu1 %9159  ;;  %v9173_v60 = vsel %vm476_vm6, %v9169_v11, 0.0  ;;  %11588 = vmatpush3.bf16.msra.mxu0 %v11585_v9 }
0x3c29   :  { %v9164_v47 = vmul.f32 0.03125, %v9160_v42  ;;  %v9157_v25 = vpop.xlane.xlu0 %9156  ;;  %9174 = vadd.xlane.f32.xlu0 %v9173_v60 }
0x3c2a   :  { %v9163_v63 = vmul.f32 0.03125, %v9157_v25 }
0x3c2b   :  { %v9168_v39 = vsub.f32 %v9148_v0, %v9164_v47 }
0x3c2c   :  { %v9167_v41 = vsub.f32 %v9147_v36, %v9163_v63 }
0x3c2d   :  { %v9172_v46 = vmul.f32 %v9168_v39, %v9168_v39 }
0x3c2e   :  { %v9171_v44 = vmul.f32 %v9167_v41, %v9167_v41 }
0x3c2f   :  { %v9182_v1 = vsel %vm476_vm6, %v9172_v46, 0.0 }
0x3c30   :  { %9183 = vadd.xlane.f32.xlu1 %v9182_v1  ;;  %v9179_v4 = vsel %vm476_vm6, %v9171_v44, 0.0 }
0x3c31   :  { %9180 = vadd.xlane.f32.xlu0 %v9179_v4 }
0x3cb5   :  { %v9178_v18 = vpop.xlane.xlu1 %9177 }
0x3cb6   :  { %v9186_v49 = vmul.f32 0.03125, %v9178_v18  ;;  %v9175_v45 = vpop.xlane.xlu0 %9174 }
0x3cb7   :  { %v9185_v61 = vmul.f32 0.03125, %v9175_v45 }
0x3cb8   :  { %v9190_v23 = vadd.f32 1e-05, %v9186_v49 }
0x3cb9   :  { %v9189_v16 = vadd.f32 1e-05, %v9185_v61 }
0x3cba   :  { %12094 = vrsqrt.f32 %v9190_v23 }
0x3cbb   :  { %12096 = vrsqrt.f32 %v9189_v16 }
0x3cbd   :  { %v9184_v43 = vpop.xlane.xlu1 %9183 }
0x3cbe   :  { %v9188_v52 = vmul.f32 0.03125, %v9184_v43  ;;  %v9181_v8 = vpop.xlane.xlu0 %9180 }
0x3cbf   :  { %v9187_v31 = vmul.f32 0.03125, %v9181_v8 }
0x3cc0   :  { %v9192_v22 = vadd.f32 1e-05, %v9188_v52 }
0x3cc1   :  { %v9191_v38 = vadd.f32 1e-05, %v9187_v31 }
0x3cc2   :  { %12098 = vrsqrt.f32 %v9192_v22 }
0x3cc3   :  { %12100 = vrsqrt.f32 %v9191_v38 }
0x3cc4   :  { %v12095_v33 = vpop.eup %12094 }
0x3cc5   :  { %v12097_v59 = vpop.eup %12096  ;;  %v9198_v54 = vmul.f32 %v12095_v33, %v9166_v56  ;;  %v9363_v56 = vld [vmem:[#allocation9 + $0x58] sm:$0xff] }
0x3cc6   :  { %v9197_v58 = vmul.f32 %v12097_v59, %v9165_v7  ;;  %v11589_v7 = vpack.c.bf16 %v9363_v56, %v9362_v40 }
0x3cc7   :  { %v9206_v30 = vmul.f32 %v9204_v37, %v9198_v54 }
0x3cc8   :  { %v9205_v10 = vmul.f32 %v9204_v37, %v9197_v58  ;;  %11590 = vmatprep.subr.bf16.mxu0 %v11589_v7 }
0x3cc9   :  { %v14256_v19 = vadd.f32 %v9212_v62, %v9206_v30  ;;  %11592 = vmatpush3.bf16.msra.mxu0 %v11589_v7 }
0x3cca   :  { %v9213_v29 = vadd.f32 %v9212_v62, %v9205_v10  ;;  %11262 = vmatprep.subr.mxu0 %v12480_v5 }
0x3ccc   :  { %v12099_v20 = vpop.eup %12098  ;;  %11232 = vmatprep.mubr.msk.f32.mxu1 %vm476_vm6, %v9213_v29 }
0x3ccd   :  { %v12101_v57 = vpop.eup %12100  ;;  %11233 = vmatmul.mubr.msk.f32.vlgmr.msra.gmra.mrb[94].mxu1 %vm476_vm6, %v14256_v19  ;;  %v9200_v13 = vmul.f32 %v12099_v20, %v9168_v39 }
0x3cce   :  { %v9199_v0 = vmul.f32 %v12101_v57, %v9167_v41 }
0x3ccf   :  { %v9208_v36 = vmul.f32 %v9204_v37, %v9200_v13  ;;  %v14277_v13 = vld [vmem:[#allocation12 + $0x18] sm:$0x1f] }
0x3cd0   :  { %v9207_v3 = vmul.f32 %v9204_v37, %v9199_v0  ;;  %v9367_v0 = vrot.slane %v14277_v13, %v13159_v55 }
0x3cd1   :  { %v14261_v24 = vadd.f32 %v9212_v62, %v9208_v36 }
0x3cd2   :  { %v9215_v28 = vadd.f32 %v9212_v62, %v9207_v3 }
0x3cd4   :  { %11235 = vmatprep.mubr.msk.f32.mxu1 %vm476_vm6, %v9215_v28 }
0x3cd5   :  { %11236 = vmatmul.mubr.msk.f32.gmra.mrb[96].mxu1 %vm476_vm6, %v14261_v24 }
0x3cd6   :  { %11254 = vmatprep.mubr.msk.f32.mxu1 %vm12481_vm11, %v12480_v5 }
0x3da0   :  { %v11234_v11 = vpop.f32.mrb[94].mxu1 }
0x3da1   :  { %v9310_v2 = vadd.f32 %v11234_v11, %v9225_v51  ;;  %v9304_v42 = vpop.f32.mrb[95].mxu1 }
0x3da2   :  { %v9305_v60 = vadd.f32 %v9304_v42, %v9225_v51 }
0x3da3   :  { %v9328_v47 = vmul.f32 0.044715, %v9310_v2  ;;  %v9324_v37 = vmul.f32 0.5, %v9310_v2 }
0x3da4   :  { %v9327_v25 = vmul.f32 0.044715, %v9305_v60  ;;  %v9323_v22 = vmul.f32 0.5, %v9305_v60 }
0x3da5   :  { %v9332_v63 = vmul.f32 %v9328_v47, %v9310_v2 }
0x3da6   :  { %v9331_v39 = vmul.f32 %v9327_v25, %v9305_v60 }
0x3da7   :  { %v9336_v41 = vmul.f32 %v9332_v63, %v9310_v2 }
0x3da8   :  { %v9335_v46 = vmul.f32 %v9331_v39, %v9305_v60  ;;  %v11237_v44 = vpop.f32.mrb[96].mxu1 }
0x3da9   :  { %v9340_v1 = vadd.f32 %v9336_v41, %v9310_v2  ;;  %v9320_v4 = vadd.f32 %v11237_v44, %v9225_v51  ;;  %v9314_v32 = vpop.f32.mrb[97].mxu1 }
0x3daa   :  { %v9339_v17 = vadd.f32 %v9335_v46, %v9305_v60  ;;  %v9315_v50 = vadd.f32 %v9314_v32, %v9225_v51  ;;  %v9494_v32 = vrot.slane %v14277_v13, %v13190_v35 }
0x3dab   :  { %v9344_v15 = vmul.f32 0.7978846, %v9340_v1  ;;  %v9330_v27 = vmul.f32 0.044715, %v9320_v4  ;;  %v9326_v29 = vmul.f32 0.5, %v9320_v4 }
0x3dac   :  { %v9329_v53 = vmul.f32 0.044715, %v9315_v50  ;;  %v9343_v26 = vmul.f32 0.7978846, %v9339_v17  ;;  %v9325_v30 = vmul.f32 0.5, %v9315_v50 }
0x3dad   :  { %12102 = vtanh.f32 %v9344_v15  ;;  %v9334_v12 = vmul.f32 %v9330_v27, %v9320_v4  ;;  %v9500_v15 = vrot.slane %v14277_v13, %v13193_v34 }
0x3dae   :  { %v9333_v18 = vmul.f32 %v9329_v53, %v9315_v50  ;;  %12104 = vtanh.f32 %v9343_v26 }
0x3daf   :  { %v9338_v49 = vmul.f32 %v9334_v12, %v9320_v4 }
0x3db0   :  { %v9337_v45 = vmul.f32 %v9333_v18, %v9315_v50 }
0x3db1   :  { %v9342_v61 = vadd.f32 %v9338_v49, %v9320_v4 }
0x3db2   :  { %v9341_v23 = vadd.f32 %v9337_v45, %v9315_v50 }
0x3db3   :  { %v9346_v16 = vmul.f32 0.7978846, %v9342_v61 }
0x3db4   :  { %v9345_v43 = vmul.f32 0.7978846, %v9341_v23 }
0x3db5   :  { %12106 = vtanh.f32 %v9346_v16 }
0x3db6   :  { %12108 = vtanh.f32 %v9345_v43 }
0x3db7   :  { %v12103_v52 = vpop.eup %12102 }
0x3db8   :  { %v12105_v8 = vpop.eup %12104  ;;  %v9352_v31 = vadd.f32 1.0, %v12103_v52 }
0x3db9   :  { %v9351_v38 = vadd.f32 1.0, %v12105_v8 }
0x3dba   :  { %v9356_v59 = vmul.f32 %v9352_v31, %v9324_v37  ;;  %v9542_v37 = vld [vmem:[%s14345_s14] sm:$0xf] }
0x3dbb   :  { %v9355_v33 = vmul.f32 %v9351_v38, %v9323_v22 }
0x3dbd   :  { %11246 = vmatprep.mubr.msk.f32.mxu0 %vm476_vm6, %v9355_v33  ;;  %v12482_v33 = vmov 0  }
0x3dbe   :  { %11247 = vmatmul.mubr.msk.f32.vlgmr.msra.gmra.mrb[88].mxu0 %vm476_vm6, %v9356_v59  ;;  %11813 = vset.pattern.permute.xlu0 %v12482_v33 }
0x3dbf   :  { %v12107_v54 = vpop.eup %12106 }
0x3dc0   :  { %v12109_v58 = vpop.eup %12108  ;;  %v9354_v62 = vadd.f32 1.0, %v12107_v54 }
0x3dc1   :  { %v9353_v10 = vadd.f32 1.0, %v12109_v58 }
0x3dc2   :  { %v9358_v57 = vmul.f32 %v9354_v62, %v9326_v29  ;;  %v9532_v29 = vrot.slane %v14277_v13, %v13216_v21 }
0x3dc3   :  { %v9357_v20 = vmul.f32 %v9353_v10, %v9325_v30 }
0x3dc5   :  { %11249 = vmatprep.mubr.msk.f32.mxu0 %vm476_vm6, %v9357_v20 }
0x3dc6   :  { %11250 = vmatmul.mubr.msk.f32.gmra.mrb[90].mxu0 %vm476_vm6, %v9358_v57 }
0x3dc7   :  { %11264 = vmatprep.mubr.msk.f32.mxu0 %vm12481_vm11, %v12480_v5 }
0x3e91   :  { %v11248_v36 = vpop.f32.mrb[88].mxu0 }
0x3e92   :  { %v9451_v3 = vadd.f32 %v11248_v36, %v9367_v0  ;;  %v9446_v28 = vpop.f32.mrb[89].mxu0 }
0x3e93   :  { %v9541_v28 = vld [vmem:[#allocation13] sm:$0xf] }
0x3e94   :  { %v9463_v6 = vadd.f32 %v9451_v3, %v14256_v19 }
0x3e96   :  { %v9465_v48 = vsel %vm476_vm6, %v9463_v6, 0.0 }
0x3e97   :  { %9466 = vadd.xlane.f32.xlu0 %v9465_v48 }
0x3e99   :  { %v11251_v9 = vpop.f32.mrb[90].mxu0 }
0x3e9a   :  { %v9460_v40 = vadd.f32 %v11251_v9, %v9367_v0  ;;  %v9455_v56 = vpop.f32.mrb[91].mxu0  ;;  %v9538_v0 = vrot.slane %v14277_v13, %v13225_v14  ;;  %v9702_v14 = vld [vmem:[#allocation15] sm:$0xff]  ;;  %v12483_v13 = vmov 0.0|0.0  }
0x3e9b   :  { %11263 = vmatpush3.msra.mxu0 %v9702_v14 }
0x3e9c   :  { %v9464_v7 = vadd.f32 %v9460_v40, %v14261_v24  ;;  %11596 = vmatprep.subr.bf16.mxu0 %v12483_v13 }
0x3e9e   :  { %v9468_v51 = vsel %vm476_vm6, %v9464_v7, 0.0 }
0x3e9f   :  { %9469 = vadd.xlane.f32.xlu1 %v9468_v51 }
0x3f24   :  { %v9467_v11 = vpop.xlane.xlu0 %9466 }
0x3f25   :  { %v9471_v2 = vmul.f32 0.03125, %v9467_v11 }
0x3f27   :  { %v9473_v42 = vsub.f32 %v9463_v6, %v9471_v2 }
0x3f29   :  { %v9475_v55 = vmul.f32 %v9473_v42, %v9473_v42 }
0x3f2b   :  { %v9477_v60 = vsel %vm476_vm6, %v9475_v55, 0.0 }
0x3f2c   :  { %9478 = vadd.xlane.f32.xlu0 %v9477_v60  ;;  %v9470_v47 = vpop.xlane.xlu1 %9469 }
0x3f2d   :  { %v9472_v19 = vmul.f32 0.03125, %v9470_v47  ;;  %v9785_v47 = vld [vmem:[#allocation18] sm:$0xff] }
0x3f2f   :  { %v9474_v25 = vsub.f32 %v9464_v7, %v9472_v19  ;;  %v9786_v19 = vld [vmem:[#allocation18 + $0x8] sm:$0xff] }
0x3f31   :  { %v9476_v63 = vmul.f32 %v9474_v25, %v9474_v25 }
0x3f33   :  { %v9480_v39 = vsel %vm476_vm6, %v9476_v63, 0.0  ;;  %v9869_v63 = vld [vmem:[#allocation21] sm:$0xff] }
0x3f34   :  { %9481 = vadd.xlane.f32.xlu1 %v9480_v39  ;;  %v9870_v39 = vld [vmem:[#allocation21 + $0x8] sm:$0xff] }
0x3fb9   :  { %v9479_v41 = vpop.xlane.xlu0 %9478 }
0x3fba   :  { %v9483_v46 = vmul.f32 0.03125, %v9479_v41  ;;  %v11597_v41 = vpack.c.bf16 %v9870_v39, %v9869_v63 }
0x3fbc   :  { %v9485_v24 = vadd.f32 1e-05, %v9483_v46  ;;  %v10239_v46 = vld [vmem:[#allocation16] ss:$0 sm:$0xff] }
0x3fbe   :  { %12110 = vrsqrt.f32 %v9485_v24 }
0x3fc1   :  { %v9482_v44 = vpop.xlane.xlu1 %9481 }
0x3fc2   :  { %v9484_v1 = vmul.f32 0.03125, %v9482_v44 }
0x3fc4   :  { %v9486_v4 = vadd.f32 1e-05, %v9484_v1 }
0x3fc6   :  { %12112 = vrsqrt.f32 %v9486_v4  ;;  %v10241_v4 = vld [vmem:[#allocation19] ss:$0 sm:$0xff] }
0x3fc8   :  { %v12111_v17 = vpop.eup %12110 }
0x3fc9   :  { %v9489_v50 = vmul.f32 %v12111_v17, %v9473_v42 }
0x3fcb   :  { %v9495_v27 = vmul.f32 %v9494_v32, %v9489_v50 }
0x3fcd   :  { %v9501_v53 = vadd.f32 %v9500_v15, %v9495_v27 }
0x3fcf   :  { %v9503_v26 = vsel %vm476_vm6, %v9501_v53, 0.0 }
0x3fd0   :  { %v12113_v12 = vpop.eup %12112  ;;  %9504 = vadd.xlane.f32.xlu0 %v9503_v26 }
0x3fd1   :  { %v9490_v18 = vmul.f32 %v12113_v12, %v9474_v25  ;;  %v11594_v25 = vpack.c.bf16 %v9786_v19, %v9785_v47 }
0x3fd3   :  { %v9496_v49 = vmul.f32 %v9494_v32, %v9490_v18 }
0x3fd5   :  { %v9502_v45 = vadd.f32 %v9500_v15, %v9496_v49  ;;  %v10243_v15 = vld [vmem:[#allocation22] ss:$0 sm:$0xff] }
0x3fd7   :  { %v9506_v61 = vsel %vm476_vm6, %v9502_v45, 0.0 }
0x3fd8   :  { %9507 = vadd.xlane.f32.xlu1 %v9506_v61 }
0x405d   :  { %v9505_v23 = vpop.xlane.xlu0 %9504 }
0x405e   :  { %v9509_v16 = vmul.f32 0.03125, %v9505_v23 }
0x4060   :  { %v9511_v35 = vsub.f32 %v9501_v53, %v9509_v16 }
0x4062   :  { %v9513_v43 = vmul.f32 %v9511_v35, %v9511_v35 }
0x4064   :  { %v9515_v52 = vsel %vm476_vm6, %v9513_v43, 0.0 }
0x4065   :  { %9516 = vadd.xlane.f32.xlu0 %v9515_v52  ;;  %v9508_v34 = vpop.xlane.xlu1 %9507 }
0x4066   :  { %v9510_v8 = vmul.f32 0.03125, %v9508_v34 }
0x4068   :  { %v9512_v31 = vsub.f32 %v9502_v45, %v9510_v8 }
0x406a   :  { %v9514_v22 = vmul.f32 %v9512_v31, %v9512_v31 }
0x406c   :  { %v9518_v38 = vsel %vm476_vm6, %v9514_v22, 0.0 }
0x406d   :  { %9519 = vadd.xlane.f32.xlu1 %v9518_v38 }
0x407b   :  { %9545 = vperm.xlu0 %11813, %v9542_v37  }
0x40f2   :  { %v9517_v59 = vpop.xlane.xlu0 %9516 }
0x40f3   :  { %v9521_v54 = vmul.f32 0.03125, %v9517_v59 }
0x40f5   :  { %v9523_v58 = vadd.f32 1e-05, %v9521_v54 }
0x40f7   :  { %12114 = vrsqrt.f32 %v9523_v58 }
0x40fa   :  { %v9520_v62 = vpop.xlane.xlu1 %9519  ;;  %v9546_v7 = vpop.permute.xlu0 %9545 }
0x40fb   :  { %v9522_v30 = vmul.f32 0.03125, %v9520_v62 }
0x40fd   :  { %v9524_v10 = vadd.f32 1e-05, %v9522_v30 }
0x40ff   :  { %12116 = vrsqrt.f32 %v9524_v10 }
0x4101   :  { %v12115_v20 = vpop.eup %12114 }
0x4102   :  { %v9527_v57 = vmul.f32 %v12115_v20, %v9511_v35 }
0x4104   :  { %v9533_v36 = vmul.f32 %v9532_v29, %v9527_v57 }
0x4106   :  { %v9539_v3 = vadd.f32 %v9538_v0, %v9533_v36 }
0x4108   :  { %11253 = vmatpush3.xpose.msk.msra.mxu1 %vm476_vm6, %v9539_v3 }
0x4109   :  { %v12117_v6 = vpop.eup %12116  ;;  %11257 = vmatprep.subr.mxu1 %v12480_v5 }
0x410a   :  { %v9528_v48 = vmul.f32 %v12117_v6, %v9512_v31 }
0x410b   :  { %11255 = vmatmul.mubr.msk.f32.vlgmr.msra.gmra.mrb[98].mxu1 %vm476_vm6, %v9541_v28 }
0x410c   :  { %v9534_v9 = vmul.f32 %v9532_v29, %v9528_v48  ;;  %11259 = vmatprep.mubr.msk.f32.mxu1 %vm12481_vm11, %v12480_v5 }
0x410e   :  { %v9540_v21 = vadd.f32 %v9538_v0, %v9534_v9 }
0x4110   :  { %11258 = vmatpush3.xpose.msk.msra.mxu1 %vm476_vm6, %v9540_v21 }
0x4111   :  { %11593 = vmatprep.subr.bf16.mxu1 %v12483_v13 }
0x4113   :  { %11260 = vmatmul.mubr.msk.f32.vlgmr.msra.gmra.mrb[100].mxu1 %vm476_vm6, %v9541_v28 }
0x4114   :  { %11271 = vmatprep.mubr.msk.f32.mxu1 %vm12481_vm11, %v12480_v5  ;;  %11595 = vmatpush3.bf16.msra.mxu1 %v11594_v25 }
0x41de   :  { %v9620_v40 = vpop.f32.mrb[98].mxu1 }
0x41df   :  { %v11256_v56 = vpop.f32.mrb[99].mxu1  ;;  %v9621_v42 = vadd.f32 %v9620_v40, %v9546_v7 }
0x41e6   :  { %v9693_v51 = vpop.f32.mrb[100].mxu1 }
0x41e7   :  { %v9694_v11 = vadd.f32 %v9693_v51, %v9546_v7  ;;  %v11261_v2 = vpop.f32.mrb[101].mxu1 }
0x41e9   :  { %v9698_v55 = vrot.slane %v9694_v11, 4 }
0x41eb   :  { %v9700_v60 = vsel %vm3168_vm15, %v9621_v42, %v9698_v55 }
0x41ec   :  { %9701 = vst.msk [vmem:[%s14355_s24] sm:$0xff] %vm349_vm3, %v9700_v60  ;;  %11265 = vmatmul.mubr.msk.f32.vlgmr.msra.gmra.mrb[92].mxu0 %vm349_vm3, %v9700_v60  ;;  %vm9867_vm3 = vcmask 523264  }
0x41ed   :  { %11278 = vmatprep.mubr.msk.f32.mxu0 %vm12481_vm11, %v12480_v5  ;;  %11598 = vmatpush3.bf16.msra.mxu0 %v11597_v41 }
0x42bf   :  { %v9779_v24 = vpop.f32.mrb[92].mxu0 }
0x42c0   :  { %v9780_v44 = vadd.f32 %v10239_v46, %v9779_v24  ;;  %v11266_v1 = vpop.f32.mrb[93].mxu0 }
0x42c2   :  { %9784 = vst.msk [vmem:[%s14352_s21] sm:$0xff] %vm9783_vm2, %v9780_v44  ;;  %9878 = vrot.lane.b32.xlu1 %v9780_v44, %s12474_s13  ;;  %11272 = vmatmul.mubr.msk.f32.vlgmr.msra.gmra.mrb[102].mxu1 %vm359_vm5, %v9780_v44 }
0x4334   :  { %v9879_v5 = vpop.permute.xlu1 %9878 }
0x4335   :  { %11279 = vmatmul.mubr.msk.f32.vlgmr.msra.gmra.mrb[94].mxu0 %vm359_vm5, %v9879_v5 }
0x4395   :  { %v9863_v32 = vpop.f32.mrb[102].mxu1 }
0x4396   :  { %v9864_v17 = vadd.f32 %v10241_v4, %v9863_v32  ;;  %v11273_v50 = vpop.f32.mrb[103].mxu1 }
0x4398   :  { %9868 = vst.msk [vmem:[%s14394_s8] sm:$0xff] %vm9867_vm3, %v9864_v17 }
0x4408   :  { %v9948_v27 = vpop.f32.mrb[94].mxu0 }
0x4409   :  { %v9949_v53 = vadd.f32 %v10243_v15, %v9948_v27  ;;  %v11280_v26 = vpop.f32.mrb[95].mxu0 }
0x440b   :  { %9952 = vst [vmem:[%s14395_s19] sm:$0xff] %v9949_v53 }
0x440c   :  { %9969 = vsyncpa [#allocation3], 1 }
0x440d   :  { %9970 = vsyncpa [#allocation5], 1 }
0x440e   :  { %9971 = vsyncpa [#allocation8], 1 }
0x440f   :  { %9972 = vsyncpa [#allocation11], 1 }
0x4410   :  { %9973 = vsyncpa [#allocation14], 1 }
0x4411   :  { %9974 = vsyncpa [#allocation17], 1 }
0x4412   :  { %9975 = vsyncpa [#allocation20], 1 }
0x4413   :  { %9976 = vsyncpa [#allocation23], 1 }

</bundles_post_ra>
